<compile_context>
chip_gen: v7x
topology: tpu7x:2x2x1
jax: 0.10.0
libtpu: 0.0.40
codegen_flags: <defaults>
</compile_context>

<pallas_src>
import functools

import jax
import jax.numpy as jnp
from jax.experimental import pallas as pl
from jax.experimental.pallas import tpu as pltpu

EPS = 1e-5


def _round_up(x, m):
    return ((x + m - 1) // m) * m


# ----------------------------------------------------------------------------
# Pallas kernel: B images per grid step -> full residual block, all in VMEM
# ----------------------------------------------------------------------------
def _resblock_kernel(x_ref, w1_ref, b1_ref, w2_ref, b2_ref, o_ref,
                     xpad_ref, y1pad_ref, slab_ref, *, B, H, W, CIP, COP):
    """
    x_ref     : (B, H, W, CIP)          bf16  unpadded NHWC input (channels padded)
    w1_ref    : (9*CIP, COP)            bf16  conv1 3x3 weights, BN1 scale folded
    b1_ref    : (1, COP)                f32   conv1 + BN1 folded bias
    w2_ref    : (9*COP + CIP, COP)      bf16  conv2 3x3 (BN2 folded) ++ 1x1 shortcut
    b2_ref    : (1, COP)                f32   conv2+BN2 bias + shortcut bias folded
    o_ref     : (B, H, W, COP)          f32   output
    xpad_ref  : VMEM (B, H+2, W+2, CIP) bf16  input with zero halo
    y1pad_ref : VMEM (B, H+2, W+2, COP) bf16  intermediate activation, zero halo
    slab_ref  : VMEM (B*H*W, SLAB_W)    bf16  shared im2col slab for both convs
    """
    M = B * H * W
    K1 = 9 * CIP          # conv1 contraction depth
    K2 = 9 * COP + CIP    # conv2 + shortcut contraction depth

    # Zero the halo'd scratches. Interiors are fully rewritten below; the ring must
    # be zero every step. Full-buffer zero is ~40 vector stores -> negligible, and
    # it is safe under a megacore grid split (scratch is per-TensorCore, so a
    # "first program instance" guard would never run on the second core).
    xpad_ref[...] = jnp.zeros_like(xpad_ref)
    y1pad_ref[...] = jnp.zeros_like(y1pad_ref)

    # In-kernel halo padding (no padded-activation HBM round trip in the wrapper).
    x = x_ref[...]                                         # (B, H, W, CIP) bf16
    xpad_ref[:, 1:H + 1, 1:W + 1, :] = x

    # ---- conv1 (3x3, pad=1): im2col slab + ONE big-K matmul -----------------
    for kh in range(3):
        for kw in range(3):
            t = kh * 3 + kw
            slab_ref[:, t * CIP:(t + 1) * CIP] = (
                xpad_ref[:, kh:kh + H, kw:kw + W, :].reshape(M, CIP))
    y1 = jnp.maximum(
        jnp.dot(slab_ref[:, :K1], w1_ref[...],
                preferred_element_type=jnp.float32) + b1_ref[...],
        0.0)                                               # BN1 + ReLU, f32 epilogue

    # ---- stash ReLU output (bf16) with a 1-pixel zero halo -------------------
    y1pad_ref[:, 1:H + 1, 1:W + 1, :] = (
        y1.astype(jnp.bfloat16).reshape(B, H, W, COP))

    # ---- conv2 (3x3, pad=1) + 1x1 shortcut as one matmul ---------------------
    # The slab gets the 9 shifted y1 taps plus x itself as a 10th "tap"; the
    # weight matrix stacks the BN2-folded conv2 weights on top of the 1x1 weights.
    for kh in range(3):
        for kw in range(3):
            t = kh * 3 + kw
            slab_ref[:, t * COP:(t + 1) * COP] = (
                y1pad_ref[:, kh:kh + H, kw:kw + W, :].reshape(M, COP))
    slab_ref[:, 9 * COP:K2] = x.reshape(M, CIP)

    out = jnp.maximum(
        jnp.dot(slab_ref[:, :K2], w2_ref[...],
                preferred_element_type=jnp.float32) + b2_ref[...],
        0.0)                                               # add + ReLU, f32 epilogue
    o_ref[...] = out.reshape(B, H, W, COP)


# ----------------------------------------------------------------------------
# Batch-block sizing: amortize per-step overhead, keep >=2 steps, fit VMEM
# ----------------------------------------------------------------------------
def _pick_batch_block(n, per_image_vmem_bytes, budget=12 * 1024 * 1024, target=8):
    blk = min(target, max(1, budget // max(per_image_vmem_bytes, 1)))
    if n >= 2:
        blk = min(blk, max(1, n // 2))   # keep >= 2 grid steps for megacore (v7x)
    blk = max(1, min(blk, n))
    while n % blk:
        blk -= 1
    return blk


# ----------------------------------------------------------------------------
# Wrapper (PyTorch-compatible: NCHW f32 in -> NCHW f32 out)
# ----------------------------------------------------------------------------
def residual_block_forward(x_nchw, params, channels_out):
    w1, b1, w2, b2 = params["w1"], params["b1"], params["w2"], params["b2"]
    n, cin, h, w = x_nchw.shape
    cip = w1.shape[0] // 9          # channel-padded Cin (multiple of 128)
    cop = w1.shape[1]               # channel-padded Cout (multiple of 128)

    # NCHW -> NHWC + bf16 (MXU feed dtype); pad channels so slab taps are aligned.
    x = jnp.transpose(x_nchw, (0, 2, 3, 1)).astype(jnp.bfloat16)
    if cip > cin:
        x = jnp.pad(x, ((0, 0), (0, 0), (0, 0), (0, cip - cin)))

    slab_w = max(9 * cip, 9 * cop + cip)
    per_image = (h * w * slab_w * 2                       # im2col slab (bf16)
                 + (h + 2) * (w + 2) * (cip + cop) * 2    # halo scratches (bf16)
                 + 2 * h * w * cip * 2                    # double-buffered input
                 + 2 * h * w * cop * 4)                   # double-buffered output
    b_blk = _pick_batch_block(n, per_image)

    kernel = functools.partial(_resblock_kernel,
                               B=b_blk, H=h, W=w, CIP=cip, COP=cop)
    out = pl.pallas_call(
        kernel,
        out_shape=jax.ShapeDtypeStruct((n, h, w, cop), jnp.float32),
        grid=(n // b_blk,),
        in_specs=[
            pl.BlockSpec((b_blk, h, w, cip), lambda i: (i, 0, 0, 0)),
            pl.BlockSpec((9 * cip, cop), lambda i: (0, 0)),
            pl.BlockSpec((1, cop), lambda i: (0, 0)),
            pl.BlockSpec((9 * cop + cip, cop), lambda i: (0, 0)),
            pl.BlockSpec((1, cop), lambda i: (0, 0)),
        ],
        out_specs=pl.BlockSpec((b_blk, h, w, cop), lambda i: (i, 0, 0, 0)),
        scratch_shapes=[
            pltpu.VMEM((b_blk, h + 2, w + 2, cip), jnp.bfloat16),
            pltpu.VMEM((b_blk, h + 2, w + 2, cop), jnp.bfloat16),
            pltpu.VMEM((b_blk * h * w, slab_w), jnp.bfloat16),
        ],
        compiler_params=pltpu.CompilerParams(
            dimension_semantics=("parallel",)),
    )(x, w1, b1, w2, b2)

    out = out[..., :channels_out]                          # drop channel padding
    return jnp.transpose(out, (0, 3, 1, 2))                # back to NCHW


# ----------------------------------------------------------------------------
# Parameter construction: fold eval-mode BN (+ shortcut bias) into weights/bias
# ----------------------------------------------------------------------------
def init_raw_params(key, cin, cout):
    ks = iter(jax.random.split(key, 16))

    def nrm(shape, s=0.05):
        return s * jax.random.normal(next(ks), shape, jnp.float32)

    def bn(c):
        return dict(
            gamma=1.0 + 0.1 * jax.random.normal(next(ks), (c,), jnp.float32),
            beta=nrm((c,)), mean=nrm((c,)),
            var=0.5 + jax.random.uniform(next(ks), (c,), jnp.float32))

    return dict(
        conv1_w=nrm((cout, cin, 3, 3)), conv1_b=nrm((cout,)), bn1=bn(cout),
        conv2_w=nrm((cout, cout, 3, 3)), conv2_b=nrm((cout,)), bn2=bn(cout),
        convp_w=nrm((cout, cin, 1, 1)), convp_b=nrm((cout,)))


def fold_params(raw, cin, cout):
    cip = _round_up(cin, 128)
    cop = _round_up(cout, 128)

    def bn_fold(w_oihw, b, bnd):
        s = bnd["gamma"] / jnp.sqrt(bnd["var"] + EPS)           # (Cout,)
        w = jnp.transpose(w_oihw, (2, 3, 1, 0)) * s             # (3,3,Cin,Cout)
        bias = (b - bnd["mean"]) * s + bnd["beta"]
        return w, bias

    # conv1 + BN1 (scale folded into columns)
    w1, b1 = bn_fold(raw["conv1_w"], raw["conv1_b"], raw["bn1"])
    w1 = jnp.pad(w1, ((0, 0), (0, 0), (0, cip - cin), (0, cop - cout)))
    w1 = w1.reshape(9 * cip, cop).astype(jnp.bfloat16)
    b1 = jnp.pad(b1, (0, cop - cout)).reshape(1, cop).astype(jnp.float32)

    # conv2 + BN2, stacked with the 1x1 shortcut as extra contraction rows
    w2, b2 = bn_fold(raw["conv2_w"], raw["conv2_b"], raw["bn2"])
    w2 = jnp.pad(w2, ((0, 0), (0, 0), (0, cop - cout), (0, cop - cout)))
    w2 = w2.reshape(9 * cop, cop)
    wp = jnp.transpose(raw["convp_w"][:, :, 0, 0], (1, 0))      # (Cin, Cout)
    wp = jnp.pad(wp, ((0, cip - cin), (0, cop - cout)))
    w2x = jnp.concatenate([w2, wp], axis=0).astype(jnp.bfloat16)
    b2 = b2 + raw["convp_b"]                                    # fold shortcut bias
    b2 = jnp.pad(b2, (0, cop - cout)).reshape(1, cop).astype(jnp.float32)

    return {"w1": w1, "b1": b1, "w2": w2x, "b2": b2}


# ----------------------------------------------------------------------------
# Pure-JAX reference (same folded bf16 params) for the correctness cross-check
# ----------------------------------------------------------------------------
def reference_forward(x_nchw, params, channels_out):
    w1, b1, w2x, b2 = params["w1"], params["b1"], params["w2"], params["b2"]
    cip = w1.shape[0] // 9
    cop = w1.shape[1]

    x = jnp.transpose(x_nchw, (0, 2, 3, 1)).astype(jnp.bfloat16).astype(jnp.float32)
    cin = x.shape[-1]
    if cip > cin:
        x = jnp.pad(x, ((0, 0), (0, 0), (0, 0), (0, cip - cin)))

    wa = w1.astype(jnp.float32).reshape(3, 3, cip, cop)
    wb = w2x[:9 * cop].astype(jnp.float32).reshape(3, 3, cop, cop)
    wp = w2x[9 * cop:].astype(jnp.float32).reshape(1, 1, cip, cop)

    def conv(a, w):
        return jax.lax.conv_general_dilated(
            a, w, (1, 1), "SAME",
            dimension_numbers=("NHWC", "HWIO", "NHWC"),
            precision=jax.lax.Precision.HIGHEST)

    y = jnp.maximum(conv(x, wa) + b1.reshape(1, 1, 1, cop), 0.0)
    y = y.astype(jnp.bfloat16).astype(jnp.float32)   # matches in-kernel bf16 stash
    out = jnp.maximum(conv(y, wb) + conv(x, wp) + b2.reshape(1, 1, 1, cop), 0.0)
    out = out[..., :channels_out]
    return jnp.transpose(out, (0, 3, 1, 2))


# ----------------------------------------------------------------------------
if __name__ == "__main__":
    key = jax.random.PRNGKey(0)
    pkey, xkey = jax.random.split(key)

    N, CIN, COUT, HW = 2, 64, 128, 16
    raw = init_raw_params(pkey, CIN, COUT)
    params = fold_params(raw, CIN, COUT)
    x = jax.random.normal(xkey, (N, CIN, HW, HW), jnp.float32)   # NCHW, like PyTorch

    fwd = jax.jit(functools.partial(residual_block_forward, channels_out=COUT))
    out = jax.block_until_ready(fwd(x, params))
    assert out.shape == (N, COUT, HW, HW)
    assert bool(jnp.all(jnp.isfinite(out)))
    assert bool(jnp.all(out >= 0.0))                             # post-ReLU

    ref_fn = jax.jit(functools.partial(reference_forward, channels_out=COUT))
    ref = jax.block_until_ready(ref_fn(x, params))
    err = float(jnp.max(jnp.abs(out - ref)))
    assert err < 2e-2, f"mismatch vs reference: {err}"

    print("KERNEL_OK")
</pallas_src>

<mosaic_0001>
module attributes {stable_mosaic.version = 11 : i64} {
  func.func @_resblock_kernel(%arg0: i32, %arg1: memref<1x16x16x128xbf16, #tpu.memory_space<vmem>>, %arg2: memref<1152x128xbf16, #tpu.memory_space<vmem>>, %arg3: memref<1x128xf32, #tpu.memory_space<vmem>>, %arg4: memref<1280x128xbf16, #tpu.memory_space<vmem>>, %arg5: memref<1x128xf32, #tpu.memory_space<vmem>>, %arg6: memref<1x16x16x128xf32, #tpu.memory_space<vmem>>, %arg7: memref<1x18x18x128xbf16, #tpu.memory_space<vmem>>, %arg8: memref<1x18x18x128xbf16, #tpu.memory_space<vmem>>, %arg9: memref<256x1280xbf16, #tpu.memory_space<vmem>>) attributes {dimension_semantics = [#tpu.dimension_semantics<parallel>], iteration_bounds = array<i64: 2>, scalar_prefetch = 0 : i64, scratch_operands = 3 : i64, tpu.core_type = #tpu.core_type<tc>, window_params = [{transform_indices = @transform_0, window_bounds = array<i64: 1, 16, 16, 128>}, {pipeline_mode = #tpu.pipeline_mode<synchronous>, transform_indices = @transform_1, window_bounds = array<i64: 1152, 128>}, {pipeline_mode = #tpu.pipeline_mode<synchronous>, transform_indices = @transform_2, window_bounds = array<i64: 1, 128>}, {pipeline_mode = #tpu.pipeline_mode<synchronous>, transform_indices = @transform_3, window_bounds = array<i64: 1280, 128>}, {pipeline_mode = #tpu.pipeline_mode<synchronous>, transform_indices = @transform_4, window_bounds = array<i64: 1, 128>}, {transform_indices = @transform_5, window_bounds = array<i64: 1, 16, 16, 128>}]} {
    %cst = arith.constant 0.000000e+00 : bf16
    %0 = vector.broadcast %cst : bf16 to vector<1x18x18x128xbf16>
    %c0 = arith.constant 0 : index
    %c0_0 = arith.constant 0 : index
    %c0_1 = arith.constant 0 : index
    %c0_2 = arith.constant 0 : index
    %1 = vector.load %arg7[%c0, %c0_0, %c0_1, %c0_2] : memref<1x18x18x128xbf16, #tpu.memory_space<vmem>>, vector<1x18x18x128xbf16>
    tpu.vector_store %arg7[%c0, %c0_0, %c0_1, %c0_2], %0 {strides = array<i32>} : memref<1x18x18x128xbf16, #tpu.memory_space<vmem>>, vector<1x18x18x128xbf16>,
    %cst_3 = arith.constant 0.000000e+00 : bf16
    %2 = vector.broadcast %cst_3 : bf16 to vector<1x18x18x128xbf16>
    %c0_4 = arith.constant 0 : index
    %c0_5 = arith.constant 0 : index
    %c0_6 = arith.constant 0 : index
    %c0_7 = arith.constant 0 : index
    %3 = vector.load %arg8[%c0_4, %c0_5, %c0_6, %c0_7] : memref<1x18x18x128xbf16, #tpu.memory_space<vmem>>, vector<1x18x18x128xbf16>
    tpu.vector_store %arg8[%c0_4, %c0_5, %c0_6, %c0_7], %2 {strides = array<i32>} : memref<1x18x18x128xbf16, #tpu.memory_space<vmem>>, vector<1x18x18x128xbf16>,
    %c0_8 = arith.constant 0 : index
    %c0_9 = arith.constant 0 : index
    %c0_10 = arith.constant 0 : index
    %c0_11 = arith.constant 0 : index
    %4 = vector.load %arg1[%c0_8, %c0_9, %c0_10, %c0_11] : memref<1x16x16x128xbf16, #tpu.memory_space<vmem>>, vector<1x16x16x128xbf16>
    %c0_12 = arith.constant 0 : index
    %c1 = arith.constant 1 : index
    %c1_13 = arith.constant 1 : index
    %c0_14 = arith.constant 0 : index
    %5 = vector.load %arg7[%c0_12, %c1, %c1_13, %c0_14] : memref<1x18x18x128xbf16, #tpu.memory_space<vmem>>, vector<1x16x16x128xbf16>
    tpu.vector_store %arg7[%c0_12, %c1, %c1_13, %c0_14], %4 {strides = array<i32>} : memref<1x18x18x128xbf16, #tpu.memory_space<vmem>>, vector<1x16x16x128xbf16>,
    %c0_15 = arith.constant 0 : index
    %c0_16 = arith.constant 0 : index
    %c0_17 = arith.constant 0 : index
    %c0_18 = arith.constant 0 : index
    %6 = vector.load %arg7[%c0_15, %c0_16, %c0_17, %c0_18] : memref<1x18x18x128xbf16, #tpu.memory_space<vmem>>, vector<1x16x16x128xbf16>
    %7 = vector.shape_cast %6 : vector<1x16x16x128xbf16> to vector<256x128xbf16>
    %c0_19 = arith.constant 0 : index
    %c0_20 = arith.constant 0 : index
    %8 = vector.load %arg9[%c0_19, %c0_20] : memref<256x1280xbf16, #tpu.memory_space<vmem>>, vector<256x128xbf16>
    tpu.vector_store %arg9[%c0_19, %c0_20], %7 {strides = array<i32>} : memref<256x1280xbf16, #tpu.memory_space<vmem>>, vector<256x128xbf16>,
    %c0_21 = arith.constant 0 : index
    %c0_22 = arith.constant 0 : index
    %c1_23 = arith.constant 1 : index
    %c0_24 = arith.constant 0 : index
    %9 = vector.load %arg7[%c0_21, %c0_22, %c1_23, %c0_24] : memref<1x18x18x128xbf16, #tpu.memory_space<vmem>>, vector<1x16x16x128xbf16>
    %10 = vector.shape_cast %9 : vector<1x16x16x128xbf16> to vector<256x128xbf16>
    %c0_25 = arith.constant 0 : index
    %c128 = arith.constant 128 : index
    %11 = vector.load %arg9[%c0_25, %c128] : memref<256x1280xbf16, #tpu.memory_space<vmem>>, vector<256x128xbf16>
    tpu.vector_store %arg9[%c0_25, %c128], %10 {strides = array<i32>} : memref<256x1280xbf16, #tpu.memory_space<vmem>>, vector<256x128xbf16>,
    %c0_26 = arith.constant 0 : index
    %c0_27 = arith.constant 0 : index
    %c2 = arith.constant 2 : index
    %c0_28 = arith.constant 0 : index
    %12 = vector.load %arg7[%c0_26, %c0_27, %c2, %c0_28] : memref<1x18x18x128xbf16, #tpu.memory_space<vmem>>, vector<1x16x16x128xbf16>
    %13 = vector.shape_cast %12 : vector<1x16x16x128xbf16> to vector<256x128xbf16>
    %c0_29 = arith.constant 0 : index
    %c256 = arith.constant 256 : index
    %14 = vector.load %arg9[%c0_29, %c256] : memref<256x1280xbf16, #tpu.memory_space<vmem>>, vector<256x128xbf16>
    tpu.vector_store %arg9[%c0_29, %c256], %13 {strides = array<i32>} : memref<256x1280xbf16, #tpu.memory_space<vmem>>, vector<256x128xbf16>,
    %c0_30 = arith.constant 0 : index
    %c1_31 = arith.constant 1 : index
    %c0_32 = arith.constant 0 : index
    %c0_33 = arith.constant 0 : index
    %15 = vector.load %arg7[%c0_30, %c1_31, %c0_32, %c0_33] : memref<1x18x18x128xbf16, #tpu.memory_space<vmem>>, vector<1x16x16x128xbf16>
    %16 = vector.shape_cast %15 : vector<1x16x16x128xbf16> to vector<256x128xbf16>
    %c0_34 = arith.constant 0 : index
    %c384 = arith.constant 384 : index
    %17 = vector.load %arg9[%c0_34, %c384] : memref<256x1280xbf16, #tpu.memory_space<vmem>>, vector<256x128xbf16>
    tpu.vector_store %arg9[%c0_34, %c384], %16 {strides = array<i32>} : memref<256x1280xbf16, #tpu.memory_space<vmem>>, vector<256x128xbf16>,
    %c0_35 = arith.constant 0 : index
    %c1_36 = arith.constant 1 : index
    %c1_37 = arith.constant 1 : index
    %c0_38 = arith.constant 0 : index
    %18 = vector.load %arg7[%c0_35, %c1_36, %c1_37, %c0_38] : memref<1x18x18x128xbf16, #tpu.memory_space<vmem>>, vector<1x16x16x128xbf16>
    %19 = vector.shape_cast %18 : vector<1x16x16x128xbf16> to vector<256x128xbf16>
    %c0_39 = arith.constant 0 : index
    %c512 = arith.constant 512 : index
    %20 = vector.load %arg9[%c0_39, %c512] : memref<256x1280xbf16, #tpu.memory_space<vmem>>, vector<256x128xbf16>
    tpu.vector_store %arg9[%c0_39, %c512], %19 {strides = array<i32>} : memref<256x1280xbf16, #tpu.memory_space<vmem>>, vector<256x128xbf16>,
    %c0_40 = arith.constant 0 : index
    %c1_41 = arith.constant 1 : index
    %c2_42 = arith.constant 2 : index
    %c0_43 = arith.constant 0 : index
    %21 = vector.load %arg7[%c0_40, %c1_41, %c2_42, %c0_43] : memref<1x18x18x128xbf16, #tpu.memory_space<vmem>>, vector<1x16x16x128xbf16>
    %22 = vector.shape_cast %21 : vector<1x16x16x128xbf16> to vector<256x128xbf16>
    %c0_44 = arith.constant 0 : index
    %c640 = arith.constant 640 : index
    %23 = vector.load %arg9[%c0_44, %c640] : memref<256x1280xbf16, #tpu.memory_space<vmem>>, vector<256x128xbf16>
    tpu.vector_store %arg9[%c0_44, %c640], %22 {strides = array<i32>} : memref<256x1280xbf16, #tpu.memory_space<vmem>>, vector<256x128xbf16>,
    %c0_45 = arith.constant 0 : index
    %c2_46 = arith.constant 2 : index
    %c0_47 = arith.constant 0 : index
    %c0_48 = arith.constant 0 : index
    %24 = vector.load %arg7[%c0_45, %c2_46, %c0_47, %c0_48] : memref<1x18x18x128xbf16, #tpu.memory_space<vmem>>, vector<1x16x16x128xbf16>
    %25 = vector.shape_cast %24 : vector<1x16x16x128xbf16> to vector<256x128xbf16>
    %c0_49 = arith.constant 0 : index
    %c768 = arith.constant 768 : index
    %26 = vector.load %arg9[%c0_49, %c768] : memref<256x1280xbf16, #tpu.memory_space<vmem>>, vector<256x128xbf16>
    tpu.vector_store %arg9[%c0_49, %c768], %25 {strides = array<i32>} : memref<256x1280xbf16, #tpu.memory_space<vmem>>, vector<256x128xbf16>,
    %c0_50 = arith.constant 0 : index
    %c2_51 = arith.constant 2 : index
    %c1_52 = arith.constant 1 : index
    %c0_53 = arith.constant 0 : index
    %27 = vector.load %arg7[%c0_50, %c2_51, %c1_52, %c0_53] : memref<1x18x18x128xbf16, #tpu.memory_space<vmem>>, vector<1x16x16x128xbf16>
    %28 = vector.shape_cast %27 : vector<1x16x16x128xbf16> to vector<256x128xbf16>
    %c0_54 = arith.constant 0 : index
    %c896 = arith.constant 896 : index
    %29 = vector.load %arg9[%c0_54, %c896] : memref<256x1280xbf16, #tpu.memory_space<vmem>>, vector<256x128xbf16>
    tpu.vector_store %arg9[%c0_54, %c896], %28 {strides = array<i32>} : memref<256x1280xbf16, #tpu.memory_space<vmem>>, vector<256x128xbf16>,
    %c0_55 = arith.constant 0 : index
    %c2_56 = arith.constant 2 : index
    %c2_57 = arith.constant 2 : index
    %c0_58 = arith.constant 0 : index
    %30 = vector.load %arg7[%c0_55, %c2_56, %c2_57, %c0_58] : memref<1x18x18x128xbf16, #tpu.memory_space<vmem>>, vector<1x16x16x128xbf16>
    %31 = vector.shape_cast %30 : vector<1x16x16x128xbf16> to vector<256x128xbf16>
    %c0_59 = arith.constant 0 : index
    %c1024 = arith.constant 1024 : index
    %32 = vector.load %arg9[%c0_59, %c1024] : memref<256x1280xbf16, #tpu.memory_space<vmem>>, vector<256x128xbf16>
    tpu.vector_store %arg9[%c0_59, %c1024], %31 {strides = array<i32>} : memref<256x1280xbf16, #tpu.memory_space<vmem>>, vector<256x128xbf16>,
    %c0_60 = arith.constant 0 : index
    %c0_61 = arith.constant 0 : index
    %33 = vector.load %arg9[%c0_60, %c0_61] : memref<256x1280xbf16, #tpu.memory_space<vmem>>, vector<256x1152xbf16>
    %c0_62 = arith.constant 0 : index
    %c0_63 = arith.constant 0 : index
    %34 = vector.load %arg2[%c0_62, %c0_63] : memref<1152x128xbf16, #tpu.memory_space<vmem>>, vector<1152x128xbf16>
    %cst_64 = arith.constant dense<0.000000e+00> : vector<256x128xf32>
    %35 = tpu.matmul %33, %34, %cst_64 {dimension_numbers = #tpu.dot_dimension_numbers<[1], [0], [0], [1], [0, 0, 1, 1], [], []>} : vector<256x1152xbf16>, vector<1152x128xbf16>, vector<256x128xf32> -> vector<256x128xf32>
    %c0_65 = arith.constant 0 : index
    %c0_66 = arith.constant 0 : index
    %36 = vector.load %arg3[%c0_65, %c0_66] : memref<1x128xf32, #tpu.memory_space<vmem>>, vector<1x128xf32>
    %37 = vector.broadcast %36 : vector<1x128xf32> to vector<256x128xf32>
    %38 = arith.addf %35, %37 : vector<256x128xf32>
    %cst_67 = arith.constant 0.000000e+00 : f32
    %39 = vector.broadcast %cst_67 : f32 to vector<256x128xf32>
    %40 = arith.maximumf %38, %39 : vector<256x128xf32>
    %41 = arith.truncf %40 : vector<256x128xf32> to vector<256x128xbf16>
    %42 = vector.shape_cast %41 : vector<256x128xbf16> to vector<1x16x16x128xbf16>
    %c0_68 = arith.constant 0 : index
    %c1_69 = arith.constant 1 : index
    %c1_70 = arith.constant 1 : index
    %c0_71 = arith.constant 0 : index
    %43 = vector.load %arg8[%c0_68, %c1_69, %c1_70, %c0_71] : memref<1x18x18x128xbf16, #tpu.memory_space<vmem>>, vector<1x16x16x128xbf16>
    tpu.vector_store %arg8[%c0_68, %c1_69, %c1_70, %c0_71], %42 {strides = array<i32>} : memref<1x18x18x128xbf16, #tpu.memory_space<vmem>>, vector<1x16x16x128xbf16>,
    %c0_72 = arith.constant 0 : index
    %c0_73 = arith.constant 0 : index
    %c0_74 = arith.constant 0 : index
    %c0_75 = arith.constant 0 : index
    %44 = vector.load %arg8[%c0_72, %c0_73, %c0_74, %c0_75] : memref<1x18x18x128xbf16, #tpu.memory_space<vmem>>, vector<1x16x16x128xbf16>
    %45 = vector.shape_cast %44 : vector<1x16x16x128xbf16> to vector<256x128xbf16>
    %c0_76 = arith.constant 0 : index
    %c0_77 = arith.constant 0 : index
    %46 = vector.load %arg9[%c0_76, %c0_77] : memref<256x1280xbf16, #tpu.memory_space<vmem>>, vector<256x128xbf16>
    tpu.vector_store %arg9[%c0_76, %c0_77], %45 {strides = array<i32>} : memref<256x1280xbf16, #tpu.memory_space<vmem>>, vector<256x128xbf16>,
    %c0_78 = arith.constant 0 : index
    %c0_79 = arith.constant 0 : index
    %c1_80 = arith.constant 1 : index
    %c0_81 = arith.constant 0 : index
    %47 = vector.load %arg8[%c0_78, %c0_79, %c1_80, %c0_81] : memref<1x18x18x128xbf16, #tpu.memory_space<vmem>>, vector<1x16x16x128xbf16>
    %48 = vector.shape_cast %47 : vector<1x16x16x128xbf16> to vector<256x128xbf16>
    %c0_82 = arith.constant 0 : index
    %c128_83 = arith.constant 128 : index
    %49 = vector.load %arg9[%c0_82, %c128_83] : memref<256x1280xbf16, #tpu.memory_space<vmem>>, vector<256x128xbf16>
    tpu.vector_store %arg9[%c0_82, %c128_83], %48 {strides = array<i32>} : memref<256x1280xbf16, #tpu.memory_space<vmem>>, vector<256x128xbf16>,
    %c0_84 = arith.constant 0 : index
    %c0_85 = arith.constant 0 : index
    %c2_86 = arith.constant 2 : index
    %c0_87 = arith.constant 0 : index
    %50 = vector.load %arg8[%c0_84, %c0_85, %c2_86, %c0_87] : memref<1x18x18x128xbf16, #tpu.memory_space<vmem>>, vector<1x16x16x128xbf16>
    %51 = vector.shape_cast %50 : vector<1x16x16x128xbf16> to vector<256x128xbf16>
    %c0_88 = arith.constant 0 : index
    %c256_89 = arith.constant 256 : index
    %52 = vector.load %arg9[%c0_88, %c256_89] : memref<256x1280xbf16, #tpu.memory_space<vmem>>, vector<256x128xbf16>
    tpu.vector_store %arg9[%c0_88, %c256_89], %51 {strides = array<i32>} : memref<256x1280xbf16, #tpu.memory_space<vmem>>, vector<256x128xbf16>,
    %c0_90 = arith.constant 0 : index
    %c1_91 = arith.constant 1 : index
    %c0_92 = arith.constant 0 : index
    %c0_93 = arith.constant 0 : index
    %53 = vector.load %arg8[%c0_90, %c1_91, %c0_92, %c0_93] : memref<1x18x18x128xbf16, #tpu.memory_space<vmem>>, vector<1x16x16x128xbf16>
    %54 = vector.shape_cast %53 : vector<1x16x16x128xbf16> to vector<256x128xbf16>
    %c0_94 = arith.constant 0 : index
    %c384_95 = arith.constant 384 : index
    %55 = vector.load %arg9[%c0_94, %c384_95] : memref<256x1280xbf16, #tpu.memory_space<vmem>>, vector<256x128xbf16>
    tpu.vector_store %arg9[%c0_94, %c384_95], %54 {strides = array<i32>} : memref<256x1280xbf16, #tpu.memory_space<vmem>>, vector<256x128xbf16>,
    %c0_96 = arith.constant 0 : index
    %c1_97 = arith.constant 1 : index
    %c1_98 = arith.constant 1 : index
    %c0_99 = arith.constant 0 : index
    %56 = vector.load %arg8[%c0_96, %c1_97, %c1_98, %c0_99] : memref<1x18x18x128xbf16, #tpu.memory_space<vmem>>, vector<1x16x16x128xbf16>
    %57 = vector.shape_cast %56 : vector<1x16x16x128xbf16> to vector<256x128xbf16>
    %c0_100 = arith.constant 0 : index
    %c512_101 = arith.constant 512 : index
    %58 = vector.load %arg9[%c0_100, %c512_101] : memref<256x1280xbf16, #tpu.memory_space<vmem>>, vector<256x128xbf16>
    tpu.vector_store %arg9[%c0_100, %c512_101], %57 {strides = array<i32>} : memref<256x1280xbf16, #tpu.memory_space<vmem>>, vector<256x128xbf16>,
    %c0_102 = arith.constant 0 : index
    %c1_103 = arith.constant 1 : index
    %c2_104 = arith.constant 2 : index
    %c0_105 = arith.constant 0 : index
    %59 = vector.load %arg8[%c0_102, %c1_103, %c2_104, %c0_105] : memref<1x18x18x128xbf16, #tpu.memory_space<vmem>>, vector<1x16x16x128xbf16>
    %60 = vector.shape_cast %59 : vector<1x16x16x128xbf16> to vector<256x128xbf16>
    %c0_106 = arith.constant 0 : index
    %c640_107 = arith.constant 640 : index
    %61 = vector.load %arg9[%c0_106, %c640_107] : memref<256x1280xbf16, #tpu.memory_space<vmem>>, vector<256x128xbf16>
    tpu.vector_store %arg9[%c0_106, %c640_107], %60 {strides = array<i32>} : memref<256x1280xbf16, #tpu.memory_space<vmem>>, vector<256x128xbf16>,
    %c0_108 = arith.constant 0 : index
    %c2_109 = arith.constant 2 : index
    %c0_110 = arith.constant 0 : index
    %c0_111 = arith.constant 0 : index
    %62 = vector.load %arg8[%c0_108, %c2_109, %c0_110, %c0_111] : memref<1x18x18x128xbf16, #tpu.memory_space<vmem>>, vector<1x16x16x128xbf16>
    %63 = vector.shape_cast %62 : vector<1x16x16x128xbf16> to vector<256x128xbf16>
    %c0_112 = arith.constant 0 : index
    %c768_113 = arith.constant 768 : index
    %64 = vector.load %arg9[%c0_112, %c768_113] : memref<256x1280xbf16, #tpu.memory_space<vmem>>, vector<256x128xbf16>
    tpu.vector_store %arg9[%c0_112, %c768_113], %63 {strides = array<i32>} : memref<256x1280xbf16, #tpu.memory_space<vmem>>, vector<256x128xbf16>,
    %c0_114 = arith.constant 0 : index
    %c2_115 = arith.constant 2 : index
    %c1_116 = arith.constant 1 : index
    %c0_117 = arith.constant 0 : index
    %65 = vector.load %arg8[%c0_114, %c2_115, %c1_116, %c0_117] : memref<1x18x18x128xbf16, #tpu.memory_space<vmem>>, vector<1x16x16x128xbf16>
    %66 = vector.shape_cast %65 : vector<1x16x16x128xbf16> to vector<256x128xbf16>
    %c0_118 = arith.constant 0 : index
    %c896_119 = arith.constant 896 : index
    %67 = vector.load %arg9[%c0_118, %c896_119] : memref<256x1280xbf16, #tpu.memory_space<vmem>>, vector<256x128xbf16>
    tpu.vector_store %arg9[%c0_118, %c896_119], %66 {strides = array<i32>} : memref<256x1280xbf16, #tpu.memory_space<vmem>>, vector<256x128xbf16>,
    %c0_120 = arith.constant 0 : index
    %c2_121 = arith.constant 2 : index
    %c2_122 = arith.constant 2 : index
    %c0_123 = arith.constant 0 : index
    %68 = vector.load %arg8[%c0_120, %c2_121, %c2_122, %c0_123] : memref<1x18x18x128xbf16, #tpu.memory_space<vmem>>, vector<1x16x16x128xbf16>
    %69 = vector.shape_cast %68 : vector<1x16x16x128xbf16> to vector<256x128xbf16>
    %c0_124 = arith.constant 0 : index
    %c1024_125 = arith.constant 1024 : index
    %70 = vector.load %arg9[%c0_124, %c1024_125] : memref<256x1280xbf16, #tpu.memory_space<vmem>>, vector<256x128xbf16>
    tpu.vector_store %arg9[%c0_124, %c1024_125], %69 {strides = array<i32>} : memref<256x1280xbf16, #tpu.memory_space<vmem>>, vector<256x128xbf16>,
    %71 = vector.shape_cast %4 : vector<1x16x16x128xbf16> to vector<256x128xbf16>
    %c0_126 = arith.constant 0 : index
    %c1152 = arith.constant 1152 : index
    %72 = vector.load %arg9[%c0_126, %c1152] : memref<256x1280xbf16, #tpu.memory_space<vmem>>, vector<256x128xbf16>
    tpu.vector_store %arg9[%c0_126, %c1152], %71 {strides = array<i32>} : memref<256x1280xbf16, #tpu.memory_space<vmem>>, vector<256x128xbf16>,
    %c0_127 = arith.constant 0 : index
    %c0_128 = arith.constant 0 : index
    %73 = vector.load %arg9[%c0_127, %c0_128] : memref<256x1280xbf16, #tpu.memory_space<vmem>>, vector<256x1280xbf16>
    %c0_129 = arith.constant 0 : index
    %c0_130 = arith.constant 0 : index
    %74 = vector.load %arg4[%c0_129, %c0_130] : memref<1280x128xbf16, #tpu.memory_space<vmem>>, vector<1280x128xbf16>
    %cst_131 = arith.constant dense<0.000000e+00> : vector<256x128xf32>
    %75 = tpu.matmul %73, %74, %cst_131 {dimension_numbers = #tpu.dot_dimension_numbers<[1], [0], [0], [1], [0, 0, 1, 1], [], []>} : vector<256x1280xbf16>, vector<1280x128xbf16>, vector<256x128xf32> -> vector<256x128xf32>
    %c0_132 = arith.constant 0 : index
    %c0_133 = arith.constant 0 : index
    %76 = vector.load %arg5[%c0_132, %c0_133] : memref<1x128xf32, #tpu.memory_space<vmem>>, vector<1x128xf32>
    %77 = vector.broadcast %76 : vector<1x128xf32> to vector<256x128xf32>
    %78 = arith.addf %75, %77 : vector<256x128xf32>
    %cst_134 = arith.constant 0.000000e+00 : f32
    %79 = vector.broadcast %cst_134 : f32 to vector<256x128xf32>
    %80 = arith.maximumf %78, %79 : vector<256x128xf32>
    %81 = vector.shape_cast %80 : vector<256x128xf32> to vector<1x16x16x128xf32>
    %c0_135 = arith.constant 0 : index
    %c0_136 = arith.constant 0 : index
    %c0_137 = arith.constant 0 : index
    %c0_138 = arith.constant 0 : index
    %82 = vector.load %arg6[%c0_135, %c0_136, %c0_137, %c0_138] : memref<1x16x16x128xf32, #tpu.memory_space<vmem>>, vector<1x16x16x128xf32>
    tpu.vector_store %arg6[%c0_135, %c0_136, %c0_137, %c0_138], %81 {strides = array<i32>} : memref<1x16x16x128xf32, #tpu.memory_space<vmem>>, vector<1x16x16x128xf32>,
    return
  }
  func.func @transform_0(%arg0: i32) -> (i32, i32, i32, i32) {
    %c0_i32 = arith.constant 0 : i32
    %c0_i32_0 = arith.constant 0 : i32
    %c0_i32_1 = arith.constant 0 : i32
    %c0_i32_2 = arith.constant 0 : i32
    return %arg0, %c0_i32, %c0_i32_0, %c0_i32_1 : i32, i32, i32, i32
  }
  func.func @transform_1(%arg0: i32) -> (i32, i32) {
    %c0_i32 = arith.constant 0 : i32
    %c0_i32_0 = arith.constant 0 : i32
    %c0_i32_1 = arith.constant 0 : i32
    return %c0_i32, %c0_i32_0 : i32, i32
  }
  func.func @transform_2(%arg0: i32) -> (i32, i32) {
    %c0_i32 = arith.constant 0 : i32
    %c0_i32_0 = arith.constant 0 : i32
    %c0_i32_1 = arith.constant 0 : i32
    return %c0_i32, %c0_i32_0 : i32, i32
  }
  func.func @transform_3(%arg0: i32) -> (i32, i32) {
    %c0_i32 = arith.constant 0 : i32
    %c0_i32_0 = arith.constant 0 : i32
    %c0_i32_1 = arith.constant 0 : i32
    return %c0_i32, %c0_i32_0 : i32, i32
  }
  func.func @transform_4(%arg0: i32) -> (i32, i32) {
    %c0_i32 = arith.constant 0 : i32
    %c0_i32_0 = arith.constant 0 : i32
    %c0_i32_1 = arith.constant 0 : i32
    return %c0_i32, %c0_i32_0 : i32, i32
  }
  func.func @transform_5(%arg0: i32) -> (i32, i32, i32, i32) {
    %c0_i32 = arith.constant 0 : i32
    %c0_i32_0 = arith.constant 0 : i32
    %c0_i32_1 = arith.constant 0 : i32
    %c0_i32_2 = arith.constant 0 : i32
    return %arg0, %c0_i32, %c0_i32_0, %c0_i32_1 : i32, i32, i32, i32
  }
}

</mosaic_0001>

<bundles_post_ra>
// kernel: residual_block_forward.1
= control target key start
LH: loop header
LB: loop body
LE: loop exit
PB: predicated region body
PF: predicated region fallthrough
CT: control target
= control target key end

     0   :  { %10 = vsyncpa [#allocation6], 0  ;;  %s16191_s0 = inlined_call_operand.vmem [shape: bf16[2,16,16,128], index: 0, kind: input, shape index: {}]   ;;  %s16192_s1 = inlined_call_operand.vmem [shape: bf16[1152,128], index: 1, kind: input, shape index: {}]   ;;  %s16193_s2 = inlined_call_operand.vmem [shape: f32[1,128], index: 2, kind: input, shape index: {}]   ;;  %s16194_s3 = inlined_call_operand.vmem [shape: bf16[1280,128], index: 3, kind: input, shape index: {}]   ;;  %s16195_s4 = inlined_call_operand.vmem [shape: f32[1,128], index: 4, kind: input, shape index: {}]   ;;  %s16196_s5 = inlined_call_operand.hbm [shape: f32[2,16,16,128], index: 5, kind: output, shape index: {}]  }
   0x1   :  { %12 = vsyncpa [#allocation6 + $0x1], 0  ;;  %s12599_s18 = smov 0   ;;  %s12601_s19 = smov 0  }
   0x2   :  { %s12603_s20 = smov 0   ;;  %s12605_s21 = smov 0  }
   0x3 LB: > { %s12620_s22 = sadd.s32 4294967295, %s12563_s21   ;;  %s10434_s23 = sadd.s32 4294967294, %s12563_s21   ;;  %s12563_s21 = sphi %s12605_s21, %s16303_s21   ;;  %s12559_s20 = sphi %s12603_s20, %s16302_s20   ;;  %s12555_s19 = sphi %s12601_s19, %s16301_s19   ;;  %s12551_s18 = sphi %s12599_s18, %s16300_s18  }
   0x4   : > { %s12624_s24 = sadd.s32 1, %s12563_s21   ;;  %s135_s25 = sadd.s32 1, %s12559_s20 }
   0x5   : > { %s132_s26 = ssub.s32 %s12563_s21, %s12624_s24  ;;  %p145_p0 = scmp.ne.s32.totalorder %s12559_s20, %s12555_s19 }
   0x6   : > { %p133_p1 = scmp.eq.s32.totalorder %s132_s26, 0  ;;  %p146_p2 = scmp.eq.s32.totalorder %s12620_s22, 1 }
   0x7   : > { %p151_p3 = scmp.ne.s32.totalorder %s12555_s19, %s12551_s18  ;;  %p152_p4 = scmp.eq.s32.totalorder %s10434_s23, 1 }
   0x8   : > { %s12635_s27 = scalar_select %p133_p1, %s12559_s20, %s135_s25  }
   0x9   : > { %p12637_p5 = por %p146_p2, %p145_p0  ;;  %p12641_p6 = por %p152_p4, %p151_p3 }
   0xa   : > { %p10437_p7 = scmp.ge.s32.totalorder %s12563_s21, 1  ;;  %p190_p8 = scmp.lt.s32.totalorder %s12563_s21, 3 }
   0xc   : > { %p191_p9 = pnand %p10437_p7, %p190_p8 }
   0xe   : > { %194 = sbr.rel (%p191_p9) target bundleno = 1348 (0x544), region = 40 }
  0x15   : > { %v12650_v0 = vld [vmem:[%s16192_s1 + $0x40] sm:$0xff]   ;;  %v12565_v2 = vmov 0   ;;  %v12206_v3 = vld [vmem:[%s16192_s1 + $0x48] sm:$0xff]   ;;  %v12208_v5 = vld [vmem:[%s16192_s1 + $0x50] sm:$0xff]   ;;  %p218_p10 = scmp.lt.s32.totalorder %s12620_s22, 1  ;;  %v16208_v24 = vmov 0 }
  0x16   : > { %v12655_v1 = vld [vmem:[%s16192_s1] sm:$0xff]   ;;  %224 = vst [vmem:[#allocation2] sm:$0xf] %v12565_v2  ;;  %225 = vst [vmem:[#allocation2 + $0x4] sm:$0xf] %v12565_v2  ;;  %11066 = vmatprep.subr.bf16.mxu0 %v12650_v0  ;;  %v12207_v4 = vld [vmem:[%s16192_s1 + $0x8] sm:$0xff]  }
  0x17   : > { %226 = vst [vmem:[#allocation2 + $0x8] sm:$0x1] %v12565_v2  ;;  %227 = vst [vmem:[#allocation2 + $0xc] sm:$0xf] %v12565_v2  ;;  %11067 = vmatpush3.bf16.msra.mxu0 %v12655_v1  ;;  %v12209_v6 = vld [vmem:[%s16192_s1 + $0x10] sm:$0xff]   ;;  %v12210_v7 = vld [vmem:[%s16192_s1 + $0x58] sm:$0xff]  }
  0x18   : > { %228 = vst [vmem:[#allocation2 + $0x10] sm:$0xf] %v12565_v2  ;;  %229 = vst [vmem:[#allocation2 + $0x14] sm:$0x1] %v12565_v2  ;;  %11068 = vmatprep.subr.bf16.mxu0 %v12206_v3  ;;  %v12211_v8 = vld [vmem:[%s16192_s1 + $0x18] sm:$0xff]   ;;  %s12787_s30 = scalar_select %p218_p10, %s12620_s22, 1 }
  0x19   : > { %230 = vst [vmem:[#allocation2 + $0x18] sm:$0xf] %v12565_v2  ;;  %231 = vst [vmem:[#allocation2 + $0x1c] sm:$0xf] %v12565_v2  ;;  %v12212_v9 = vld [vmem:[%s16192_s1 + $0x60] sm:$0xff]   ;;  %v12214_v11 = vld [vmem:[%s16192_s1 + $0x68] sm:$0xff]  }
  0x1a   : > { %232 = vst [vmem:[#allocation2 + $0x20] sm:$0x1] %v12565_v2  ;;  %233 = vst [vmem:[#allocation2 + $0x24] sm:$0xf] %v12565_v2  ;;  %v12213_v10 = vld [vmem:[%s16192_s1 + $0x20] sm:$0xff]   ;;  %s11032_s12 = sshll.u32 %s12787_s30, 7 }
  0x1b   : > { %234 = vst [vmem:[#allocation2 + $0x28] sm:$0xf] %v12565_v2  ;;  %235 = vst [vmem:[#allocation2 + $0x2c] sm:$0x1] %v12565_v2  ;;  %11069 = vmatpush3.bf16.msra.mxu0 %v12207_v4  ;;  %v12215_v15 = vld [vmem:[%s16192_s1 + $0x28] sm:$0xff]   ;;  %v12216_v18 = vld [vmem:[%s16192_s1 + $0x70] sm:$0xff]   ;;  %s12815_s30 = scalar_lea.vmem %s16191_s0, %s11032_s12 }
  0x1c   : > { %236 = vst [vmem:[#allocation2 + $0x30] sm:$0xf] %v12565_v2  ;;  %237 = vst [vmem:[#allocation2 + $0x34] sm:$0xf] %v12565_v2  ;;  %11070 = vmatprep.subr.bf16.mxu0 %v12208_v5  ;;  %vm997_vm0 = vsmask.f32 3328 }
  0x1d   : > { %238 = vst [vmem:[#allocation2 + $0x38] sm:$0x1] %v12565_v2  ;;  %239 = vst [vmem:[#allocation2 + $0x3c] sm:$0xf] %v12565_v2  ;;  %v949_v12 = vld [vmem:[#allocation2] sm:$0xf] }
  0x1e   : > { %240 = vst [vmem:[#allocation2 + $0x40] sm:$0xf] %v12565_v2  ;;  %241 = vst [vmem:[#allocation2 + $0x44] sm:$0x1] %v12565_v2  ;;  %v950_v13 = vld [vmem:[#allocation2 + $0x4] sm:$0xf] }
  0x1f   : > { %242 = vst [vmem:[#allocation2 + $0x48] sm:$0xf] %v12565_v2  ;;  %243 = vst [vmem:[#allocation2 + $0x4c] sm:$0xf] %v12565_v2  ;;  %11071 = vmatpush3.bf16.msra.mxu0 %v12209_v6  ;;  %v951_v14 = vld [vmem:[#allocation2 + $0x8] sm:$0x1] }
  0x20   : > { %244 = vst [vmem:[#allocation2 + $0x50] sm:$0x1] %v12565_v2  ;;  %245 = vst [vmem:[#allocation2 + $0x54] sm:$0xf] %v12565_v2  ;;  %11072 = vmatprep.subr.bf16.mxu0 %v12210_v7  ;;  %vm998_vm1 = vsmask.f32 7440 }
  0x21   : > { %246 = vst [vmem:[#allocation2 + $0x58] sm:$0xf] %v12565_v2  ;;  %247 = vst [vmem:[#allocation2 + $0x5c] sm:$0x1] %v12565_v2  ;;  %v1001_v16 = vshrl.u32 %v949_v12, 16  ;;  %v1004_v17 = vshll.u32 %v949_v12, 16 }
  0x22   : > { %248 = vst [vmem:[#allocation2 + $0x60] sm:$0xf] %v12565_v2  ;;  %249 = vst [vmem:[#allocation2 + $0x64] sm:$0xf] %v12565_v2  ;;  %v1010_v19 = vshll.u32 %v950_v13, 16  ;;  %v1014_v20 = vshrl.u32 %v950_v13, 16 }
  0x23   : > { %250 = vst [vmem:[#allocation2 + $0x68] sm:$0x1] %v12565_v2  ;;  %251 = vst [vmem:[#allocation2 + $0x6c] sm:$0xf] %v12565_v2  ;;  %11073 = vmatpush3.bf16.msra.mxu0 %v12211_v8  ;;  %v1020_v21 = vshll.u32 %v951_v14, 16  ;;  %v1003_v22 = vrot.slane %v1001_v16, 4 }
  0x24   : > { %252 = vst [vmem:[#allocation2 + $0x70] sm:$0xf] %v12565_v2  ;;  %253 = vst [vmem:[#allocation2 + $0x74] sm:$0x1] %v12565_v2  ;;  %11074 = vmatprep.subr.bf16.mxu0 %v12212_v9  ;;  %v1006_v23 = vrot.slane %v1004_v17, 5  ;;  %v1012_v25 = vrot.slane %v1010_v19, 5 }
  0x25   : > { %254 = vst [vmem:[#allocation2 + $0x78] sm:$0xf] %v12565_v2  ;;  %255 = vst [vmem:[#allocation2 + $0x7c] sm:$0xf] %v12565_v2  ;;  %v1016_v26 = vrot.slane %v1014_v20, 4  ;;  %v12221_v27 = vld [vmem:[%s16192_s1 + $0xc0] sm:$0xff]  }
  0x26   : > { %256 = vst [vmem:[#allocation2 + $0x80] sm:$0x1] %v12565_v2  ;;  %257 = vst [vmem:[#allocation2 + $0x84] sm:$0xf] %v12565_v2  ;;  %vm688_vm3 = vcmask 1043456   ;;  %v12217_v28 = vld [vmem:[%s16192_s1 + $0x30] sm:$0xff]   ;;  %v1007_v29 = vor.u32 %v1006_v23, %v1003_v22  ;;  %12146 = vmatprep.subr.bf16.mxu1 %v12221_v27 }
  0x27   : > { %258 = vst [vmem:[#allocation2 + $0x88] sm:$0xf] %v12565_v2  ;;  %259 = vst [vmem:[#allocation2 + $0x8c] sm:$0x1] %v12565_v2  ;;  %11075 = vmatpush3.bf16.msra.mxu0 %v12213_v10  ;;  %v12823_v30 = vld [vmem:[%s16192_s1 + $0x80] sm:$0xff]   ;;  %vm695_vm4 = vcmask 1040384   ;;  %v1017_v32 = vor.u32 %v1016_v26, %v1012_v25 }
  0x28   : > { %260 = vst [vmem:[#allocation2 + $0x90] sm:$0xf] %v12565_v2  ;;  %261 = vst [vmem:[#allocation2 + $0x94] sm:$0xf] %v12565_v2  ;;  %11076 = vmatprep.subr.bf16.mxu0 %v12214_v11  ;;  %v12218_v31 = vld [vmem:[%s16192_s1 + $0x78] sm:$0xff]   ;;  %v1022_v33 = vrot.slane %v1020_v21, 5  ;;  %12154 = vmatpush3.bf16.msra.mxu1 %v12823_v30 }
  0x29   : > { %262 = vst [vmem:[#allocation2 + $0x98] sm:$0x1] %v12565_v2  ;;  %263 = vst [vmem:[#allocation2 + $0x9c] sm:$0xf] %v12565_v2  ;;  %v12831_v34 = vld [vmem:[%s16192_s1 + $0xc8] sm:$0xff]   ;;  %v1008_v35 = vrot.slane %v1007_v29, 4 }
  0x2a   : > { %264 = vst [vmem:[#allocation2 + $0xa0] sm:$0xf] %v12565_v2  ;;  %265 = vst [vmem:[#allocation2 + $0xa4] sm:$0x1] %v12565_v2  ;;  %v332_v36 = vld [vmem:[%s12815_s30] sm:$0xf]  ;;  %12147 = vmatprep.subr.bf16.mxu1 %v12831_v34 }
  0x2b   : > { %266 = vst [vmem:[#allocation2 + $0xa8] sm:$0xf] %v12565_v2  ;;  %267 = vst [vmem:[#allocation2 + $0xac] sm:$0xf] %v12565_v2  ;;  %11077 = vmatpush3.bf16.msra.mxu0 %v12215_v15  ;;  %v333_v37 = vld [vmem:[%s12815_s30 + $0x4] sm:$0xf] }
  0x2c   : > { %268 = vst [vmem:[#allocation2 + $0xb0] sm:$0x1] %v12565_v2  ;;  %269 = vst [vmem:[#allocation2 + $0xb4] sm:$0xf] %v12565_v2  ;;  %v12839_v38 = vld [vmem:[%s16192_s1 + $0x88] sm:$0xff]   ;;  %11078 = vmatprep.subr.bf16.mxu0 %v12216_v18  ;;  %v1018_v39 = vrot.slane %v1017_v32, 4 }
  0x2d   : > { %270 = vst [vmem:[#allocation2 + $0xb8] sm:$0xf] %v12565_v2  ;;  %271 = vst [vmem:[#allocation2 + $0xbc] sm:$0x1] %v12565_v2  ;;  %vm364_vm5 = vsmask.f32 256  ;;  %12155 = vmatpush3.bf16.msra.mxu1 %v12839_v38 }
  0x2e   : > { %272 = vst [vmem:[#allocation2 + $0xc0] sm:$0xf] %v12565_v2  ;;  %273 = vst [vmem:[#allocation2 + $0xc4] sm:$0xf] %v12565_v2  ;;  %vm365_vm6 = vsmask.f32 4368 }
  0x2f   : > { %274 = vst [vmem:[#allocation2 + $0xc8] sm:$0x1] %v12565_v2  ;;  %275 = vst [vmem:[#allocation2 + $0xcc] sm:$0xf] %v12565_v2  ;;  %v368_v40 = vshrl.u32 %v332_v36, 16  ;;  %v12219_v41 = vld [vmem:[%s16192_s1 + $0x38] sm:$0xff]   ;;  %11079 = vmatpush3.bf16.msra.mxu0 %v12217_v28 }
  0x30   : > { %276 = vst [vmem:[#allocation2 + $0xd0] sm:$0xf] %v12565_v2  ;;  %277 = vst [vmem:[#allocation2 + $0xd4] sm:$0x1] %v12565_v2  ;;  %v16211_v43 = vmov 0  ;;  %v371_v44 = vshll.u32 %v332_v36, 16  ;;  %11080 = vmatprep.subr.bf16.mxu0 %v12218_v31 }
  0x31   : > { %278 = vst [vmem:[#allocation3] sm:$0xf] %v12565_v2  ;;  %279 = vst [vmem:[#allocation3 + $0x4] sm:$0xf] %v12565_v2  ;;  %v376_v45 = vshrl.u32 %v333_v37, 16  ;;  %v379_v46 = vshll.u32 %v333_v37, 16 }
  0x32   : > { %280 = vst [vmem:[#allocation3 + $0x8] sm:$0x1] %v12565_v2  ;;  %281 = vst [vmem:[#allocation3 + $0xc] sm:$0xf] %v12565_v2  ;;  %v691_v47 = vld [vmem:[#allocation2 + $0xc] sm:$0xf] }
  0x33   : > { %282 = vst [vmem:[#allocation3 + $0x10] sm:$0xf] %v12565_v2  ;;  %283 = vst [vmem:[#allocation3 + $0x14] sm:$0x1] %v12565_v2  ;;  %v12854_v48 = vld [vmem:[%s16192_s1 + $0xd0] sm:$0xff]   ;;  %v370_v50 = vrot.slane %v368_v40, 7  ;;  %11081 = vmatpush3.bf16.msra.mxu0 %v12219_v41 }
  0x34   : > { %284 = vst [vmem:[#allocation3 + $0x18] sm:$0xf] %v12565_v2  ;;  %285 = vst [vmem:[#allocation3 + $0x1c] sm:$0xf] %v12565_v2  ;;  %vm689_vm8 = vsmask.f32 7938  ;;  %12148 = vmatprep.subr.bf16.mxu1 %v12854_v48  ;;  %11178 = vmatprep.subr.bf16.mxu0 %v12221_v27 }
  0x35   : > { %286 = vst [vmem:[#allocation3 + $0x20] sm:$0x1] %v12565_v2  ;;  %287 = vst [vmem:[#allocation3 + $0x24] sm:$0xf] %v12565_v2  ;;  %v16214_v51 = vmov 0  ;;  %v12866_v53 = vld [vmem:[%s16192_s1 + $0x90] sm:$0xff]   ;;  %v373_v57 = vor.u32 %v371_v44, %v370_v50 }
  0x36   : > { %288 = vst [vmem:[#allocation3 + $0x28] sm:$0xf] %v12565_v2  ;;  %289 = vst [vmem:[#allocation3 + $0x2c] sm:$0x1] %v12565_v2  ;;  %v697_v52 = vld [vmem:[#allocation2 + $0x14] sm:$0x1]  ;;  %12156 = vmatpush3.bf16.msra.mxu1 %v12866_v53 }
  0x37   : > { %290 = vst [vmem:[#allocation3 + $0x30] sm:$0xf] %v12565_v2  ;;  %291 = vst [vmem:[#allocation3 + $0x34] sm:$0xf] %v12565_v2  ;;  %v378_v55 = vrot.slane %v376_v45, 7  ;;  %v16217_v56 = vmov 0 }
  0x38   : > { %292 = vst [vmem:[#allocation3 + $0x38] sm:$0x1] %v12565_v2  ;;  %293 = vst [vmem:[#allocation3 + $0x3c] sm:$0xf] %v12565_v2  ;;  %v374_v58 = vrot.slane %v370_v50, 4  ;;  %v12878_v59 = vld [vmem:[%s16192_s1 + $0xd8] sm:$0xff]  }
  0x39   : > { %294 = vst [vmem:[#allocation3 + $0x40] sm:$0xf] %v12565_v2  ;;  %295 = vst [vmem:[#allocation3 + $0x44] sm:$0x1] %v12565_v2  ;;  %v12220_v60 = vld [vmem:[#allocation2] sm:$0xff]   ;;  %v381_v61 = vor.u32 %v379_v46, %v378_v55  ;;  %v383_v62 = vrot.slane %v378_v55, 4  ;;  %12149 = vmatprep.subr.bf16.mxu1 %v12878_v59 }
  0x3a   : > { %296 = vst [vmem:[#allocation3 + $0x48] sm:$0xf] %v12565_v2  ;;  %297 = vst [vmem:[#allocation3 + $0x4c] sm:$0xf] %v12565_v2  ;;  %v334_v0 = vld [vmem:[%s12815_s30 + $0x8] sm:$0xf] }
  0x3b   : > { %298 = vst [vmem:[#allocation3 + $0x50] sm:$0x1] %v12565_v2  ;;  %299 = vst [vmem:[#allocation3 + $0x54] sm:$0xf] %v12565_v2  ;;  %v335_v3 = vld [vmem:[%s12815_s30 + $0xc] sm:$0xf] }
  0x3c   : > { %300 = vst [vmem:[#allocation3 + $0x58] sm:$0xf] %v12565_v2  ;;  %301 = vst [vmem:[#allocation3 + $0x5c] sm:$0x1] %v12565_v2  ;;  %v385_v4 = vshrl.u32 %v334_v0, 16  ;;  %v388_v5 = vshll.u32 %v334_v0, 16 }
  0x3d   : > { %302 = vst [vmem:[#allocation3 + $0x60] sm:$0xf] %v12565_v2  ;;  %303 = vst [vmem:[#allocation3 + $0x64] sm:$0xf] %v12565_v2  ;;  %v12892_v6 = vld [vmem:[%s16192_s1 + $0x98] sm:$0xff]   ;;  %v393_v7 = vshrl.u32 %v335_v3, 16 }
  0x3e   : > { %304 = vst [vmem:[#allocation3 + $0x68] sm:$0x1] %v12565_v2  ;;  %305 = vst [vmem:[#allocation3 + $0x6c] sm:$0xf] %v12565_v2  ;;  %v396_v8 = vshll.u32 %v335_v3, 16  ;;  %v387_v10 = vrot.slane %v385_v4, 7  ;;  %12157 = vmatpush3.bf16.msra.mxu1 %v12892_v6 }
  0x3f   : > { %306 = vst [vmem:[#allocation3 + $0x70] sm:$0xf] %v12565_v2  ;;  %307 = vst [vmem:[#allocation3 + $0x74] sm:$0x1] %v12565_v2  ;;  %v700_v9 = vld [vmem:[#allocation2 + $0x18] sm:$0xf] }
  0x40   : > { %308 = vst [vmem:[#allocation3 + $0x78] sm:$0xf] %v12565_v2  ;;  %309 = vst [vmem:[#allocation3 + $0x7c] sm:$0xf] %v12565_v2  ;;  %v704_v11 = vld [vmem:[#allocation2 + $0x20] sm:$0x1]  ;;  %v390_v14 = vor.u32 %v388_v5, %v387_v10 }
  0x41   : > { %310 = vst [vmem:[#allocation3 + $0x80] sm:$0x1] %v12565_v2  ;;  %311 = vst [vmem:[#allocation3 + $0x84] sm:$0xf] %v12565_v2  ;;  %v12898_v12 = vld [vmem:[%s16192_s1 + $0xe0] sm:$0xff]   ;;  %v395_v13 = vrot.slane %v393_v7, 7 }
  0x42   : > { %312 = vst [vmem:[#allocation3 + $0x88] sm:$0xf] %v12565_v2  ;;  %313 = vst [vmem:[#allocation3 + $0x8c] sm:$0x1] %v12565_v2  ;;  %v391_v15 = vrot.slane %v387_v10, 4  ;;  %v12905_v16 = vld [vmem:[%s16192_s1 + $0xa0] sm:$0xff]   ;;  %12150 = vmatprep.subr.bf16.mxu1 %v12898_v12 }
  0x43   : > { %314 = vst [vmem:[#allocation3 + $0x90] sm:$0xf] %v12565_v2  ;;  %315 = vst [vmem:[#allocation3 + $0x94] sm:$0xf] %v12565_v2  ;;  %v398_v17 = vor.u32 %v396_v8, %v395_v13  ;;  %v400_v18 = vrot.slane %v395_v13, 4  ;;  %v12912_v19 = vld [vmem:[%s16192_s1 + $0xe8] sm:$0xff]   ;;  %12158 = vmatpush3.bf16.msra.mxu1 %v12905_v16 }
  0x44   : > { %316 = vst [vmem:[#allocation3 + $0x98] sm:$0x1] %v12565_v2  ;;  %317 = vst [vmem:[#allocation3 + $0x9c] sm:$0xf] %v12565_v2  ;;  %v336_v20 = vld [vmem:[%s12815_s30 + $0x10] sm:$0xf]  ;;  %12151 = vmatprep.subr.bf16.mxu1 %v12912_v19 }
  0x45   : > { %318 = vst [vmem:[#allocation3 + $0xa0] sm:$0xf] %v12565_v2  ;;  %319 = vst [vmem:[#allocation3 + $0xa4] sm:$0x1] %v12565_v2  ;;  %v337_v22 = vld [vmem:[%s12815_s30 + $0x14] sm:$0xf] }
  0x46   : > { %320 = vst [vmem:[#allocation3 + $0xa8] sm:$0xf] %v12565_v2  ;;  %321 = vst [vmem:[#allocation3 + $0xac] sm:$0xf] %v12565_v2  ;;  %v402_v23 = vshrl.u32 %v336_v20, 16  ;;  %v12921_v26 = vld [vmem:[%s16192_s1 + $0xa8] sm:$0xff]  }
  0x47   : > { %322 = vst [vmem:[#allocation3 + $0xb0] sm:$0x1] %v12565_v2  ;;  %323 = vst [vmem:[#allocation3 + $0xb4] sm:$0xf] %v12565_v2  ;;  %v413_v31 = vshll.u32 %v337_v22, 16  ;;  %12159 = vmatpush3.bf16.msra.mxu1 %v12921_v26  ;;  %vm1560_vm11 = vcmask 1042432  }
  0x48   : > { %324 = vst [vmem:[#allocation3 + $0xb8] sm:$0xf] %v12565_v2  ;;  %325 = vst [vmem:[#allocation3 + $0xbc] sm:$0x1] %v12565_v2  ;;  %v707_v40 = vld [vmem:[#allocation2 + $0x24] sm:$0xf] }
  0x49   : > { %326 = vst [vmem:[#allocation3 + $0xc0] sm:$0xf] %v12565_v2  ;;  %327 = vst [vmem:[#allocation3 + $0xc4] sm:$0xf] %v12565_v2  ;;  %v404_v44 = vrot.slane %v402_v23, 7  ;;  %vm1561_vm12 = vcmask 1046532  }
  0x4a   : > { %328 = vst [vmem:[#allocation3 + $0xc8] sm:$0x1] %v12565_v2  ;;  %329 = vst [vmem:[#allocation3 + $0xcc] sm:$0xf] %v12565_v2  ;;  %v711_v46 = vld [vmem:[#allocation2 + $0x2c] sm:$0x1] }
  0x4b   : > { %330 = vst [vmem:[#allocation3 + $0xd0] sm:$0xf] %v12565_v2  ;;  %331 = vst [vmem:[#allocation3 + $0xd4] sm:$0x1] %v12565_v2  ;;  %v408_v55 = vrot.slane %v404_v44, 4  ;;  %s11065_s26 = sshll.u32 %s12620_s22, 12 }
  0x4c   : > { %vm12805_vm2 = vmor %vm997_vm0, %vm998_vm1  ;;  %v339_v23 = vld [vmem:[%s12815_s30 + $0x1c] sm:$0xf]  ;;  %s16142_s9 = scalar_lea.hbm %s16196_s5, %s11065_s26  ;;  %s12566_s11 = smov [#allocation5]  }
  0x4d   : > { %v16209_v24 = vsel %vm12805_vm2, 4294967295, %v16208_v24  ;;  %v1013_v42 = vsel %vm12805_vm2, %v1008_v35, %v1012_v25  ;;  %vm12847_vm7 = vmor %vm364_vm5, %vm365_vm6  ;;  %v1023_v49 = vsel %vm12805_vm2, %v1018_v39, %v1022_v33  ;;  %v405_v25 = vshll.u32 %v336_v20, 16  ;;  %s12505_s12 = sshll.u32 %s12566_s11, 4  ;;  %s12506_s12 = int_to_ptr.vmem [resolvable:$false] %s12505_s12 }
  0x4e   : > { %16210 = vst [vmem:[#allocation8_spill] sm:$0xff] %v16209_v24  ;;  %v16212_v43 = vsel %vm12847_vm7, 4294967295, %v16211_v43  ;;  %vm12859_vm9 = vmand %vm695_vm4, %vm364_vm5  ;;  %v10457_v54 = vcombine.low %v1013_v42, %v1023_v49  ;;  %v382_v1 = vsel %vm12847_vm7, %v374_v58, %v381_v61  ;;  %v399_v28 = vsel %vm12847_vm7, %v391_v15, %v398_v17  ;;  %v12947_v61 = vld [vmem:[%s16192_s1 + $0xf8] sm:$0xff]   ;;  %s12507_s13 = scalar_lea.vmem %s12506_s12, 8192 }
  0x4f   : > { %16213 = vst [vmem:[#allocation9_spill] sm:$0xff] %v16212_v43  ;;  %v16215_v51 = vsel %vm12859_vm9, 4294967295, %v16214_v51  ;;  %vm12869_vm10 = vmand %vm688_vm3, %vm689_vm8  ;;  %v698_v2 = vsel %vm12859_vm9, %v383_v62, %v697_v52  ;;  %v705_v29 = vsel %vm12859_vm9, %v400_v18, %v704_v11  ;;  %v12962_v11 = vld [vmem:[%s16192_s1 + $0xb8] sm:$0xff]  }
  0x50   : > { %16216 = vst [vmem:[#allocation10_spill] sm:$0xff] %v16215_v51  ;;  %v16218_v56 = vsel %vm12869_vm10, 4294967295, %v16217_v56  ;;  %4403 = vmatprep.mubr.bf16.mxu0 %v10457_v54  ;;  %v692_v63 = vsel %vm12869_vm10, %v373_v57, %v691_v47  ;;  %694 = vst [vmem:[#allocation2 + $0x10] sm:$0xf] %v382_v1  ;;  %v701_v21 = vsel %vm12869_vm10, %v390_v14, %v700_v9 }
  0x51   : > { %16219 = vst [vmem:[#allocation11_spill] sm:$0xff] %v16218_v56  ;;  %693 = vst [vmem:[#allocation2 + $0xc] sm:$0xf] %v692_v63  ;;  %4404 = vmatmul.mubr.bf16.vlgmr.msra.gmra.mrb[0].mxu0 %v12220_v60  ;;  %v407_v54 = vor.u32 %v405_v25, %v404_v44  ;;  %v430_v44 = vshll.u32 %v339_v23, 16 }
  0x52   : > { %699 = vst [vmem:[#allocation2 + $0x14] sm:$0x1] %v698_v2  ;;  %11179 = vmatpush3.bf16.msra.mxu0 %v12823_v30  ;;  %702 = vst [vmem:[#allocation2 + $0x18] sm:$0xf] %v701_v21  ;;  %v410_v30 = vshrl.u32 %v337_v22, 16 }
  0x53   : > { %11180 = vmatprep.subr.bf16.mxu0 %v12831_v34  ;;  %703 = vst [vmem:[#allocation2 + $0x1c] sm:$0xf] %v399_v28  ;;  %706 = vst [vmem:[#allocation2 + $0x20] sm:$0x1] %v705_v29  ;;  %v708_v1 = vsel %vm12869_vm10, %v407_v54, %v707_v40  ;;  %v338_v22 = vld [vmem:[%s12815_s30 + $0x18] sm:$0xf] }
  0x54   : > { %v412_v45 = vrot.slane %v410_v30, 7  ;;  %709 = vst [vmem:[#allocation2 + $0x24] sm:$0xf] %v708_v1  ;;  %v422_v29 = vshll.u32 %v338_v22, 16  ;;  %v427_v30 = vshrl.u32 %v339_v23, 16  ;;  %vm13026_vm13 = vmor %vm1560_vm11, %vm1561_vm12 }
  0x56   : > { %11181 = vmatpush3.bf16.msra.mxu0 %v12839_v38  ;;  %v12934_v38 = vld [vmem:[%s16192_s1 + $0xf0] sm:$0xff]   ;;  %v415_v57 = vor.u32 %v413_v31, %v412_v45  ;;  %v417_v60 = vrot.slane %v412_v45, 4 }
  0x57   : > { %v953_v32 = vld [vmem:[#allocation2 + $0x10] sm:$0xf]  ;;  %11182 = vmatprep.subr.bf16.mxu0 %v12854_v48  ;;  %12152 = vmatprep.subr.bf16.mxu1 %v12934_v38 }
  0x58   : > { %v952_v27 = vld [vmem:[#allocation2 + $0xc] sm:$0xf]  ;;  %v1034_v36 = vshll.u32 %v953_v32, 16  ;;  %v1038_v37 = vshrl.u32 %v953_v32, 16  ;;  %v12940_v48 = vld [vmem:[%s16192_s1 + $0xb0] sm:$0xff]   ;;  %v416_v0 = vsel %vm12847_vm7, %v408_v55, %v415_v57  ;;  %v712_v7 = vsel %vm12859_vm9, %v417_v60, %v711_v46 }
  0x59   : > { %v954_v33 = vld [vmem:[#allocation2 + $0x14] sm:$0x1]  ;;  %v1025_v34 = vshrl.u32 %v952_v27, 16  ;;  %v1028_v35 = vshll.u32 %v952_v27, 16  ;;  %v955_v63 = vld [vmem:[#allocation2 + $0x18] sm:$0xf]  ;;  %12160 = vmatpush3.bf16.msra.mxu1 %v12940_v48 }
  0x5a   : > { %v1044_v39 = vshll.u32 %v954_v33, 16  ;;  %v1036_v47 = vrot.slane %v1034_v36, 5  ;;  %v1040_v49 = vrot.slane %v1038_v37, 4  ;;  %11183 = vmatpush3.bf16.msra.mxu0 %v12866_v53  ;;  %v12225_v2 = vld [vmem:[#allocation2 + $0xc] sm:$0xff]   ;;  %v956_v3 = vld [vmem:[#allocation2 + $0x1c] sm:$0xf]  ;;  %12153 = vmatprep.subr.bf16.mxu1 %v12947_v61 }
  0x5b   : > { %v1027_v41 = vrot.slane %v1025_v34, 4  ;;  %v1030_v42 = vrot.slane %v1028_v35, 5  ;;  %11184 = vmatprep.subr.bf16.mxu0 %v12878_v59  ;;  %v957_v4 = vld [vmem:[#allocation2 + $0x20] sm:$0x1]  ;;  %v1049_v5 = vshrl.u32 %v955_v63, 16  ;;  %v1052_v8 = vshll.u32 %v955_v63, 16 }
  0x5c   : > { %v1046_v50 = vrot.slane %v1044_v39, 5  ;;  %v1041_v58 = vor.u32 %v1040_v49, %v1036_v47  ;;  %710 = vst [vmem:[#allocation2 + $0x28] sm:$0xf] %v416_v0  ;;  %v1058_v9 = vshll.u32 %v956_v3, 16  ;;  %v1062_v10 = vshrl.u32 %v956_v3, 16  ;;  %v12230_v46 = vld [vmem:[#allocation2 + $0x18] sm:$0xff]  }
  0x5d   : > { %v1031_v52 = vor.u32 %v1030_v42, %v1027_v41  ;;  %713 = vst [vmem:[#allocation2 + $0x2c] sm:$0x1] %v712_v7  ;;  %v1051_v14 = vrot.slane %v1049_v5, 4  ;;  %v1068_v15 = vshll.u32 %v957_v4, 16  ;;  %v1054_v18 = vrot.slane %v1052_v8, 5  ;;  %12161 = vmatpush3.bf16.msra.mxu1 %v12962_v11 }
  0x5e   : > { %v1042_v53 = vrot.slane %v1041_v58, 4  ;;  %11185 = vmatpush3.bf16.msra.mxu0 %v12892_v6  ;;  %v1060_v20 = vrot.slane %v1058_v9, 5  ;;  %v1064_v21 = vrot.slane %v1062_v10, 4  ;;  %v419_v6 = vshrl.u32 %v338_v22, 16  ;;  %v958_v33 = vld [vmem:[#allocation2 + $0x24] sm:$0xf] }
  0x5f   : > { %v1032_v62 = vrot.slane %v1031_v52, 4  ;;  %11186 = vmatprep.subr.bf16.mxu0 %v12898_v12  ;;  %v1055_v25 = vor.u32 %v1054_v18, %v1051_v14  ;;  %v1070_v28 = vrot.slane %v1068_v15, 5  ;;  %v1073_v35 = vshrl.u32 %v958_v33, 16  ;;  %v341_v58 = vld [vmem:[%s12815_s30 + $0x24] sm:$0xf] }
  0x60   : > { %v1047_v13 = vsel %vm12805_vm2, %v1042_v53, %v1046_v50  ;;  %v1065_v27 = vor.u32 %v1064_v21, %v1060_v20  ;;  %v1076_v36 = vshll.u32 %v958_v33, 16  ;;  %v340_v50 = vld [vmem:[%s12815_s30 + $0x20] sm:$0xf]  ;;  %v421_v55 = vrot.slane %v419_v6, 7  ;;  %v714_v60 = vld [vmem:[#allocation2 + $0x30] sm:$0xf] }
  0x61   : > { %v1037_v59 = vsel %vm12805_vm2, %v1032_v62, %v1036_v47  ;;  %v1056_v31 = vrot.slane %v1055_v25, 4  ;;  %v429_v57 = vrot.slane %v427_v30, 7  ;;  %v436_v62 = vshrl.u32 %v340_v50, 16  ;;  %v718_v4 = vld [vmem:[#allocation2 + $0x38] sm:$0x1] }
  0x62   : > { %v10458_v17 = vcombine.low %v1037_v59, %v1047_v13  ;;  %v1066_v32 = vrot.slane %v1065_v27, 4  ;;  %11187 = vmatpush3.bf16.msra.mxu0 %v12905_v16  ;;  %v1075_v16 = vrot.slane %v1073_v35, 4  ;;  %v1078_v47 = vrot.slane %v1076_v36, 5  ;;  %v342_v8 = vld [vmem:[%s12815_s30 + $0x28] sm:$0xf] }
  0x63   : > { %v959_v12 = vld [vmem:[#allocation2 + $0x28] sm:$0xf]  ;;  %11188 = vmatprep.subr.bf16.mxu0 %v12912_v19  ;;  %v1061_v40 = vsel %vm12805_vm2, %v1056_v31, %v1060_v20  ;;  %v439_v63 = vshll.u32 %v340_v50, 16  ;;  %v444_v0 = vshrl.u32 %v341_v58, 16  ;;  %v424_v53 = vor.u32 %v422_v29, %v421_v55  ;;  %v721_v14 = vld [vmem:[#allocation2 + $0x3c] sm:$0xf] }
  0x64   : > { %4411 = vmatprep.mubr.bf16.mxu0 %v10458_v17  ;;  %v960_v34 = vld [vmem:[#allocation2 + $0x2c] sm:$0x1]  ;;  %v1082_v37 = vshll.u32 %v959_v12, 16  ;;  %v1086_v39 = vshrl.u32 %v959_v12, 16  ;;  %v1071_v41 = vsel %vm12805_vm2, %v1066_v32, %v1070_v28  ;;  %v1079_v19 = vor.u32 %v1078_v47, %v1075_v16  ;;  %v725_v22 = vld [vmem:[#allocation2 + $0x44] sm:$0x1] }
  0x65   : > { %4412 = vmatmul.mubr.bf16.gmra.mrb[4].mxu0 %v12225_v2  ;;  %v1092_v42 = vshll.u32 %v960_v34, 16  ;;  %v10459_v45 = vcombine.low %v1061_v40, %v1071_v41  ;;  %v425_v2 = vrot.slane %v421_v55, 4  ;;  %v432_v3 = vor.u32 %v430_v44, %v429_v57  ;;  %v343_v15 = vld [vmem:[%s12815_s30 + $0x2c] sm:$0xf]  ;;  %v344_v28 = vld [vmem:[%s12815_s30 + $0x30] sm:$0xf] }
  0x66   : > { %v1084_v49 = vrot.slane %v1082_v37, 5  ;;  %v1088_v52 = vrot.slane %v1086_v39, 4  ;;  %11189 = vmatpush3.bf16.msra.mxu0 %v12921_v26  ;;  %v1080_v5 = vrot.slane %v1079_v19, 4  ;;  %v434_v7 = vrot.slane %v429_v57, 4  ;;  %v12998_v6 = vld [vmem:[%s12815_s30 + $0x34] sm:$0xf] }
  0x67   : > { %v1094_v54 = vrot.slane %v1092_v42, 5  ;;  %4419 = vmatprep.mubr.bf16.mxu0 %v10459_v45  ;;  %11190 = vmatprep.subr.bf16.mxu0 %v12934_v38  ;;  %v438_v59 = vrot.slane %v436_v62, 7  ;;  %v446_v26 = vrot.slane %v444_v0, 7  ;;  %v433_v10 = vsel %vm12847_vm7, %v425_v2, %v432_v3  ;;  %v12235_v30 = vld [vmem:[#allocation2 + $0x24] sm:$0xff]   ;;  %v13003_v12 = vld [vmem:[%s12815_s30 + $0x38] sm:$0xf] }
  0x68   : > { %v1089_v1 = vor.u32 %v1088_v52, %v1084_v49  ;;  %v715_v13 = vsel %vm12869_vm10, %v424_v53, %v714_v60  ;;  %v447_v38 = vshll.u32 %v341_v58, 16  ;;  %v1085_v17 = vsel %vm12805_vm2, %v1080_v5, %v1084_v49  ;;  %717 = vst [vmem:[#allocation2 + $0x34] sm:$0xf] %v433_v10  ;;  %v728_v39 = vld [vmem:[#allocation2 + $0x48] sm:$0xf] }
  0x69   : > { %716 = vst [vmem:[#allocation2 + $0x30] sm:$0xf] %v715_v13  ;;  %v719_v18 = vsel %vm12859_vm9, %v434_v7, %v718_v4  ;;  %v441_v20 = vor.u32 %v439_v63, %v438_v59  ;;  %v442_v21 = vrot.slane %v438_v59, 4  ;;  %v453_v27 = vshrl.u32 %v342_v8, 16 }
  0x6a   : > { %v1090_v9 = vrot.slane %v1089_v1, 4  ;;  %11191 = vmatpush3.bf16.msra.mxu0 %v12940_v48  ;;  %720 = vst [vmem:[#allocation2 + $0x38] sm:$0x1] %v719_v18  ;;  %v449_v25 = vor.u32 %v447_v38, %v446_v26  ;;  %v451_v48 = vrot.slane %v446_v26, 4  ;;  %v456_v32 = vshll.u32 %v342_v8, 16 }
  0x6b   : > { %11192 = vmatprep.subr.bf16.mxu0 %v12947_v61  ;;  %v722_v31 = vsel %vm12869_vm10, %v441_v20, %v721_v14  ;;  %v461_v33 = vshrl.u32 %v343_v15, 16  ;;  %v455_v35 = vrot.slane %v453_v27, 7  ;;  %v464_v36 = vshll.u32 %v343_v15, 16 }
  0x6c   : > { %v1095_v23 = vsel %vm12805_vm2, %v1090_v9, %v1094_v54  ;;  %v450_v61 = vsel %vm12847_vm7, %v442_v21, %v449_v25  ;;  %723 = vst [vmem:[#allocation2 + $0x3c] sm:$0xf] %v722_v31  ;;  %v726_v34 = vsel %vm12859_vm9, %v451_v48, %v725_v22  ;;  %v470_v40 = vshrl.u32 %v344_v28, 16  ;;  %v735_v54 = vld [vmem:[#allocation2 + $0x54] sm:$0xf] }
  0x6d   : > { %4420 = vmatmul.mubr.bf16.gmra.mrb[8].mxu0 %v12230_v46  ;;  %v10460_v29 = vcombine.low %v1085_v17, %v1095_v23  ;;  %724 = vst [vmem:[#allocation2 + $0x40] sm:$0xf] %v450_v61  ;;  %727 = vst [vmem:[#allocation2 + $0x44] sm:$0x1] %v726_v34  ;;  %v463_v37 = vrot.slane %v461_v33, 7  ;;  %v473_v41 = vshll.u32 %v344_v28, 16  ;;  %v458_v44 = vor.u32 %v456_v32, %v455_v35 }
  0x6e   : > { %11193 = vmatpush3.bf16.msra.mxu0 %v12962_v11  ;;  %v478_v42 = vshrl.u32 %v12998_v6, 16  ;;  %v459_v45 = vrot.slane %v455_v35, 4  ;;  %v732_v46 = vld [vmem:[#allocation2 + $0x50] sm:$0x1]  ;;  %v481_v16 = vshll.u32 %v12998_v6, 16  ;;  %v487_v47 = vshrl.u32 %v13003_v12, 16 }
  0x6f   : > { %4427 = vmatprep.mubr.bf16.mxu0 %v10460_v29  ;;  %v466_v49 = vor.u32 %v464_v36, %v463_v37  ;;  %v468_v50 = vrot.slane %v463_v37, 4  ;;  %v13013_v11 = vrot.slane %v470_v40, 7  ;;  %v962_v57 = vld [vmem:[#allocation2 + $0x34] sm:$0xf]  ;;  %v729_v58 = vsel %vm12869_vm10, %v458_v44, %v728_v39 }
  0x70   : > { %v13015_v52 = vrot.slane %v478_v42, 7  ;;  %v961_v55 = vld [vmem:[#allocation2 + $0x30] sm:$0xf]  ;;  %v1106_v63 = vshll.u32 %v962_v57, 16  ;;  %v1110_v0 = vshrl.u32 %v962_v57, 16 }
  0x71   : > { %v963_v19 = vld [vmem:[#allocation2 + $0x38] sm:$0x1]  ;;  %v1097_v60 = vshrl.u32 %v961_v55, 16  ;;  %v1100_v62 = vshll.u32 %v961_v55, 16  ;;  %730 = vst [vmem:[#allocation2 + $0x48] sm:$0xf] %v729_v58  ;;  %v467_v2 = vsel %vm12847_vm7, %v459_v45, %v466_v49  ;;  %v733_v3 = vsel %vm12859_vm9, %v468_v50, %v732_v46 }
  0x72   : > { %v1116_v1 = vshll.u32 %v963_v19, 16  ;;  %v1476_v53 = vld [vmem:[#allocation2 + $0x30] sm:$0xe]  ;;  %v475_v4 = vor.u32 %v473_v41, %v13013_v11  ;;  %v1108_v59 = vrot.slane %v1106_v63, 5  ;;  %v1112_v26 = vrot.slane %v1110_v0, 4  ;;  %v12265_v41 = vld [vmem:[%s16192_s1 + $0x140] sm:$0xff]  }
  0x73   : > { %v1099_v5 = vrot.slane %v1097_v60, 4  ;;  %v1102_v7 = vrot.slane %v1100_v62, 5  ;;  %731 = vst [vmem:[#allocation2 + $0x4c] sm:$0xf] %v467_v2  ;;  %734 = vst [vmem:[#allocation2 + $0x50] sm:$0x1] %v733_v3  ;;  %11290 = vmatprep.subr.bf16.mxu0 %v12265_v41 }
  0x74   : > { %v1118_v9 = vrot.slane %v1116_v1, 5  ;;  %v12241_v10 = vld [vmem:[#allocation2 + $0x3c] sm:$0xff]   ;;  %v1477_v13 = vld [vmem:[#allocation2 + $0x34] sm:$0xf]  ;;  %v736_v38 = vsel %vm12869_vm10, %v475_v4, %v735_v54  ;;  %v1113_v15 = vor.u32 %v1112_v26, %v1108_v59  ;;  %v1478_v17 = vld [vmem:[#allocation2 + $0x38] sm:$0x1]  ;;  %v483_v4 = vor.u32 %v481_v16, %v13015_v52 }
  0x75   : > { %4428 = vmatmul.mubr.bf16.gmra.mrb[12].mxu0 %v12235_v30  ;;  %v1103_v14 = vor.u32 %v1102_v7, %v1099_v5  ;;  %v10477_v18 = vrot.slane %v1476_v53, 9  ;;  %v1593_v20 = vrot.slane %v1477_v13, 5  ;;  %v964_v21 = vld [vmem:[#allocation2 + $0x3c] sm:$0xf]  ;;  %737 = vst [vmem:[#allocation2 + $0x54] sm:$0xf] %v736_v38  ;;  %4596 = vmatprep.mubr.bf16.mxu1 %v12241_v10 }
  0x76   : > { %v1596_v22 = vrot.slane %v1478_v17, 5  ;;  %v965_v23 = vld [vmem:[#allocation2 + $0x40] sm:$0xf]  ;;  %v966_v25 = vld [vmem:[#allocation2 + $0x44] sm:$0x1]  ;;  %v1121_v48 = vshrl.u32 %v964_v21, 16 }
  0x77   : > { %v1104_v27 = vrot.slane %v1103_v14, 4  ;;  %v1114_v28 = vrot.slane %v1113_v15, 4  ;;  %v12240_v29 = vld [vmem:[#allocation2 + $0x30] sm:$0xff]   ;;  %v1594_v30 = vsel %vm13026_vm13, %v10477_v18, %v1593_v20  ;;  %v1595_v31 = vrot.slane %v1593_v20, 4  ;;  %v1479_v40 = vld [vmem:[#allocation2 + $0x3c] sm:$0xe] }
  0x78   : > { %v1123_v32 = vrot.slane %v1121_v48, 4  ;;  %v1124_v33 = vshll.u32 %v964_v21, 16  ;;  %v1130_v61 = vshll.u32 %v965_v23, 16  ;;  %v1134_v34 = vshrl.u32 %v965_v23, 16  ;;  %v1480_v55 = vld [vmem:[#allocation2 + $0x40] sm:$0xf] }
  0x79   : > { %v1109_v35 = vsel %vm12805_vm2, %v1104_v27, %v1108_v59  ;;  %v1119_v36 = vsel %vm12805_vm2, %v1114_v28, %v1118_v9  ;;  %v1597_v37 = vsel %vm13026_vm13, %v1595_v31, %v1596_v22  ;;  %v1140_v39 = vshll.u32 %v966_v25, 16  ;;  %v1481_v57 = vld [vmem:[#allocation2 + $0x44] sm:$0x1]  ;;  %v967_v63 = vld [vmem:[#allocation2 + $0x48] sm:$0xf]  ;;  %v12242_v13 = vld [vmem:[#allocation2 + $0x3c] sm:$0xff]  }
  0x7a   : > { %v10461_v42 = vcombine.low %v1109_v35, %v1119_v36  ;;  %v10493_v44 = vcombine.low %v1594_v30, %v1597_v37  ;;  %v1126_v45 = vrot.slane %v1124_v33, 5  ;;  %v1132_v46 = vrot.slane %v1130_v61, 5  ;;  %v12243_v49 = vld [vmem:[#allocation2 + $0x48] sm:$0xff]   ;;  %v969_v53 = vld [vmem:[#allocation2 + $0x50] sm:$0x1]  ;;  %v12267_v9 = vld [vmem:[%s16192_s1 + $0x1c0] sm:$0xff]  }
  0x7b   : > { %v1136_v50 = vrot.slane %v1134_v34, 4  ;;  %v1142_v54 = vrot.slane %v1140_v39, 5  ;;  %v10478_v19 = vrot.slane %v1479_v40, 9  ;;  %v1600_v60 = vrot.slane %v1480_v55, 5  ;;  %v968_v1 = vld [vmem:[#allocation2 + $0x4c] sm:$0xf]  ;;  %11402 = vmatprep.subr.bf16.mxu1 %v12267_v9 }
  0x7c   : > { %4435 = vmatprep.mubr.bf16.mxu0 %v10461_v42  ;;  %4597 = vmatmul.mubr.bf16.vlgmr.msra.gmra.mrb[0].mxu1 %v10493_v44  ;;  %v1127_v58 = vor.u32 %v1126_v45, %v1123_v32  ;;  %v1603_v62 = vrot.slane %v1481_v57, 5  ;;  %v1145_v2 = vshrl.u32 %v967_v63, 16  ;;  %v1148_v3 = vshll.u32 %v967_v63, 16  ;;  %v739_v17 = vld [vmem:[#allocation2 + $0x5c] sm:$0x1] }
  0x7d   : > { %4436 = vmatmul.mubr.bf16.gmra.mrb[16].mxu0 %v12240_v29  ;;  %v1137_v0 = vor.u32 %v1136_v50, %v1132_v46  ;;  %4604 = vmatprep.mubr.bf16.mxu1 %v12243_v49  ;;  %v1601_v7 = vsel %vm13026_vm13, %v10478_v19, %v1600_v60  ;;  %v1602_v59 = vrot.slane %v1600_v60, 4  ;;  %v1154_v26 = vshll.u32 %v968_v1, 16  ;;  %v1482_v21 = vld [vmem:[#allocation2 + $0x48] sm:$0xe]  ;;  %v1483_v27 = vld [vmem:[#allocation2 + $0x4c] sm:$0xf] }
  0x7e   : > { %v1128_v5 = vrot.slane %v1127_v58, 4  ;;  %v1147_v38 = vrot.slane %v1145_v2, 4  ;;  %v1150_v14 = vrot.slane %v1148_v3, 5  ;;  %v1158_v15 = vshrl.u32 %v968_v1, 16  ;;  %v1484_v28 = vld [vmem:[#allocation2 + $0x50] sm:$0x1] }
  0x7f   : > { %v1138_v10 = vrot.slane %v1137_v0, 4  ;;  %v1604_v16 = vsel %vm13026_vm13, %v1602_v59, %v1603_v62  ;;  %v1156_v18 = vrot.slane %v1154_v26, 5  ;;  %v1164_v20 = vshll.u32 %v969_v53, 16  ;;  %v12268_v29 = vld [vmem:[%s16192_s1 + $0x180] sm:$0xff]   ;;  %v970_v61 = vld [vmem:[#allocation2 + $0x54] sm:$0xf] }
  0x80   : > { %v1133_v6 = vsel %vm12805_vm2, %v1128_v5, %v1132_v46  ;;  %v10494_v23 = vcombine.low %v1601_v7, %v1604_v16  ;;  %v1151_v25 = vor.u32 %v1150_v14, %v1147_v38  ;;  %v1160_v48 = vrot.slane %v1158_v15, 4  ;;  %11403 = vmatpush3.bf16.msra.mxu1 %v12268_v29  ;;  %v348_v57 = vld [vmem:[%s12815_s30 + $0x40] sm:$0xf]  ;;  %v1485_v0 = vld [vmem:[#allocation2 + $0x54] sm:$0xe] }
  0x81   : > { %v1143_v22 = vsel %vm12805_vm2, %v1138_v10, %v1142_v54  ;;  %v1166_v31 = vrot.slane %v1164_v20, 5  ;;  %v476_v32 = vrot.slane %v13013_v11, 4  ;;  %v485_v33 = vrot.slane %v13015_v52, 4  ;;  %v347_v11 = vld [vmem:[%s12815_s30 + $0x3c] sm:$0xf] }
  0x82   : > { %v10462_v30 = vcombine.low %v1133_v6, %v1143_v22  ;;  %v1152_v34 = vrot.slane %v1151_v25, 4  ;;  %v1161_v35 = vor.u32 %v1160_v48, %v1156_v18  ;;  %v10479_v36 = vrot.slane %v1482_v21, 9  ;;  %v742_v63 = vld [vmem:[#allocation2 + $0x60] sm:$0xf]  ;;  %v349_v3 = vld [vmem:[%s12815_s30 + $0x44] sm:$0xf] }
  0x83   : > { %v1607_v37 = vrot.slane %v1483_v27, 5  ;;  %v484_v39 = vsel %vm12847_vm7, %v476_v32, %v483_v4  ;;  %v1610_v40 = vrot.slane %v1484_v28, 5  ;;  %v740_v41 = vsel %vm12859_vm9, %v485_v33, %v739_v17  ;;  %v749_v16 = vld [vmem:[#allocation2 + $0x6c] sm:$0xf] }
  0x84   : > { %4443 = vmatprep.mubr.bf16.mxu0 %v10462_v30  ;;  %4605 = vmatmul.mubr.bf16.gmra.mrb[4].mxu1 %v10494_v23  ;;  %v1169_v42 = vshrl.u32 %v970_v61, 16  ;;  %v1157_v52 = vsel %vm12805_vm2, %v1152_v34, %v1156_v18  ;;  %v1162_v44 = vrot.slane %v1161_v35, 4  ;;  %738 = vst [vmem:[#allocation2 + $0x58] sm:$0xf] %v484_v39  ;;  %741 = vst [vmem:[#allocation2 + $0x5c] sm:$0x1] %v740_v41 }
  0x85   : > { %4444 = vmatmul.mubr.bf16.gmra.mrb[20].mxu0 %v12242_v13  ;;  %v1608_v45 = vsel %vm13026_vm13, %v10479_v36, %v1607_v37  ;;  %v1609_v46 = vrot.slane %v1607_v37, 4  ;;  %v1172_v50 = vshll.u32 %v970_v61, 16  ;;  %v489_v54 = vrot.slane %v487_v47, 7  ;;  %v12271_v47 = vld [vmem:[%s16192_s1 + $0x1c8] sm:$0xff]  }
  0x86   : > { %v1171_v49 = vrot.slane %v1169_v42, 4  ;;  %v490_v55 = vshll.u32 %v13003_v12, 16  ;;  %v1167_v58 = vsel %vm12805_vm2, %v1162_v44, %v1166_v31  ;;  %v495_v60 = vshrl.u32 %v347_v11, 16  ;;  %v12244_v12 = vld [vmem:[#allocation2 + $0x48] sm:$0xff]   ;;  %11404 = vmatprep.subr.bf16.mxu1 %v12271_v47 }
  0x87   : > { %v1611_v19 = vsel %vm13026_vm13, %v1609_v46, %v1610_v40  ;;  %v498_v62 = vshll.u32 %v347_v11, 16  ;;  %v10463_v1 = vcombine.low %v1157_v52, %v1167_v58  ;;  %v1174_v53 = vrot.slane %v1172_v50, 5  ;;  %v746_v13 = vld [vmem:[#allocation2 + $0x68] sm:$0x1] }
  0x88   : > { %v492_v2 = vor.u32 %v490_v55, %v489_v54  ;;  %v10495_v4 = vcombine.low %v1608_v45, %v1611_v19  ;;  %v493_v5 = vrot.slane %v489_v54, 4  ;;  %v497_v7 = vrot.slane %v495_v60, 7  ;;  %v12273_v40 = vld [vmem:[%s16192_s1 + $0x188] sm:$0xff]  }
  0x89   : > { %v504_v59 = vshrl.u32 %v348_v57, 16  ;;  %4451 = vmatprep.mubr.bf16.mxu0 %v10463_v1  ;;  %v1175_v26 = vor.u32 %v1174_v53, %v1171_v49  ;;  %v10480_v10 = vrot.slane %v1485_v0, 9  ;;  %v507_v38 = vshll.u32 %v348_v57, 16  ;;  %v753_v49 = vld [vmem:[#allocation2 + $0x74] sm:$0x1]  ;;  %11405 = vmatpush3.bf16.msra.mxu1 %v12273_v40 }
  0x8a   : > { %v743_v9 = vsel %vm12869_vm10, %v492_v2, %v742_v63  ;;  %v500_v14 = vor.u32 %v498_v62, %v497_v7  ;;  %v502_v15 = vrot.slane %v497_v7, 4  ;;  %v512_v6 = vshrl.u32 %v349_v3, 16  ;;  %v350_v1 = vld [vmem:[%s12815_s30 + $0x48] sm:$0xf] }
  0x8b   : > { %744 = vst [vmem:[#allocation2 + $0x60] sm:$0xf] %v743_v9  ;;  %v506_v17 = vrot.slane %v504_v59, 7  ;;  %v12245_v18 = vld [vmem:[#allocation2 + $0x54] sm:$0xff]   ;;  %v515_v21 = vshll.u32 %v349_v3, 16  ;;  %v1176_v28 = vrot.slane %v1175_v26, 4 }
  0x8c   : > { %v971_v20 = vld [vmem:[#allocation2 + $0x58] sm:$0xf]  ;;  %v972_v22 = vld [vmem:[#allocation2 + $0x5c] sm:$0x1]  ;;  %v501_v48 = vsel %vm12847_vm7, %v493_v5, %v500_v14  ;;  %v747_v27 = vsel %vm12859_vm9, %v502_v15, %v746_v13  ;;  %4612 = vmatprep.mubr.bf16.mxu1 %v12245_v18  ;;  %v514_v37 = vrot.slane %v512_v6, 7  ;;  %v521_v13 = vshrl.u32 %v350_v1, 16 }
  0x8d   : > { %4452 = vmatmul.mubr.bf16.gmra.mrb[24].mxu0 %v12244_v12  ;;  %v1178_v23 = vshll.u32 %v971_v20, 16  ;;  %v1182_v25 = vshrl.u32 %v971_v20, 16  ;;  %v1188_v29 = vshll.u32 %v972_v22, 16  ;;  %745 = vst [vmem:[#allocation2 + $0x64] sm:$0xf] %v501_v48  ;;  %v509_v32 = vor.u32 %v507_v38, %v506_v17  ;;  %4613 = vmatmul.mubr.bf16.gmra.mrb[8].mxu1 %v10495_v4  ;;  %v12246_v19 = vld [vmem:[#allocation2 + $0x54] sm:$0xff]  }
  0x8e   : > { %v1486_v30 = vld [vmem:[#allocation2 + $0x58] sm:$0xf]  ;;  %v1487_v31 = vld [vmem:[#allocation2 + $0x5c] sm:$0x1]  ;;  %748 = vst [vmem:[#allocation2 + $0x68] sm:$0x1] %v747_v27  ;;  %v517_v46 = vor.u32 %v515_v21, %v514_v37 }
  0x8f   : > { %v1180_v33 = vrot.slane %v1178_v23, 5  ;;  %v1184_v61 = vrot.slane %v1182_v25, 4  ;;  %v1614_v34 = vrot.slane %v1486_v30, 5  ;;  %v1617_v35 = vrot.slane %v1487_v31, 5  ;;  %v351_v27 = vld [vmem:[%s12815_s30 + $0x4c] sm:$0xf] }
  0x90   : > { %v510_v36 = vrot.slane %v506_v17, 4  ;;  %v750_v39 = vsel %vm12869_vm10, %v509_v32, %v749_v16  ;;  %v1190_v42 = vrot.slane %v1188_v29, 5  ;;  %v519_v63 = vrot.slane %v514_v37, 4 }
  0x91   : > { %v1185_v41 = vor.u32 %v1184_v61, %v1180_v33  ;;  %v1615_v11 = vsel %vm13026_vm13, %v10480_v10, %v1614_v34  ;;  %v1616_v52 = vrot.slane %v1614_v34, 4  ;;  %751 = vst [vmem:[#allocation2 + $0x6c] sm:$0xf] %v750_v39  ;;  %v1181_v44 = vsel %vm12805_vm2, %v1176_v28, %v1180_v33  ;;  %v12276_v28 = vld [vmem:[%s16192_s1 + $0x1d0] sm:$0xff]   ;;  %v756_v33 = vld [vmem:[#allocation2 + $0x78] sm:$0xf] }
  0x92   : > { %v973_v45 = vld [vmem:[#allocation2 + $0x60] sm:$0xf]  ;;  %v518_v62 = vsel %vm12847_vm7, %v510_v36, %v517_v46  ;;  %v754_v10 = vsel %vm12859_vm9, %v519_v63, %v753_v49  ;;  %v13107_v21 = vrot.slane %v521_v13, 7  ;;  %v524_v31 = vshll.u32 %v350_v1, 16  ;;  %v12277_v61 = vld [vmem:[%s16192_s1 + $0x190] sm:$0xff]   ;;  %11406 = vmatprep.subr.bf16.mxu1 %v12276_v28 }
  0x93   : > { %v1186_v50 = vrot.slane %v1185_v41, 4  ;;  %v1618_v54 = vsel %vm13026_vm13, %v1616_v52, %v1617_v35  ;;  %v1193_v55 = vshrl.u32 %v973_v45, 16  ;;  %v1196_v57 = vshll.u32 %v973_v45, 16  ;;  %v1488_v58 = vld [vmem:[#allocation2 + $0x60] sm:$0xe]  ;;  %11407 = vmatpush3.bf16.msra.mxu1 %v12277_v61 }
  0x94   : > { %v10496_v60 = vcombine.low %v1615_v11, %v1618_v54  ;;  %v10481_v0 = vrot.slane %v1488_v58, 9  ;;  %v12247_v2 = vld [vmem:[#allocation2 + $0x60] sm:$0xff]   ;;  %752 = vst [vmem:[#allocation2 + $0x70] sm:$0xf] %v518_v62  ;;  %755 = vst [vmem:[#allocation2 + $0x74] sm:$0x1] %v754_v10  ;;  %v526_v49 = vor.u32 %v524_v31, %v13107_v21 }
  0x95   : > { %v1191_v53 = vsel %vm12805_vm2, %v1186_v50, %v1190_v42  ;;  %v974_v3 = vld [vmem:[#allocation2 + $0x64] sm:$0xf]  ;;  %v1195_v47 = vrot.slane %v1193_v55, 4  ;;  %v975_v4 = vld [vmem:[#allocation2 + $0x68] sm:$0x1]  ;;  %v1198_v5 = vrot.slane %v1196_v57, 5  ;;  %4620 = vmatprep.mubr.bf16.mxu1 %v12247_v2 }
  0x96   : > { %v10464_v12 = vcombine.low %v1181_v44, %v1191_v53  ;;  %v1202_v7 = vshll.u32 %v974_v3, 16  ;;  %v1206_v59 = vshrl.u32 %v974_v3, 16  ;;  %v1212_v26 = vshll.u32 %v975_v4, 16  ;;  %v1489_v9 = vld [vmem:[#allocation2 + $0x64] sm:$0xf]  ;;  %4621 = vmatmul.mubr.bf16.gmra.mrb[12].mxu1 %v10496_v60  ;;  %v12280_v10 = vld [vmem:[%s16192_s1 + $0x1d8] sm:$0xff]  }
  0x97   : > { %v1199_v38 = vor.u32 %v1198_v5, %v1195_v47  ;;  %v1490_v17 = vld [vmem:[#allocation2 + $0x68] sm:$0x1]  ;;  %v1621_v16 = vrot.slane %v1489_v9, 5  ;;  %v527_v32 = vrot.slane %v13107_v21, 4  ;;  %v352_v11 = vld [vmem:[%s12815_s30 + $0x50] sm:$0xf]  ;;  %v757_v53 = vsel %vm12869_vm10, %v526_v49, %v756_v33  ;;  %11408 = vmatprep.subr.bf16.mxu1 %v12280_v10 }
  0x98   : > { %4459 = vmatprep.mubr.bf16.mxu0 %v10464_v12  ;;  %v1204_v14 = vrot.slane %v1202_v7, 5  ;;  %v1208_v15 = vrot.slane %v1206_v59, 4  ;;  %v1214_v6 = vrot.slane %v1212_v26, 5  ;;  %v1624_v18 = vrot.slane %v1490_v17, 5  ;;  %v976_v20 = vld [vmem:[#allocation2 + $0x6c] sm:$0xf] }
  0x99   : > { %4460 = vmatmul.mubr.bf16.gmra.mrb[28].mxu0 %v12246_v19  ;;  %v1200_v22 = vrot.slane %v1199_v38, 4  ;;  %v1217_v25 = vshrl.u32 %v976_v20, 16  ;;  %v1220_v48 = vshll.u32 %v976_v20, 16  ;;  %v1622_v29 = vsel %vm13026_vm13, %v10481_v0, %v1621_v16  ;;  %v12248_v44 = vld [vmem:[#allocation2 + $0x60] sm:$0xff]   ;;  %v1491_v50 = vld [vmem:[#allocation2 + $0x6c] sm:$0xe] }
  0x9a   : > { %v1209_v23 = vor.u32 %v1208_v15, %v1204_v14  ;;  %v1623_v30 = vrot.slane %v1621_v16, 4  ;;  %v529_v60 = vshrl.u32 %v351_v27, 16  ;;  %v532_v1 = vshll.u32 %v351_v27, 16  ;;  %758 = vst [vmem:[#allocation2 + $0x78] sm:$0xf] %v757_v53  ;;  %v12282_v33 = vld [vmem:[%s16192_s1 + $0x198] sm:$0xff]  }
  0x9b   : > { %v1205_v34 = vsel %vm12805_vm2, %v1200_v22, %v1204_v14  ;;  %v12249_v36 = vld [vmem:[#allocation2 + $0x6c] sm:$0xff]   ;;  %v1219_v40 = vrot.slane %v1217_v25, 4  ;;  %v1222_v41 = vrot.slane %v1220_v48, 5  ;;  %v978_v57 = vld [vmem:[#allocation2 + $0x74] sm:$0x1]  ;;  %v10482_v47 = vrot.slane %v1491_v50, 9  ;;  %11409 = vmatpush3.bf16.msra.mxu1 %v12282_v33 }
  0x9c   : > { %v1210_v35 = vrot.slane %v1209_v23, 4  ;;  %v977_v37 = vld [vmem:[#allocation2 + $0x70] sm:$0xf]  ;;  %v1625_v39 = vsel %vm13026_vm13, %v1623_v30, %v1624_v18  ;;  %4628 = vmatprep.mubr.bf16.mxu1 %v12249_v36  ;;  %v1493_v62 = vld [vmem:[#allocation2 + $0x74] sm:$0x1]  ;;  %v1236_v0 = vshll.u32 %v978_v57, 16 }
  0x9d   : > { %v1226_v42 = vshll.u32 %v977_v37, 16  ;;  %v10497_v45 = vcombine.low %v1622_v29, %v1625_v39  ;;  %v1230_v46 = vshrl.u32 %v977_v37, 16  ;;  %v1492_v54 = vld [vmem:[#allocation2 + $0x70] sm:$0xf]  ;;  %v1223_v58 = vor.u32 %v1222_v41, %v1219_v40  ;;  %v760_v4 = vld [vmem:[#allocation2 + $0x80] sm:$0x1] }
  0x9e   : > { %v1215_v52 = vsel %vm12805_vm2, %v1210_v35, %v1214_v6  ;;  %v531_v3 = vrot.slane %v529_v60, 7  ;;  %v1628_v12 = vrot.slane %v1492_v54, 5  ;;  %v1238_v7 = vrot.slane %v1236_v0, 5  ;;  %v353_v26 = vld [vmem:[%s12815_s30 + $0x54] sm:$0xf]  ;;  %v12250_v28 = vld [vmem:[#allocation2 + $0x6c] sm:$0xff]  }
  0x9f   : > { %v10465_v55 = vcombine.low %v1205_v34, %v1215_v52  ;;  %v1228_v19 = vrot.slane %v1226_v42, 5  ;;  %4629 = vmatmul.mubr.bf16.gmra.mrb[16].mxu1 %v10497_v45  ;;  %v1232_v63 = vrot.slane %v1230_v46, 4  ;;  %v1224_v2 = vrot.slane %v1223_v58, 4  ;;  %v354_v18 = vld [vmem:[%s12815_s30 + $0x58] sm:$0xf] }
  0xa0   : > { %v1631_v59 = vrot.slane %v1493_v62, 5  ;;  %v538_v9 = vshrl.u32 %v352_v11, 16  ;;  %v534_v38 = vor.u32 %v532_v1, %v531_v3  ;;  %v536_v14 = vrot.slane %v531_v3, 4  ;;  %v763_v25 = vld [vmem:[#allocation2 + $0x84] sm:$0xf] }
  0xa1   : > { %4467 = vmatprep.mubr.bf16.mxu0 %v10465_v55  ;;  %v1233_v5 = vor.u32 %v1232_v63, %v1228_v19  ;;  %v1229_v13 = vsel %vm12805_vm2, %v1224_v2, %v1228_v19  ;;  %v1630_v17 = vrot.slane %v1628_v12, 4  ;;  %v541_v16 = vshll.u32 %v352_v11, 16  ;;  %v355_v48 = vld [vmem:[%s12815_s30 + $0x5c] sm:$0xf]  ;;  %v979_v37 = vld [vmem:[#allocation2 + $0x78] sm:$0xf] }
  0xa2   : > { %4468 = vmatmul.mubr.bf16.gmra.mrb[32].mxu0 %v12248_v44  ;;  %v540_v6 = vrot.slane %v538_v9, 7  ;;  %v535_v20 = vsel %vm12847_vm7, %v527_v32, %v534_v38  ;;  %v761_v21 = vsel %vm12859_vm9, %v536_v14, %v760_v4  ;;  %v546_v22 = vshrl.u32 %v353_v26, 16  ;;  %v767_v32 = vld [vmem:[#allocation2 + $0x8c] sm:$0x1]  ;;  %v770_v52 = vld [vmem:[#allocation2 + $0x90] sm:$0xf] }
  0xa3   : > { %v1234_v15 = vrot.slane %v1233_v5, 4  ;;  %v549_v23 = vshll.u32 %v353_v26, 16  ;;  %759 = vst [vmem:[#allocation2 + $0x7c] sm:$0xf] %v535_v20  ;;  %v1629_v29 = vsel %vm13026_vm13, %v10482_v47, %v1628_v12  ;;  %v1632_v30 = vsel %vm13026_vm13, %v1630_v17, %v1631_v59  ;;  %762 = vst [vmem:[#allocation2 + $0x80] sm:$0x1] %v761_v21 }
  0xa4   : > { %v543_v31 = vor.u32 %v541_v16, %v540_v6  ;;  %v544_v34 = vrot.slane %v540_v6, 4  ;;  %v548_v35 = vrot.slane %v546_v22, 7  ;;  %v555_v36 = vshrl.u32 %v354_v18, 16  ;;  %v1494_v45 = vld [vmem:[#allocation2 + $0x78] sm:$0xe] }
  0xa5   : > { %v1239_v27 = vsel %vm12805_vm2, %v1234_v15, %v1238_v7  ;;  %v1241_v40 = vshrl.u32 %v979_v37, 16  ;;  %v1244_v41 = vshll.u32 %v979_v37, 16  ;;  %v10498_v44 = vcombine.low %v1629_v29, %v1632_v30  ;;  %v13157_v19 = vld [vmem:[%s12815_s30 + $0x60] sm:$0xf]  ;;  %v774_v1 = vld [vmem:[#allocation2 + $0x98] sm:$0x1] }
  0xa6   : > { %v10466_v61 = vcombine.low %v1229_v13, %v1239_v27  ;;  %v764_v39 = vsel %vm12869_vm10, %v543_v31, %v763_v25  ;;  %v551_v42 = vor.u32 %v549_v23, %v548_v35  ;;  %v553_v11 = vrot.slane %v548_v35, 4  ;;  %v12285_v23 = vld [vmem:[%s16192_s1 + $0x1e0] sm:$0xff]  }
  0xa7   : > { %765 = vst [vmem:[#allocation2 + $0x84] sm:$0xf] %v764_v39  ;;  %v557_v46 = vrot.slane %v555_v36, 7  ;;  %v558_v49 = vshll.u32 %v354_v18, 16  ;;  %v563_v50 = vshrl.u32 %v355_v48, 16  ;;  %v1243_v54 = vrot.slane %v1241_v40, 4  ;;  %11410 = vmatprep.subr.bf16.mxu1 %v12285_v23 }
  0xa8   : > { %4475 = vmatprep.mubr.bf16.mxu0 %v10466_v61  ;;  %v1246_v55 = vrot.slane %v1244_v41, 5  ;;  %v552_v57 = vsel %vm12847_vm7, %v544_v34, %v551_v42  ;;  %v768_v58 = vsel %vm12859_vm9, %v553_v11, %v767_v32  ;;  %v566_v0 = vshll.u32 %v355_v48, 16 }
  0xa9   : > { %766 = vst [vmem:[#allocation2 + $0x88] sm:$0xf] %v552_v57  ;;  %769 = vst [vmem:[#allocation2 + $0x8c] sm:$0x1] %v768_v58  ;;  %v560_v60 = vor.u32 %v558_v49, %v557_v46  ;;  %v561_v62 = vrot.slane %v557_v46, 4  ;;  %v565_v63 = vrot.slane %v563_v50, 7 }
  0xaa   : > { %4476 = vmatmul.mubr.bf16.gmra.mrb[36].mxu0 %v12250_v28  ;;  %v12251_v53 = vld [vmem:[#allocation2 + $0x78] sm:$0xff]   ;;  %v1247_v3 = vor.u32 %v1246_v55, %v1243_v54  ;;  %v10483_v47 = vrot.slane %v1494_v45, 9  ;;  %v981_v12 = vld [vmem:[#allocation2 + $0x80] sm:$0x1]  ;;  %v572_v38 = vshrl.u32 %v13157_v19, 16 }
  0xab   : > { %v980_v2 = vld [vmem:[#allocation2 + $0x7c] sm:$0xf]  ;;  %v568_v7 = vor.u32 %v566_v0, %v565_v63  ;;  %v771_v59 = vsel %vm12869_vm10, %v560_v60, %v770_v52  ;;  %4636 = vmatprep.mubr.bf16.mxu1 %v12251_v53  ;;  %v1260_v9 = vshll.u32 %v981_v12, 16  ;;  %v570_v13 = vrot.slane %v565_v63, 4  ;;  %v1496_v17 = vld [vmem:[#allocation2 + $0x80] sm:$0x1] }
  0xac   : > { %v1250_v4 = vshll.u32 %v980_v2, 16  ;;  %v1254_v5 = vshrl.u32 %v980_v2, 16  ;;  %v1248_v26 = vrot.slane %v1247_v3, 4  ;;  %v1495_v10 = vld [vmem:[#allocation2 + $0x7c] sm:$0xf]  ;;  %4637 = vmatmul.mubr.bf16.gmra.mrb[20].mxu1 %v10498_v44  ;;  %v1638_v20 = vrot.slane %v1496_v17, 5 }
  0xad   : > { %772 = vst [vmem:[#allocation2 + $0x90] sm:$0xf] %v771_v59  ;;  %v569_v6 = vsel %vm12847_vm7, %v561_v62, %v568_v7  ;;  %v1262_v16 = vrot.slane %v1260_v9, 5  ;;  %v1635_v18 = vrot.slane %v1495_v10, 5  ;;  %v775_v22 = vsel %vm12859_vm9, %v570_v13, %v774_v1  ;;  %v12252_v39 = vld [vmem:[#allocation2 + $0x78] sm:$0xff]   ;;  %v12286_v50 = vld [vmem:[%s16192_s1 + $0x1a0] sm:$0xff]  }
  0xae   : > { %v1252_v14 = vrot.slane %v1250_v4, 5  ;;  %v1256_v15 = vrot.slane %v1254_v5, 4  ;;  %v982_v21 = vld [vmem:[#allocation2 + $0x84] sm:$0xf]  ;;  %773 = vst [vmem:[#allocation2 + $0x94] sm:$0xf] %v569_v6  ;;  %11411 = vmatpush3.bf16.msra.mxu1 %v12286_v50 }
  0xaf   : > { %v1265_v48 = vshrl.u32 %v982_v21, 16  ;;  %v1268_v27 = vshll.u32 %v982_v21, 16  ;;  %v1497_v28 = vld [vmem:[#allocation2 + $0x84] sm:$0xe]  ;;  %776 = vst [vmem:[#allocation2 + $0x98] sm:$0x1] %v775_v22  ;;  %v1636_v31 = vsel %vm13026_vm13, %v10483_v47, %v1635_v18 }
  0xb0   : > { %v1257_v25 = vor.u32 %v1256_v15, %v1252_v14  ;;  %v1253_v29 = vsel %vm12805_vm2, %v1248_v26, %v1252_v14  ;;  %v12253_v30 = vld [vmem:[#allocation2 + $0x84] sm:$0xff]   ;;  %v1637_v32 = vrot.slane %v1635_v18, 4  ;;  %v984_v34 = vld [vmem:[#allocation2 + $0x8c] sm:$0x1]  ;;  %v10484_v11 = vrot.slane %v1497_v28, 9 }
  0xb1   : > { %v983_v33 = vld [vmem:[#allocation2 + $0x88] sm:$0xf]  ;;  %v1267_v35 = vrot.slane %v1265_v48, 4  ;;  %v1270_v36 = vrot.slane %v1268_v27, 5  ;;  %4644 = vmatprep.mubr.bf16.mxu1 %v12253_v30  ;;  %v1284_v42 = vshll.u32 %v984_v34, 16  ;;  %v13183_v4 = vrot.slane %v572_v38, 7 }
  0xb2   : > { %v1258_v61 = vrot.slane %v1257_v25, 4  ;;  %v1274_v37 = vshll.u32 %v983_v33, 16  ;;  %v1639_v40 = vsel %vm13026_vm13, %v1637_v32, %v1638_v20  ;;  %v1278_v41 = vshrl.u32 %v983_v33, 16  ;;  %v1498_v49 = vld [vmem:[#allocation2 + $0x88] sm:$0xf] }
  0xb3   : > { %v10499_v44 = vcombine.low %v1636_v31, %v1639_v40  ;;  %v1271_v45 = vor.u32 %v1270_v36, %v1267_v35  ;;  %v1499_v57 = vld [vmem:[#allocation2 + $0x8c] sm:$0x1]  ;;  %v1642_v58 = vrot.slane %v1498_v49, 5  ;;  %v1286_v62 = vrot.slane %v1284_v42, 5  ;;  %v357_v12 = vld [vmem:[%s12815_s30 + $0x64] sm:$0xf] }
  0xb4   : > { %v1263_v52 = vsel %vm12805_vm2, %v1258_v61, %v1262_v16  ;;  %v1276_v46 = vrot.slane %v1274_v37, 5  ;;  %v1280_v55 = vrot.slane %v1278_v41, 4  ;;  %v1645_v0 = vrot.slane %v1499_v57, 5  ;;  %v985_v3 = vld [vmem:[#allocation2 + $0x90] sm:$0xf]  ;;  %v12289_v38 = vld [vmem:[%s16192_s1 + $0x1e8] sm:$0xff]  }
  0xb5   : > { %v10467_v54 = vcombine.low %v1253_v29, %v1263_v52  ;;  %4645 = vmatmul.mubr.bf16.gmra.mrb[24].mxu1 %v10499_v44  ;;  %v1272_v60 = vrot.slane %v1271_v45, 4  ;;  %v12255_v63 = vld [vmem:[#allocation2 + $0x90] sm:$0xff]   ;;  %v1643_v53 = vsel %vm13026_vm13, %v10484_v11, %v1642_v58  ;;  %v1644_v2 = vrot.slane %v1642_v58, 4  ;;  %v777_v20 = vld [vmem:[#allocation2 + $0x9c] sm:$0xf]  ;;  %v12254_v23 = vld [vmem:[#allocation2 + $0x84] sm:$0xff]   ;;  %11412 = vmatprep.subr.bf16.mxu1 %v12289_v38 }
  0xb6   : > { %v1281_v1 = vor.u32 %v1280_v55, %v1276_v46  ;;  %v986_v47 = vld [vmem:[#allocation2 + $0x94] sm:$0xf]  ;;  %4652 = vmatprep.mubr.bf16.mxu1 %v12255_v63  ;;  %v987_v7 = vld [vmem:[#allocation2 + $0x98] sm:$0x1]  ;;  %v1289_v59 = vshrl.u32 %v985_v3, 16  ;;  %v1292_v26 = vshll.u32 %v985_v3, 16 }
  0xb7   : > { %4483 = vmatprep.mubr.bf16.mxu0 %v10467_v54  ;;  %v1277_v5 = vsel %vm12805_vm2, %v1272_v60, %v1276_v46  ;;  %v1298_v9 = vshll.u32 %v986_v47, 16  ;;  %v1646_v13 = vsel %vm13026_vm13, %v1644_v2, %v1645_v0  ;;  %v1302_v14 = vshrl.u32 %v986_v47, 16  ;;  %v358_v21 = vld [vmem:[%s12815_s30 + $0x68] sm:$0xf]  ;;  %v1500_v27 = vld [vmem:[#allocation2 + $0x90] sm:$0xe] }
  0xb8   : > { %4484 = vmatmul.mubr.bf16.gmra.mrb[40].mxu0 %v12252_v39  ;;  %v1282_v10 = vrot.slane %v1281_v1, 4  ;;  %v1308_v15 = vshll.u32 %v987_v7, 16  ;;  %v10500_v17 = vcombine.low %v1643_v53, %v1646_v13  ;;  %v1291_v6 = vrot.slane %v1289_v59, 4  ;;  %v12291_v28 = vld [vmem:[%s16192_s1 + $0x1a8] sm:$0xff]   ;;  %v1501_v33 = vld [vmem:[#allocation2 + $0x94] sm:$0xf] }
  0xb9   : > { %v1294_v16 = vrot.slane %v1292_v26, 5  ;;  %v1300_v18 = vrot.slane %v1298_v9, 5  ;;  %v1304_v25 = vrot.slane %v1302_v14, 4  ;;  %v575_v48 = vshll.u32 %v13157_v19, 16  ;;  %v1502_v61 = vld [vmem:[#allocation2 + $0x98] sm:$0x1]  ;;  %11413 = vmatpush3.bf16.msra.mxu1 %v12291_v28 }
  0xba   : > { %v1287_v22 = vsel %vm12805_vm2, %v1282_v10, %v1286_v62  ;;  %v1310_v31 = vrot.slane %v1308_v15, 5  ;;  %v580_v32 = vshrl.u32 %v357_v12, 16  ;;  %v359_v34 = vld [vmem:[%s12815_s30 + $0x6c] sm:$0xf]  ;;  %v578_v19 = vrot.slane %v13183_v4, 4  ;;  %v12294_v2 = vld [vmem:[%s16192_s1 + $0x1f0] sm:$0xff]  }
  0xbb   : > { %v10468_v29 = vcombine.low %v1277_v5, %v1287_v22  ;;  %v1295_v30 = vor.u32 %v1294_v16, %v1291_v6  ;;  %v1305_v35 = vor.u32 %v1304_v25, %v1300_v18  ;;  %v577_v36 = vor.u32 %v575_v48, %v13183_v4  ;;  %v781_v39 = vld [vmem:[#allocation2 + $0xa4] sm:$0x1]  ;;  %v360_v49 = vld [vmem:[%s12815_s30 + $0x70] sm:$0xf]  ;;  %v361_v50 = vld [vmem:[%s12815_s30 + $0x74] sm:$0xf]  ;;  %11414 = vmatprep.subr.bf16.mxu1 %v12294_v2 }
  0xbc   : > { %v583_v37 = vshll.u32 %v357_v12, 16  ;;  %v582_v41 = vrot.slane %v580_v32, 7  ;;  %v10485_v42 = vrot.slane %v1500_v27, 9  ;;  %v1649_v11 = vrot.slane %v1501_v33, 5  ;;  %v784_v60 = vld [vmem:[#allocation2 + $0xa8] sm:$0xf] }
  0xbd   : > { %4491 = vmatprep.mubr.bf16.mxu0 %v10468_v29  ;;  %4653 = vmatmul.mubr.bf16.gmra.mrb[28].mxu1 %v10500_v17  ;;  %v1296_v40 = vrot.slane %v1295_v30, 4  ;;  %v1306_v52 = vrot.slane %v1305_v35, 4  ;;  %v778_v44 = vsel %vm12869_vm10, %v577_v36, %v777_v20  ;;  %v589_v45 = vshrl.u32 %v358_v21, 16  ;;  %v13211_v53 = vld [vmem:[%s12815_s30 + $0x78] sm:$0xf]  ;;  %v12295_v7 = vld [vmem:[%s16192_s1 + $0x1b0] sm:$0xff]  }
  0xbe   : > { %v592_v46 = vshll.u32 %v358_v21, 16  ;;  %v585_v55 = vor.u32 %v583_v37, %v582_v41  ;;  %v587_v57 = vrot.slane %v582_v41, 4  ;;  %779 = vst [vmem:[#allocation2 + $0x9c] sm:$0xf] %v778_v44  ;;  %v1652_v58 = vrot.slane %v1502_v61, 5  ;;  %v12256_v13 = vld [vmem:[#allocation2 + $0x90] sm:$0xff]   ;;  %11415 = vmatpush3.bf16.msra.mxu1 %v12295_v7 }
  0xbf   : > { %v1301_v54 = vsel %vm12805_vm2, %v1296_v40, %v1300_v18  ;;  %v1311_v62 = vsel %vm12805_vm2, %v1306_v52, %v1310_v31  ;;  %v1651_v63 = vrot.slane %v1649_v11, 4  ;;  %v591_v0 = vrot.slane %v589_v45, 7  ;;  %v788_v5 = vld [vmem:[#allocation2 + $0xb0] sm:$0x1]  ;;  %v791_v21 = vld [vmem:[#allocation2 + $0xb4] sm:$0xf] }
  0xc0   : > { %4492 = vmatmul.mubr.bf16.gmra.mrb[44].mxu0 %v12254_v23  ;;  %v597_v1 = vshrl.u32 %v359_v34, 16  ;;  %v10469_v3 = vcombine.low %v1301_v54, %v1311_v62  ;;  %v586_v47 = vsel %vm12847_vm7, %v578_v19, %v585_v55  ;;  %v782_v12 = vsel %vm12859_vm9, %v587_v57, %v781_v39  ;;  %v795_v31 = vld [vmem:[#allocation2 + $0xbc] sm:$0x1]  ;;  %v798_v45 = vld [vmem:[#allocation2 + $0xc0] sm:$0xf] }
  0xc1   : > { %v600_v4 = vshll.u32 %v359_v34, 16  ;;  %780 = vst [vmem:[#allocation2 + $0xa0] sm:$0xf] %v586_v47  ;;  %v1650_v59 = vsel %vm13026_vm13, %v10485_v42, %v1649_v11  ;;  %783 = vst [vmem:[#allocation2 + $0xa4] sm:$0x1] %v782_v12  ;;  %v594_v26 = vor.u32 %v592_v46, %v591_v0  ;;  %v595_v9 = vrot.slane %v591_v0, 4 }
  0xc2   : > { %v599_v10 = vrot.slane %v597_v1, 7  ;;  %4499 = vmatprep.mubr.bf16.mxu0 %v10469_v3  ;;  %v1653_v14 = vsel %vm13026_vm13, %v1651_v63, %v1652_v58  ;;  %v606_v15 = vshrl.u32 %v360_v49, 16  ;;  %v609_v38 = vshll.u32 %v360_v49, 16  ;;  %v13236_v39 = vld [vmem:[%s12815_s30 + $0x7c] sm:$0xf] }
  0xc3   : > { %v614_v17 = vshrl.u32 %v361_v50, 16  ;;  %v785_v18 = vsel %vm12869_vm10, %v594_v26, %v784_v60  ;;  %v617_v20 = vshll.u32 %v361_v50, 16  ;;  %v623_v25 = vshrl.u32 %v13211_v53, 16  ;;  %v12298_v41 = vld [vmem:[%s16192_s1 + $0x1f8] sm:$0xff]  }
  0xc4   : > { %v602_v6 = vor.u32 %v600_v4, %v599_v10  ;;  %v604_v16 = vrot.slane %v599_v10, 4  ;;  %786 = vst [vmem:[#allocation2 + $0xa8] sm:$0xf] %v785_v18  ;;  %v608_v22 = vrot.slane %v606_v15, 7  ;;  %v626_v48 = vshll.u32 %v13211_v53, 16  ;;  %11416 = vmatprep.subr.bf16.mxu1 %v12298_v41 }
  0xc5   : > { %v616_v23 = vrot.slane %v614_v17, 7  ;;  %v10501_v27 = vcombine.low %v1650_v59, %v1653_v14  ;;  %v988_v28 = vld [vmem:[#allocation2 + $0x9c] sm:$0xf]  ;;  %v13238_v40 = vrot.slane %v623_v25, 7 }
  0xc6   : > { %v603_v29 = vsel %vm12847_vm7, %v595_v9, %v602_v6  ;;  %v789_v30 = vsel %vm12859_vm9, %v604_v16, %v788_v5  ;;  %v1313_v32 = vshrl.u32 %v988_v28, 16  ;;  %v1316_v33 = vshll.u32 %v988_v28, 16  ;;  %v1503_v61 = vld [vmem:[#allocation2 + $0x9c] sm:$0xe] }
  0xc7   : > { %787 = vst [vmem:[#allocation2 + $0xac] sm:$0xf] %v603_v29  ;;  %790 = vst [vmem:[#allocation2 + $0xb0] sm:$0x1] %v789_v30  ;;  %v611_v34 = vor.u32 %v609_v38, %v608_v22  ;;  %v612_v35 = vrot.slane %v608_v22, 4  ;;  %v10486_v36 = vrot.slane %v1503_v61, 9  ;;  %v619_v19 = vor.u32 %v617_v20, %v616_v23 }
  0xc8   : > { %4500 = vmatmul.mubr.bf16.gmra.mrb[48].mxu0 %v12256_v13  ;;  %v621_v37 = vrot.slane %v616_v23, 4  ;;  %v12257_v42 = vld [vmem:[#allocation2 + $0x9c] sm:$0xff]   ;;  %v1315_v52 = vrot.slane %v1313_v32, 4  ;;  %v990_v46 = vld [vmem:[#allocation2 + $0xa4] sm:$0x1]  ;;  %v1318_v49 = vrot.slane %v1316_v33, 5  ;;  %v628_v62 = vor.u32 %v626_v48, %v13238_v40 }
  0xc9   : > { %v989_v11 = vld [vmem:[#allocation2 + $0xa0] sm:$0xf]  ;;  %v792_v44 = vsel %vm12869_vm10, %v611_v34, %v791_v21  ;;  %v620_v55 = vsel %vm12847_vm7, %v612_v35, %v619_v19  ;;  %4660 = vmatprep.mubr.bf16.mxu1 %v12257_v42  ;;  %v1332_v57 = vshll.u32 %v990_v46, 16  ;;  %v629_v63 = vrot.slane %v13238_v40, 4  ;;  %v1505_v2 = vld [vmem:[#allocation2 + $0xa4] sm:$0x1] }
  0xca   : > { %v1322_v50 = vshll.u32 %v989_v11, 16  ;;  %v1326_v54 = vshrl.u32 %v989_v11, 16  ;;  %793 = vst [vmem:[#allocation2 + $0xb4] sm:$0xf] %v792_v44  ;;  %v1504_v58 = vld [vmem:[#allocation2 + $0xa0] sm:$0xf]  ;;  %v796_v60 = vsel %vm12859_vm9, %v621_v37, %v795_v31  ;;  %4661 = vmatmul.mubr.bf16.gmra.mrb[32].mxu1 %v10501_v27  ;;  %v1319_v0 = vor.u32 %v1318_v49, %v1315_v52 }
  0xcb   : > { %794 = vst [vmem:[#allocation2 + $0xb8] sm:$0xf] %v620_v55  ;;  %797 = vst [vmem:[#allocation2 + $0xbc] sm:$0x1] %v796_v60  ;;  %v1334_v3 = vrot.slane %v1332_v57, 5  ;;  %v1656_v47 = vrot.slane %v1504_v58, 5  ;;  %v799_v10 = vsel %vm12869_vm10, %v628_v62, %v798_v45 }
  0xcc   : > { %v1324_v1 = vrot.slane %v1322_v50, 5  ;;  %v1328_v53 = vrot.slane %v1326_v54, 4  ;;  %v1659_v12 = vrot.slane %v1505_v2, 5  ;;  %v991_v4 = vld [vmem:[#allocation2 + $0xa8] sm:$0xf]  ;;  %v631_v5 = vshrl.u32 %v13236_v39, 16 }
  0xcd   : > { %v1320_v7 = vrot.slane %v1319_v0, 4  ;;  %v1657_v13 = vsel %vm13026_vm13, %v10486_v36, %v1656_v47  ;;  %v1658_v14 = vrot.slane %v1656_v47, 4  ;;  %v1337_v38 = vshrl.u32 %v991_v4, 16  ;;  %800 = vst [vmem:[#allocation2 + $0xc0] sm:$0xf] %v799_v10  ;;  %v12299_v21 = vld [vmem:[%s16192_s1 + $0x1b8] sm:$0xff]  }
  0xce   : > { %v1329_v59 = vor.u32 %v1328_v53, %v1324_v1  ;;  %v12259_v26 = vld [vmem:[#allocation2 + $0xa8] sm:$0xff]   ;;  %v993_v15 = vld [vmem:[#allocation2 + $0xb0] sm:$0x1]  ;;  %v1340_v17 = vshll.u32 %v991_v4, 16  ;;  %v12258_v22 = vld [vmem:[#allocation2 + $0x9c] sm:$0xff]   ;;  %11417 = vmatpush3.bf16.msra.mxu1 %v12299_v21  ;;  %v13275_v10 = vrot.slane %v631_v5, 7 }
  0xcf   : > { %v992_v9 = vld [vmem:[#allocation2 + $0xac] sm:$0xf]  ;;  %v1325_v6 = vsel %vm12805_vm2, %v1320_v7, %v1324_v1  ;;  %4668 = vmatprep.mubr.bf16.mxu1 %v12259_v26  ;;  %v1660_v23 = vsel %vm13026_vm13, %v1658_v14, %v1659_v12  ;;  %v1339_v25 = vrot.slane %v1337_v38, 4  ;;  %v1356_v27 = vshll.u32 %v993_v15, 16  ;;  %v1506_v35 = vld [vmem:[#allocation2 + $0xa8] sm:$0xe] }
  0xd0   : > { %v1330_v16 = vrot.slane %v1329_v59, 4  ;;  %v1346_v18 = vshll.u32 %v992_v9, 16  ;;  %v1350_v20 = vshrl.u32 %v992_v9, 16  ;;  %v1342_v48 = vrot.slane %v1340_v17, 5  ;;  %v1507_v36 = vld [vmem:[#allocation2 + $0xac] sm:$0xf] }
  0xd1   : > { %v10502_v29 = vcombine.low %v1657_v13, %v1660_v23  ;;  %v1358_v61 = vrot.slane %v1356_v27, 5  ;;  %v1508_v37 = vld [vmem:[#allocation2 + $0xb0] sm:$0x1]  ;;  %v10487_v41 = vrot.slane %v1506_v35, 9  ;;  %v1663_v42 = vrot.slane %v1507_v36, 5  ;;  %v12260_v26 = vld [vmem:[#allocation2 + $0xa8] sm:$0xff]  }
  0xd2   : > { %v1335_v28 = vsel %vm12805_vm2, %v1330_v16, %v1334_v3  ;;  %v1348_v30 = vrot.slane %v1346_v18, 5  ;;  %v1352_v31 = vrot.slane %v1350_v20, 4  ;;  %v1343_v33 = vor.u32 %v1342_v48, %v1339_v25  ;;  %v12261_v34 = vld [vmem:[#allocation2 + $0xb4] sm:$0xff]   ;;  %v996_v46 = vld [vmem:[#allocation2 + $0xbc] sm:$0x1] }
  0xd3   : > { %v10470_v32 = vcombine.low %v1325_v6, %v1335_v28  ;;  %4669 = vmatmul.mubr.bf16.gmra.mrb[36].mxu1 %v10502_v29  ;;  %v994_v11 = vld [vmem:[#allocation2 + $0xb4] sm:$0xf]  ;;  %v1666_v44 = vrot.slane %v1508_v37, 5  ;;  %v995_v45 = vld [vmem:[#allocation2 + $0xb8] sm:$0xf]  ;;  %v1664_v50 = vsel %vm13026_vm13, %v10487_v41, %v1663_v42  ;;  %v1665_v54 = vrot.slane %v1663_v42, 4 }
  0xd4   : > { %v1353_v19 = vor.u32 %v1352_v31, %v1348_v30  ;;  %v1344_v52 = vrot.slane %v1343_v33, 4  ;;  %4676 = vmatprep.mubr.bf16.mxu1 %v12261_v34  ;;  %v1361_v55 = vshrl.u32 %v994_v11, 16  ;;  %v1364_v58 = vshll.u32 %v994_v11, 16  ;;  %v1509_v7 = vld [vmem:[#allocation2 + $0xb4] sm:$0xe]  ;;  %v12264_v34 = vld [vmem:[#allocation2 + $0xc] sm:$0xff]  }
  0xd5   : > { %4507 = vmatprep.mubr.bf16.mxu0 %v10470_v32  ;;  %v1370_v60 = vshll.u32 %v995_v45, 16  ;;  %v1374_v62 = vshrl.u32 %v995_v45, 16  ;;  %v1667_v1 = vsel %vm13026_vm13, %v1665_v54, %v1666_v44  ;;  %v1380_v2 = vshll.u32 %v996_v46, 16  ;;  %v1510_v59 = vld [vmem:[#allocation2 + $0xb8] sm:$0xf]  ;;  %v12266_v54 = vld [vmem:[%s16192_s1 + $0x100] sm:$0xff]  }
  0xd6   : > { %4508 = vmatmul.mubr.bf16.gmra.mrb[52].mxu0 %v12258_v22  ;;  %v1354_v49 = vrot.slane %v1353_v19, 4  ;;  %v1349_v57 = vsel %vm12805_vm2, %v1344_v52, %v1348_v30  ;;  %v1363_v53 = vrot.slane %v1361_v55, 4  ;;  %v10503_v47 = vcombine.low %v1664_v50, %v1667_v1  ;;  %v1511_v14 = vld [vmem:[#allocation2 + $0xbc] sm:$0x1]  ;;  %v1464_v17 = vld [vmem:[#allocation2] sm:$0xe] }
  0xd7   : > { %v1366_v12 = vrot.slane %v1364_v58, 5  ;;  %v1372_v4 = vrot.slane %v1370_v60, 5  ;;  %v1376_v9 = vrot.slane %v1374_v62, 4  ;;  %v634_v13 = vshll.u32 %v13236_v39, 16  ;;  %v1465_v6 = vld [vmem:[#allocation2 + $0x4] sm:$0xf] }
  0xd8   : > { %v1359_v0 = vsel %vm12805_vm2, %v1354_v49, %v1358_v61  ;;  %v1670_v38 = vrot.slane %v1510_v59, 5  ;;  %v1382_v18 = vrot.slane %v1380_v2, 5  ;;  %v1466_v21 = vld [vmem:[#allocation2 + $0x8] sm:$0x1]  ;;  %v10488_v23 = vrot.slane %v1509_v7, 9  ;;  %v12262_v31 = vld [vmem:[#allocation2 + $0xb4] sm:$0xff]  }
  0xd9   : > { %v10471_v3 = vcombine.low %v1349_v57, %v1359_v0  ;;  %v1367_v15 = vor.u32 %v1366_v12, %v1363_v53  ;;  %v1377_v16 = vor.u32 %v1376_v9, %v1372_v4  ;;  %v636_v20 = vor.u32 %v634_v13, %v13275_v10  ;;  %v1468_v29 = vld [vmem:[#allocation2 + $0x10] sm:$0xf]  ;;  %v1467_v35 = vld [vmem:[#allocation2 + $0xc] sm:$0xe]  ;;  %v1469_v40 = vld [vmem:[#allocation2 + $0x14] sm:$0x1] }
  0xda   : > { %v1673_v25 = vrot.slane %v1511_v14, 5  ;;  %v1672_v48 = vrot.slane %v1670_v38, 4  ;;  %v1565_v27 = vrot.slane %v1465_v6, 5  ;;  %v10473_v32 = vrot.slane %v1464_v17, 9  ;;  %v1471_v42 = vld [vmem:[#allocation2 + $0x1c] sm:$0xf] }
  0xdb   : > { %4515 = vmatprep.mubr.bf16.mxu0 %v10471_v3  ;;  %4677 = vmatmul.mubr.bf16.gmra.mrb[40].mxu1 %v10503_v47  ;;  %v1368_v22 = vrot.slane %v1367_v15, 4  ;;  %v1378_v5 = vrot.slane %v1377_v16, 4  ;;  %v637_v39 = vsel %vm12847_vm7, %v629_v63, %v636_v20  ;;  %v1568_v33 = vrot.slane %v1466_v21, 5  ;;  %v12272_v55 = vld [vmem:[#allocation2 + $0x18] sm:$0xff]   ;;  %v1472_v58 = vld [vmem:[#allocation2 + $0x20] sm:$0x1] }
  0xdc   : > { %801 = vst [vmem:[#allocation2 + $0xc4] sm:$0xf] %v637_v39  ;;  %v1671_v63 = vsel %vm13026_vm13, %v10488_v23, %v1670_v38  ;;  %v1674_v36 = vsel %vm13026_vm13, %v1672_v48, %v1673_v25  ;;  %v1567_v19 = vrot.slane %v1565_v27, 4  ;;  %v1572_v37 = vrot.slane %v1468_v29, 5  ;;  %v1470_v57 = vld [vmem:[#allocation2 + $0x18] sm:$0xe] }
  0xdd   : > { %v1373_v28 = vsel %vm12805_vm2, %v1368_v22, %v1372_v4  ;;  %v1383_v30 = vsel %vm12805_vm2, %v1378_v5, %v1382_v18  ;;  %v10504_v41 = vcombine.low %v1671_v63, %v1674_v36  ;;  %v10474_v52 = vrot.slane %v1467_v35, 9  ;;  %v12269_v62 = vld [vmem:[%s16192_s1 + $0x148] sm:$0xff]   ;;  %v1473_v1 = vld [vmem:[#allocation2 + $0x24] sm:$0xe]  ;;  %v12274_v2 = vld [vmem:[%s16192_s1 + $0x150] sm:$0xff]  }
  0xde   : > { %4516 = vmatmul.mubr.bf16.gmra.mrb[56].mxu0 %v12260_v26  ;;  %v10472_v61 = vcombine.low %v1373_v28, %v1383_v30  ;;  %v1575_v44 = vrot.slane %v1469_v40, 5  ;;  %v1566_v45 = vsel %vm13026_vm13, %v10473_v32, %v1565_v27  ;;  %v1569_v46 = vsel %vm13026_vm13, %v1567_v19, %v1568_v33  ;;  %v12270_v0 = vld [vmem:[%s16192_s1 + $0x108] sm:$0xff]   ;;  %v12275_v14 = vld [vmem:[%s16192_s1 + $0x110] sm:$0xff]   ;;  %v12278_v17 = vld [vmem:[%s16192_s1 + $0x158] sm:$0xff]  }
  0xdf   : > { %v1574_v49 = vrot.slane %v1572_v37, 4  ;;  %v1579_v50 = vrot.slane %v1471_v42, 5  ;;  %v10489_v60 = vcombine.low %v1566_v45, %v1569_v46  ;;  %v1474_v53 = vld [vmem:[#allocation2 + $0x28] sm:$0xf]  ;;  %v10475_v3 = vrot.slane %v1470_v57, 9  ;;  %v12279_v27 = vld [vmem:[%s16192_s1 + $0x118] sm:$0xff]  }
  0xe0   : > { %4523 = vmatprep.mubr.bf16.mxu0 %v10472_v61  ;;  %v1582_v47 = vrot.slane %v1472_v58, 5  ;;  %v1475_v12 = vld [vmem:[#allocation2 + $0x2c] sm:$0x1]  ;;  %v1573_v4 = vsel %vm13026_vm13, %v10474_v52, %v1572_v37  ;;  %v10476_v26 = vrot.slane %v1473_v1, 9  ;;  %v1586_v9 = vrot.slane %v1474_v53, 5  ;;  %v12281_v15 = vld [vmem:[#allocation2 + $0x24] sm:$0xff]  }
  0xe1   : > { %v1576_v7 = vsel %vm13026_vm13, %v1574_v49, %v1575_v44  ;;  %v1581_v59 = vrot.slane %v1579_v50, 4  ;;  %v1589_v13 = vrot.slane %v1475_v12, 5  ;;  %v1580_v6 = vsel %vm13026_vm13, %v10475_v3, %v1579_v50  ;;  %v2411_v18 = vld [vmem:[#allocation2 + $0xc] sm:$0xe]  ;;  %v2412_v20 = vld [vmem:[#allocation2 + $0x10] sm:$0xf] }
  0xe2   : > { %v10490_v38 = vcombine.low %v1573_v4, %v1576_v7  ;;  %v2413_v21 = vld [vmem:[#allocation2 + $0x14] sm:$0x1]  ;;  %v1588_v22 = vrot.slane %v1586_v9, 4  ;;  %v10537_v23 = vrot.slane %v2411_v18, 9  ;;  %v2509_v25 = vrot.slane %v2412_v20, 5  ;;  %v12283_v33 = vld [vmem:[%s16192_s1 + $0x160] sm:$0xff]  }
  0xe3   : > { %v12263_v11 = vld [vmem:[#allocation2 + $0xc0] sm:$0xff]   ;;  %v1583_v16 = vsel %vm13026_vm13, %v1581_v59, %v1582_v47  ;;  %v2512_v5 = vrot.slane %v2413_v21, 5  ;;  %v1899_v39 = vld [vmem:[#allocation2 + $0xc] sm:$0xf]  ;;  %v1900_v48 = vld [vmem:[#allocation2 + $0x10] sm:$0xf]  ;;  %v13329_v61 = vsel %vm13026_vm13, %v10476_v26, %v1586_v9 }
  0xe4   : > { %4684 = vmatprep.mubr.bf16.mxu1 %v12263_v11  ;;  %v10491_v28 = vcombine.low %v1580_v6, %v1583_v16  ;;  %v2511_v29 = vrot.slane %v2509_v25, 4  ;;  %v1901_v30 = vld [vmem:[#allocation2 + $0x14] sm:$0x1]  ;;  %v1951_v32 = vshll.u32 %v1899_v39, 16  ;;  %v1961_v35 = vshrl.u32 %v1900_v48, 16  ;;  %v12284_v63 = vld [vmem:[%s16192_s1 + $0x120] sm:$0xff]  }
  0xe5   : > { %4685 = vmatmul.mubr.bf16.gmra.mrb[44].mxu1 %v10504_v41  ;;  %v1967_v40 = vshll.u32 %v1901_v30, 16  ;;  %v13336_v36 = vsel %vm13026_vm13, %v1588_v22, %v1589_v13  ;;  %v13340_v19 = vsel %vm13026_vm13, %v10537_v23, %v2509_v25  ;;  %v2844_v42 = vld [vmem:[#allocation2 + $0x18] sm:$0xf]  ;;  %v12287_v11 = vld [vmem:[%s16192_s1 + $0x168] sm:$0xff]   ;;  %v2845_v49 = vld [vmem:[#allocation2 + $0x1c] sm:$0xf] }
  0xe6   : > { %4524 = vmatmul.mubr.bf16.gmra.mrb[60].mxu0 %v12262_v31  ;;  %v1948_v31 = vshrl.u32 %v1899_v39, 16  ;;  %v1953_v41 = vrot.slane %v1951_v32, 5  ;;  %v13347_v52 = vsel %vm13026_vm13, %v2511_v29, %v2512_v5  ;;  %v1963_v45 = vrot.slane %v1961_v35, 4  ;;  %v12290_v50 = vld [vmem:[#allocation2 + $0x30] sm:$0xff]   ;;  %v2414_v7 = vld [vmem:[#allocation2 + $0x18] sm:$0xe] }
  0xe7   : > { %4564 = vmatprep.mubr.bf16.mxu0 %v12264_v34  ;;  %v1957_v34 = vshll.u32 %v1900_v48, 16  ;;  %v1969_v46 = vrot.slane %v1967_v40, 5  ;;  %v2893_v57 = vshrl.u32 %v2844_v42, 16  ;;  %v2896_v58 = vshll.u32 %v2844_v42, 16  ;;  %v12292_v59 = vld [vmem:[%s16192_s1 + $0x170] sm:$0xff]   ;;  %v12296_v32 = vld [vmem:[%s16192_s1 + $0x178] sm:$0xff]  }
  0xe8   : > { %v1950_v37 = vrot.slane %v1948_v31, 4  ;;  %v2906_v1 = vshrl.u32 %v2845_v49, 16  ;;  %v10553_v26 = vcombine.low %v13340_v19, %v13347_v52  ;;  %v2416_v16 = vld [vmem:[#allocation2 + $0x20] sm:$0x1]  ;;  %v1902_v20 = vld [vmem:[#allocation2 + $0x18] sm:$0xf] }
  0xe9   : > { %v1959_v44 = vrot.slane %v1957_v34, 5  ;;  %v2895_v47 = vrot.slane %v2893_v57, 4  ;;  %v2898_v12 = vrot.slane %v2896_v58, 5  ;;  %v2519_v23 = vrot.slane %v2416_v16, 5  ;;  %v1903_v25 = vld [vmem:[#allocation2 + $0x1c] sm:$0xf] }
  0xea   : > { %v2908_v13 = vrot.slane %v2906_v1, 4  ;;  %v1904_v5 = vld [vmem:[#allocation2 + $0x20] sm:$0x1]  ;;  %v1972_v39 = vshrl.u32 %v1902_v20, 16  ;;  %v12293_v48 = vld [vmem:[%s16192_s1 + $0x130] sm:$0xff]   ;;  %v1975_v34 = vshll.u32 %v1902_v20, 16 }
  0xeb   : > { %v2847_v31 = vld [vmem:[#allocation2 + $0x24] sm:$0xf]  ;;  %v1981_v35 = vshll.u32 %v1903_v25, 16  ;;  %v2848_v40 = vld [vmem:[#allocation2 + $0x28] sm:$0xf]  ;;  %v1985_v19 = vshrl.u32 %v1903_v25, 16 }
  0xec   : > { %v2418_v57 = vld [vmem:[#allocation2 + $0x28] sm:$0xf]  ;;  %v12297_v58 = vld [vmem:[%s16192_s1 + $0x138] sm:$0xff]   ;;  %v2926_v1 = vshll.u32 %v2848_v40, 16 }
  0xed   : > { %v1983_v52 = vrot.slane %v1981_v35, 5 }
  0xee   : > { %4565 = vmatmul.mubr.bf16.vlgmr.msra.gmra.mrb[64].mxu0 %v10489_v60  ;;  %v2902_v60 = vshll.u32 %v2845_v49, 16  ;;  %v12301_v49 = vld [vmem:[#allocation2 + $0x18] sm:$0xff]  }
  0xef   : > { %11291 = vmatpush3.bf16.msra.mxu0 %v12266_v54  ;;  %4572 = vmatprep.mubr.bf16.mxu0 %v12272_v55  ;;  %v1954_v54 = vor.u32 %v1953_v41, %v1950_v37  ;;  %v2846_v55 = vld [vmem:[#allocation2 + $0x20] sm:$0x1]  ;;  %v1991_v37 = vshll.u32 %v1904_v5, 16 }
  0xf0   : > { %11292 = vmatprep.subr.bf16.mxu0 %v12269_v62  ;;  %v10492_v62 = vcombine.low %v13329_v61, %v13336_v36  ;;  %v2912_v53 = vshll.u32 %v2846_v55, 16  ;;  %v2904_v4 = vrot.slane %v2902_v60, 5  ;;  %v1974_v61 = vrot.slane %v1972_v39, 4 }
  0xf1   : > { %v1955_v3 = vrot.slane %v1954_v54, 4  ;;  %v1993_v54 = vrot.slane %v1991_v37, 5  ;;  %v2917_v55 = vshrl.u32 %v2847_v31, 16 }
  0xf2   : > { %v2914_v6 = vrot.slane %v2912_v53, 5  ;;  %v2909_v22 = vor.u32 %v2908_v13, %v2904_v4  ;;  %v2930_v53 = vshrl.u32 %v2848_v40, 16  ;;  %v2928_v13 = vrot.slane %v2926_v1, 5  ;;  %v2422_v1 = vld [vmem:[#allocation2 + $0x38] sm:$0x1] }
  0xf3   : > { %11293 = vmatpush3.bf16.msra.mxu0 %v12270_v0  ;;  %v1964_v0 = vor.u32 %v1963_v45, %v1959_v44  ;;  %v2417_v45 = vld [vmem:[#allocation2 + $0x24] sm:$0xe] }
  0xf4   : > { %11294 = vmatprep.subr.bf16.mxu0 %v12274_v2  ;;  %v12288_v2 = vld [vmem:[%s16192_s1 + $0x128] sm:$0xff]  }
  0xf5   : > { %v1965_v9 = vrot.slane %v1964_v0, 4  ;;  %v2920_v0 = vshll.u32 %v2847_v31, 16 }
  0xf6   : > { %4573 = vmatmul.mubr.bf16.gmra.mrb[68].mxu0 %v10490_v38  ;;  %v1960_v38 = vsel %vm12805_vm2, %v1955_v3, %v1959_v44  ;;  %v2849_v44 = vld [vmem:[#allocation2 + $0x2c] sm:$0x1]  ;;  %v12300_v3 = vld [vmem:[%s16192_s1 + $0x200] sm:$0xff]  }
  0xf7   : > { %11295 = vmatpush3.bf16.msra.mxu0 %v12275_v14  ;;  %4580 = vmatprep.mubr.bf16.mxu0 %v12281_v15  ;;  %v2415_v14 = vld [vmem:[#allocation2 + $0x1c] sm:$0xf]  ;;  %v10538_v15 = vrot.slane %v2414_v7, 9  ;;  %v1970_v21 = vsel %vm12805_vm2, %v1965_v9, %v1969_v46  ;;  %v10539_v7 = vrot.slane %v2417_v45, 9  ;;  %v2922_v9 = vrot.slane %v2920_v0, 5  ;;  %v12306_v45 = vld [vmem:[%s16192_s1 + $0x210] sm:$0xff]  }
  0xf8   : > { %11296 = vmatprep.subr.bf16.mxu0 %v12278_v17  ;;  %v2899_v17 = vor.u32 %v2898_v12, %v2895_v47  ;;  %v2516_v18 = vrot.slane %v2415_v14, 5  ;;  %v2919_v12 = vrot.slane %v2917_v55, 4  ;;  %v2932_v14 = vrot.slane %v2930_v53, 4  ;;  %v2421_v55 = vld [vmem:[#allocation2 + $0x34] sm:$0xf] }
  0xfa   : > { %v13370_v29 = vsel %vm13026_vm13, %v10538_v15, %v2516_v18  ;;  %v2518_v30 = vrot.slane %v2516_v18, 4  ;;  %v1906_v15 = vld [vmem:[#allocation2 + $0x28] sm:$0xf]  ;;  %v2923_v18 = vor.u32 %v2922_v9, %v2919_v12  ;;  %v2933_v20 = vor.u32 %v2932_v14, %v2928_v13  ;;  %v1908_v12 = vld [vmem:[#allocation2 + $0x30] sm:$0xf] }
  0xfb   : > { %11297 = vmatpush3.bf16.msra.mxu0 %v12279_v27  ;;  %v13366_v27 = vcombine.low %v1960_v38, %v1970_v21  ;;  %v1907_v21 = vld [vmem:[#allocation2 + $0x2c] sm:$0x1]  ;;  %v2005_v40 = vshll.u32 %v1906_v15, 16 }
  0xfc   : > { %11298 = vmatprep.subr.bf16.mxu0 %v12283_v33  ;;  %v2910_v33 = vrot.slane %v2909_v22, 4  ;;  %v13379_v36 = vsel %vm13026_vm13, %v2518_v30, %v2519_v23  ;;  %v2924_v31 = vrot.slane %v2923_v18, 4 }
  0xfd   : > { %v10554_v42 = vcombine.low %v13370_v29, %v13379_v36 }
  0xfe   : > { %4581 = vmatmul.mubr.bf16.gmra.mrb[72].mxu0 %v10491_v28  ;;  %v2900_v28 = vrot.slane %v2899_v17, 4  ;;  %v2915_v41 = vsel %vm12805_vm2, %v2910_v33, %v2914_v6 }
  0xff   : > { %11299 = vmatpush3.bf16.msra.mxu0 %v12284_v63  ;;  %4588 = vmatprep.mubr.bf16.mxu0 %v12290_v50  ;;  %v1987_v50 = vrot.slane %v1985_v19, 4  ;;  %v2929_v19 = vsel %vm12805_vm2, %v2924_v31, %v2928_v13 }
 0x100   : > { %11300 = vmatprep.subr.bf16.mxu0 %v12287_v11  ;;  %v2905_v63 = vsel %vm12805_vm2, %v2900_v28, %v2904_v4  ;;  %v1977_v11 = vrot.slane %v1975_v34, 5  ;;  %v2936_v4 = vshll.u32 %v2849_v44, 16  ;;  %v2851_v28 = vld [vmem:[#allocation2 + $0x34] sm:$0xf]  ;;  %v2852_v44 = vld [vmem:[#allocation2 + $0x38] sm:$0x1] }
 0x101   : > { %v10585_v46 = vcombine.low %v2905_v63, %v2915_v41  ;;  %v1988_v47 = vor.u32 %v1987_v50, %v1983_v52  ;;  %v2009_v63 = vshrl.u32 %v1906_v15, 16  ;;  %v12302_v41 = vld [vmem:[#allocation2 + $0x24] sm:$0xff]   ;;  %v2950_v0 = vshll.u32 %v2851_v28, 16 }
 0x102   : > { %v1978_v60 = vor.u32 %v1977_v11, %v1974_v61  ;;  %v2938_v17 = vrot.slane %v2936_v4, 5  ;;  %v12303_v61 = vld [vmem:[%s16192_s1 + $0x208] sm:$0xff]   ;;  %v2530_v15 = vrot.slane %v2421_v55, 5 }
 0x103   : > { %11301 = vmatpush3.bf16.msra.mxu0 %v12288_v2  ;;  %v2419_v2 = vld [vmem:[#allocation2 + $0x2c] sm:$0x1]  ;;  %4886 = vmatprep.mubr.bf16.mxu1 %v10585_v46  ;;  %v1989_v38 = vrot.slane %v1988_v47, 4  ;;  %v2011_v50 = vrot.slane %v2009_v63, 4  ;;  %v2960_v47 = vshll.u32 %v2852_v44, 16 }
 0x104   : > { %11302 = vmatprep.subr.bf16.mxu0 %v12292_v59  ;;  %v1979_v59 = vrot.slane %v1978_v60, 4  ;;  %4887 = vmatmul.mubr.bf16.vlgmr.msra.gmra.mrb[48].mxu1 %v12301_v49  ;;  %v2526_v6 = vrot.slane %v2419_v2, 5  ;;  %v2007_v49 = vrot.slane %v2005_v40, 5  ;;  %v2855_v63 = vld [vmem:[#allocation2 + $0x44] sm:$0x1] }
 0x105   : > { %v1994_v23 = vsel %vm12805_vm2, %v1989_v38, %v1993_v54  ;;  %v2420_v54 = vld [vmem:[#allocation2 + $0x30] sm:$0xe]  ;;  %v2962_v13 = vrot.slane %v2960_v47, 5  ;;  %v2533_v38 = vrot.slane %v2422_v1, 5  ;;  %v12315_v47 = vld [vmem:[%s16192_s1 + $0x228] sm:$0xff]  }
 0x106   : > { %4589 = vmatmul.mubr.bf16.gmra.mrb[76].mxu0 %v10492_v62  ;;  %v1905_v62 = vld [vmem:[#allocation2 + $0x24] sm:$0xf]  ;;  %v1984_v16 = vsel %vm12805_vm2, %v1979_v59, %v1983_v52  ;;  %v2015_v52 = vshll.u32 %v1907_v21, 16  ;;  %v2012_v2 = vor.u32 %v2011_v50, %v2007_v49  ;;  %v10540_v4 = vrot.slane %v2420_v54, 9 }
 0x107   : > { %11303 = vmatpush3.bf16.msra.mxu0 %v12293_v48  ;;  %4725 = vmatprep.mubr.bf16.mxu0 %v10553_v26  ;;  %v2523_v26 = vrot.slane %v2418_v57, 5  ;;  %v1996_v22 = vshrl.u32 %v1905_v62, 16  ;;  %v1999_v39 = vshll.u32 %v1905_v62, 16  ;;  %v2850_v48 = vld [vmem:[#allocation2 + $0x30] sm:$0xf]  ;;  %v10522_v30 = vcombine.low %v1984_v16, %v1994_v23 }
 0x108   : > { %11304 = vmatprep.subr.bf16.mxu0 %v12296_v32  ;;  %v2934_v32 = vrot.slane %v2933_v20, 4  ;;  %v2017_v57 = vrot.slane %v2015_v52, 5  ;;  %v2944_v60 = vshll.u32 %v2850_v48, 16  ;;  %v2013_v59 = vrot.slane %v2012_v2, 4 }
 0x109   : > { %v13397_v25 = vsel %vm13026_vm13, %v10539_v7, %v2523_v26  ;;  %v2525_v5 = vrot.slane %v2523_v26, 4  ;;  %v1998_v33 = vrot.slane %v1996_v22, 4  ;;  %v2001_v35 = vrot.slane %v1999_v39, 5  ;;  %v1909_v7 = vld [vmem:[#allocation2 + $0x34] sm:$0xf] }
 0x10a   : > { %v2939_v37 = vsel %vm12805_vm2, %v2934_v32, %v2938_v17  ;;  %v2946_v36 = vrot.slane %v2944_v60, 5  ;;  %v1910_v17 = vld [vmem:[#allocation2 + $0x38] sm:$0x1]  ;;  %v2020_v26 = vshrl.u32 %v1908_v12, 16  ;;  %v2018_v16 = vsel %vm12805_vm2, %v2013_v59, %v2017_v57  ;;  %v2853_v39 = vld [vmem:[#allocation2 + $0x3c] sm:$0xf] }
 0x10b   : > { %11305 = vmatpush3.bf16.msra.mxu0 %v12297_v58  ;;  %v2527_v34 = vsel %vm13026_vm13, %v2525_v5, %v2526_v6  ;;  %v2002_v46 = vor.u32 %v2001_v35, %v1998_v33  ;;  %v2941_v58 = vshrl.u32 %v2850_v48, 16  ;;  %v12309_v6 = vld [vmem:[%s16192_s1 + $0x218] sm:$0xff]   ;;  %v2023_v20 = vshll.u32 %v1908_v12, 16  ;;  %v12312_v48 = vld [vmem:[%s16192_s1 + $0x220] sm:$0xff]  }
 0x10c   : > { %12098 = vmatprep.subr.bf16.mxu0 %v12300_v3  ;;  %v10555_v11 = vcombine.low %v13397_v25, %v2527_v34  ;;  %v2029_v21 = vshll.u32 %v1909_v7, 16  ;;  %v2531_v25 = vsel %vm13026_vm13, %v10540_v4, %v2530_v15  ;;  %v2532_v5 = vrot.slane %v2530_v15, 4  ;;  %v2425_v60 = vld [vmem:[#allocation2 + $0x44] sm:$0x1]  ;;  %v1912_v4 = vld [vmem:[#allocation2 + $0x40] sm:$0xf] }
 0x10d   : > { %v2003_v53 = vrot.slane %v2002_v46, 4  ;;  %v2943_v29 = vrot.slane %v2941_v58, 4  ;;  %v2022_v31 = vrot.slane %v2020_v26, 4  ;;  %v2025_v32 = vrot.slane %v2023_v20, 5  ;;  %v12318_v15 = vld [vmem:[%s16192_s1 + $0x230] sm:$0xff]  }
 0x10e   : > { %4726 = vmatmul.mubr.bf16.vlgmr.msra.gmra.mrb[80].mxu0 %v13366_v27  ;;  %v10586_v27 = vcombine.low %v2929_v19, %v2939_v37  ;;  %v13428_v33 = vrot.slane %v2029_v21, 5  ;;  %v2534_v34 = vsel %vm13026_vm13, %v2532_v5, %v2533_v38  ;;  %v2033_v35 = vshrl.u32 %v1909_v7, 16  ;;  %v2423_v19 = vld [vmem:[#allocation2 + $0x3c] sm:$0xe] }
 0x10f   : > { %12099 = vmatpush3.bf16.msra.mxu0 %v12300_v3  ;;  %4733 = vmatprep.mubr.bf16.mxu0 %v10554_v42  ;;  %v2954_v3 = vshrl.u32 %v2851_v28, 16  ;;  %v2952_v42 = vrot.slane %v2950_v0, 5  ;;  %v2008_v62 = vsel %vm12805_vm2, %v2003_v53, %v2007_v49  ;;  %v2947_v14 = vor.u32 %v2946_v36, %v2943_v29 }
 0x110   : > { %12100 = vmatprep.subr.bf16.mxu0 %v12303_v61  ;;  %4894 = vmatprep.mubr.bf16.mxu1 %v10586_v27  ;;  %v10523_v22 = vcombine.low %v2008_v62, %v2018_v16  ;;  %v2039_v40 = vshll.u32 %v1910_v17, 16  ;;  %v2026_v52 = vor.u32 %v2025_v32, %v2022_v31  ;;  %v2965_v44 = vshrl.u32 %v2853_v39, 16  ;;  %v2424_v27 = vld [vmem:[#allocation2 + $0x40] sm:$0xf]  ;;  %v2857_v32 = vld [vmem:[#allocation2 + $0x4c] sm:$0xf] }
 0x111   : > { %4895 = vmatmul.mubr.bf16.gmra.mrb[52].mxu1 %v12302_v41  ;;  %v2956_v9 = vrot.slane %v2954_v3, 4  ;;  %v2948_v23 = vrot.slane %v2947_v14, 4  ;;  %v12304_v41 = vld [vmem:[#allocation2 + $0x30] sm:$0xff]   ;;  %v2035_v46 = vrot.slane %v2033_v35, 4  ;;  %v2968_v50 = vshll.u32 %v2853_v39, 16 }
 0x112   : > { %v2041_v49 = vrot.slane %v2039_v40, 5  ;;  %v2027_v54 = vrot.slane %v2026_v52, 4  ;;  %v2967_v55 = vrot.slane %v2965_v44, 4  ;;  %v2984_v53 = vshll.u32 %v2855_v63, 16  ;;  %v1911_v3 = vld [vmem:[#allocation2 + $0x3c] sm:$0xf] }
 0x113   : > { %12101 = vmatpush3.bf16.msra.mxu0 %v12303_v61  ;;  %v2957_v18 = vor.u32 %v2956_v9, %v2952_v42  ;;  %v2854_v61 = vld [vmem:[#allocation2 + $0x40] sm:$0xf]  ;;  %v2036_v0 = vor.u32 %v2035_v46, %v13428_v33  ;;  %v2970_v1 = vrot.slane %v2968_v50, 5  ;;  %v10541_v2 = vrot.slane %v2423_v19, 9  ;;  %v2858_v35 = vld [vmem:[#allocation2 + $0x50] sm:$0x1] }
 0x114   : > { %12102 = vmatprep.subr.bf16.mxu0 %v12306_v45  ;;  %v2974_v57 = vshll.u32 %v2854_v61, 16  ;;  %v2978_v58 = vshrl.u32 %v2854_v61, 16  ;;  %v2032_v12 = vsel %vm12805_vm2, %v2027_v54, %v13428_v33  ;;  %v2986_v9 = vrot.slane %v2984_v53, 5  ;;  %v12305_v33 = vld [vmem:[#allocation2 + $0x3c] sm:$0xff]   ;;  %v2428_v50 = vld [vmem:[#allocation2 + $0x50] sm:$0x1] }
 0x115   : > { %v2958_v28 = vrot.slane %v2957_v18, 4  ;;  %v2037_v62 = vrot.slane %v2036_v0, 4  ;;  %v2971_v59 = vor.u32 %v2970_v1, %v2967_v55  ;;  %v2044_v16 = vshrl.u32 %v1911_v3, 16  ;;  %v12321_v52 = vld [vmem:[%s16192_s1 + $0x238] sm:$0xff]  }
 0x116   : > { %4734 = vmatmul.mubr.bf16.gmra.mrb[84].mxu0 %v10522_v30  ;;  %v2953_v30 = vsel %vm12805_vm2, %v2948_v23, %v2952_v42  ;;  %v2976_v29 = vrot.slane %v2974_v57, 5  ;;  %v2980_v36 = vrot.slane %v2978_v58, 4  ;;  %v2537_v42 = vrot.slane %v2424_v27, 5  ;;  %v2856_v23 = vld [vmem:[#allocation2 + $0x48] sm:$0xf] }
 0x117   : > { %4741 = vmatprep.mubr.bf16.mxu0 %v10555_v11  ;;  %12103 = vmatpush3.bf16.msra.mxu0 %v12306_v45  ;;  %v2963_v37 = vsel %vm12805_vm2, %v2958_v28, %v2962_v13  ;;  %v10556_v11 = vcombine.low %v2531_v25, %v2534_v34  ;;  %v2540_v13 = vrot.slane %v2425_v60, 5  ;;  %v2042_v18 = vsel %vm12805_vm2, %v2037_v62, %v2041_v49  ;;  %v2427_v49 = vld [vmem:[#allocation2 + $0x4c] sm:$0xf]  ;;  %v1914_v60 = vld [vmem:[#allocation2 + $0x48] sm:$0xf] }
 0x118   : > { %12104 = vmatprep.subr.bf16.mxu0 %v12309_v6  ;;  %v10587_v45 = vcombine.low %v2953_v30, %v2963_v37  ;;  %v2981_v38 = vor.u32 %v2980_v36, %v2976_v29  ;;  %v2538_v17 = vsel %vm13026_vm13, %v10541_v2, %v2537_v42  ;;  %v2539_v26 = vrot.slane %v2537_v42, 4  ;;  %v1915_v36 = vld [vmem:[#allocation2 + $0x4c] sm:$0xf] }
 0x119   : > { %v2972_v20 = vrot.slane %v2971_v59, 4  ;;  %v2047_v21 = vshll.u32 %v1911_v3, 16  ;;  %v10524_v5 = vcombine.low %v2032_v12, %v2042_v18  ;;  %v2046_v31 = vrot.slane %v2044_v16, 4 }
 0x11a   : > { %4902 = vmatprep.mubr.bf16.mxu1 %v10587_v45  ;;  %v2982_v39 = vrot.slane %v2981_v38, 4  ;;  %v2541_v28 = vsel %vm13026_vm13, %v2539_v26, %v2540_v13  ;;  %v2057_v63 = vshrl.u32 %v1912_v4, 16  ;;  %v2989_v37 = vshrl.u32 %v2856_v23, 16  ;;  %v1916_v26 = vld [vmem:[#allocation2 + $0x50] sm:$0x1] }
 0x11b   : > { %12105 = vmatpush3.bf16.msra.mxu0 %v12309_v6  ;;  %4903 = vmatmul.mubr.bf16.gmra.mrb[56].mxu1 %v12304_v41  ;;  %v1913_v6 = vld [vmem:[#allocation2 + $0x44] sm:$0x1]  ;;  %v10557_v61 = vcombine.low %v2538_v17, %v2541_v28  ;;  %v2049_v30 = vrot.slane %v2047_v21, 5  ;;  %v2426_v41 = vld [vmem:[#allocation2 + $0x48] sm:$0xe]  ;;  %v2992_v45 = vshll.u32 %v2856_v23, 16 }
 0x11c   : > { %12106 = vmatprep.subr.bf16.mxu0 %v12312_v48  ;;  %v2987_v40 = vsel %vm12805_vm2, %v2982_v39, %v2986_v9  ;;  %v2063_v19 = vshll.u32 %v1913_v6, 16  ;;  %v2998_v46 = vshll.u32 %v2857_v32, 16  ;;  %v2059_v54 = vrot.slane %v2057_v63, 4  ;;  %v2859_v21 = vld [vmem:[#allocation2 + $0x54] sm:$0xf] }
 0x11d   : > { %v2050_v27 = vor.u32 %v2049_v30, %v2046_v31  ;;  %v2991_v57 = vrot.slane %v2989_v37, 4  ;;  %v3002_v58 = vshrl.u32 %v2857_v32, 16  ;;  %v2994_v1 = vrot.slane %v2992_v45, 5  ;;  %v12307_v30 = vld [vmem:[#allocation2 + $0x48] sm:$0xff]   ;;  %v2429_v63 = vld [vmem:[#allocation2 + $0x54] sm:$0xe] }
 0x11e   : > { %4742 = vmatmul.mubr.bf16.gmra.mrb[88].mxu0 %v10523_v22  ;;  %v2053_v22 = vshll.u32 %v1912_v4, 16  ;;  %v2065_v55 = vrot.slane %v2063_v19, 5  ;;  %v3000_v53 = vrot.slane %v2998_v46, 5  ;;  %v3008_v2 = vshll.u32 %v2858_v35, 16 }
 0x11f   : > { %4749 = vmatprep.mubr.bf16.mxu0 %v10556_v11  ;;  %12107 = vmatpush3.bf16.msra.mxu0 %v12312_v48  ;;  %v2977_v48 = vsel %vm12805_vm2, %v2972_v20, %v2976_v29  ;;  %v2051_v0 = vrot.slane %v2050_v27, 4  ;;  %v10542_v12 = vrot.slane %v2426_v41, 9  ;;  %v2544_v29 = vrot.slane %v2427_v49, 5 }
 0x120   : > { %12108 = vmatprep.subr.bf16.mxu0 %v12315_v47  ;;  %v2055_v34 = vrot.slane %v2053_v22, 5  ;;  %v10588_v44 = vcombine.low %v2977_v48, %v2987_v40  ;;  %v2995_v4 = vor.u32 %v2994_v1, %v2991_v57  ;;  %v3010_v62 = vrot.slane %v3008_v2, 5  ;;  %v2860_v48 = vld [vmem:[#allocation2 + $0x58] sm:$0xf]  ;;  %v1917_v2 = vld [vmem:[#allocation2 + $0x54] sm:$0xf] }
 0x121   : > { %v2547_v59 = vrot.slane %v2428_v50, 5  ;;  %v2545_v38 = vsel %vm13026_vm13, %v10542_v12, %v2544_v29  ;;  %v2546_v17 = vrot.slane %v2544_v29, 4  ;;  %v2068_v16 = vshrl.u32 %v1914_v60, 16  ;;  %v2430_v50 = vld [vmem:[#allocation2 + $0x58] sm:$0xf] }
 0x122   : > { %4910 = vmatprep.mubr.bf16.mxu1 %v10588_v44  ;;  %v2060_v3 = vor.u32 %v2059_v54, %v2055_v34  ;;  %v2056_v42 = vsel %vm12805_vm2, %v2051_v0, %v2055_v34  ;;  %v2996_v6 = vrot.slane %v2995_v4, 4  ;;  %v2071_v18 = vshll.u32 %v1914_v60, 16 }
 0x123   : > { %12109 = vmatpush3.bf16.msra.mxu0 %v12315_v47  ;;  %4911 = vmatmul.mubr.bf16.gmra.mrb[60].mxu1 %v12305_v33  ;;  %v3004_v47 = vrot.slane %v3002_v58, 4  ;;  %v2077_v20 = vshll.u32 %v1915_v36, 16  ;;  %v2070_v32 = vrot.slane %v2068_v16, 4  ;;  %v2861_v33 = vld [vmem:[#allocation2 + $0x5c] sm:$0x1]  ;;  %v2087_v37 = vshll.u32 %v1916_v26, 16 }
 0x124   : > { %v13443_v7 = vpop.f32.mrb[0].mxu0  ;;  %12110 = vmatprep.subr.bf16.mxu0 %v12318_v15  ;;  %v2061_v9 = vrot.slane %v2060_v3, 4  ;;  %v3001_v28 = vsel %vm12805_vm2, %v2996_v6, %v3000_v53  ;;  %v2073_v34 = vrot.slane %v2071_v18, 5  ;;  %v3013_v41 = vshrl.u32 %v2859_v21, 16  ;;  %v2431_v58 = vld [vmem:[#allocation2 + $0x5c] sm:$0x1] }
 0x125   : > { %v13445_v14 = vpop.f32.mrb[1].mxu0  ;;  %v3005_v13 = vor.u32 %v3004_v47, %v3000_v53  ;;  %v2079_v35 = vrot.slane %v2077_v20, 5  ;;  %v3016_v44 = vshll.u32 %v2859_v21, 16  ;;  %v3022_v46 = vshll.u32 %v2860_v48, 16  ;;  %v2862_v18 = vld [vmem:[#allocation2 + $0x60] sm:$0xf] }
 0x126   : > { %v13454_v25 = vpop.f32.mrb[2].mxu0  ;;  %4750 = vmatmul.mubr.bf16.gmra.mrb[92].mxu0 %v10524_v5  ;;  %v2066_v22 = vsel %vm12805_vm2, %v2061_v9, %v2065_v55  ;;  %v2081_v5 = vshrl.u32 %v1915_v36, 16  ;;  %v2074_v27 = vor.u32 %v2073_v34, %v2070_v32  ;;  %v3026_v49 = vshrl.u32 %v2860_v48, 16  ;;  %v1918_v36 = vld [vmem:[#allocation2 + $0x58] sm:$0xf] }
 0x127   : > { %v13462_v11 = vpop.f32.mrb[3].mxu0  ;;  %4757 = vmatprep.mubr.bf16.mxu0 %v10557_v61  ;;  %12111 = vmatpush3.bf16.msra.mxu0 %v12318_v15  ;;  %v3006_v23 = vrot.slane %v3005_v13, 4  ;;  %v2548_v15 = vsel %vm13026_vm13, %v2546_v17, %v2547_v59  ;;  %v10525_v39 = vcombine.low %v2056_v42, %v2066_v22  ;;  %v3015_v54 = vrot.slane %v3013_v41, 4  ;;  %v1919_v13 = vld [vmem:[#allocation2 + $0x5c] sm:$0x1]  ;;  %v12308_v48 = vld [vmem:[#allocation2 + $0x54] sm:$0xff]  }
 0x128   : > { %12112 = vmatprep.subr.bf16.mxu0 %v12321_v52  ;;  %v10558_v31 = vcombine.low %v2545_v38, %v2548_v15  ;;  %v2083_v40 = vrot.slane %v2081_v5, 4  ;;  %v3018_v55 = vrot.slane %v3016_v44, 5  ;;  %v3032_v57 = vshll.u32 %v2861_v33, 16  ;;  %v2863_v15 = vld [vmem:[#allocation2 + $0x64] sm:$0xf] }
 0x129   : > { %v3011_v61 = vsel %vm12805_vm2, %v3006_v23, %v3010_v62  ;;  %v2075_v60 = vrot.slane %v2074_v27, 4  ;;  %v3024_v1 = vrot.slane %v3022_v46, 5  ;;  %v3028_v53 = vrot.slane %v3026_v49, 4  ;;  %v2864_v34 = vld [vmem:[#allocation2 + $0x68] sm:$0x1] }
 0x12a   : > { %v10589_v19 = vcombine.low %v3001_v28, %v3011_v61  ;;  %v2084_v45 = vor.u32 %v2083_v40, %v2079_v35  ;;  %v3019_v3 = vor.u32 %v3018_v55, %v3015_v54  ;;  %v3034_v47 = vrot.slane %v3032_v57, 5  ;;  %v2432_v49 = vld [vmem:[#allocation2 + $0x60] sm:$0xe] }
 0x12b   : > { %12113 = vmatpush3.bf16.msra.mxu0 %v12321_v52  ;;  %v2089_v52 = vrot.slane %v2087_v37, 5  ;;  %v10543_v12 = vrot.slane %v2429_v63, 9  ;;  %v2551_v29 = vrot.slane %v2430_v50, 5  ;;  %v2080_v4 = vsel %vm12805_vm2, %v2075_v60, %v2079_v35  ;;  %v2434_v60 = vld [vmem:[#allocation2 + $0x68] sm:$0x1] }
 0x12c   : > { %4918 = vmatprep.mubr.bf16.mxu1 %v10589_v19  ;;  %v2085_v0 = vrot.slane %v2084_v45, 4  ;;  %v3029_v59 = vor.u32 %v3028_v53, %v3024_v1  ;;  %v2554_v9 = vrot.slane %v2431_v58, 5  ;;  %v3020_v26 = vrot.slane %v3019_v3, 4  ;;  %v2433_v58 = vld [vmem:[#allocation2 + $0x64] sm:$0xf] }
 0x12d   : > { %4919 = vmatmul.mubr.bf16.gmra.mrb[64].mxu1 %v12307_v30  ;;  %v2552_v6 = vsel %vm13026_vm13, %v10543_v12, %v2551_v29  ;;  %v2553_v16 = vrot.slane %v2551_v29, 4  ;;  %v2092_v21 = vshrl.u32 %v1917_v2, 16  ;;  %v2095_v22 = vshll.u32 %v1917_v2, 16  ;;  %v1920_v3 = vld [vmem:[#allocation2 + $0x60] sm:$0xf] }
 0x12e   : > { %4758 = vmatmul.mubr.bf16.gmra.mrb[96].mxu0 %v10525_v39  ;;  %v2090_v62 = vsel %vm12805_vm2, %v2085_v0, %v2089_v52  ;;  %v3030_v20 = vrot.slane %v3029_v59, 4  ;;  %v2101_v23 = vshll.u32 %v1918_v36, 16  ;;  %v3025_v5 = vsel %vm12805_vm2, %v3020_v26, %v3024_v1 }
 0x12f   : > { %4765 = vmatprep.mubr.bf16.mxu0 %v10558_v31  ;;  %v10526_v17 = vcombine.low %v2080_v4, %v2090_v62  ;;  %v2555_v39 = vsel %vm13026_vm13, %v2553_v16, %v2554_v9  ;;  %v2105_v28 = vshrl.u32 %v1918_v36, 16  ;;  %v2111_v31 = vshll.u32 %v1919_v13, 16  ;;  %v1921_v9 = vld [vmem:[#allocation2 + $0x64] sm:$0xf] }
 0x130   : > { %v3035_v32 = vsel %vm12805_vm2, %v3030_v20, %v3034_v47  ;;  %v10559_v33 = vcombine.low %v2552_v6, %v2555_v39  ;;  %v2094_v61 = vrot.slane %v2092_v21, 4  ;;  %v2097_v30 = vrot.slane %v2095_v22, 5  ;;  %v1922_v6 = vld [vmem:[#allocation2 + $0x68] sm:$0x1] }
 0x131   : > { %v10590_v40 = vcombine.low %v3025_v5, %v3035_v32  ;;  %v2103_v63 = vrot.slane %v2101_v23, 5  ;;  %v2107_v19 = vrot.slane %v2105_v28, 4  ;;  %v2113_v37 = vrot.slane %v2111_v31, 5 }
 0x132   : > { %v2098_v44 = vor.u32 %v2097_v30, %v2094_v61  ;;  %v3037_v27 = vshrl.u32 %v2862_v18, 16  ;;  %v3040_v45 = vshll.u32 %v2862_v18, 16  ;;  %v3046_v46 = vshll.u32 %v2863_v15, 16  ;;  %v2865_v18 = vld [vmem:[#allocation2 + $0x6c] sm:$0xf] }
 0x133   : > { %4926 = vmatprep.mubr.bf16.mxu1 %v10590_v40  ;;  %v2108_v52 = vor.u32 %v2107_v19, %v2103_v63  ;;  %v3050_v54 = vshrl.u32 %v2863_v15, 16  ;;  %v3056_v55 = vshll.u32 %v2864_v34, 16  ;;  %v13503_v57 = vadd.f32 %v13445_v14, %v13443_v7  ;;  %v12310_v34 = vld [vmem:[#allocation2 + $0x60] sm:$0xff]  }
 0x134   : > { %v2099_v0 = vrot.slane %v2098_v44, 4  ;;  %v3039_v1 = vrot.slane %v3037_v27, 4  ;;  %v3042_v53 = vrot.slane %v3040_v45, 5  ;;  %v3048_v2 = vrot.slane %v3046_v46, 5 }
 0x135   : > { %16222 = vst [vmem:[#allocation12_spill] sm:$0xff] %v13503_v57  ;;  %4927 = vmatmul.mubr.bf16.gmra.mrb[68].mxu1 %v12308_v48  ;;  %v2109_v47 = vrot.slane %v2108_v52, 4  ;;  %v3052_v12 = vrot.slane %v3050_v54, 4  ;;  %v3058_v29 = vrot.slane %v3056_v55, 5  ;;  %v13507_v36 = vadd.f32 %v13462_v11, %v13454_v25 }
 0x136   : > { %4766 = vmatmul.mubr.bf16.gmra.mrb[100].mxu0 %v10526_v17  ;;  %v2104_v7 = vsel %vm12805_vm2, %v2099_v0, %v2103_v63  ;;  %v3043_v14 = vor.u32 %v3042_v53, %v3039_v1  ;;  %v10544_v62 = vrot.slane %v2432_v49, 9  ;;  %v2558_v59 = vrot.slane %v2433_v58, 5 }
 0x137   : > { %4773 = vmatprep.mubr.bf16.mxu0 %v10559_v33  ;;  %16223 = vst [vmem:[#allocation13_spill] sm:$0xff] %v13507_v36  ;;  %v2114_v13 = vsel %vm12805_vm2, %v2109_v47, %v2113_v37  ;;  %v3053_v17 = vor.u32 %v3052_v12, %v3048_v2  ;;  %v2561_v26 = vrot.slane %v2434_v60, 5  ;;  %v2116_v16 = vshrl.u32 %v1920_v3, 16  ;;  %v2866_v33 = vld [vmem:[#allocation2 + $0x70] sm:$0xf] }
 0x138   : > { %v13479_v42 = vpop.f32.mrb[4].mxu0  ;;  %v10527_v20 = vcombine.low %v2104_v7, %v2114_v13  ;;  %v3044_v25 = vrot.slane %v3043_v14, 4  ;;  %v2559_v11 = vsel %vm13026_vm13, %v10544_v62, %v2558_v59  ;;  %v2560_v21 = vrot.slane %v2558_v59, 4  ;;  %v2867_v37 = vld [vmem:[#allocation2 + $0x74] sm:$0x1] }
 0x139   : > { %v13485_v38 = vpop.f32.mrb[5].mxu0  ;;  %v3054_v22 = vrot.slane %v3053_v17, 4  ;;  %v2118_v23 = vrot.slane %v2116_v16, 4  ;;  %v2119_v15 = vshll.u32 %v1920_v3, 16  ;;  %v2125_v5 = vshll.u32 %v1921_v9, 16 }
 0x13a   : > { %v13495_v35 = vpop.f32.mrb[6].mxu0  ;;  %v3049_v28 = vsel %vm12805_vm2, %v3044_v25, %v3048_v2  ;;  %v2562_v31 = vsel %vm13026_vm13, %v2560_v21, %v2561_v26  ;;  %v2129_v32 = vshrl.u32 %v1921_v9, 16  ;;  %v2135_v48 = vshll.u32 %v1922_v6, 16  ;;  %v2435_v60 = vld [vmem:[#allocation2 + $0x6c] sm:$0xe] }
 0x13b   : > { %v13497_v41 = vpop.f32.mrb[7].mxu0  ;;  %v3059_v30 = vsel %vm12805_vm2, %v3054_v22, %v3058_v29  ;;  %v10560_v40 = vcombine.low %v2559_v11, %v2562_v31  ;;  %v2121_v63 = vrot.slane %v2119_v15, 5  ;;  %v2127_v19 = vrot.slane %v2125_v5, 5  ;;  %v2436_v47 = vld [vmem:[#allocation2 + $0x70] sm:$0xf] }
 0x13c   : > { %v10591_v44 = vcombine.low %v3049_v28, %v3059_v30  ;;  %v2131_v27 = vrot.slane %v2129_v32, 4  ;;  %v2137_v45 = vrot.slane %v2135_v48, 5  ;;  %v3061_v46 = vshrl.u32 %v2865_v18, 16  ;;  %v2437_v12 = vld [vmem:[#allocation2 + $0x74] sm:$0x1]  ;;  %v12311_v28 = vld [vmem:[#allocation2 + $0x6c] sm:$0xff]  }
 0x13d   : > { %v2122_v52 = vor.u32 %v2121_v63, %v2118_v23  ;;  %v3064_v54 = vshll.u32 %v2865_v18, 16  ;;  %v3070_v55 = vshll.u32 %v2866_v33, 16  ;;  %v3074_v58 = vshrl.u32 %v2866_v33, 16  ;;  %v1923_v59 = vld [vmem:[#allocation2 + $0x6c] sm:$0xf] }
 0x13e   : > { %4774 = vmatmul.mubr.bf16.gmra.mrb[104].mxu0 %v10527_v20  ;;  %4934 = vmatprep.mubr.bf16.mxu1 %v10591_v44  ;;  %v2132_v1 = vor.u32 %v2131_v27, %v2127_v19  ;;  %v3063_v53 = vrot.slane %v3061_v46, 4  ;;  %v3080_v2 = vshll.u32 %v2867_v37, 16  ;;  %v13533_v3 = vadd.f32 %v13485_v38, %v13479_v42  ;;  %v1924_v6 = vld [vmem:[#allocation2 + $0x70] sm:$0xf]  ;;  %v1925_v22 = vld [vmem:[#allocation2 + $0x74] sm:$0x1] }
 0x13f   : > { %4781 = vmatprep.mubr.bf16.mxu0 %v10560_v40  ;;  %4935 = vmatmul.mubr.bf16.gmra.mrb[72].mxu1 %v12310_v34  ;;  %v2123_v29 = vrot.slane %v2122_v52, 4  ;;  %v3066_v7 = vrot.slane %v3064_v54, 5  ;;  %v3072_v14 = vrot.slane %v3070_v55, 5  ;;  %v3076_v62 = vrot.slane %v3074_v58, 4  ;;  %v2868_v34 = vld [vmem:[#allocation2 + $0x78] sm:$0xf] }
 0x140   : > { %v13499_v50 = vpop.f32.mrb[8].mxu0  ;;  %16224 = vst [vmem:[#allocation14_spill] sm:$0xff] %v13533_v3  ;;  %v2133_v9 = vrot.slane %v2132_v1, 4  ;;  %v3082_v13 = vrot.slane %v3080_v2, 5  ;;  %v13537_v17 = vadd.f32 %v13497_v41, %v13495_v35  ;;  %v10545_v26 = vrot.slane %v2435_v60, 9 }
 0x141   : > { %v13509_v4 = vpop.f32.mrb[9].mxu0  ;;  %v2128_v42 = vsel %vm12805_vm2, %v2123_v29, %v2127_v19  ;;  %v3067_v38 = vor.u32 %v3066_v7, %v3063_v53  ;;  %v3077_v18 = vor.u32 %v3076_v62, %v3072_v14  ;;  %v2565_v20 = vrot.slane %v2436_v47, 5  ;;  %v2869_v44 = vld [vmem:[#allocation2 + $0x7c] sm:$0xf]  ;;  %v2870_v27 = vld [vmem:[#allocation2 + $0x80] sm:$0x1] }
 0x142   : > { %v13517_v39 = vpop.f32.mrb[10].mxu0  ;;  %16225 = vst [vmem:[#allocation15_spill] sm:$0xff] %v13537_v17  ;;  %v2138_v11 = vsel %vm12805_vm2, %v2133_v9, %v2137_v45  ;;  %v2568_v21 = vrot.slane %v2437_v12, 5  ;;  %v2140_v23 = vshrl.u32 %v1923_v59, 16  ;;  %v2143_v35 = vshll.u32 %v1923_v59, 16 }
 0x143   : > { %v13523_v61 = vpop.f32.mrb[11].mxu0  ;;  %v10528_v41 = vcombine.low %v2128_v42, %v2138_v11  ;;  %v3068_v15 = vrot.slane %v3067_v38, 4  ;;  %v3078_v5 = vrot.slane %v3077_v18, 4  ;;  %v2566_v31 = vsel %vm13026_vm13, %v10545_v26, %v2565_v20  ;;  %v2438_v55 = vld [vmem:[#allocation2 + $0x78] sm:$0xe] }
 0x144   : > { %v2567_v32 = vrot.slane %v2565_v20, 4  ;;  %v2142_v48 = vrot.slane %v2140_v23, 4  ;;  %v2145_v33 = vrot.slane %v2143_v35, 5  ;;  %v2149_v30 = vshll.u32 %v1924_v6, 16  ;;  %v2439_v47 = vld [vmem:[#allocation2 + $0x7c] sm:$0xf] }
 0x145   : > { %v3073_v40 = vsel %vm12805_vm2, %v3068_v15, %v3072_v14  ;;  %v3083_v63 = vsel %vm12805_vm2, %v3078_v5, %v3082_v13  ;;  %v2153_v19 = vshrl.u32 %v1924_v6, 16  ;;  %v2159_v37 = vshll.u32 %v1925_v22, 16  ;;  %v2440_v12 = vld [vmem:[#allocation2 + $0x80] sm:$0x1]  ;;  %v1926_v9 = vld [vmem:[#allocation2 + $0x78] sm:$0xf] }
 0x146   : > { %4782 = vmatmul.mubr.bf16.gmra.mrb[108].mxu0 %v10528_v41  ;;  %v10592_v45 = vcombine.low %v3073_v40, %v3083_v63  ;;  %v2569_v46 = vsel %vm13026_vm13, %v2567_v32, %v2568_v21  ;;  %v2146_v52 = vor.u32 %v2145_v33, %v2142_v48  ;;  %v2151_v54 = vrot.slane %v2149_v30, 5  ;;  %v1927_v38 = vld [vmem:[#allocation2 + $0x7c] sm:$0xf]  ;;  %v1928_v30 = vld [vmem:[#allocation2 + $0x80] sm:$0x1] }
 0x147   : > { %v10561_v60 = vcombine.low %v2566_v31, %v2569_v46  ;;  %v2155_v1 = vrot.slane %v2153_v19, 4  ;;  %v2161_v53 = vrot.slane %v2159_v37, 5  ;;  %v3085_v2 = vshrl.u32 %v2868_v34, 16  ;;  %v2453_v36 = vld [vmem:[#allocation2 + $0xb4] sm:$0xe] }
 0x148   : > { %v13527_v49 = vpop.f32.mrb[12].mxu0  ;;  %4942 = vmatprep.mubr.bf16.mxu1 %v10592_v45  ;;  %v2147_v7 = vrot.slane %v2146_v52, 4  ;;  %v3088_v14 = vshll.u32 %v2868_v34, 16  ;;  %v3094_v62 = vshll.u32 %v2869_v44, 16  ;;  %v3098_v59 = vshrl.u32 %v2869_v44, 16 }
 0x149   : > { %v13529_v0 = vpop.f32.mrb[13].mxu0  ;;  %4943 = vmatmul.mubr.bf16.gmra.mrb[76].mxu1 %v12311_v28  ;;  %4789 = vmatprep.mubr.bf16.mxu0 %v10561_v60  ;;  %v2156_v13 = vor.u32 %v2155_v1, %v2151_v54  ;;  %v3087_v26 = vrot.slane %v3085_v2, 4  ;;  %v3104_v6 = vshll.u32 %v2870_v27, 16  ;;  %v13561_v42 = vadd.f32 %v13509_v4, %v13499_v50  ;;  %v2871_v27 = vld [vmem:[#allocation2 + $0x84] sm:$0xf]  ;;  %v12313_v2 = vld [vmem:[#allocation2 + $0x78] sm:$0xff]  }
 0x14a   : > { %v13539_v16 = vpop.f32.mrb[14].mxu0  ;;  %v2152_v18 = vsel %vm12805_vm2, %v2147_v7, %v2151_v54  ;;  %v3090_v20 = vrot.slane %v3088_v14, 5  ;;  %v3096_v11 = vrot.slane %v3094_v62, 5  ;;  %v3100_v21 = vrot.slane %v3098_v59, 4  ;;  %v2872_v7 = vld [vmem:[#allocation2 + $0x88] sm:$0xf] }
 0x14b   : > { %v13543_v25 = vpop.f32.mrb[15].mxu0  ;;  %16226 = vst [vmem:[#allocation16_spill] sm:$0xff] %v13561_v42  ;;  %v2157_v23 = vrot.slane %v2156_v13, 4  ;;  %v3106_v35 = vrot.slane %v3104_v6, 5  ;;  %v13569_v41 = vadd.f32 %v13523_v61, %v13517_v39  ;;  %v10546_v15 = vrot.slane %v2438_v55, 9 }
 0x14c   : > { %v3091_v50 = vor.u32 %v3090_v20, %v3087_v26  ;;  %v3101_v4 = vor.u32 %v3100_v21, %v3096_v11  ;;  %v2572_v28 = vrot.slane %v2439_v47, 5  ;;  %v2575_v31 = vrot.slane %v2440_v12, 5  ;;  %v2441_v26 = vld [vmem:[#allocation2 + $0x84] sm:$0xe] }
 0x14d   : > { %16227 = vst [vmem:[#allocation17_spill] sm:$0xff] %v13569_v41  ;;  %v2162_v33 = vsel %vm12805_vm2, %v2157_v23, %v2161_v53  ;;  %v2164_v34 = vshrl.u32 %v1926_v9, 16  ;;  %v2167_v40 = vshll.u32 %v1926_v9, 16  ;;  %v2173_v63 = vshll.u32 %v1927_v38, 16  ;;  %v2873_v9 = vld [vmem:[#allocation2 + $0x8c] sm:$0x1] }
 0x14e   : > { %v10529_v61 = vcombine.low %v2152_v18, %v2162_v33  ;;  %v3092_v19 = vrot.slane %v3091_v50, 4  ;;  %v3102_v37 = vrot.slane %v3101_v4, 4  ;;  %v2573_v44 = vsel %vm13026_vm13, %v10546_v15, %v2572_v28  ;;  %v2442_v23 = vld [vmem:[#allocation2 + $0x88] sm:$0xf]  ;;  %v1929_v15 = vld [vmem:[#allocation2 + $0x84] sm:$0xf] }
 0x14f   : > { %v13571_v5 = vpop.f32.mrb[0].mxu1  ;;  %v2574_v52 = vrot.slane %v2572_v28, 4  ;;  %v2166_v54 = vrot.slane %v2164_v34, 4  ;;  %v2169_v55 = vrot.slane %v2167_v40, 5  ;;  %v2175_v60 = vrot.slane %v2173_v63, 5 }
 0x150   : > { %v13555_v58 = vpop.f32.mrb[16].mxu0  ;;  %v13575_v48 = vpop.f32.mrb[1].mxu1  ;;  %4790 = vmatmul.mubr.bf16.gmra.mrb[112].mxu0 %v10529_v61  ;;  %v3097_v1 = vsel %vm12805_vm2, %v3092_v19, %v3096_v11  ;;  %v3107_v53 = vsel %vm12805_vm2, %v3102_v37, %v3106_v35  ;;  %v2177_v47 = vshrl.u32 %v1927_v38, 16  ;;  %v2183_v12 = vshll.u32 %v1928_v30, 16  ;;  %v2443_v35 = vld [vmem:[#allocation2 + $0x8c] sm:$0x1] }
 0x151   : > { %v13557_v29 = vpop.f32.mrb[17].mxu0  ;;  %v13579_v39 = vpop.f32.mrb[2].mxu1  ;;  %v10593_v14 = vcombine.low %v3097_v1, %v3107_v53  ;;  %v2576_v62 = vsel %vm13026_vm13, %v2574_v52, %v2575_v31  ;;  %v2170_v59 = vor.u32 %v2169_v55, %v2166_v54  ;;  %v3109_v13 = vshrl.u32 %v2871_v27, 16  ;;  %v1930_v52 = vld [vmem:[#allocation2 + $0x88] sm:$0xf] }
 0x152   : > { %v13565_v22 = vpop.f32.mrb[18].mxu0  ;;  %v13583_v45 = vpop.f32.mrb[3].mxu1  ;;  %v10562_v18 = vcombine.low %v2573_v44, %v2576_v62  ;;  %v2179_v20 = vrot.slane %v2177_v47, 4  ;;  %v2185_v11 = vrot.slane %v2183_v12, 5  ;;  %v3112_v21 = vshll.u32 %v2871_v27, 16 }
 0x153   : > { %v13573_v32 = vpop.f32.mrb[19].mxu0  ;;  %4950 = vmatprep.mubr.bf16.mxu1 %v10593_v14  ;;  %v2171_v50 = vrot.slane %v2170_v59, 4  ;;  %v3111_v4 = vrot.slane %v3109_v13, 4  ;;  %v3118_v28 = vshll.u32 %v2872_v7, 16  ;;  %v3122_v31 = vshrl.u32 %v2872_v7, 16 }
 0x154   : > { %4951 = vmatmul.mubr.bf16.gmra.mrb[80].mxu1 %v12313_v2  ;;  %4797 = vmatprep.mubr.bf16.mxu0 %v10562_v18  ;;  %v2180_v33 = vor.u32 %v2179_v20, %v2175_v60  ;;  %v3114_v30 = vrot.slane %v3112_v21, 5  ;;  %v3128_v34 = vshll.u32 %v2873_v9, 16  ;;  %v13599_v40 = vadd.f32 %v13529_v0, %v13527_v49 }
 0x155   : > { %v2176_v19 = vsel %vm12805_vm2, %v2171_v50, %v2175_v60  ;;  %v3120_v37 = vrot.slane %v3118_v28, 5  ;;  %v3124_v44 = vrot.slane %v3122_v31, 4  ;;  %v13609_v27 = vadd.f32 %v13543_v25, %v13539_v16  ;;  %v1931_v25 = vld [vmem:[#allocation2 + $0x8c] sm:$0x1] }
 0x156   : > { %16228 = vst [vmem:[#allocation18_spill] sm:$0xff] %v13599_v40  ;;  %v2181_v55 = vrot.slane %v2180_v33, 4  ;;  %v3115_v1 = vor.u32 %v3114_v30, %v3111_v4  ;;  %v3130_v49 = vrot.slane %v3128_v34, 5  ;;  %v10547_v0 = vrot.slane %v2441_v26, 9  ;;  %v12314_v26 = vld [vmem:[#allocation2 + $0x84] sm:$0xff]  }
 0x157   : > { %v13601_v63 = vpop.f32.mrb[4].mxu1  ;;  %16229 = vst [vmem:[#allocation19_spill] sm:$0xff] %v13609_v27  ;;  %v3125_v2 = vor.u32 %v3124_v44, %v3120_v37  ;;  %v2579_v47 = vrot.slane %v2442_v23, 5  ;;  %v2582_v12 = vrot.slane %v2443_v35, 5  ;;  %v2188_v7 = vshrl.u32 %v1929_v15, 16 }
 0x158   : > { %v13585_v46 = vpop.f32.mrb[20].mxu0  ;;  %v13611_v54 = vpop.f32.mrb[5].mxu1  ;;  %v2186_v14 = vsel %vm12805_vm2, %v2181_v55, %v2185_v11  ;;  %v3116_v16 = vrot.slane %v3115_v1, 4  ;;  %v2191_v62 = vshll.u32 %v1929_v15, 16  ;;  %v2197_v59 = vshll.u32 %v1930_v52, 16 }
 0x159   : > { %v13593_v6 = vpop.f32.mrb[21].mxu0  ;;  %v13613_v53 = vpop.f32.mrb[6].mxu1  ;;  %v10530_v13 = vcombine.low %v2176_v19, %v2186_v14  ;;  %v3126_v18 = vrot.slane %v3125_v2, 4  ;;  %v2580_v20 = vsel %vm13026_vm13, %v10547_v0, %v2579_v47  ;;  %v2581_v21 = vrot.slane %v2579_v47, 4  ;;  %v2874_v23 = vld [vmem:[#allocation2 + $0x90] sm:$0xf] }
 0x15a   : > { %v13595_v38 = vpop.f32.mrb[22].mxu0  ;;  %v13615_v60 = vpop.f32.mrb[7].mxu1  ;;  %v2875_v35 = vld [vmem:[#allocation2 + $0x94] sm:$0xf]  ;;  %v3121_v50 = vsel %vm12805_vm2, %v3116_v16, %v3120_v37  ;;  %v2190_v4 = vrot.slane %v2188_v7, 4  ;;  %v2193_v11 = vrot.slane %v2191_v62, 5 }
 0x15b   : > { %v13603_v61 = vpop.f32.mrb[23].mxu0  ;;  %v2199_v28 = vrot.slane %v2197_v59, 5  ;;  %4798 = vmatmul.mubr.bf16.gmra.mrb[116].mxu0 %v10530_v13  ;;  %v3131_v15 = vsel %vm12805_vm2, %v3126_v18, %v3130_v49  ;;  %v2583_v33 = vsel %vm13026_vm13, %v2581_v21, %v2582_v12  ;;  %v2201_v30 = vshrl.u32 %v1930_v52, 16  ;;  %v2876_v19 = vld [vmem:[#allocation2 + $0x98] sm:$0x1] }
 0x15c   : > { %v2207_v34 = vshll.u32 %v1931_v25, 16  ;;  %v10594_v44 = vcombine.low %v3121_v50, %v3131_v15  ;;  %v10563_v55 = vcombine.low %v2580_v20, %v2583_v33  ;;  %v2194_v1 = vor.u32 %v2193_v11, %v2190_v4  ;;  %v2444_v16 = vld [vmem:[#allocation2 + $0x90] sm:$0xe]  ;;  %v2445_v20 = vld [vmem:[#allocation2 + $0x94] sm:$0xf] }
 0x15d   : > { %v3133_v0 = vshrl.u32 %v2874_v23, 16  ;;  %v2203_v2 = vrot.slane %v2201_v30, 4  ;;  %v3136_v7 = vshll.u32 %v2874_v23, 16  ;;  %v3142_v14 = vshll.u32 %v2875_v35, 16  ;;  %v1933_v30 = vld [vmem:[#allocation2 + $0x94] sm:$0xf] }
 0x15e   : > { %v2209_v47 = vrot.slane %v2207_v34, 5  ;;  %4958 = vmatprep.mubr.bf16.mxu1 %v10594_v44  ;;  %4805 = vmatprep.mubr.bf16.mxu0 %v10563_v55  ;;  %v2195_v49 = vrot.slane %v2194_v1, 4  ;;  %v3146_v59 = vshrl.u32 %v2875_v35, 16  ;;  %v3152_v12 = vshll.u32 %v2876_v19, 16  ;;  %v2446_v35 = vld [vmem:[#allocation2 + $0x98] sm:$0x1] }
 0x15f   : > { %v3135_v62 = vrot.slane %v3133_v0, 4  ;;  %4959 = vmatmul.mubr.bf16.gmra.mrb[84].mxu1 %v12314_v26  ;;  %v2204_v52 = vor.u32 %v2203_v2, %v2199_v28  ;;  %v3138_v25 = vrot.slane %v3136_v7, 5  ;;  %v3144_v13 = vrot.slane %v3142_v14, 5 }
 0x160   : > { %v13619_v9 = vpop.f32.mrb[24].mxu0  ;;  %v13635_v18 = vadd.f32 %v13557_v29, %v13555_v58  ;;  %v13637_v21 = vpop.f32.mrb[8].mxu1  ;;  %v3148_v50 = vrot.slane %v3146_v59, 4  ;;  %v13643_v4 = vadd.f32 %v13573_v32, %v13565_v22  ;;  %v2200_v26 = vsel %vm12805_vm2, %v2195_v49, %v2199_v28  ;;  %v1932_v29 = vld [vmem:[#allocation2 + $0x90] sm:$0xf] }
 0x161   : > { %v13625_v31 = vpop.f32.mrb[25].mxu0  ;;  %v13645_v11 = vpop.f32.mrb[9].mxu1  ;;  %v2205_v15 = vrot.slane %v2204_v52, 4  ;;  %v3139_v33 = vor.u32 %v3138_v25, %v3135_v62  ;;  %v13651_v58 = vadd.f32 %v13575_v48, %v13571_v5  ;;  %v3154_v44 = vrot.slane %v3152_v12, 5  ;;  %v1934_v48 = vld [vmem:[#allocation2 + $0x98] sm:$0x1] }
 0x162   : > { %v13631_v37 = vpop.f32.mrb[26].mxu0  ;;  %v13653_v34 = vpop.f32.mrb[10].mxu1  ;;  %v3149_v19 = vor.u32 %v3148_v50, %v3144_v13  ;;  %v10548_v22 = vrot.slane %v2444_v16, 9  ;;  %v2586_v32 = vrot.slane %v2445_v20, 5  ;;  %v2589_v2 = vrot.slane %v2446_v35, 5  ;;  %v12316_v49 = vld [vmem:[#allocation2 + $0x90] sm:$0xff]  }
 0x163   : > { %v13639_v23 = vpop.f32.mrb[27].mxu0  ;;  %16230 = vst [vmem:[#allocation20_spill] sm:$0xff] %v13651_v58  ;;  %v13655_v55 = vpop.f32.mrb[11].mxu1  ;;  %v2210_v28 = vsel %vm12805_vm2, %v2205_v15, %v2209_v47  ;;  %v3140_v0 = vrot.slane %v3139_v33, 4  ;;  %v13663_v5 = vadd.f32 %v13583_v45, %v13579_v39  ;;  %v2877_v59 = vld [vmem:[#allocation2 + $0x9c] sm:$0xf] }
 0x164   : > { %v10531_v7 = vcombine.low %v2200_v26, %v2210_v28  ;;  %v3150_v14 = vrot.slane %v3149_v19, 4  ;;  %v2587_v16 = vsel %vm13026_vm13, %v10548_v22, %v2586_v32  ;;  %v2588_v62 = vrot.slane %v2586_v32, 4  ;;  %v2878_v12 = vld [vmem:[#allocation2 + $0xa0] sm:$0xf]  ;;  %v2879_v32 = vld [vmem:[#allocation2 + $0xa4] sm:$0x1] }
 0x165   : > { %16231 = vst [vmem:[#allocation21_spill] sm:$0xff] %v13663_v5  ;;  %v3145_v52 = vsel %vm12805_vm2, %v3140_v0, %v3144_v13  ;;  %v2212_v47 = vshrl.u32 %v1932_v29, 16  ;;  %v2215_v25 = vshll.u32 %v1932_v29, 16  ;;  %v2221_v20 = vshll.u32 %v1933_v30, 16  ;;  %v2450_v5 = vld [vmem:[#allocation2 + $0xa8] sm:$0xe] }
 0x166   : > { %4806 = vmatmul.mubr.bf16.gmra.mrb[120].mxu0 %v10531_v7  ;;  %v3155_v39 = vsel %vm12805_vm2, %v3150_v14, %v3154_v44  ;;  %v2590_v45 = vsel %vm13026_vm13, %v2588_v62, %v2589_v2  ;;  %v2225_v35 = vshrl.u32 %v1933_v30, 16  ;;  %v2231_v26 = vshll.u32 %v1934_v48, 16 }
 0x167   : > { %v10595_v19 = vcombine.low %v3145_v52, %v3155_v39  ;;  %v10564_v13 = vcombine.low %v2587_v16, %v2590_v45  ;;  %v2214_v22 = vrot.slane %v2212_v47, 4  ;;  %v2217_v29 = vrot.slane %v2215_v25, 5  ;;  %v2447_v45 = vld [vmem:[#allocation2 + $0x9c] sm:$0xe] }
 0x168   : > { %v2223_v7 = vrot.slane %v2221_v20, 5  ;;  %v2227_v44 = vrot.slane %v2225_v35, 4  ;;  %v2233_v14 = vrot.slane %v2231_v26, 5  ;;  %v3157_v43 = vshrl.u32 %v2877_v59, 16 }
 0x169   : > { %v13677_v33 = vpop.f32.mrb[12].mxu1  ;;  %4966 = vmatprep.mubr.bf16.mxu1 %v10595_v19  ;;  %4813 = vmatprep.mubr.bf16.mxu0 %v10564_v13  ;;  %v2218_v30 = vor.u32 %v2217_v29, %v2214_v22  ;;  %v3160_v48 = vshll.u32 %v2877_v59, 16  ;;  %v3166_v62 = vshll.u32 %v2878_v12, 16  ;;  %v3170_v52 = vshrl.u32 %v2878_v12, 16  ;;  %v2448_v13 = vld [vmem:[#allocation2 + $0xa0] sm:$0xf] }
 0x16a   : > { %v13681_v0 = vpop.f32.mrb[13].mxu1  ;;  %4967 = vmatmul.mubr.bf16.gmra.mrb[88].mxu1 %v12316_v49  ;;  %v2228_v47 = vor.u32 %v2227_v44, %v2223_v7  ;;  %v3159_v25 = vrot.slane %v3157_v43, 4  ;;  %v3176_v39 = vshll.u32 %v2879_v32, 16  ;;  %v13689_v20 = vadd.f32 %v13593_v6, %v13585_v46  ;;  %v2449_v49 = vld [vmem:[#allocation2 + $0xa4] sm:$0x1] }
 0x16b   : > { %v13683_v2 = vpop.f32.mrb[14].mxu1  ;;  %v2219_v35 = vrot.slane %v2218_v30, 4  ;;  %v3162_v26 = vrot.slane %v3160_v48, 5  ;;  %v3168_v56 = vrot.slane %v3166_v62, 5  ;;  %v3172_v19 = vrot.slane %v3170_v52, 4 }
 0x16c   : > { %v13657_v1 = vpop.f32.mrb[28].mxu0  ;;  %v13685_v16 = vpop.f32.mrb[15].mxu1  ;;  %v2229_v22 = vrot.slane %v2228_v47, 4  ;;  %v3178_v59 = vrot.slane %v3176_v39, 5  ;;  %v13693_v12 = vadd.f32 %v13603_v61, %v13595_v38  ;;  %v13699_v46 = vadd.f32 %v13611_v54, %v13601_v63  ;;  %v1935_v6 = vld [vmem:[#allocation2 + $0x9c] sm:$0xf] }
 0x16d   : > { %v13669_v50 = vpop.f32.mrb[29].mxu0  ;;  %v2224_v43 = vsel %vm12805_vm2, %v2219_v35, %v2223_v7  ;;  %v3163_v29 = vor.u32 %v3162_v26, %v3159_v25  ;;  %v3173_v32 = vor.u32 %v3172_v19, %v3168_v56  ;;  %v1936_v44 = vld [vmem:[#allocation2 + $0xa0] sm:$0xf]  ;;  %v10549_v48 = vrot.slane %v2447_v45, 9  ;;  %v1937_v52 = vld [vmem:[#allocation2 + $0xa4] sm:$0x1] }
 0x16e   : > { %v13675_v15 = vpop.f32.mrb[30].mxu0  ;;  %16232 = vst [vmem:[#allocation22_spill] sm:$0xff] %v13699_v46  ;;  %v2234_v30 = vsel %vm12805_vm2, %v2229_v22, %v2233_v14  ;;  %v2593_v62 = vrot.slane %v2448_v13, 5  ;;  %v12317_v39 = vld [vmem:[#allocation2 + $0x9c] sm:$0xff]   ;;  %v2596_v27 = vrot.slane %v2449_v49, 5  ;;  %v13709_v54 = vadd.f32 %v13615_v60, %v13613_v53 }
 0x16f   : > { %v13679_v28 = vpop.f32.mrb[31].mxu0  ;;  %v10532_v38 = vcombine.low %v2224_v43, %v2234_v30  ;;  %v3164_v61 = vrot.slane %v3163_v29, 4  ;;  %v3174_v47 = vrot.slane %v3173_v32, 4  ;;  %v2236_v35 = vshrl.u32 %v1935_v6, 16  ;;  %v2880_v14 = vld [vmem:[#allocation2 + $0xa8] sm:$0xf] }
 0x170   : > { %v2594_v25 = vsel %vm13026_vm13, %v10549_v48, %v2593_v62  ;;  %v2595_v63 = vrot.slane %v2593_v62, 4  ;;  %16233 = vst [vmem:[#allocation23_spill] sm:$0xff] %v13709_v54  ;;  %v2239_v22 = vshll.u32 %v1935_v6, 16  ;;  %v2245_v49 = vshll.u32 %v1936_v44, 16  ;;  %v2881_v43 = vld [vmem:[#allocation2 + $0xac] sm:$0xf] }
 0x171   : > { %4814 = vmatmul.mubr.bf16.gmra.mrb[124].mxu0 %v10532_v38  ;;  %v3169_v19 = vsel %vm12805_vm2, %v3164_v61, %v3168_v56  ;;  %v3179_v13 = vsel %vm12805_vm2, %v3174_v47, %v3178_v59  ;;  %v2238_v30 = vrot.slane %v2236_v35, 4  ;;  %v2249_v48 = vshrl.u32 %v1936_v44, 16  ;;  %v2882_v62 = vld [vmem:[#allocation2 + $0xb0] sm:$0x1] }
 0x172   : > { %v13713_v26 = vpop.f32.mrb[16].mxu1  ;;  %v10596_v60 = vcombine.low %v3169_v19, %v3179_v13  ;;  %v2597_v32 = vsel %vm13026_vm13, %v2595_v63, %v2596_v27  ;;  %v2241_v59 = vrot.slane %v2239_v22, 5  ;;  %v2247_v6 = vrot.slane %v2245_v49, 5 }
 0x173   : > { %v13721_v53 = vpop.f32.mrb[17].mxu1  ;;  %v10565_v61 = vcombine.low %v2594_v25, %v2597_v32  ;;  %v2255_v47 = vshll.u32 %v1937_v52, 16  ;;  %v2251_v54 = vrot.slane %v2249_v48, 4  ;;  %v3181_v46 = vshrl.u32 %v2880_v14, 16  ;;  %v2451_v32 = vld [vmem:[#allocation2 + $0xac] sm:$0xf] }
 0x174   : > { %v13727_v56 = vpop.f32.mrb[18].mxu1  ;;  %4974 = vmatprep.mubr.bf16.mxu1 %v10596_v60  ;;  %v3184_v19 = vshll.u32 %v2880_v14, 16  ;;  %v3190_v13 = vshll.u32 %v2881_v43, 16  ;;  %v2242_v27 = vor.u32 %v2241_v59, %v2238_v30  ;;  %v3194_v63 = vshrl.u32 %v2881_v43, 16 }
 0x175   : > { %v13703_v7 = vpop.f32.mrb[32].mxu0  ;;  %v13729_v40 = vpop.f32.mrb[19].mxu1  ;;  %4975 = vmatmul.mubr.bf16.gmra.mrb[92].mxu1 %v12317_v39  ;;  %4821 = vmatprep.mubr.bf16.mxu0 %v10565_v61  ;;  %v2257_v44 = vrot.slane %v2255_v47, 5  ;;  %v3200_v35 = vshll.u32 %v2882_v62, 16  ;;  %v2252_v25 = vor.u32 %v2251_v54, %v2247_v6  ;;  %v3183_v22 = vrot.slane %v3181_v46, 4 }
 0x176   : > { %v13711_v45 = vpop.f32.mrb[33].mxu0  ;;  %v3186_v49 = vrot.slane %v3184_v19, 5  ;;  %v3192_v52 = vrot.slane %v3190_v13, 5  ;;  %v2243_v60 = vrot.slane %v2242_v27, 4  ;;  %v3196_v48 = vrot.slane %v3194_v63, 4 }
 0x177   : > { %v13719_v29 = vpop.f32.mrb[34].mxu0  ;;  %v13737_v39 = vadd.f32 %v13625_v31, %v13619_v9  ;;  %v2253_v43 = vrot.slane %v2252_v25, 4  ;;  %v13743_v62 = vadd.f32 %v13639_v23, %v13631_v37  ;;  %v13747_v46 = vadd.f32 %v13645_v11, %v13637_v21  ;;  %v2452_v54 = vld [vmem:[#allocation2 + $0xb0] sm:$0x1]  ;;  %v1938_v19 = vld [vmem:[#allocation2 + $0xa8] sm:$0xf] }
 0x178   : > { %v13725_v38 = vpop.f32.mrb[35].mxu0  ;;  %v3187_v30 = vor.u32 %v3186_v49, %v3183_v22  ;;  %v2248_v59 = vsel %vm12805_vm2, %v2243_v60, %v2247_v6  ;;  %v3197_v9 = vor.u32 %v3196_v48, %v3192_v52  ;;  %v3202_v31 = vrot.slane %v3200_v35, 5  ;;  %v1939_v63 = vld [vmem:[#allocation2 + $0xac] sm:$0xf]  ;;  %v12324_v11 = vld [vmem:[%s16194_s3 + $0x40] sm:$0xff]  }
 0x179   : > { %16234 = vst [vmem:[#allocation24_spill] sm:$0xff] %v13747_v46  ;;  %v10550_v47 = vrot.slane %v2450_v5, 9  ;;  %v2258_v37 = vsel %vm12805_vm2, %v2253_v43, %v2257_v44  ;;  %v2600_v27 = vrot.slane %v2451_v32, 5  ;;  %v2603_v22 = vrot.slane %v2452_v54, 5  ;;  %v1940_v35 = vld [vmem:[#allocation2 + $0xb0] sm:$0x1]  ;;  %11538 = vmatprep.subr.bf16.mxu1 %v12324_v11 }
 0x17a   : > { %v3188_v23 = vrot.slane %v3187_v30, 4  ;;  %v10533_v25 = vcombine.low %v2248_v59, %v2258_v37  ;;  %v3198_v6 = vrot.slane %v3197_v9, 4  ;;  %v13764_v5 = vadd.f32 %v13655_v55, %v13653_v34  ;;  %v12325_v44 = vld [vmem:[%s16194_s3] sm:$0xff]   ;;  %v2883_v30 = vld [vmem:[#allocation2 + $0xb4] sm:$0xf]  ;;  %v12319_v55 = vld [vmem:[#allocation2 + $0xa8] sm:$0xff]  }
 0x17b   : > { %v2601_v60 = vsel %vm13026_vm13, %v10550_v47, %v2600_v27  ;;  %v2602_v48 = vrot.slane %v2600_v27, 4  ;;  %v2260_v43 = vshrl.u32 %v1938_v19, 16  ;;  %v2263_v59 = vshll.u32 %v1938_v19, 16  ;;  %11539 = vmatpush3.bf16.msra.mxu1 %v12325_v44  ;;  %v2885_v46 = vld [vmem:[#allocation2 + $0xbc] sm:$0x1] }
 0x17c   : > { %16235 = vst [vmem:[#allocation25_spill] sm:$0xff] %v13764_v5  ;;  %v3193_v32 = vsel %vm12805_vm2, %v3188_v23, %v3192_v52  ;;  %4822 = vmatmul.mubr.bf16.gmra.mrb[128].mxu0 %v10533_v25  ;;  %v3203_v34 = vsel %vm12805_vm2, %v3198_v6, %v3202_v31  ;;  %v2269_v9 = vshll.u32 %v1939_v63, 16  ;;  %v2273_v37 = vshrl.u32 %v1939_v63, 16  ;;  %v2884_v5 = vld [vmem:[#allocation2 + $0xb8] sm:$0xf] }
 0x17d   : > { %v13731_v58 = vpop.f32.mrb[36].mxu0  ;;  %v10597_v52 = vcombine.low %v3193_v32, %v3203_v34  ;;  %v2604_v47 = vsel %vm13026_vm13, %v2602_v48, %v2603_v22  ;;  %v2262_v23 = vrot.slane %v2260_v43, 4  ;;  %v2279_v27 = vshll.u32 %v1940_v35, 16  ;;  %v2454_v22 = vld [vmem:[#allocation2 + $0xb8] sm:$0xf] }
 0x17e   : > { %v13733_v41 = vpop.f32.mrb[37].mxu0  ;;  %v10566_v42 = vcombine.low %v2601_v60, %v2604_v47  ;;  %v2265_v17 = vrot.slane %v2263_v59, 5  ;;  %v2271_v11 = vrot.slane %v2269_v9, 5  ;;  %v2275_v25 = vrot.slane %v2273_v37, 4  ;;  %v2455_v9 = vld [vmem:[#allocation2 + $0xbc] sm:$0x1] }
 0x17f   : > { %v13739_v14 = vpop.f32.mrb[38].mxu0  ;;  %v13753_v13 = vpop.f32.mrb[20].mxu1  ;;  %4982 = vmatprep.mubr.bf16.mxu1 %v10597_v52  ;;  %v2281_v3 = vrot.slane %v2279_v27, 5  ;;  %v3205_v31 = vshrl.u32 %v2883_v30, 16  ;;  %v3208_v6 = vshll.u32 %v2883_v30, 16  ;;  %v3214_v19 = vshll.u32 %v2884_v5, 16 }
 0x180   : > { %v13749_v61 = vpop.f32.mrb[39].mxu0  ;;  %v13757_v21 = vpop.f32.mrb[21].mxu1  ;;  %4983 = vmatmul.mubr.bf16.gmra.mrb[96].mxu1 %v12319_v55  ;;  %4829 = vmatprep.mubr.bf16.mxu0 %v10566_v42  ;;  %v2266_v63 = vor.u32 %v2265_v17, %v2262_v23  ;;  %v2276_v44 = vor.u32 %v2275_v25, %v2271_v11  ;;  %v3218_v32 = vshrl.u32 %v2884_v5, 16  ;;  %v3224_v34 = vshll.u32 %v2885_v46, 16 }
 0x181   : > { %v13766_v49 = vpop.f32.mrb[22].mxu1  ;;  %v3207_v35 = vrot.slane %v3205_v31, 4  ;;  %v3210_v60 = vrot.slane %v3208_v6, 5  ;;  %v3216_v43 = vrot.slane %v3214_v19, 5  ;;  %v13785_v59 = vadd.f32 %v13669_v50, %v13657_v1  ;;  %v1941_v50 = vld [vmem:[#allocation2 + $0xb4] sm:$0xf] }
 0x182   : > { %v13775_v54 = vpop.f32.mrb[23].mxu1  ;;  %v2267_v37 = vrot.slane %v2266_v63, 4  ;;  %v2277_v55 = vrot.slane %v2276_v44, 4  ;;  %v3220_v42 = vrot.slane %v3218_v32, 4  ;;  %v3226_v52 = vrot.slane %v3224_v34, 5 }
 0x183   : > { %16236 = vst [vmem:[#allocation26_spill] sm:$0xff] %v13785_v59  ;;  %v3211_v46 = vor.u32 %v3210_v60, %v3207_v35  ;;  %v13795_v47 = vadd.f32 %v13679_v28, %v13675_v15  ;;  %v13799_v1 = vadd.f32 %v13681_v0, %v13677_v33  ;;  %v10551_v19 = vrot.slane %v2453_v36, 9  ;;  %v1942_v44 = vld [vmem:[#allocation2 + $0xb8] sm:$0xf]  ;;  %v1943_v60 = vld [vmem:[#allocation2 + $0xbc] sm:$0x1] }
 0x184   : > { %v2272_v25 = vsel %vm12805_vm2, %v2267_v37, %v2271_v11  ;;  %v2282_v31 = vsel %vm12805_vm2, %v2277_v55, %v2281_v3  ;;  %v3221_v6 = vor.u32 %v3220_v42, %v3216_v43  ;;  %v638_v15 = vrot.slane %v13275_v10, 4  ;;  %v12320_v37 = vld [vmem:[#allocation2 + $0xb4] sm:$0xff]   ;;  %v802_v42 = vld [vmem:[#allocation2 + $0xc8] sm:$0x1] }
 0x185   : > { %16237 = vst [vmem:[#allocation27_spill] sm:$0xff] %v13795_v47  ;;  %16238 = vst [vmem:[#allocation28_spill] sm:$0xff] %v13799_v1  ;;  %v10534_v28 = vcombine.low %v2272_v25, %v2282_v31  ;;  %v3212_v33 = vrot.slane %v3211_v46, 4  ;;  %v2607_v0 = vrot.slane %v2454_v22, 5  ;;  %v2610_v35 = vrot.slane %v2455_v9, 5 }
 0x186   : > { %v3222_v34 = vrot.slane %v3221_v6, 4  ;;  %v13816_v11 = vadd.f32 %v13685_v16, %v13683_v2  ;;  %v2284_v3 = vshrl.u32 %v1941_v50, 16  ;;  %v2287_v55 = vshll.u32 %v1941_v50, 16  ;;  %v2886_v16 = vld [vmem:[#allocation2 + $0xc0] sm:$0xf] }
 0x187   : > { %4830 = vmatmul.mubr.bf16.gmra.mrb[132].mxu0 %v10534_v28  ;;  %v3217_v36 = vsel %vm12805_vm2, %v3212_v33, %v3216_v43  ;;  %v2608_v10 = vsel %vm13026_vm13, %v10551_v19, %v2607_v0  ;;  %v2609_v22 = vrot.slane %v2607_v0, 4  ;;  %v2293_v25 = vshll.u32 %v1942_v44, 16  ;;  %v3357_v47 = vld [vmem:[#allocation2 + $0x1c] sm:$0xf] }
 0x188   : > { %v13781_v48 = vpop.f32.mrb[24].mxu1  ;;  %16239 = vst [vmem:[#allocation29_spill] sm:$0xff] %v13816_v11  ;;  %v3227_v9 = vsel %vm12805_vm2, %v3222_v34, %v3226_v52  ;;  %v2286_v46 = vrot.slane %v2284_v3, 4  ;;  %v2297_v2 = vshrl.u32 %v1942_v44, 16  ;;  %v2289_v28 = vrot.slane %v2287_v55, 5 }
 0x189   : > { %v13787_v30 = vpop.f32.mrb[25].mxu1  ;;  %v10598_v6 = vcombine.low %v3217_v36, %v3227_v9  ;;  %v2611_v43 = vsel %vm13026_vm13, %v2609_v22, %v2610_v35  ;;  %v2303_v33 = vshll.u32 %v1943_v60, 16  ;;  %v2887_v11 = vld [vmem:[#allocation2 + $0xc4] sm:$0xf]  ;;  %v2295_v0 = vrot.slane %v2293_v25, 5 }
 0x18a   : > { %v13791_v5 = vpop.f32.mrb[26].mxu1  ;;  %v10567_v50 = vcombine.low %v2608_v10, %v2611_v43  ;;  %v2299_v1 = vrot.slane %v2297_v2, 4  ;;  %v803_v52 = vsel %vm12859_vm9, %v638_v15, %v802_v42  ;;  %v2290_v3 = vor.u32 %v2289_v28, %v2286_v46  ;;  %v12326_v10 = vld [vmem:[%s16194_s3 + $0x48] sm:$0xff]   ;;  %v2456_v25 = vld [vmem:[#allocation2 + $0xc0] sm:$0xe] }
 0x18b   : > { %v13789_v17 = vpop.f32.mrb[40].mxu0  ;;  %v13803_v27 = vpop.f32.mrb[27].mxu1  ;;  %4990 = vmatprep.mubr.bf16.mxu1 %v10598_v6  ;;  %v2305_v36 = vrot.slane %v2303_v33, 5  ;;  %804 = vst [vmem:[#allocation2 + $0xc8] sm:$0x1] %v803_v52  ;;  %v3229_v35 = vshrl.u32 %v2886_v16, 16  ;;  %v13845_v46 = vadd.f32 %v13711_v45, %v13703_v7  ;;  %11540 = vmatprep.subr.bf16.mxu1 %v12326_v10 }
 0x18c   : > { %v13801_v23 = vpop.f32.mrb[41].mxu0  ;;  %v3232_v22 = vshll.u32 %v2886_v16, 16  ;;  %4991 = vmatmul.mubr.bf16.gmra.mrb[100].mxu1 %v12320_v37  ;;  %4837 = vmatprep.mubr.bf16.mxu0 %v10567_v50  ;;  %v2300_v15 = vor.u32 %v2299_v1, %v2295_v0  ;;  %v3238_v42 = vshll.u32 %v2887_v11, 16  ;;  %v3242_v9 = vshrl.u32 %v2887_v11, 16  ;;  %v12327_v16 = vld [vmem:[%s16194_s3 + $0x8] sm:$0xff]  }
 0x18d   : > { %v13809_v63 = vpop.f32.mrb[42].mxu0  ;;  %16240 = vst [vmem:[#allocation30_spill] sm:$0xff] %v13845_v46  ;;  %v2291_v6 = vrot.slane %v2290_v3, 4  ;;  %v3231_v43 = vrot.slane %v3229_v35, 4  ;;  %v13854_v37 = vadd.f32 %v13725_v38, %v13719_v29  ;;  %v2457_v1 = vld [vmem:[#allocation2 + $0xc4] sm:$0xf]  ;;  %11541 = vmatpush3.bf16.msra.mxu1 %v12327_v16  ;;  %v13862_v3 = vadd.f32 %v13721_v53, %v13713_v26 }
 0x18e   : > { %v13812_v32 = vpop.f32.mrb[43].mxu0  ;;  %v3234_v28 = vrot.slane %v3232_v22, 5  ;;  %v2301_v7 = vrot.slane %v2300_v15, 4  ;;  %v3240_v45 = vrot.slane %v3238_v42, 5  ;;  %v3244_v33 = vrot.slane %v3242_v9, 4 }
 0x18f   : > { %16241 = vst [vmem:[#allocation31_spill] sm:$0xff] %v13854_v37  ;;  %v1944_v50 = vld [vmem:[#allocation2 + $0xc0] sm:$0xf]  ;;  %v2296_v52 = vsel %vm12805_vm2, %v2291_v6, %v2295_v0  ;;  %16242 = vst [vmem:[#allocation32_spill] sm:$0xff] %v13862_v3  ;;  %v10552_v35 = vrot.slane %v2456_v25, 9  ;;  %v2614_v22 = vrot.slane %v2457_v1, 5  ;;  %v13868_v42 = vadd.f32 %v13729_v40, %v13727_v56 }
 0x190   : > { %v13824_v31 = vpop.f32.mrb[28].mxu1  ;;  %v3235_v51 = vor.u32 %v3234_v28, %v3231_v43  ;;  %v2306_v29 = vsel %vm12805_vm2, %v2301_v7, %v2305_v36  ;;  %v3245_v38 = vor.u32 %v3244_v33, %v3240_v45  ;;  %v1945_v9 = vld [vmem:[#allocation2 + $0xc4] sm:$0xf]  ;;  %v2308_v16 = vshrl.u32 %v1944_v50, 16  ;;  %v2889_v0 = vld [vmem:[#allocation2 + $0xcc] sm:$0xf] }
 0x191   : > { %v13828_v19 = vpop.f32.mrb[29].mxu1  ;;  %v10535_v10 = vcombine.low %v2296_v52, %v2306_v29  ;;  %16243 = vst [vmem:[#allocation33_spill] sm:$0xff] %v13868_v42  ;;  %v2615_v26 = vsel %vm13026_vm13, %v10552_v35, %v2614_v22  ;;  %v2616_v53 = vrot.slane %v2614_v22, 4  ;;  %v13874_v36 = vadd.f32 %v13733_v41, %v13731_v58  ;;  %v2890_v58 = vld [vmem:[#allocation2 + $0xd0] sm:$0xf] }
 0x192   : > { %v13834_v44 = vpop.f32.mrb[30].mxu1  ;;  %v3236_v15 = vrot.slane %v3235_v51, 4  ;;  %v2888_v6 = vld [vmem:[#allocation2 + $0xc8] sm:$0x1]  ;;  %v3246_v43 = vrot.slane %v3245_v38, 4  ;;  %v2310_v1 = vrot.slane %v2308_v16, 4 }
 0x193   : > { %v13832_v34 = vpop.f32.mrb[44].mxu0  ;;  %v13838_v55 = vpop.f32.mrb[31].mxu1  ;;  %v2458_v28 = vld [vmem:[#allocation2 + $0xc8] sm:$0x1]  ;;  %16244 = vst [vmem:[#allocation34_spill] sm:$0xff] %v13874_v36  ;;  %4838 = vmatmul.mubr.bf16.gmra.mrb[136].mxu0 %v10535_v10  ;;  %v3248_v40 = vshll.u32 %v2888_v6, 16 }
 0x194   : > { %v13836_v60 = vpop.f32.mrb[45].mxu0  ;;  %v3241_v51 = vsel %vm12805_vm2, %v3236_v15, %v3240_v45  ;;  %v2617_v56 = vrot.slane %v2458_v28, 5  ;;  %v1946_v25 = vld [vmem:[#allocation2 + $0xc8] sm:$0x1]  ;;  %v2311_v33 = vshll.u32 %v1944_v50, 16  ;;  %v2317_v52 = vshll.u32 %v1945_v9, 16 }
 0x195   : > { %v13847_v2 = vpop.f32.mrb[46].mxu0  ;;  %v2321_v29 = vshrl.u32 %v1945_v9, 16  ;;  %v2327_v38 = vshll.u32 %v1946_v25, 16  ;;  %v3250_v22 = vrot.slane %v3248_v40, 5  ;;  %v3253_v10 = vshrl.u32 %v2889_v0, 16  ;;  %v12322_v25 = vld [vmem:[#allocation2 + $0xc0] sm:$0xff]  }
 0x196   : > { %v13856_v11 = vpop.f32.mrb[47].mxu0  ;;  %v2618_v41 = vsel %vm13026_vm13, %v2616_v53, %v2617_v56  ;;  %v3256_v42 = vshll.u32 %v2889_v0, 16  ;;  %v2313_v6 = vrot.slane %v2311_v33, 5  ;;  %v2319_v16 = vrot.slane %v2317_v52, 5  ;;  %v2891_v3 = vld [vmem:[#allocation2 + $0xd4] sm:$0x1] }
 0x197   : > { %v10568_v15 = vcombine.low %v2615_v26, %v2618_v41  ;;  %v2323_v28 = vrot.slane %v2321_v29, 4  ;;  %v3251_v9 = vsel %vm12805_vm2, %v3246_v43, %v3250_v22  ;;  %v2329_v40 = vrot.slane %v2327_v38, 5  ;;  %v3356_v33 = vld [vmem:[#allocation2 + $0x18] sm:$0xe] }
 0x198   : > { %v3255_v57 = vrot.slane %v3253_v10, 4  ;;  %v3258_v36 = vrot.slane %v3256_v42, 5  ;;  %v10599_v56 = vcombine.low %v3241_v51, %v3251_v9  ;;  %v2314_v0 = vor.u32 %v2313_v6, %v2310_v1  ;;  %v3358_v1 = vld [vmem:[#allocation2 + $0x20] sm:$0x1]  ;;  %v3361_v6 = vld [vmem:[#allocation2 + $0x2c] sm:$0x1] }
 0x199   : > { %4845 = vmatprep.mubr.bf16.mxu0 %v10568_v15  ;;  %v2324_v37 = vor.u32 %v2323_v28, %v2319_v16  ;;  %v3262_v26 = vshll.u32 %v2890_v58, 16  ;;  %v3266_v41 = vshrl.u32 %v2890_v58, 16  ;;  %v3272_v46 = vshll.u32 %v2891_v3, 16  ;;  %v3359_v3 = vld [vmem:[#allocation2 + $0x24] sm:$0xe] }
 0x19a   : > { %v3259_v29 = vor.u32 %v3258_v36, %v3255_v57  ;;  %4998 = vmatprep.mubr.bf16.mxu1 %v10599_v56  ;;  %v2315_v43 = vrot.slane %v2314_v0, 4  ;;  %v13898_v51 = vadd.f32 %v13749_v61, %v13739_v14  ;;  %v13904_v57 = vadd.f32 %v13757_v21, %v13753_v13  ;;  %v3360_v36 = vld [vmem:[#allocation2 + $0x28] sm:$0xf]  ;;  %v3362_v0 = vld [vmem:[#allocation2 + $0x30] sm:$0xe] }
 0x19b   : > { %v13878_v7 = vpop.f32.mrb[48].mxu0  ;;  %v2325_v38 = vrot.slane %v2324_v37, 4  ;;  %v3264_v42 = vrot.slane %v3262_v26, 5  ;;  %4999 = vmatmul.mubr.bf16.gmra.mrb[104].mxu1 %v12322_v25  ;;  %v3268_v15 = vrot.slane %v3266_v41, 4  ;;  %v3274_v14 = vrot.slane %v3272_v46, 5 }
 0x19c   : > { %v13880_v35 = vpop.f32.mrb[49].mxu0  ;;  %v3260_v10 = vrot.slane %v3259_v29, 4  ;;  %v2320_v37 = vsel %vm12805_vm2, %v2315_v43, %v2319_v16  ;;  %v10601_v61 = vrot.slane %v3356_v33, 9  ;;  %v3454_v56 = vrot.slane %v3357_v47, 5  ;;  %v3363_v29 = vld [vmem:[#allocation2 + $0x34] sm:$0xf] }
 0x19d   : > { %v13884_v45 = vpop.f32.mrb[50].mxu0  ;;  %v13890_v53 = vpop.f32.mrb[32].mxu1  ;;  %v2330_v58 = vsel %vm12805_vm2, %v2325_v38, %v2329_v40  ;;  %v3269_v25 = vor.u32 %v3268_v15, %v3264_v42  ;;  %v3457_v13 = vrot.slane %v3358_v1, 5  ;;  %v13914_v21 = vadd.f32 %v13775_v54, %v13766_v49  ;;  %v13916_v41 = vld [vmem:[#allocation2 + $0x38] sm:$0x1]  ;;  %v12323_v40 = vld [vmem:[#allocation2 + $0xcc] sm:$0xff]  }
 0x19e   : > { %v13886_v50 = vpop.f32.mrb[51].mxu0  ;;  %v13892_v52 = vpop.f32.mrb[33].mxu1  ;;  %v10536_v28 = vcombine.low %v2320_v37, %v2330_v58  ;;  %v3265_v9 = vsel %vm12805_vm2, %v3260_v10, %v3264_v42  ;;  %v10602_v26 = vrot.slane %v3359_v3, 9  ;;  %v3461_v16 = vrot.slane %v3360_v36, 5  ;;  %v3365_v47 = vld [vmem:[#allocation2 + $0x3c] sm:$0xe] }
 0x19f   : > { %v13894_v59 = vpop.f32.mrb[34].mxu1  ;;  %v3270_v46 = vrot.slane %v3269_v25, 4  ;;  %v3455_v33 = vsel %vm13026_vm13, %v10601_v61, %v3454_v56  ;;  %v3456_v43 = vrot.slane %v3454_v56, 4  ;;  %v3464_v38 = vrot.slane %v3361_v6, 5  ;;  %v3366_v42 = vld [vmem:[#allocation2 + $0x40] sm:$0xf] }
 0x1a0   : > { %v13900_v22 = vpop.f32.mrb[35].mxu1  ;;  %4846 = vmatmul.mubr.bf16.gmra.mrb[140].mxu0 %v10536_v28  ;;  %v3367_v1 = vld [vmem:[#allocation2 + $0x44] sm:$0x1]  ;;  %v13925_v49 = vld [vmem:[%s16193_s2] ss:$0 sm:$0xff]  ;;  %v3462_v54 = vsel %vm13026_vm13, %v10602_v26, %v3461_v16  ;;  %v3463_v15 = vrot.slane %v3461_v16, 4  ;;  %v13931_v3 = vadd.f32 %v13801_v23, %v13789_v17  ;;  %v13935_v36 = vadd.f32 %v13812_v32, %v13809_v63 }
 0x1a1   : > { %v3275_v58 = vsel %vm12805_vm2, %v3270_v46, %v3274_v14  ;;  %v3458_v61 = vsel %vm13026_vm13, %v3456_v43, %v3457_v13  ;;  %v13945_v6 = vadd.f32 %v13787_v30, %v13781_v48  ;;  %v10603_v28 = vrot.slane %v3362_v0, 9  ;;  %v3368_v25 = vld [vmem:[#allocation2 + $0x48] sm:$0xe]  ;;  %v12328_v63 = vld [vmem:[%s16194_s3 + $0x50] sm:$0xff]   ;;  %v3369_v13 = vld [vmem:[#allocation2 + $0x4c] sm:$0xf] }
 0x1a2   : > { %v10600_v32 = vcombine.low %v3265_v9, %v3275_v58  ;;  %v10617_v56 = vcombine.low %v3455_v33, %v3458_v61  ;;  %v3465_v14 = vsel %vm13026_vm13, %v3463_v15, %v3464_v38  ;;  %v13962_v30 = vadd.f32 %v13635_v18, %v13925_v49  ;;  %v3370_v43 = vld [vmem:[#allocation2 + $0x50] sm:$0x1]  ;;  %11542 = vmatprep.subr.bf16.mxu1 %v12328_v63 }
 0x1a3   : > { %v10618_v0 = vcombine.low %v3462_v54, %v3465_v14  ;;  %v3468_v16 = vrot.slane %v3363_v29, 5  ;;  %v3471_v46 = vrot.slane %v13916_v41, 5  ;;  %v12329_v9 = vld [vmem:[%s16194_s3 + $0x10] sm:$0xff]   ;;  %v13972_v33 = vadd.f32 %v13803_v27, %v13791_v5  ;;  %v3372_v5 = vld [vmem:[#allocation2 + $0x58] sm:$0xf] }
 0x1a4   : > { %5006 = vmatprep.mubr.bf16.mxu1 %v10600_v32  ;;  %12114 = vmatprep.mubr.bf16.mxu0 %v10617_v56  ;;  %v10604_v18 = vrot.slane %v3365_v47, 9  ;;  %v3475_v38 = vrot.slane %v3366_v42, 5  ;;  %v3478_v54 = vrot.slane %v3367_v1, 5  ;;  %v3371_v29 = vld [vmem:[#allocation2 + $0x54] sm:$0xe]  ;;  %v13980_v61 = vadd.f32 %v13836_v60, %v13832_v34 }
 0x1a5   : > { %5007 = vmatmul.mubr.bf16.gmra.mrb[108].mxu1 %v12323_v40  ;;  %v3469_v41 = vsel %vm13026_vm13, %v10603_v28, %v3468_v16  ;;  %v3470_v58 = vrot.slane %v3468_v16, 4  ;;  %v13984_v63 = vadd.f32 %v13856_v11, %v13847_v2  ;;  %v3373_v27 = vld [vmem:[#allocation2 + $0x5c] sm:$0x1]  ;;  %v13990_v40 = vadd.f32 %v13828_v19, %v13824_v31  ;;  %v3374_v28 = vld [vmem:[#allocation2 + $0x60] sm:$0xe] }
 0x1a6   : > { %v13920_v10 = vpop.f32.mrb[36].mxu1  ;;  %v3476_v47 = vsel %vm13026_vm13, %v10604_v18, %v3475_v38  ;;  %v3477_v42 = vrot.slane %v3475_v38, 4  ;;  %v10605_v1 = vrot.slane %v3368_v25, 9  ;;  %v3375_v32 = vld [vmem:[#allocation2 + $0x64] sm:$0xf]  ;;  %11543 = vmatpush3.bf16.msra.mxu1 %v12329_v9  ;;  %v13994_v34 = vadd.f32 %v13643_v4, %v13925_v49 }
 0x1a7   : > { %v13937_v37 = vpop.f32.mrb[37].mxu1  ;;  %16245 = vst [vmem:[#allocation35_spill] sm:$0xff] %v13990_v40  ;;  %v13998_v60 = vadd.f32 %v13689_v20, %v13925_v49  ;;  %v3472_v2 = vsel %vm13026_vm13, %v3470_v58, %v3471_v46  ;;  %v3482_v11 = vrot.slane %v3369_v13, 5  ;;  %v3485_v25 = vrot.slane %v3370_v43, 5  ;;  %v3376_v14 = vld [vmem:[#allocation2 + $0x68] sm:$0x1] }
 0x1a8   : > { %v13949_v23 = vpop.f32.mrb[38].mxu1  ;;  %12115 = vmatmul.mubr.bf16.vlgmr.msra.gmra.mrb[144].mxu0 %v10618_v0  ;;  %v10619_v31 = vcombine.low %v3469_v41, %v3472_v2  ;;  %v3479_v19 = vsel %vm13026_vm13, %v3477_v42, %v3478_v54  ;;  %v14008_v4 = vadd.f32 %v13838_v55, %v13834_v44  ;;  %v10606_v13 = vrot.slane %v3371_v29, 9  ;;  %v3378_v9 = vld [vmem:[#allocation2 + $0x70] sm:$0xf]  ;;  %v3377_v41 = vld [vmem:[#allocation2 + $0x6c] sm:$0xe] }
 0x1a9   : > { %v13947_v17 = vpop.f32.mrb[52].mxu0  ;;  %v13958_v48 = vpop.f32.mrb[39].mxu1  ;;  %v10620_v20 = vcombine.low %v3476_v47, %v3479_v19  ;;  %v3483_v0 = vsel %vm13026_vm13, %v10605_v1, %v3482_v11  ;;  %v3484_v46 = vrot.slane %v3482_v11, 4  ;;  %v3489_v43 = vrot.slane %v3372_v5, 5  ;;  %v3379_v58 = vld [vmem:[#allocation2 + $0x74] sm:$0x1] }
 0x1aa   : > { %v13956_v26 = vpop.f32.mrb[53].mxu0  ;;  %16246 = vst [vmem:[#allocation36_spill] sm:$0xff] %v14008_v4  ;;  %12118 = vmatprep.mubr.bf16.mxu0 %v10619_v31  ;;  %v3492_v54 = vrot.slane %v3373_v27, 5  ;;  %v14020_v44 = vadd.f32 %v13880_v35, %v13878_v7  ;;  %v14024_v55 = vadd.f32 %v13886_v50, %v13884_v45  ;;  %v14032_v5 = vadd.f32 %v13892_v52, %v13890_v53  ;;  %v14042_v11 = vld [vmem:[#allocation2 + $0x7c] sm:$0xf] }
 0x1ab   : > { %v13965_v24 = vpop.f32.mrb[54].mxu0  ;;  %v3486_v42 = vsel %vm13026_vm13, %v3484_v46, %v3485_v25  ;;  %v10607_v27 = vrot.slane %v3374_v28, 9  ;;  %v3496_v1 = vrot.slane %v3375_v32, 5  ;;  %v14036_v35 = vadd.f32 %v13693_v12, %v13925_v49 }
 0x1ac   : > { %v13974_v15 = vpop.f32.mrb[55].mxu0  ;;  %16247 = vst [vmem:[#allocation37_spill] sm:$0xff] %v14032_v5  ;;  %v14040_v45 = vadd.f32 %v13737_v39, %v13925_v49  ;;  %v10621_v50 = vcombine.low %v3483_v0, %v3486_v42  ;;  %v3491_v2 = vrot.slane %v3489_v43, 4  ;;  %v14046_v53 = vadd.f32 %v13743_v62, %v13925_v49  ;;  %v14062_v62 = vld [vmem:[#allocation2 + $0x78] sm:$0xe] }
 0x1ad   : > { %v14050_v52 = vsel %vm13026_vm13, %v10606_v13, %v3489_v43  ;;  %v3498_v28 = vrot.slane %v3496_v1, 4  ;;  %v3499_v12 = vrot.slane %v3376_v14, 5  ;;  %v14056_v39 = vsel %vm13026_vm13, %v10607_v27, %v3496_v1  ;;  %v14064_v0 = vld [vmem:[#allocation2 + $0x80] sm:$0x1]  ;;  %v16252_v1 = vld [vmem:[#allocation31_spill] sm:$0xff] }
 0x1ae   : > { %v14002_v56 = vpop.f32.mrb[40].mxu1  ;;  %v3493_v32 = vsel %vm13026_vm13, %v3491_v2, %v3492_v54  ;;  %v14060_v19 = vadd.f32 %v13900_v22, %v13894_v59  ;;  %v3503_v25 = vrot.slane %v3378_v9, 5  ;;  %v10608_v46 = vrot.slane %v3377_v41, 9  ;;  %v14072_v54 = vld [vmem:[#allocation2 + $0x88] sm:$0xf]  ;;  %v16249_v59 = vld [vmem:[#allocation26_spill] sm:$0xff] }
 0x1af   : > { %v14010_v16 = vpop.f32.mrb[41].mxu1  ;;  %v3500_v14 = vsel %vm13026_vm13, %v3498_v28, %v3499_v12  ;;  %v3506_v13 = vrot.slane %v3379_v58, 5  ;;  %v14070_v43 = vadd.f32 %v13956_v26, %v13947_v17  ;;  %v14076_v22 = vadd.f32 %v16249_v59, %v13925_v49  ;;  %v16250_v9 = vld [vmem:[#allocation27_spill] sm:$0xff]  ;;  %v14086_v58 = vld [vmem:[#allocation2 + $0x84] sm:$0xe] }
 0x1b0   : > { %v14016_v38 = vpop.f32.mrb[42].mxu1  ;;  %16248 = vst [vmem:[#allocation38_spill] sm:$0xff] %v14060_v19  ;;  %12119 = vmatmul.mubr.bf16.gmra.mrb[148].mxu0 %v10620_v20  ;;  %v14080_v42 = vadd.f32 %v16250_v9, %v13925_v49  ;;  %v3505_v20 = vrot.slane %v3503_v25, 4  ;;  %v14084_v41 = vadd.f32 %v13974_v15, %v13965_v24  ;;  %v14088_v17 = vld [vmem:[#allocation2 + $0x8c] sm:$0x1]  ;;  %v16251_v26 = vld [vmem:[#allocation30_spill] sm:$0xff]  ;;  %v14096_v2 = vadd.f32 %v16252_v1, %v13925_v49 }
 0x1b1   : > { %v14014_v18 = vpop.f32.mrb[56].mxu0  ;;  %v14026_v29 = vpop.f32.mrb[43].mxu1  ;;  %12122 = vmatprep.mubr.bf16.mxu0 %v10621_v50  ;;  %v14092_v27 = vadd.f32 %v16251_v26, %v13925_v49  ;;  %v14100_v50 = vadd.f32 %v13937_v37, %v13920_v10  ;;  %v3510_v28 = vrot.slane %v14042_v11, 5  ;;  %v14103_v24 = vld [vmem:[#allocation2 + $0x94] sm:$0xf]  ;;  %v16254_v12 = vld [vmem:[#allocation34_spill] sm:$0xff]  ;;  %v10622_v9 = vcombine.low %v14050_v52, %v3493_v32 }
 0x1b2   : > { %v11167_v47 = vpop.f32.mrb[57].mxu0  ;;  %v14107_v59 = vadd.f32 %v16254_v12, %v13925_v49  ;;  %v10623_v26 = vcombine.low %v14056_v39, %v3500_v14  ;;  %v14113_v1 = vadd.f32 %v13958_v48, %v13949_v23  ;;  %v14117_v10 = vsel %vm13026_vm13, %v10608_v46, %v3503_v25  ;;  %v14125_v52 = vld [vmem:[#allocation2 + $0x90] sm:$0xe]  ;;  %v14127_v32 = vld [vmem:[#allocation2 + $0xa0] sm:$0xf] }
 0x1b3   : > { %v11169_v7 = vpop.f32.mrb[58].mxu0  ;;  %16253 = vst [vmem:[#allocation26_spill] sm:$0xff] %v14100_v50  ;;  %v14121_v37 = vsel %vm13026_vm13, %v3505_v20, %v3506_v13  ;;  %v10609_v11 = vrot.slane %v14062_v62, 9  ;;  %v3513_v12 = vrot.slane %v14064_v0, 5  ;;  %v3512_v23 = vrot.slane %v3510_v28, 4 }
 0x1b4   : > { %v11170_v31 = vpop.f32.mrb[59].mxu0  ;;  %16255 = vst [vmem:[#allocation27_spill] sm:$0xff] %v14113_v1  ;;  %v3517_v48 = vrot.slane %v14072_v54, 5  ;;  %v14131_v14 = vadd.f32 %v11167_v47, %v14014_v18  ;;  %v10610_v20 = vrot.slane %v14086_v58, 9  ;;  %v3520_v62 = vrot.slane %v14088_v17, 5  ;;  %v12330_v18 = vld [vmem:[%s16194_s3 + $0x58] sm:$0xff]  }
 0x1b5   : > { %v14133_v25 = vadd.f32 %v11170_v31, %v11169_v7  ;;  %v14139_v0 = vadd.f32 %v14010_v16, %v14002_v56  ;;  %v14141_v1 = vld [vmem:[#allocation2 + $0x98] sm:$0x1]  ;;  %v3524_v50 = vrot.slane %v14103_v24, 5  ;;  %v14152_v7 = vadd.f32 %v13898_v51, %v13925_v49  ;;  %v3389_v58 = vld [vmem:[#allocation2 + $0x9c] sm:$0xe]  ;;  %11544 = vmatprep.subr.bf16.mxu1 %v12330_v18 }
 0x1b6   : > { %v12331_v47 = vld [vmem:[%s16194_s3 + $0x18] sm:$0xff]   ;;  %v14156_v56 = vadd.f32 %v13931_v3, %v13925_v49  ;;  %v14160_v16 = vadd.f32 %v13935_v36, %v13925_v49  ;;  %v3519_v31 = vrot.slane %v3517_v48, 4  ;;  %v3391_v17 = vld [vmem:[#allocation2 + $0xa4] sm:$0x1]  ;;  %v14168_v51 = vadd.f32 %v13984_v63, %v13925_v49  ;;  %v14174_v5 = vld [vmem:[#allocation2 + $0xac] sm:$0xf] }
 0x1b7   : > { %16256 = vst [vmem:[#allocation30_spill] sm:$0xff] %v14139_v0  ;;  %v14164_v0 = vadd.f32 %v13980_v61, %v13925_v49  ;;  %v14172_v3 = vadd.f32 %v14020_v44, %v13925_v49  ;;  %v10624_v4 = vcombine.low %v14117_v10, %v14121_v37  ;;  %v10611_v61 = vrot.slane %v14125_v52, 9  ;;  %11545 = vmatpush3.bf16.msra.mxu1 %v12331_v47  ;;  %v14190_v10 = vld [vmem:[#allocation2 + $0xb8] sm:$0xf]  ;;  %v3394_v52 = vld [vmem:[#allocation2 + $0xb0] sm:$0x1] }
 0x1b8   : > { %v11284_v46 = vpop.f32.mrb[44].mxu1  ;;  %12123 = vmatmul.mubr.bf16.gmra.mrb[152].mxu0 %v10622_v9  ;;  %v14181_v40 = vadd.f32 %v14026_v29, %v14016_v38  ;;  %v3531_v63 = vrot.slane %v14127_v32, 5  ;;  %v3511_v44 = vsel %vm13026_vm13, %v10609_v11, %v3510_v28  ;;  %v3514_v9 = vsel %vm13026_vm13, %v3512_v23, %v3513_v12 }
 0x1b9   : > { %v11172_v15 = vpop.f32.mrb[60].mxu0  ;;  %v11285_v54 = vpop.f32.mrb[45].mxu1  ;;  %16257 = vst [vmem:[#allocation31_spill] sm:$0xff] %v14172_v3  ;;  %12126 = vmatprep.mubr.bf16.mxu0 %v10623_v26  ;;  %v3526_v18 = vrot.slane %v3524_v50, 4  ;;  %v3392_v3 = vld [vmem:[#allocation2 + $0xa8] sm:$0xe]  ;;  %v14194_v38 = vsel %vm13026_vm13, %v10610_v20, %v3517_v48  ;;  %v14198_v29 = vsel %vm13026_vm13, %v3519_v31, %v3520_v62  ;;  %v14206_v48 = vadd.f32 %v14024_v55, %v13925_v49 }
 0x1ba   : > { %v11173_v19 = vpop.f32.mrb[61].mxu0  ;;  %v11287_v24 = vpop.f32.mrb[46].mxu1  ;;  %16258 = vst [vmem:[#allocation34_spill] sm:$0xff] %v14181_v40  ;;  %v3527_v28 = vrot.slane %v14141_v1, 5  ;;  %v10612_v32 = vrot.slane %v3389_v58, 9  ;;  %v3538_v23 = vrot.slane %v14174_v5, 5  ;;  %v10625_v20 = vcombine.low %v3511_v44, %v3514_v9 }
 0x1bb   : > { %v11175_v39 = vpop.f32.mrb[62].mxu0  ;;  %v11288_v36 = vpop.f32.mrb[47].mxu1  ;;  %v14188_v26 = vadd.f32 %v11173_v19, %v11172_v15  ;;  %v3534_v19 = vrot.slane %v3391_v17, 5  ;;  %v14201_v15 = vadd.f32 %v11285_v54, %v11284_v46  ;;  %v3533_v40 = vrot.slane %v3531_v63, 4  ;;  %v14210_v31 = vld [vmem:[#allocation2 + $0xb4] sm:$0xe] }
 0x1bc   : > { %v11176_v13 = vpop.f32.mrb[63].mxu0  ;;  %v14208_v62 = vadd.f32 %v11288_v36, %v11287_v24  ;;  %v14212_v1 = vld [vmem:[#allocation2 + $0xbc] sm:$0x1]  ;;  %v14218_v46 = vadd.f32 %v14070_v43, %v13925_v49  ;;  %v14222_v5 = vadd.f32 %v14084_v41, %v13925_v49  ;;  %v10626_v55 = vcombine.low %v14194_v38, %v14198_v29  ;;  %v14228_v58 = vld [vmem:[#allocation2 + $0xc0] sm:$0xe]  ;;  %v16261_v43 = vld [vmem:[#allocation12_spill] sm:$0xff] }
 0x1bd   : > { %v11177_v11 = vadd.f32 %v11176_v13, %v11175_v39  ;;  %16259 = vst [vmem:[#allocation39_spill] sm:$0xff] %v14201_v15  ;;  %v14214_v13 = vld [vmem:[#allocation2 + $0xc4] sm:$0xf]  ;;  %v3525_v54 = vsel %vm13026_vm13, %v10611_v61, %v3524_v50  ;;  %v14230_v17 = vld [vmem:[#allocation2 + $0xc8] sm:$0x1]  ;;  %v10613_v24 = vrot.slane %v3392_v3, 9  ;;  %v4406_v44 = vadd.f32 %v16261_v43, %v13925_v49 }
 0x1be   : > { %16260 = vst [vmem:[#allocation40_spill] sm:$0xff] %v14208_v62  ;;  %v3545_v36 = vrot.slane %v14190_v10, 5  ;;  %v3540_v41 = vrot.slane %v3538_v23, 4  ;;  %v3541_v62 = vrot.slane %v3394_v52, 5  ;;  %v16262_v15 = vld [vmem:[#allocation13_spill] sm:$0xff]  ;;  %v3528_v50 = vsel %vm13026_vm13, %v3526_v18, %v3527_v28  ;;  %v16263_v43 = vld [vmem:[#allocation14_spill] sm:$0xff] }
 0x1bf   : > { %v4409_v38 = vadd.f32 %v16262_v15, %v13925_v49  ;;  %v14241_v3 = vsel %vm13026_vm13, %v10612_v32, %v3531_v63  ;;  %v14245_v61 = vsel %vm13026_vm13, %v3533_v40, %v3534_v19  ;;  %v10614_v52 = vrot.slane %v14210_v31, 9 }
 0x1c0   : > { %12127 = vmatmul.mubr.bf16.gmra.mrb[156].mxu0 %v10624_v4  ;;  %v14249_v4 = vld [vmem:[#allocation2 + $0xd0] sm:$0xf]  ;;  %v16205_v18 = vrot.slane %v14214_v13, 5  ;;  %v14258_v63 = vsel %vm13026_vm13, %v10613_v24, %v3538_v23  ;;  %v14262_v40 = vrot.slane %v3545_v36, 4  ;;  %v4518_v24 = vadd.f32 %v14131_v14, %v13925_v49 }
 0x1c1   : > { %v11194_v37 = vpop.f32.mrb[64].mxu0  ;;  %12130 = vmatprep.mubr.bf16.mxu0 %v10625_v20  ;;  %v3542_v20 = vsel %vm13026_vm13, %v3540_v41, %v3541_v62  ;;  %v4526_v62 = vadd.f32 %v14188_v26, %v13925_v49  ;;  %v10628_v14 = vcombine.low %v14241_v3, %v14245_v61  ;;  %v16266_v26 = vld [vmem:[#allocation17_spill] sm:$0xff]  ;;  %v16291_v10 = vrot.slane %v14230_v17, 5 }
 0x1c2   : > { %v11195_v12 = vpop.f32.mrb[65].mxu0  ;;  %v3554_v19 = vrot.slane %v16205_v18, 4 }
 0x1c3   : > { %v11197_v47 = vpop.f32.mrb[66].mxu0  ;;  %v11196_v9 = vadd.f32 %v11195_v12, %v11194_v37 }
 0x1c4   : > { %v11198_v39 = vpop.f32.mrb[67].mxu0  ;;  %v3556_v31 = vsel %vm13026_vm13, %v3554_v19, %v16291_v10  ;;  %v16294_v19 = vld [vmem:[#allocation19_spill] sm:$0xff] }
 0x1c5   : > { %v11199_v29 = vadd.f32 %v11198_v39, %v11197_v47  ;;  %v14247_v37 = vadd.f32 %v11196_v9, %v4406_v44  ;;  %v4414_v44 = vadd.f32 %v16263_v43, %v13925_v49  ;;  %v16264_v43 = vld [vmem:[#allocation15_spill] sm:$0xff]  ;;  %v4529_v39 = vadd.f32 %v11177_v11, %v13925_v49  ;;  %v16269_v11 = vld [vmem:[#allocation22_spill] sm:$0xff] }
 0x1c6   : > { %v14303_v61 = vadd.f32 %v16269_v11, %v13998_v60  ;;  %v16274_v60 = vld [vmem:[#allocation29_spill] sm:$0xff] }
 0x1c7   : > { %v14253_v15 = vadd.f32 %v11199_v29, %v4409_v38  ;;  %v4521_v38 = vadd.f32 %v14133_v25, %v13925_v49  ;;  %v10627_v29 = vcombine.low %v3525_v54, %v3528_v50  ;;  %v10629_v25 = vcombine.low %v14258_v63, %v3542_v20  ;;  %v16265_v54 = vld [vmem:[#allocation16_spill] sm:$0xff] }
 0x1c8   : > { %v4422_v50 = vadd.f32 %v16265_v54, %v13925_v49  ;;  %12131 = vmatmul.mubr.bf16.gmra.mrb[160].mxu0 %v10626_v55  ;;  %v16270_v55 = vld [vmem:[#allocation23_spill] sm:$0xff]  ;;  %v16271_v20 = vld [vmem:[#allocation24_spill] sm:$0xff]  ;;  %v14323_v54 = vadd.f32 %v16274_v60, %v14080_v42  ;;  %v14343_v42 = vadd.f32 %v13945_v6, %v14156_v56  ;;  %v12333_v6 = vld [vmem:[%s16194_s3 + $0x20] sm:$0xff]  }
 0x1c9   : > { %v11200_v28 = vpop.f32.mrb[68].mxu0  ;;  %12134 = vmatprep.mubr.bf16.mxu0 %v10627_v29  ;;  %v14307_v63 = vadd.f32 %v16270_v55, %v14036_v35  ;;  %v16275_v35 = vld [vmem:[#allocation32_spill] sm:$0xff]  ;;  %v16277_v55 = vld [vmem:[#allocation35_spill] sm:$0xff] }
 0x1ca   : > { %v11201_v47 = vpop.f32.mrb[69].mxu0  ;;  %v16283_v60 = vld [vmem:[#allocation27_spill] sm:$0xff] }
 0x1cb   : > { %v11202_v9 = vadd.f32 %v11201_v47, %v11200_v28  ;;  %v11203_v23 = vpop.f32.mrb[70].mxu0  ;;  %v4417_v28 = vadd.f32 %v16264_v43, %v13925_v49 }
 0x1cc   : > { %v11204_v32 = vpop.f32.mrb[71].mxu0 }
 0x1cd   : > { %v14279_v41 = vadd.f32 %v11202_v9, %v4414_v44  ;;  %v11205_v47 = vadd.f32 %v11204_v32, %v11203_v23  ;;  %v4425_v44 = vadd.f32 %v16266_v26, %v13925_v49  ;;  %v16267_v9 = vld [vmem:[#allocation20_spill] sm:$0xff]  ;;  %v16268_v32 = vld [vmem:[#allocation21_spill] sm:$0xff]  ;;  %v14311_v23 = vadd.f32 %v16271_v20, %v14040_v45 }
 0x1ce   : > { %v14295_v43 = vadd.f32 %v16267_v9, %v13962_v30  ;;  %v14299_v3 = vadd.f32 %v16268_v32, %v13994_v34  ;;  %v16272_v30 = vld [vmem:[#allocation25_spill] sm:$0xff]  ;;  %v16273_v34 = vld [vmem:[#allocation28_spill] sm:$0xff]  ;;  %v14327_v26 = vadd.f32 %v16275_v35, %v14092_v27  ;;  %v14347_v27 = vadd.f32 %v13972_v33, %v14160_v16  ;;  %v16279_v33 = vld [vmem:[#allocation31_spill] sm:$0xff] }
 0x1cf   : > { %v14289_v18 = vadd.f32 %v11205_v47, %v4417_v28  ;;  %v14315_v28 = vadd.f32 %v16272_v30, %v14046_v53  ;;  %v14319_v29 = vadd.f32 %v16273_v34, %v14076_v22  ;;  %v16276_v45 = vld [vmem:[#allocation33_spill] sm:$0xff]  ;;  %v14335_v53 = vadd.f32 %v13904_v57, %v14107_v59  ;;  %v16278_v57 = vld [vmem:[#allocation36_spill] sm:$0xff]  ;;  %v3401_v16 = vld [vmem:[#allocation2 + $0xcc] sm:$0xe] }
 0x1d0   : > { %v14331_v9 = vadd.f32 %v16276_v45, %v14096_v2  ;;  %v14339_v22 = vadd.f32 %v13914_v21, %v14152_v7  ;;  %v14351_v20 = vadd.f32 %v16277_v55, %v14164_v0  ;;  %v14355_v59 = vadd.f32 %v16278_v57, %v14168_v51  ;;  %v12332_v21 = vld [vmem:[%s16194_s3 + $0x60] sm:$0xff]   ;;  %v16280_v7 = vld [vmem:[#allocation37_spill] sm:$0xff]  ;;  %v3403_v55 = vld [vmem:[#allocation2 + $0xd4] sm:$0x1]  ;;  %12135 = vmatmul.mubr.bf16.gmra.mrb[164].mxu0 %v10628_v14 }
 0x1d1   : > { %v11206_v47 = vpop.f32.mrb[72].mxu0  ;;  %v14365_v56 = vadd.f32 %v16280_v7, %v16279_v33  ;;  %v16281_v0 = vld [vmem:[#allocation38_spill] sm:$0xff]  ;;  %v14377_v35 = vadd.f32 %v16283_v60, %v14222_v5  ;;  %11546 = vmatprep.subr.bf16.mxu1 %v12332_v21  ;;  %12138 = vmatprep.mubr.bf16.mxu0 %v10629_v25  ;;  %v16290_v14 = vrot.slane %v14228_v58, 9 }
 0x1d2   : > { %v11207_v32 = vpop.f32.mrb[73].mxu0  ;;  %v16282_v51 = vld [vmem:[#allocation26_spill] sm:$0xff]  ;;  %11547 = vmatpush3.bf16.msra.mxu1 %v12333_v6 }
 0x1d3   : > { %v11208_v11 = vadd.f32 %v11207_v32, %v11206_v47  ;;  %v11209_v2 = vpop.f32.mrb[74].mxu0  ;;  %v14369_v47 = vadd.f32 %v16281_v0, %v14206_v48  ;;  %v14373_v34 = vadd.f32 %v16282_v51, %v14218_v46  ;;  %v16284_v45 = vld [vmem:[#allocation30_spill] sm:$0xff]  ;;  %v16286_v48 = vld [vmem:[#allocation39_spill] sm:$0xff]  ;;  %v16287_v46 = vld [vmem:[#allocation40_spill] sm:$0xff] }
 0x1d4   : > { %v11210_v30 = vpop.f32.mrb[75].mxu0  ;;  %v14380_v32 = vadd.f32 %v16284_v45, %v4518_v24  ;;  %v16285_v7 = vld [vmem:[#allocation34_spill] sm:$0xff]  ;;  %v14388_v0 = vadd.f32 %v16286_v48, %v4526_v62  ;;  %v14391_v51 = vadd.f32 %v16287_v46, %v4529_v39  ;;  %v3546_v24 = vsel %vm13026_vm13, %v10614_v52, %v3545_v36 }
 0x1d5   : > { %v14382_v57 = vadd.f32 %v11208_v11, %v4422_v50  ;;  %v11211_v33 = vadd.f32 %v11210_v30, %v11209_v2  ;;  %v14385_v12 = vadd.f32 %v16285_v7, %v4521_v38  ;;  %v16288_v38 = vrot.slane %v14212_v1, 5 }
 0x1d6   : > { %v16289_v39 = vrot.slane %v14214_v13, 5  ;;  %v10616_v50 = vrot.slane %v3401_v16, 9  ;;  %v3562_v52 = vrot.slane %v3403_v55, 5  ;;  %v16292_v11 = vrot.slane %v14249_v4, 5  ;;  %v16293_v13 = vld [vmem:[#allocation18_spill] sm:$0xff] }
 0x1d7   : > { %v14393_v5 = vadd.f32 %v11211_v33, %v4425_v44  ;;  %v3549_v62 = vsel %vm13026_vm13, %v14262_v40, %v16288_v38  ;;  %v4430_v2 = vadd.f32 %v16293_v13, %v13925_v49  ;;  %v11418_v60 = vpop.f32.mrb[48].mxu1  ;;  %v4433_v16 = vadd.f32 %v16294_v19, %v13925_v49 }
 0x1d8   : > { %v3553_v25 = vsel %vm13026_vm13, %v16290_v14, %v16289_v39  ;;  %v10630_v44 = vcombine.low %v3546_v24, %v3549_v62  ;;  %v3561_v40 = vrot.slane %v16292_v11, 4  ;;  %v11419_v55 = vpop.f32.mrb[49].mxu1  ;;  %v16295_v24 = vmov %v16292_v11 }
 0x1d9   : > { %v11212_v36 = vpop.f32.mrb[76].mxu0  ;;  %v10631_v6 = vcombine.low %v3553_v25, %v3556_v31  ;;  %v11420_v33 = vadd.f32 %v11419_v55, %v11418_v60  ;;  %v11421_v7 = vpop.f32.mrb[50].mxu1  ;;  %v3560_v38 = vsel %vm13026_vm13, %v10616_v50, %v16295_v24 }
 0x1da   : > { %v11213_v1 = vpop.f32.mrb[77].mxu0  ;;  %12139 = vmatmul.mubr.bf16.gmra.mrb[168].mxu0 %v10630_v44  ;;  %v11422_v46 = vpop.f32.mrb[51].mxu1  ;;  %v3563_v62 = vsel %vm13026_vm13, %v3561_v40, %v3562_v52 }
 0x1db   : > { %v11214_v58 = vadd.f32 %v11213_v1, %v11212_v36  ;;  %v11215_v21 = vpop.f32.mrb[78].mxu0  ;;  %12142 = vmatprep.mubr.bf16.mxu0 %v10631_v6  ;;  %v11423_v39 = vadd.f32 %v11422_v46, %v11421_v7  ;;  %v10632_v25 = vcombine.low %v3560_v38, %v3563_v62 }
 0x1dc   : > { %v11216_v30 = vpop.f32.mrb[79].mxu0 }
 0x1dd   : > { %v14420_v17 = vadd.f32 %v11214_v58, %v4430_v2  ;;  %v11217_v45 = vadd.f32 %v11216_v30, %v11215_v21 }
 0x1df   : > { %v14424_v48 = vadd.f32 %v11217_v45, %v4433_v16 }
 0x1e1   : > { %v11306_v14 = vpop.f32.mrb[80].mxu0 }
 0x1e2   : > { %v11307_v49 = vpop.f32.mrb[81].mxu0  ;;  %12143 = vmatmul.mubr.bf16.gmra.mrb[172].mxu0 %v10632_v25 }
 0x1e3   : > { %v11308_v10 = vadd.f32 %v11307_v49, %v11306_v14  ;;  %v11309_v31 = vpop.f32.mrb[82].mxu0 }
 0x1e4   : > { %v11310_v36 = vpop.f32.mrb[83].mxu0  ;;  %v11424_v11 = vpop.f32.mrb[52].mxu1 }
 0x1e5   : > { %v4728_v1 = vadd.f32 %v11308_v10, %v14247_v37  ;;  %v11311_v44 = vadd.f32 %v11310_v36, %v11309_v31  ;;  %v11425_v13 = vpop.f32.mrb[53].mxu1  ;;  %v12334_v37 = vld [vmem:[%s16194_s3 + $0x68] sm:$0xff]  }
 0x1e6   : > { %v11426_v2 = vadd.f32 %v11425_v13, %v11424_v11  ;;  %v11427_v50 = vpop.f32.mrb[54].mxu1  ;;  %11548 = vmatprep.subr.bf16.mxu1 %v12334_v37 }
 0x1e7   : > { %v4731_v4 = vadd.f32 %v11311_v44, %v14253_v15  ;;  %v11428_v58 = vpop.f32.mrb[55].mxu1  ;;  %v14434_v21 = vadd.f32 %v11420_v33, %v4728_v1  ;;  %v12335_v15 = vld [vmem:[%s16194_s3 + $0x28] sm:$0xff]  }
 0x1e8   : > { %v11429_v40 = vadd.f32 %v11428_v58, %v11427_v50  ;;  %11549 = vmatpush3.bf16.msra.mxu1 %v12335_v15 }
 0x1e9   : > { %v11312_v52 = vpop.f32.mrb[84].mxu0  ;;  %v14436_v30 = vadd.f32 %v11423_v39, %v4731_v4 }
 0x1ea   : > { %v11313_v6 = vpop.f32.mrb[85].mxu0 }
 0x1eb   : > { %v11314_v60 = vadd.f32 %v11313_v6, %v11312_v52  ;;  %v11315_v19 = vpop.f32.mrb[86].mxu0 }
 0x1ec   : > { %v11316_v16 = vpop.f32.mrb[87].mxu0 }
 0x1ed   : > { %v4736_v45 = vadd.f32 %v11314_v60, %v14279_v41  ;;  %v11317_v55 = vadd.f32 %v11316_v16, %v11315_v19 }
 0x1ee   : > { %v11430_v7 = vpop.f32.mrb[56].mxu1 }
 0x1ef   : > { %v4739_v33 = vadd.f32 %v11317_v55, %v14289_v18  ;;  %v14446_v46 = vadd.f32 %v11426_v2, %v4736_v45  ;;  %v11431_v38 = vpop.f32.mrb[57].mxu1 }
 0x1f0   : > { %v11432_v39 = vadd.f32 %v11431_v38, %v11430_v7  ;;  %v11433_v14 = vpop.f32.mrb[58].mxu1  ;;  %v12336_v7 = vld [vmem:[%s16194_s3 + $0xc0] sm:$0xff]  }
 0x1f1   : > { %v11318_v24 = vpop.f32.mrb[88].mxu0  ;;  %v14448_v49 = vadd.f32 %v11429_v40, %v4739_v33  ;;  %v11434_v31 = vpop.f32.mrb[59].mxu1  ;;  %11650 = vmatprep.subr.bf16.mxu0 %v12336_v7 }
 0x1f2   : > { %v11319_v62 = vpop.f32.mrb[89].mxu0  ;;  %v11435_v41 = vadd.f32 %v11434_v31, %v11433_v14 }
 0x1f3   : > { %v11320_v25 = vadd.f32 %v11319_v62, %v11318_v24  ;;  %v11321_v10 = vpop.f32.mrb[90].mxu0 }
 0x1f4   : > { %v11322_v36 = vpop.f32.mrb[91].mxu0 }
 0x1f5   : > { %v4744_v1 = vadd.f32 %v11320_v25, %v14382_v57  ;;  %v11323_v44 = vadd.f32 %v11322_v36, %v11321_v10  ;;  %v12339_v25 = vld [vmem:[%s16194_s3 + $0x30] sm:$0xff]  }
 0x1f6   : > { %v11436_v2 = vpop.f32.mrb[60].mxu1 }
 0x1f7   : > { %v4747_v18 = vadd.f32 %v11323_v44, %v14393_v5  ;;  %v14452_v11 = vadd.f32 %v11432_v39, %v4744_v1  ;;  %v11437_v40 = vpop.f32.mrb[61].mxu1 }
 0x1f8   : > { %v11438_v60 = vadd.f32 %v11437_v40, %v11436_v2  ;;  %v11439_v19 = vpop.f32.mrb[62].mxu1 }
 0x1f9   : > { %v11324_v13 = vpop.f32.mrb[92].mxu0  ;;  %v14454_v50 = vadd.f32 %v11435_v41, %v4747_v18  ;;  %v11440_v57 = vpop.f32.mrb[63].mxu1 }
 0x1fa   : > { %v11325_v4 = vpop.f32.mrb[93].mxu0  ;;  %v11441_v16 = vadd.f32 %v11440_v57, %v11439_v19 }
 0x1fb   : > { %v11326_v58 = vadd.f32 %v11325_v4, %v11324_v13  ;;  %v11327_v52 = vpop.f32.mrb[94].mxu0 }
 0x1fc   : > { %v11328_v6 = vpop.f32.mrb[95].mxu0 }
 0x1fd   : > { %v4752_v37 = vadd.f32 %v11326_v58, %v14420_v17  ;;  %v11329_v15 = vadd.f32 %v11328_v6, %v11327_v52  ;;  %v12337_v17 = vld [vmem:[%s16194_s3 + $0x70] sm:$0xff]  }
 0x1fe   : > { %11550 = vmatprep.subr.bf16.mxu1 %v12337_v17 }
 0x1ff   : > { %v4755_v5 = vadd.f32 %v11329_v15, %v14424_v48  ;;  %v14458_v45 = vadd.f32 %v11438_v60, %v4752_v37  ;;  %v12338_v48 = vld [vmem:[%s16194_s3 + $0x80] sm:$0xff]   ;;  %11551 = vmatpush3.bf16.msra.mxu1 %v12339_v25 }
 0x200   : > { %v11442_v39 = vpop.f32.mrb[64].mxu1  ;;  %11651 = vmatpush3.bf16.msra.mxu0 %v12338_v48 }
 0x201   : > { %v11330_v55 = vpop.f32.mrb[96].mxu0  ;;  %v14463_v24 = vadd.f32 %v11441_v16, %v4755_v5  ;;  %v11443_v36 = vpop.f32.mrb[65].mxu1  ;;  %v12340_v5 = vld [vmem:[%s16194_s3 + $0xc8] sm:$0xff]  }
 0x202   : > { %v11331_v33 = vpop.f32.mrb[97].mxu0  ;;  %v11444_v41 = vadd.f32 %v11443_v36, %v11442_v39  ;;  %v11445_v1 = vpop.f32.mrb[66].mxu1  ;;  %11652 = vmatprep.subr.bf16.mxu0 %v12340_v5  ;;  %v12344_v36 = vld [vmem:[%s16194_s3 + $0xd8] sm:$0xff]   ;;  %v12350_v5 = vld [vmem:[%s16194_s3 + $0xe8] sm:$0xff]  }
 0x203   : > { %v11332_v38 = vadd.f32 %v11331_v33, %v11330_v55  ;;  %v11333_v62 = vpop.f32.mrb[98].mxu0  ;;  %v11446_v18 = vpop.f32.mrb[67].mxu1  ;;  %v12341_v33 = vld [vmem:[%s16194_s3 + $0x88] sm:$0xff]  }
 0x204   : > { %v11334_v14 = vpop.f32.mrb[99].mxu0  ;;  %v11447_v13 = vadd.f32 %v11446_v18, %v11445_v1  ;;  %11653 = vmatpush3.bf16.msra.mxu0 %v12341_v33  ;;  %v12345_v1 = vld [vmem:[%s16194_s3 + $0x98] sm:$0xff]  }
 0x205   : > { %v4760_v10 = vadd.f32 %v11332_v38, %v14295_v43  ;;  %v11335_v31 = vadd.f32 %v11334_v14, %v11333_v62 }
 0x207   : > { %v4763_v44 = vadd.f32 %v11335_v31, %v14299_v3  ;;  %v14476_v4 = vadd.f32 %v11444_v41, %v4760_v10 }
 0x208   : > { %v11448_v37 = vpop.f32.mrb[68].mxu1 }
 0x209   : > { %v11336_v2 = vpop.f32.mrb[100].mxu0  ;;  %v14478_v52 = vadd.f32 %v11447_v13, %v4763_v44  ;;  %v11449_v57 = vpop.f32.mrb[69].mxu1 }
 0x20a   : > { %v11337_v58 = vpop.f32.mrb[101].mxu0  ;;  %v11450_v3 = vadd.f32 %v11449_v57, %v11448_v37  ;;  %v11451_v16 = vpop.f32.mrb[70].mxu1  ;;  %v12348_v57 = vld [vmem:[%s16194_s3 + $0xa0] sm:$0xff]  }
 0x20b   : > { %v11338_v40 = vadd.f32 %v11337_v58, %v11336_v2  ;;  %v11339_v6 = vpop.f32.mrb[102].mxu0  ;;  %v11452_v55 = vpop.f32.mrb[71].mxu1 }
 0x20c   : > { %v11340_v43 = vpop.f32.mrb[103].mxu0  ;;  %v11453_v7 = vadd.f32 %v11452_v55, %v11451_v16 }
 0x20d   : > { %v4768_v60 = vadd.f32 %v11338_v40, %v14303_v61  ;;  %v11341_v19 = vadd.f32 %v11340_v43, %v11339_v6  ;;  %v12342_v61 = vld [vmem:[%s16194_s3 + $0xd0] sm:$0xff]  }
 0x20e   : > { %11654 = vmatprep.subr.bf16.mxu0 %v12342_v61  ;;  %v12351_v61 = vld [vmem:[%s16194_s3 + $0xa8] sm:$0xff]  }
 0x20f   : > { %v4771_v15 = vadd.f32 %v11341_v19, %v14307_v63  ;;  %v14488_v38 = vadd.f32 %v11450_v3, %v4768_v60  ;;  %v12343_v63 = vld [vmem:[%s16194_s3 + $0x90] sm:$0xff]   ;;  %v12346_v19 = vld [vmem:[%s16194_s3 + $0xe0] sm:$0xff]   ;;  %v12349_v3 = vld [vmem:[%s16194_s3 + $0x38] sm:$0xff]  }
 0x210   : > { %11655 = vmatpush3.bf16.msra.mxu0 %v12343_v63 }
 0x211   : > { %v11342_v62 = vpop.f32.mrb[104].mxu0  ;;  %v14496_v39 = vadd.f32 %v11453_v7, %v4771_v15  ;;  %11656 = vmatprep.subr.bf16.mxu0 %v12344_v36 }
 0x212   : > { %v11343_v14 = vpop.f32.mrb[105].mxu0  ;;  %v11454_v41 = vpop.f32.mrb[72].mxu1 }
 0x213   : > { %v11344_v17 = vadd.f32 %v11343_v14, %v11342_v62  ;;  %v11345_v48 = vpop.f32.mrb[106].mxu0  ;;  %v11455_v18 = vpop.f32.mrb[73].mxu1 }
 0x214   : > { %v11346_v25 = vpop.f32.mrb[107].mxu0  ;;  %v11456_v13 = vadd.f32 %v11455_v18, %v11454_v41  ;;  %v11457_v2 = vpop.f32.mrb[74].mxu1  ;;  %11657 = vmatpush3.bf16.msra.mxu0 %v12345_v1  ;;  %v12353_v41 = vld [vmem:[%s16194_s3 + $0xb0] sm:$0xff]   ;;  %v12354_v18 = vld [vmem:[%s16194_s3 + $0xf8] sm:$0xff]  }
 0x215   : > { %v4776_v10 = vadd.f32 %v11344_v17, %v14311_v23  ;;  %v11347_v31 = vadd.f32 %v11346_v25, %v11345_v48  ;;  %v11458_v58 = vpop.f32.mrb[75].mxu1  ;;  %11658 = vmatprep.subr.bf16.mxu0 %v12346_v19 }
 0x216   : > { %v11459_v40 = vadd.f32 %v11458_v58, %v11457_v2 }
 0x217   : > { %v4779_v44 = vadd.f32 %v11347_v31, %v14315_v28  ;;  %v14506_v23 = vadd.f32 %v11456_v13, %v4776_v10  ;;  %v12347_v28 = vld [vmem:[%s16194_s3 + $0x78] sm:$0xff]  }
 0x218   : > { %11552 = vmatprep.subr.bf16.mxu1 %v12347_v28  ;;  %11659 = vmatpush3.bf16.msra.mxu0 %v12348_v57  ;;  %v12355_v13 = vld [vmem:[%s16194_s3 + $0xb8] sm:$0xff]  }
 0x219   : > { %v11348_v6 = vpop.f32.mrb[108].mxu0  ;;  %v14508_v43 = vadd.f32 %v11459_v40, %v4779_v44  ;;  %11553 = vmatpush3.bf16.msra.mxu1 %v12349_v3  ;;  %11660 = vmatprep.subr.bf16.mxu0 %v12350_v5  ;;  %v5881_v57 = vld [vmem:[#allocation3] sm:$0xf]  ;;  %v5883_v5 = vld [vmem:[#allocation3 + $0x8] sm:$0x1] }
 0x21a   : > { %v11349_v60 = vpop.f32.mrb[109].mxu0 }
 0x21b   : > { %v11350_v37 = vadd.f32 %v11349_v60, %v11348_v6  ;;  %v11351_v15 = vpop.f32.mrb[110].mxu0 }
 0x21c   : > { %v11352_v16 = vpop.f32.mrb[111].mxu0  ;;  %v11460_v33 = vpop.f32.mrb[76].mxu1  ;;  %11661 = vmatpush3.bf16.msra.mxu0 %v12351_v61 }
 0x21d   : > { %v4784_v55 = vadd.f32 %v11350_v37, %v14319_v29  ;;  %v11353_v7 = vadd.f32 %v11352_v16, %v11351_v15  ;;  %v11461_v63 = vpop.f32.mrb[77].mxu1  ;;  %v12352_v29 = vld [vmem:[%s16194_s3 + $0xf0] sm:$0xff]   ;;  %v5882_v16 = vld [vmem:[#allocation3 + $0x4] sm:$0xf] }
 0x21e   : > { %v11462_v14 = vadd.f32 %v11461_v63, %v11460_v33  ;;  %v11463_v17 = vpop.f32.mrb[78].mxu1  ;;  %11662 = vmatprep.subr.bf16.mxu0 %v12352_v29  ;;  %v5933_v33 = vshll.u32 %v5881_v57, 16  ;;  %v5939_v61 = vshll.u32 %v5882_v16, 16  ;;  %v5949_v63 = vshll.u32 %v5883_v5, 16  ;;  %v12356_v5 = vld [vmem:[#allocation3] sm:$0xff]  }
 0x21f   : > { %v4787_v62 = vadd.f32 %v11353_v7, %v14323_v54  ;;  %v11464_v48 = vpop.f32.mrb[79].mxu1 }
 0x220   : > { %v11465_v25 = vadd.f32 %v11464_v48, %v11463_v17  ;;  %v14530_v10 = vadd.f32 %v11462_v14, %v4784_v55  ;;  %11663 = vmatpush3.bf16.msra.mxu0 %v12353_v41  ;;  %v5930_v55 = vshrl.u32 %v5881_v57, 16  ;;  %v5935_v14 = vrot.slane %v5933_v33, 5 }
 0x221   : > { %11664 = vmatprep.subr.bf16.mxu0 %v12354_v18  ;;  %v5951_v18 = vrot.slane %v5949_v63, 5 }
 0x222   : > { %v14535_v31 = vadd.f32 %v11465_v25, %v4787_v62  ;;  %v12359_v62 = vld [vmem:[%s16194_s3 + $0x140] sm:$0xff]   ;;  %v5941_v25 = vrot.slane %v5939_v61, 5 }
 0x223   : > { %v11354_v36 = vpop.f32.mrb[112].mxu0  ;;  %11762 = vmatprep.subr.bf16.mxu1 %v12359_v62 }
 0x224   : > { %v11355_v1 = vpop.f32.mrb[113].mxu0  ;;  %11665 = vmatpush3.bf16.msra.mxu0 %v12355_v13 }
 0x225   : > { %v11356_v54 = vadd.f32 %v11355_v1, %v11354_v36  ;;  %v11357_v44 = vpop.f32.mrb[114].mxu0 }
 0x226   : > { %v11358_v2 = vpop.f32.mrb[115].mxu0 }
 0x227   : > { %v4792_v58 = vadd.f32 %v11356_v54, %v14327_v26  ;;  %v11466_v40 = vpop.f32.mrb[80].mxu1  ;;  %v11359_v6 = vadd.f32 %v11358_v2, %v11357_v44  ;;  %v5943_v26 = vshrl.u32 %v5882_v16, 16 }
 0x228   : > { %v11467_v60 = vpop.f32.mrb[81].mxu1 }
 0x229   : > { %v4795_v19 = vadd.f32 %v11359_v6, %v14331_v9  ;;  %v11468_v37 = vadd.f32 %v11467_v60, %v11466_v40  ;;  %v11469_v15 = vpop.f32.mrb[82].mxu1  ;;  %v5932_v9 = vrot.slane %v5930_v55, 4  ;;  %v5945_v29 = vrot.slane %v5943_v26, 4 }
 0x22a   : > { %v11470_v28 = vpop.f32.mrb[83].mxu1 }
 0x22b   : > { %v11471_v3 = vadd.f32 %v11470_v28, %v11469_v15  ;;  %v14548_v7 = vadd.f32 %v11468_v37, %v4792_v58  ;;  %v5936_v41 = vor.u32 %v5935_v14, %v5932_v9  ;;  %v5946_v44 = vor.u32 %v5945_v29, %v5941_v25 }
 0x22d   : > { %v14553_v17 = vadd.f32 %v11471_v3, %v4795_v19  ;;  %v5937_v2 = vrot.slane %v5936_v41, 4  ;;  %v5947_v60 = vrot.slane %v5946_v44, 4 }
 0x22e   : > { %v11360_v48 = vpop.f32.mrb[116].mxu0 }
 0x22f   : > { %v11361_v36 = vpop.f32.mrb[117].mxu0  ;;  %v5942_v15 = vsel %vm12805_vm2, %v5937_v2, %v5941_v25  ;;  %v5952_v16 = vsel %vm12805_vm2, %v5947_v60, %v5951_v18 }
 0x230   : > { %v11362_v1 = vadd.f32 %v11361_v36, %v11360_v48  ;;  %v11363_v54 = vpop.f32.mrb[118].mxu0  ;;  %v10754_v33 = vcombine.low %v5942_v15, %v5952_v16 }
 0x231   : > { %v11364_v13 = vpop.f32.mrb[119].mxu0 }
 0x232   : > { %v4800_v58 = vadd.f32 %v11362_v1, %v14335_v53  ;;  %v11472_v40 = vpop.f32.mrb[84].mxu1  ;;  %v11365_v6 = vadd.f32 %v11364_v13, %v11363_v54  ;;  %v12360_v53 = vld [vmem:[%s16194_s3 + $0x100] sm:$0xff]   ;;  %9521 = vmatprep.mubr.bf16.mxu1 %v10754_v33 }
 0x233   : > { %v11473_v37 = vpop.f32.mrb[85].mxu1  ;;  %9522 = vmatmul.mubr.bf16.vlgmr.msra.gmra.mrb[112].mxu1 %v12356_v5 }
 0x234   : > { %v4803_v28 = vadd.f32 %v11365_v6, %v14339_v22  ;;  %v11474_v57 = vadd.f32 %v11473_v37, %v11472_v40  ;;  %v11475_v3 = vpop.f32.mrb[86].mxu1  ;;  %11763 = vmatpush3.bf16.msra.mxu1 %v12360_v53 }
 0x235   : > { %v11476_v55 = vpop.f32.mrb[87].mxu1 }
 0x236   : > { %v11477_v61 = vadd.f32 %v11476_v55, %v11475_v3  ;;  %v14564_v26 = vadd.f32 %v11474_v57, %v4800_v58 }
 0x238   : > { %v14566_v63 = vadd.f32 %v11477_v61, %v4803_v28 }
 0x239   : > { %v11366_v22 = vpop.f32.mrb[120].mxu0 }
 0x23a   : > { %v11367_v62 = vpop.f32.mrb[121].mxu0 }
 0x23b   : > { %v11368_v9 = vadd.f32 %v11367_v62, %v11366_v22  ;;  %v11369_v14 = vpop.f32.mrb[122].mxu0 }
 0x23c   : > { %v11370_v48 = vpop.f32.mrb[123].mxu0 }
 0x23d   : > { %v4808_v25 = vadd.f32 %v11368_v9, %v14343_v42  ;;  %v11478_v29 = vpop.f32.mrb[88].mxu1  ;;  %v11371_v36 = vadd.f32 %v11370_v48, %v11369_v14  ;;  %v12365_v42 = vld [vmem:[%s16194_s3 + $0x148] sm:$0xff]  }
 0x23e   : > { %v11479_v41 = vpop.f32.mrb[89].mxu1  ;;  %11764 = vmatprep.subr.bf16.mxu1 %v12365_v42 }
 0x23f   : > { %v4811_v1 = vadd.f32 %v11371_v36, %v14347_v27  ;;  %v11480_v54 = vadd.f32 %v11479_v41, %v11478_v29  ;;  %v11481_v44 = vpop.f32.mrb[90].mxu1 }
 0x240   : > { %v11482_v18 = vpop.f32.mrb[91].mxu1 }
 0x241   : > { %v11483_v13 = vadd.f32 %v11482_v18, %v11481_v44  ;;  %v14570_v2 = vadd.f32 %v11480_v54, %v4808_v25 }
 0x243   : > { %v14572_v58 = vadd.f32 %v11483_v13, %v4811_v1 }
 0x244   : > { %v11372_v40 = vpop.f32.mrb[124].mxu0 }
 0x245   : > { %v11373_v6 = vpop.f32.mrb[125].mxu0 }
 0x246   : > { %v11374_v60 = vadd.f32 %v11373_v6, %v11372_v40  ;;  %v11375_v37 = vpop.f32.mrb[126].mxu0 }
 0x247   : > { %v11376_v15 = vpop.f32.mrb[127].mxu0 }
 0x248   : > { %v4816_v28 = vadd.f32 %v11374_v60, %v14351_v20  ;;  %v11484_v27 = vpop.f32.mrb[92].mxu1  ;;  %v11377_v57 = vadd.f32 %v11376_v15, %v11375_v37  ;;  %v12366_v20 = vld [vmem:[%s16194_s3 + $0x108] sm:$0xff]  }
 0x249   : > { %v11485_v3 = vpop.f32.mrb[93].mxu1  ;;  %11765 = vmatpush3.bf16.msra.mxu1 %v12366_v20 }
 0x24a   : > { %v4819_v16 = vadd.f32 %v11377_v57, %v14355_v59  ;;  %v11486_v5 = vadd.f32 %v11485_v3, %v11484_v27  ;;  %v11487_v55 = vpop.f32.mrb[94].mxu1 }
 0x24b   : > { %v11488_v33 = vpop.f32.mrb[95].mxu1 }
 0x24c   : > { %v11489_v53 = vadd.f32 %v11488_v33, %v11487_v55  ;;  %v14579_v61 = vadd.f32 %v11486_v5, %v4816_v28 }
 0x24e   : > { %v14581_v22 = vadd.f32 %v11489_v53, %v4819_v16 }
 0x24f   : > { %v11378_v62 = vpop.f32.mrb[128].mxu0 }
 0x250   : > { %v11379_v9 = vpop.f32.mrb[129].mxu0 }
 0x251   : > { %v11380_v14 = vadd.f32 %v11379_v9, %v11378_v62  ;;  %v11381_v48 = vpop.f32.mrb[130].mxu0  ;;  %v12371_v9 = vld [vmem:[%s16194_s3 + $0x150] sm:$0xff]  }
 0x252   : > { %v11382_v25 = vpop.f32.mrb[131].mxu0  ;;  %11766 = vmatprep.subr.bf16.mxu1 %v12371_v9 }
 0x253   : > { %v4824_v59 = vadd.f32 %v11380_v14, %v14365_v56  ;;  %v11490_v29 = vpop.f32.mrb[96].mxu1  ;;  %v11383_v36 = vadd.f32 %v11382_v25, %v11381_v48 }
 0x254   : > { %v11491_v41 = vpop.f32.mrb[97].mxu1 }
 0x255   : > { %v4827_v1 = vadd.f32 %v11383_v36, %v14369_v47  ;;  %v11492_v54 = vadd.f32 %v11491_v41, %v11490_v29  ;;  %v11493_v44 = vpop.f32.mrb[98].mxu1 }
 0x256   : > { %v11494_v18 = vpop.f32.mrb[99].mxu1 }
 0x257   : > { %v11495_v13 = vadd.f32 %v11494_v18, %v11493_v44  ;;  %v14588_v40 = vadd.f32 %v11492_v54, %v4824_v59 }
 0x259   : > { %v14590_v6 = vadd.f32 %v11495_v13, %v4827_v1  ;;  %v12372_v1 = vld [vmem:[%s16194_s3 + $0x110] sm:$0xff]  }
 0x25a   : > { %v11384_v60 = vpop.f32.mrb[132].mxu0  ;;  %11767 = vmatpush3.bf16.msra.mxu1 %v12372_v1  ;;  %v6395_v1 = vld [vmem:[#allocation3 + $0x8] sm:$0x1] }
 0x25b   : > { %v11385_v37 = vpop.f32.mrb[133].mxu0 }
 0x25c   : > { %v11386_v15 = vadd.f32 %v11385_v37, %v11384_v60  ;;  %v11387_v42 = vpop.f32.mrb[134].mxu0 }
 0x25d   : > { %v11388_v28 = vpop.f32.mrb[135].mxu0 }
 0x25e   : > { %v4832_v56 = vadd.f32 %v11386_v15, %v14373_v34  ;;  %v11389_v27 = vadd.f32 %v11388_v28, %v11387_v42 }
 0x25f   : > { %v11496_v57 = vpop.f32.mrb[100].mxu1 }
 0x260   : > { %v4835_v3 = vadd.f32 %v11389_v27, %v14377_v35  ;;  %v11497_v47 = vpop.f32.mrb[101].mxu1 }
 0x261   : > { %v11498_v16 = vadd.f32 %v11497_v47, %v11496_v57  ;;  %v11499_v5 = vpop.f32.mrb[102].mxu1  ;;  %v12377_v47 = vld [vmem:[%s16194_s3 + $0x158] sm:$0xff]  }
 0x262   : > { %v11500_v55 = vpop.f32.mrb[103].mxu1  ;;  %11768 = vmatprep.subr.bf16.mxu1 %v12377_v47 }
 0x263   : > { %v11501_v33 = vadd.f32 %v11500_v55, %v11499_v5  ;;  %v14594_v53 = vadd.f32 %v11498_v16, %v4832_v56  ;;  %v6393_v5 = vld [vmem:[#allocation3] sm:$0xe] }
 0x265   : > { %v14596_v62 = vadd.f32 %v11501_v33, %v4835_v3 }
 0x266   : > { %v11390_v20 = vpop.f32.mrb[136].mxu0 }
 0x267   : > { %v11391_v14 = vpop.f32.mrb[137].mxu0 }
 0x268   : > { %v11392_v34 = vadd.f32 %v11391_v14, %v11390_v20  ;;  %v11393_v48 = vpop.f32.mrb[138].mxu0  ;;  %v6394_v20 = vld [vmem:[#allocation3 + $0x4] sm:$0xf] }
 0x269   : > { %v11394_v25 = vpop.f32.mrb[139].mxu0  ;;  %v12378_v14 = vld [vmem:[%s16194_s3 + $0x118] sm:$0xff]  }
 0x26a   : > { %v4840_v35 = vadd.f32 %v11392_v34, %v14380_v32  ;;  %v11395_v59 = vadd.f32 %v11394_v25, %v11393_v48  ;;  %11769 = vmatpush3.bf16.msra.mxu1 %v12378_v14  ;;  %v5632_v14 = vld [vmem:[#allocation3 + $0x18] sm:$0xf] }
 0x26c   : > { %v4843_v29 = vadd.f32 %v11395_v59, %v14385_v12 }
 0x26e   : > { %v11502_v36 = vpop.f32.mrb[104].mxu1 }
 0x26f   : > { %v11503_v41 = vpop.f32.mrb[105].mxu1 }
 0x270   : > { %v11504_v54 = vadd.f32 %v11503_v41, %v11502_v36  ;;  %v11505_v44 = vpop.f32.mrb[106].mxu1 }
 0x271   : > { %v11506_v18 = vpop.f32.mrb[107].mxu1 }
 0x272   : > { %v11507_v13 = vadd.f32 %v11506_v18, %v11505_v44  ;;  %v14606_v37 = vadd.f32 %v11504_v54, %v4840_v35  ;;  %v10770_v54 = vrot.slane %v6393_v5, 9  ;;  %v6491_v44 = vrot.slane %v6394_v20, 5 }
 0x273   : > { %v11396_v60 = vpop.f32.mrb[140].mxu0 }
 0x274   : > { %v11397_v15 = vpop.f32.mrb[141].mxu0  ;;  %v14608_v28 = vadd.f32 %v11507_v13, %v4843_v29 }
 0x275   : > { %v11398_v42 = vadd.f32 %v11397_v15, %v11396_v60  ;;  %v11399_v32 = vpop.f32.mrb[142].mxu0 }
 0x276   : > { %v11400_v12 = vpop.f32.mrb[143].mxu0 }
 0x277   : > { %v4848_v56 = vadd.f32 %v11398_v42, %v14388_v0  ;;  %v11401_v27 = vadd.f32 %v11400_v12, %v11399_v32  ;;  %v6494_v32 = vrot.slane %v6395_v1, 5 }
 0x278   : > { %v11508_v57 = vpop.f32.mrb[108].mxu1 }
 0x279   : > { %v4851_v3 = vadd.f32 %v11401_v27, %v14391_v51  ;;  %v11509_v16 = vpop.f32.mrb[109].mxu1  ;;  %v14628_v27 = vsel %vm13026_vm13, %v10770_v54, %v6491_v44 }
 0x27a   : > { %v11510_v55 = vadd.f32 %v11509_v16, %v11508_v57  ;;  %v11511_v33 = vpop.f32.mrb[110].mxu1 }
 0x27b   : > { %v12116_v9 = vpop.f32.mrb[144].mxu0  ;;  %v11512_v0 = vpop.f32.mrb[111].mxu1 }
 0x27c   : > { %v5058_v34 = vadd.f32 %v12116_v9, %v14446_v46  ;;  %v5049_v48 = vpop.f32.mrb[145].mxu0  ;;  %v11513_v51 = vadd.f32 %v11512_v0, %v11511_v33  ;;  %v14620_v59 = vadd.f32 %v11510_v55, %v4848_v56 }
 0x27d   : > { %v5050_v25 = vadd.f32 %v5049_v48, %v14434_v21  ;;  %v12117_v35 = vpop.f32.mrb[146].mxu0 }
 0x27e   : > { %v5178_v29 = vmax.f32 %v5058_v34, 0.0  ;;  %v5061_v36 = vadd.f32 %v12117_v35, %v14448_v49  ;;  %v5052_v41 = vpop.f32.mrb[147].mxu0  ;;  %v14624_v60 = vadd.f32 %v11513_v51, %v4851_v3  ;;  %v6493_v49 = vrot.slane %v6491_v44, 4 }
 0x27f   : > { %v5176_v18 = vmax.f32 %v5050_v25, 0.0  ;;  %v5053_v13 = vadd.f32 %v5052_v41, %v14436_v30 }
 0x280   : > { %v11035_v46 = vpack.c.bf16 %v5178_v29, %v5178_v29  ;;  %v5179_v15 = vmax.f32 %v5061_v36, 0.0  ;;  %v5625_v36 = vld [vmem:[#allocation3 + $0xc] sm:$0xf] }
 0x281   : > { %v11033_v42 = vpack.c.bf16 %v5176_v18, %v5176_v18  ;;  %v5177_v21 = vmax.f32 %v5053_v13, 0.0  ;;  %v5636_v13 = vld [vmem:[#allocation3 + $0x20] sm:$0x1] }
 0x282   : > { %v5322_v12 = vshrl.u32 %v11035_v46, 16  ;;  %v11036_v56 = vpack.c.bf16 %v5179_v15, %v5179_v15  ;;  %v5325_v57 = vshll.u32 %v11035_v46, 16 }
 0x283   : > { %v5305_v47 = vshrl.u32 %v11033_v42, 16  ;;  %v5308_v16 = vshll.u32 %v11033_v42, 16  ;;  %v11034_v5 = vpack.c.bf16 %v5177_v21, %v5177_v21  ;;  %v12120_v55 = vpop.f32.mrb[148].mxu0 }
 0x284   : > { %v5324_v30 = vrot.slane %v5322_v12, 7  ;;  %v5330_v3 = vshrl.u32 %v11036_v56, 16  ;;  %v5333_v33 = vshll.u32 %v11036_v56, 16  ;;  %v5074_v9 = vadd.f32 %v12120_v55, %v14458_v45  ;;  %v5065_v20 = vpop.f32.mrb[149].mxu0  ;;  %v5629_v56 = vld [vmem:[#allocation3 + $0x14] sm:$0x1] }
 0x285   : > { %v5307_v0 = vrot.slane %v5305_v47, 7  ;;  %v5313_v34 = vshrl.u32 %v11034_v5, 16  ;;  %v5316_v48 = vshll.u32 %v11034_v5, 16  ;;  %v5066_v51 = vadd.f32 %v5065_v20, %v14452_v11  ;;  %v12121_v25 = vpop.f32.mrb[150].mxu0 }
 0x286   : > { %v5327_v35 = vor.u32 %v5325_v57, %v5324_v30  ;;  %v5328_v29 = vrot.slane %v5324_v30, 4  ;;  %v5332_v41 = vrot.slane %v5330_v3, 7  ;;  %v5182_v1 = vmax.f32 %v5074_v9, 0.0  ;;  %v5068_v54 = vpop.f32.mrb[151].mxu0 }
 0x287   : > { %v5310_v44 = vor.u32 %v5308_v16, %v5307_v0  ;;  %v5311_v18 = vrot.slane %v5307_v0, 4  ;;  %v5315_v46 = vrot.slane %v5313_v34, 7  ;;  %v5180_v15 = vmax.f32 %v5066_v51, 0.0  ;;  %v12383_v16 = vld [vmem:[%s16194_s3 + $0x160] sm:$0xff]  }
 0x288   : > { %v5633_v42 = vsel %vm12869_vm10, %v5327_v35, %v5632_v14  ;;  %v5335_v21 = vor.u32 %v5333_v33, %v5332_v41  ;;  %v5337_v12 = vrot.slane %v5332_v41, 4  ;;  %v11039_v47 = vpack.c.bf16 %v5182_v1, %v5182_v1  ;;  %v12384_v0 = vld [vmem:[%s16194_s3 + $0x120] sm:$0xff]   ;;  %11770 = vmatprep.subr.bf16.mxu1 %v12383_v16 }
 0x289   : > { %5634 = vst [vmem:[#allocation3 + $0x18] sm:$0xf] %v5633_v42  ;;  %v5626_v11 = vsel %vm12869_vm10, %v5310_v44, %v5625_v36  ;;  %v5318_v57 = vor.u32 %v5316_v48, %v5315_v46  ;;  %v5320_v5 = vrot.slane %v5315_v46, 4  ;;  %v11037_v55 = vpack.c.bf16 %v5180_v15, %v5180_v15  ;;  %11771 = vmatpush3.bf16.msra.mxu1 %v12384_v0  ;;  %v5646_v44 = vld [vmem:[#allocation3 + $0x30] sm:$0xf] }
 0x28a   : > { %5627 = vst [vmem:[#allocation3 + $0xc] sm:$0xf] %v5626_v11  ;;  %v5336_v3 = vsel %vm12847_vm7, %v5328_v29, %v5335_v21  ;;  %v5637_v33 = vsel %vm12859_vm9, %v5337_v12, %v5636_v13  ;;  %v5356_v20 = vshrl.u32 %v11039_v47, 16  ;;  %v14645_v14 = vsel %vm13026_vm13, %v6493_v49, %v6494_v32 }
 0x28b   : > { %5635 = vst [vmem:[#allocation3 + $0x1c] sm:$0xf] %v5336_v3  ;;  %5638 = vst [vmem:[#allocation3 + $0x20] sm:$0x1] %v5637_v33  ;;  %v5319_v34 = vsel %vm12847_vm7, %v5311_v18, %v5318_v57  ;;  %v5630_v48 = vsel %vm12859_vm9, %v5320_v5, %v5629_v56  ;;  %v5359_v51 = vshll.u32 %v11039_v47, 16  ;;  %v5339_v35 = vshrl.u32 %v11037_v55, 16 }
 0x28c   : > { %v12124_v29 = vpop.f32.mrb[152].mxu0  ;;  %5628 = vst [vmem:[#allocation3 + $0x10] sm:$0xf] %v5319_v34  ;;  %5631 = vst [vmem:[#allocation3 + $0x14] sm:$0x1] %v5630_v48  ;;  %v14654_v32 = vrot.slane %v5356_v20, 7  ;;  %v5077_v49 = vadd.f32 %v12121_v25, %v14463_v24  ;;  %v5069_v36 = vadd.f32 %v5068_v54, %v14454_v50  ;;  %v10786_v42 = vcombine.low %v14628_v27, %v14645_v14 }
 0x28d   : > { %v5090_v41 = vadd.f32 %v12124_v29, %v14488_v38  ;;  %v5081_v1 = vpop.f32.mrb[153].mxu0  ;;  %v14659_v18 = vrot.slane %v5339_v35, 7  ;;  %v5342_v13 = vshll.u32 %v11037_v55, 16  ;;  %v5639_v25 = vld [vmem:[#allocation3 + $0x24] sm:$0xf] }
 0x28e   : > { %v5082_v46 = vadd.f32 %v5081_v1, %v14476_v4  ;;  %v12125_v15 = vpop.f32.mrb[154].mxu0  ;;  %v5361_v21 = vor.u32 %v5359_v51, %v14654_v32  ;;  %v5362_v24 = vrot.slane %v14654_v32, 4  ;;  %v5183_v50 = vmax.f32 %v5077_v49, 0.0  ;;  %v5650_v48 = vld [vmem:[#allocation3 + $0x38] sm:$0x1] }
 0x28f   : > { %v5181_v54 = vmax.f32 %v5069_v36, 0.0  ;;  %v5084_v38 = vpop.f32.mrb[155].mxu0  ;;  %v5344_v12 = vor.u32 %v5342_v13, %v14659_v18  ;;  %v5345_v56 = vrot.slane %v14659_v18, 4  ;;  %v5186_v47 = vmax.f32 %v5090_v41, 0.0  ;;  %v5643_v51 = vld [vmem:[#allocation3 + $0x2c] sm:$0x1] }
 0x290   : > { %v5184_v11 = vmax.f32 %v5082_v46, 0.0  ;;  %v5647_v4 = vsel %vm12869_vm10, %v5361_v21, %v5646_v44  ;;  %v11040_v57 = vpack.c.bf16 %v5183_v50, %v5183_v50  ;;  %v5093_v27 = vadd.f32 %v12125_v15, %v14496_v39  ;;  %v5660_v44 = vld [vmem:[#allocation3 + $0x48] sm:$0xf] }
 0x291   : > { %v11038_v5 = vpack.c.bf16 %v5181_v54, %v5181_v54  ;;  %5648 = vst [vmem:[#allocation3 + $0x30] sm:$0xf] %v5647_v4  ;;  %v5640_v55 = vsel %vm12869_vm10, %v5344_v12, %v5639_v25  ;;  %v11043_v16 = vpack.c.bf16 %v5186_v47, %v5186_v47  ;;  %v5085_v33 = vadd.f32 %v5084_v38, %v14478_v52  ;;  %v5653_v4 = vld [vmem:[#allocation3 + $0x3c] sm:$0xf] }
 0x292   : > { %v11041_v3 = vpack.c.bf16 %v5184_v11, %v5184_v11  ;;  %5641 = vst [vmem:[#allocation3 + $0x24] sm:$0xf] %v5640_v55  ;;  %v5364_v20 = vshrl.u32 %v11040_v57, 16  ;;  %v5367_v14 = vshll.u32 %v11040_v57, 16  ;;  %v5187_v18 = vmax.f32 %v5093_v27, 0.0  ;;  %v12358_v54 = vld [vmem:[#allocation3 + $0x18] sm:$0xff]  }
 0x293   : > { %v5347_v0 = vshrl.u32 %v11038_v5, 16  ;;  %v5350_v34 = vshll.u32 %v11038_v5, 16  ;;  %v5390_v35 = vshrl.u32 %v11043_v16, 16  ;;  %v5393_v29 = vshll.u32 %v11043_v16, 16  ;;  %v12128_v39 = vpop.f32.mrb[156].mxu0  ;;  %v12357_v36 = vld [vmem:[#allocation3 + $0xc] sm:$0xff]  }
 0x294   : > { %v5373_v32 = vshrl.u32 %v11041_v3, 16  ;;  %v5376_v49 = vshll.u32 %v11041_v3, 16  ;;  %v5366_v41 = vrot.slane %v5364_v20, 7  ;;  %v5185_v13 = vmax.f32 %v5085_v33, 0.0  ;;  %v5097_v46 = vpop.f32.mrb[157].mxu0  ;;  %9682 = vmatprep.mubr.bf16.mxu0 %v12357_v36 }
 0x295   : > { %v5349_v1 = vrot.slane %v5347_v0, 7  ;;  %v14674_v52 = vrot.slane %v5390_v35, 7  ;;  %v5106_v21 = vadd.f32 %v12128_v39, %v14530_v10  ;;  %v5098_v25 = vadd.f32 %v5097_v46, %v14506_v23  ;;  %v12129_v50 = vpop.f32.mrb[158].mxu0  ;;  %9683 = vmatmul.mubr.bf16.vlgmr.msra.gmra.mrb[176].mxu0 %v10786_v42  ;;  %v12389_v39 = vld [vmem:[%s16194_s3 + $0x168] sm:$0xff]  }
 0x296   : > { %v14676_v15 = vrot.slane %v5373_v32, 7  ;;  %v5369_v38 = vor.u32 %v5367_v14, %v5366_v41  ;;  %v5371_v12 = vrot.slane %v5366_v41, 4  ;;  %v5100_v57 = vpop.f32.mrb[159].mxu0  ;;  %9690 = vmatprep.mubr.bf16.mxu0 %v12358_v54  ;;  %v11042_v14 = vpack.c.bf16 %v5185_v13, %v5185_v13  ;;  %v5664_v36 = vld [vmem:[#allocation3 + $0x50] sm:$0x1]  ;;  %11772 = vmatprep.subr.bf16.mxu1 %v12389_v39 }
 0x297   : > { %v5352_v47 = vor.u32 %v5350_v34, %v5349_v1  ;;  %v5354_v11 = vrot.slane %v5349_v1, 4  ;;  %v5395_v5 = vor.u32 %v5393_v29, %v14674_v52  ;;  %v5396_v27 = vrot.slane %v14674_v52, 4  ;;  %v5657_v41 = vld [vmem:[#allocation3 + $0x44] sm:$0x1]  ;;  %v5678_v39 = vld [vmem:[#allocation3 + $0x68] sm:$0x1] }
 0x298   : > { %v5378_v55 = vor.u32 %v5376_v49, %v14676_v15  ;;  %v5379_v10 = vrot.slane %v14676_v15, 4  ;;  %v5370_v23 = vsel %vm12847_vm7, %v5362_v24, %v5369_v38  ;;  %v5651_v16 = vsel %vm12859_vm9, %v5371_v12, %v5650_v48 }
 0x299   : > { %v5353_v3 = vsel %vm12847_vm7, %v5345_v56, %v5352_v47  ;;  %v5644_v42 = vsel %vm12859_vm9, %v5354_v11, %v5643_v51  ;;  %5649 = vst [vmem:[#allocation3 + $0x34] sm:$0xf] %v5370_v23  ;;  %5652 = vst [vmem:[#allocation3 + $0x38] sm:$0x1] %v5651_v16  ;;  %v5661_v33 = vsel %vm12869_vm10, %v5395_v5, %v5660_v44  ;;  %v5190_v0 = vmax.f32 %v5106_v21, 0.0 }
 0x29a   : > { %5642 = vst [vmem:[#allocation3 + $0x28] sm:$0xf] %v5353_v3  ;;  %5645 = vst [vmem:[#allocation3 + $0x2c] sm:$0x1] %v5644_v42  ;;  %v5654_v20 = vsel %vm12869_vm10, %v5378_v55, %v5653_v4  ;;  %v11044_v24 = vpack.c.bf16 %v5187_v18, %v5187_v18  ;;  %v5188_v34 = vmax.f32 %v5098_v25, 0.0  ;;  %v5109_v56 = vadd.f32 %v12129_v50, %v14535_v31 }
 0x29b   : > { %5662 = vst [vmem:[#allocation3 + $0x48] sm:$0xf] %v5661_v33  ;;  %5655 = vst [vmem:[#allocation3 + $0x3c] sm:$0xf] %v5654_v20  ;;  %v5101_v48 = vadd.f32 %v5100_v57, %v14508_v43  ;;  %v5381_v29 = vshrl.u32 %v11042_v14, 16  ;;  %v5384_v32 = vshll.u32 %v11042_v14, 16  ;;  %v11047_v1 = vpack.c.bf16 %v5190_v0, %v5190_v0 }
 0x29c   : > { %v5398_v51 = vshrl.u32 %v11044_v24, 16  ;;  %v5401_v35 = vshll.u32 %v11044_v24, 16  ;;  %v12132_v49 = vpop.f32.mrb[160].mxu0  ;;  %v11045_v44 = vpack.c.bf16 %v5188_v34, %v5188_v34  ;;  %v5191_v18 = vmax.f32 %v5109_v56, 0.0  ;;  %v12390_v43 = vld [vmem:[%s16194_s3 + $0x128] sm:$0xff]  }
 0x29d   : > { %v5189_v13 = vmax.f32 %v5101_v48, 0.0  ;;  %v5113_v46 = vpop.f32.mrb[161].mxu0  ;;  %v5383_v52 = vrot.slane %v5381_v29, 7  ;;  %v5122_v15 = vadd.f32 %v12132_v49, %v14564_v26  ;;  %v5424_v50 = vshrl.u32 %v11047_v1, 16  ;;  %11773 = vmatpush3.bf16.msra.mxu1 %v12390_v43  ;;  %v5674_v20 = vld [vmem:[#allocation3 + $0x60] sm:$0xf] }
 0x29e   : > { %v5400_v31 = vrot.slane %v5398_v51, 7  ;;  %v5114_v21 = vadd.f32 %v5113_v46, %v14548_v7  ;;  %v12133_v25 = vpop.f32.mrb[162].mxu0  ;;  %v5427_v54 = vshll.u32 %v11047_v1, 16  ;;  %v5407_v38 = vshrl.u32 %v11045_v44, 16  ;;  %v5667_v24 = vld [vmem:[#allocation3 + $0x54] sm:$0xf] }
 0x29f   : > { %v5410_v12 = vshll.u32 %v11045_v44, 16  ;;  %v5116_v47 = vpop.f32.mrb[163].mxu0  ;;  %v5386_v57 = vor.u32 %v5384_v32, %v5383_v52  ;;  %v5388_v5 = vrot.slane %v5383_v52, 4  ;;  %v5426_v55 = vrot.slane %v5424_v50, 7  ;;  %v12393_v52 = vld [vmem:[%s16194_s3 + $0x1c0] sm:$0xff]  }
 0x2a0   : > { %v5403_v11 = vor.u32 %v5401_v35, %v5400_v31  ;;  %v5405_v4 = vrot.slane %v5400_v31, 4  ;;  %v5409_v23 = vrot.slane %v5407_v38, 7  ;;  %v11048_v16 = vpack.c.bf16 %v5191_v18, %v5191_v18  ;;  %11874 = vmatprep.subr.bf16.mxu0 %v12393_v52 }
 0x2a1   : > { %v11046_v3 = vpack.c.bf16 %v5189_v13, %v5189_v13  ;;  %v5387_v42 = vsel %vm12847_vm7, %v5379_v10, %v5386_v57  ;;  %v5658_v33 = vsel %vm12859_vm9, %v5388_v5, %v5657_v41  ;;  %v5429_v14 = vor.u32 %v5427_v54, %v5426_v55  ;;  %v5885_v5 = vld [vmem:[#allocation3 + $0x10] sm:$0xf] }
 0x2a2   : > { %v5404_v26 = vsel %vm12847_vm7, %v5396_v27, %v5403_v11  ;;  %v5665_v7 = vsel %vm12859_vm9, %v5405_v4, %v5664_v36  ;;  %5656 = vst [vmem:[#allocation3 + $0x40] sm:$0xf] %v5387_v42  ;;  %5659 = vst [vmem:[#allocation3 + $0x44] sm:$0x1] %v5658_v33  ;;  %v5430_v0 = vrot.slane %v5426_v55, 4  ;;  %v5412_v34 = vor.u32 %v5410_v12, %v5409_v23 }
 0x2a3   : > { %5663 = vst [vmem:[#allocation3 + $0x4c] sm:$0xf] %v5404_v26  ;;  %5666 = vst [vmem:[#allocation3 + $0x50] sm:$0x1] %v5665_v7  ;;  %v5413_v56 = vrot.slane %v5409_v23, 4  ;;  %v5432_v48 = vshrl.u32 %v11048_v16, 16  ;;  %v5675_v10 = vsel %vm12869_vm10, %v5429_v14, %v5674_v20  ;;  %v5125_v46 = vadd.f32 %v12133_v25, %v14566_v63 }
 0x2a4   : > { %v5884_v27 = vld [vmem:[#allocation3 + $0xc] sm:$0xf]  ;;  %v5435_v51 = vshll.u32 %v11048_v16, 16  ;;  %v5415_v35 = vshrl.u32 %v11046_v3, 16  ;;  %v5418_v29 = vshll.u32 %v11046_v3, 16  ;;  %v14714_v32 = vpop.f32.mrb[164].mxu0  ;;  %v5668_v49 = vsel %vm12869_vm10, %v5412_v34, %v5667_v24 }
 0x2a5   : > { %v5671_v36 = vld [vmem:[#allocation3 + $0x5c] sm:$0x1]  ;;  %v5194_v41 = vmax.f32 %v5122_v15, 0.0  ;;  %v5192_v1 = vmax.f32 %v5114_v21, 0.0  ;;  %v14720_v44 = vpop.f32.mrb[165].mxu0  ;;  %v5434_v18 = vrot.slane %v5432_v48, 7  ;;  %v5117_v43 = vadd.f32 %v5116_v47, %v14553_v17 }
 0x2a6   : > { %5676 = vst [vmem:[#allocation3 + $0x60] sm:$0xf] %v5675_v10  ;;  %5669 = vst [vmem:[#allocation3 + $0x54] sm:$0xf] %v5668_v49  ;;  %v5417_v13 = vrot.slane %v5415_v35, 7  ;;  %v14724_v31 = vpop.f32.mrb[166].mxu0 }
 0x2a7   : > { %v11051_v50 = vpack.c.bf16 %v5194_v41, %v5194_v41  ;;  %v11049_v54 = vpack.c.bf16 %v5192_v1, %v5192_v1  ;;  %v5954_v15 = vshrl.u32 %v5884_v27, 16  ;;  %v5957_v21 = vshll.u32 %v5884_v27, 16  ;;  %v14729_v38 = vpop.f32.mrb[167].mxu0  ;;  %v5688_v26 = vld [vmem:[#allocation3 + $0x78] sm:$0xf] }
 0x2a8   : > { %v5437_v12 = vor.u32 %v5435_v51, %v5434_v18  ;;  %v5439_v11 = vrot.slane %v5434_v18, 4  ;;  %v5420_v4 = vor.u32 %v5418_v29, %v5417_v13  ;;  %v5422_v57 = vrot.slane %v5417_v13, 4  ;;  %v5681_v7 = vld [vmem:[#allocation3 + $0x6c] sm:$0xf]  ;;  %v5886_v14 = vld [vmem:[#allocation3 + $0x14] sm:$0x1] }
 0x2a9   : > { %v5458_v63 = vshrl.u32 %v11051_v50, 16  ;;  %v5461_v25 = vshll.u32 %v11051_v50, 16  ;;  %v5441_v17 = vshrl.u32 %v11049_v54, 16  ;;  %v5444_v47 = vshll.u32 %v11049_v54, 16  ;;  %v6396_v48 = vld [vmem:[#allocation3 + $0xc] sm:$0xe] }
 0x2aa   : > { %v5438_v55 = vsel %vm12847_vm7, %v5430_v0, %v5437_v12  ;;  %v5679_v23 = vsel %vm12859_vm9, %v5439_v11, %v5678_v39  ;;  %v5421_v16 = vsel %vm12847_vm7, %v5413_v56, %v5420_v4  ;;  %v5672_v3 = vsel %vm12859_vm9, %v5422_v57, %v5671_v36  ;;  %v6397_v39 = vld [vmem:[#allocation3 + $0x10] sm:$0xf]  ;;  %v6411_v30 = vld [vmem:[#allocation3 + $0x48] sm:$0xe] }
 0x2ab   : > { %5677 = vst [vmem:[#allocation3 + $0x64] sm:$0xf] %v5438_v55  ;;  %5680 = vst [vmem:[#allocation3 + $0x68] sm:$0x1] %v5679_v23  ;;  %v14739_v42 = vrot.slane %v5458_v63, 7  ;;  %v14741_v33 = vrot.slane %v5441_v17, 7 }
 0x2ac   : > { %5670 = vst [vmem:[#allocation3 + $0x58] sm:$0xf] %v5421_v16  ;;  %5673 = vst [vmem:[#allocation3 + $0x5c] sm:$0x1] %v5672_v3  ;;  %v5195_v20 = vmax.f32 %v5125_v46, 0.0  ;;  %v5193_v24 = vmax.f32 %v5117_v43, 0.0 }
 0x2ad   : > { %v5956_v0 = vrot.slane %v5954_v15, 4  ;;  %v5959_v34 = vrot.slane %v5957_v21, 5  ;;  %v5963_v27 = vshll.u32 %v5885_v5, 16  ;;  %v5967_v56 = vshrl.u32 %v5885_v5, 16  ;;  %v14743_v51 = vpop.f32.mrb[168].mxu0  ;;  %v12396_v55 = vld [vmem:[%s16194_s3 + $0x170] sm:$0xff]  }
 0x2ae   : > { %v5463_v35 = vor.u32 %v5461_v25, %v14739_v42  ;;  %v5464_v29 = vrot.slane %v14739_v42, 4  ;;  %v5446_v10 = vor.u32 %v5444_v47, %v14741_v33  ;;  %v5447_v49 = vrot.slane %v14741_v33, 4  ;;  %v14749_v36 = vpop.f32.mrb[169].mxu0  ;;  %v6398_v46 = vld [vmem:[#allocation3 + $0x14] sm:$0x1]  ;;  %11774 = vmatprep.subr.bf16.mxu1 %v12396_v55 }
 0x2af   : > { %v11052_v41 = vpack.c.bf16 %v5195_v20, %v5195_v20  ;;  %v11050_v1 = vpack.c.bf16 %v5193_v24, %v5193_v24  ;;  %v5960_v18 = vor.u32 %v5959_v34, %v5956_v0  ;;  %v5965_v13 = vrot.slane %v5963_v27, 5  ;;  %v5887_v43 = vld [vmem:[#allocation3 + $0x18] sm:$0xf]  ;;  %v14751_v52 = vpop.f32.mrb[170].mxu0  ;;  %v5692_v16 = vld [vmem:[#allocation3 + $0x80] sm:$0x1] }
 0x2b0   : > { %v5689_v50 = vsel %vm12869_vm10, %v5463_v35, %v5688_v26  ;;  %v5682_v54 = vsel %vm12869_vm10, %v5446_v10, %v5681_v7  ;;  %v5969_v15 = vrot.slane %v5967_v56, 4  ;;  %v5973_v21 = vshll.u32 %v5886_v14, 16  ;;  %v14757_v12 = vpop.f32.mrb[171].mxu0  ;;  %v5685_v42 = vld [vmem:[#allocation3 + $0x74] sm:$0x1] }
 0x2b1   : > { %5690 = vst [vmem:[#allocation3 + $0x78] sm:$0xf] %v5689_v50  ;;  %5683 = vst [vmem:[#allocation3 + $0x6c] sm:$0xf] %v5682_v54  ;;  %v5466_v11 = vshrl.u32 %v11052_v41, 16  ;;  %v5469_v4 = vshll.u32 %v11052_v41, 16 }
 0x2b2   : > { %v5449_v57 = vshrl.u32 %v11050_v1, 16  ;;  %v5452_v63 = vshll.u32 %v11050_v1, 16  ;;  %v5961_v25 = vrot.slane %v5960_v18, 4  ;;  %v5970_v17 = vor.u32 %v5969_v15, %v5965_v13  ;;  %v5889_v1 = vld [vmem:[#allocation3 + $0x20] sm:$0x1]  ;;  %v12361_v15 = vld [vmem:[#allocation3 + $0xc] sm:$0xff]  }
 0x2b3   : > { %v5975_v47 = vrot.slane %v5973_v21, 5  ;;  %v10771_v5 = vrot.slane %v6396_v48, 9  ;;  %v5468_v23 = vrot.slane %v5466_v11, 7  ;;  %v6498_v26 = vrot.slane %v6397_v39, 5  ;;  %v5888_v48 = vld [vmem:[#allocation3 + $0x1c] sm:$0xf] }
 0x2b4   : > { %v5451_v3 = vrot.slane %v5449_v57, 7  ;;  %v6501_v7 = vrot.slane %v6398_v46, 5  ;;  %v5966_v33 = vsel %vm12805_vm2, %v5961_v25, %v5965_v13  ;;  %v5971_v20 = vrot.slane %v5970_v17, 4  ;;  %v14780_v21 = vld [vmem:[#allocation3 + $0x18] sm:$0xe]  ;;  %v12397_v17 = vld [vmem:[%s16194_s3 + $0x180] sm:$0xff]  }
 0x2b5   : > { %v5978_v24 = vshrl.u32 %v5887_v43, 16  ;;  %v5981_v14 = vshll.u32 %v5887_v43, 16  ;;  %v5471_v0 = vor.u32 %v5469_v4, %v5468_v23  ;;  %v5473_v34 = vrot.slane %v5468_v23, 4  ;;  %v14764_v35 = vpop.f32.mrb[172].mxu0  ;;  %v14786_v25 = vld [vmem:[#allocation3 + $0x1c] sm:$0xf]  ;;  %11875 = vmatpush3.bf16.msra.mxu0 %v12397_v17 }
 0x2b6   : > { %v5454_v27 = vor.u32 %v5452_v63, %v5451_v3  ;;  %v5456_v56 = vrot.slane %v5451_v3, 4  ;;  %v5976_v10 = vsel %vm12805_vm2, %v5971_v20, %v5975_v47  ;;  %v6499_v39 = vsel %vm13026_vm13, %v10771_v5, %v6498_v26  ;;  %v14770_v13 = vpop.f32.mrb[173].mxu0 }
 0x2b7   : > { %v6500_v41 = vrot.slane %v6498_v26, 4  ;;  %v5980_v18 = vrot.slane %v5978_v24, 4  ;;  %v5472_v46 = vsel %vm12847_vm7, %v5464_v29, %v5471_v0  ;;  %v5693_v43 = vsel %vm12859_vm9, %v5473_v34, %v5692_v16  ;;  %v14782_v11 = vpop.f32.mrb[174].mxu0  ;;  %v12362_v16 = vld [vmem:[#allocation3 + $0x24] sm:$0xff]  }
 0x2b8   : > { %v5455_v50 = vsel %vm12847_vm7, %v5447_v49, %v5454_v27  ;;  %v5686_v54 = vsel %vm12859_vm9, %v5456_v56, %v5685_v42  ;;  %5691 = vst [vmem:[#allocation3 + $0x7c] sm:$0xf] %v5472_v46  ;;  %5694 = vst [vmem:[#allocation3 + $0x80] sm:$0x1] %v5693_v43  ;;  %v10755_v4 = vcombine.low %v5966_v33, %v5976_v10  ;;  %v5983_v57 = vrot.slane %v5981_v14, 5  ;;  %v14788_v49 = vpop.f32.mrb[175].mxu0 }
 0x2b9   : > { %5684 = vst [vmem:[#allocation3 + $0x70] sm:$0xf] %v5455_v50  ;;  %5687 = vst [vmem:[#allocation3 + $0x74] sm:$0x1] %v5686_v54  ;;  %v6502_v29 = vsel %vm13026_vm13, %v6500_v41, %v6501_v7  ;;  %v5987_v63 = vshll.u32 %v5888_v48, 16  ;;  %v5991_v5 = vshrl.u32 %v5888_v48, 16  ;;  %v5138_v23 = vadd.f32 %v14714_v32, %v14579_v61 }
 0x2ba   : > { %v10787_v47 = vcombine.low %v6499_v39, %v6502_v29  ;;  %v5997_v55 = vshll.u32 %v5889_v1, 16  ;;  %9529 = vmatprep.mubr.bf16.mxu1 %v10755_v4  ;;  %v5984_v3 = vor.u32 %v5983_v57, %v5980_v18  ;;  %v5130_v7 = vadd.f32 %v14720_v44, %v14570_v2  ;;  %v12398_v33 = vld [vmem:[%s16194_s3 + $0x130] sm:$0xff]   ;;  %v6401_v14 = vld [vmem:[#allocation3 + $0x20] sm:$0x1]  ;;  %v12399_v2 = vld [vmem:[%s16194_s3 + $0x1c8] sm:$0xff]  }
 0x2bb   : > { %v5989_v26 = vrot.slane %v5987_v63, 5  ;;  %v5141_v42 = vadd.f32 %v14724_v31, %v14581_v22  ;;  %9530 = vmatmul.mubr.bf16.gmra.mrb[116].mxu1 %v12361_v15  ;;  %v5993_v20 = vrot.slane %v5991_v5, 4  ;;  %v5198_v61 = vmax.f32 %v5138_v23, 0.0  ;;  %11876 = vmatprep.subr.bf16.mxu0 %v12399_v2  ;;  %v12400_v41 = vld [vmem:[%s16194_s3 + $0x188] sm:$0xff]   ;;  %v5695_v5 = vld [vmem:[#allocation3 + $0x84] sm:$0xf] }
 0x2bc   : > { %9691 = vmatmul.mubr.bf16.gmra.mrb[180].mxu0 %v10787_v47  ;;  %v5999_v24 = vrot.slane %v5997_v55, 5  ;;  %v5133_v32 = vadd.f32 %v14729_v38, %v14572_v58  ;;  %v5985_v22 = vrot.slane %v5984_v3, 4  ;;  %v5196_v44 = vmax.f32 %v5130_v7, 0.0  ;;  %11775 = vmatpush3.bf16.msra.mxu1 %v12398_v33  ;;  %v5702_v50 = vld [vmem:[#allocation3 + $0x90] sm:$0xf] }
 0x2bd   : > { %9698 = vmatprep.mubr.bf16.mxu0 %v12362_v16  ;;  %v5199_v31 = vmax.f32 %v5141_v42, 0.0  ;;  %v10772_v0 = vrot.slane %v14780_v21, 9  ;;  %v5994_v34 = vor.u32 %v5993_v20, %v5989_v26  ;;  %v11055_v27 = vpack.c.bf16 %v5198_v61, %v5198_v61  ;;  %11877 = vmatpush3.bf16.msra.mxu0 %v12400_v41  ;;  %v5706_v23 = vld [vmem:[#allocation3 + $0x98] sm:$0x1]  ;;  %v5699_v42 = vld [vmem:[#allocation3 + $0x8c] sm:$0x1] }
 0x2be   : > { %v5197_v56 = vmax.f32 %v5133_v32, 0.0  ;;  %v6505_v48 = vrot.slane %v14786_v25, 5  ;;  %v5990_v58 = vsel %vm12805_vm2, %v5985_v22, %v5989_v26  ;;  %v11053_v38 = vpack.c.bf16 %v5196_v44, %v5196_v44  ;;  %v12363_v20 = vld [vmem:[#allocation3 + $0x18] sm:$0xff]   ;;  %v5890_v2 = vld [vmem:[#allocation3 + $0x24] sm:$0xf]  ;;  %v12364_v41 = vld [vmem:[#allocation3 + $0x30] sm:$0xff]  }
 0x2bf   : > { %v11056_v10 = vpack.c.bf16 %v5199_v31, %v5199_v31  ;;  %v6508_v39 = vrot.slane %v6401_v14, 5  ;;  %v5995_v1 = vrot.slane %v5994_v34, 4  ;;  %v5492_v18 = vshrl.u32 %v11055_v27, 16  ;;  %v5891_v22 = vld [vmem:[#allocation3 + $0x28] sm:$0xf] }
 0x2c0   : > { %v5495_v46 = vshll.u32 %v11055_v27, 16  ;;  %v11054_v43 = vpack.c.bf16 %v5197_v56, %v5197_v56  ;;  %v5475_v54 = vshrl.u32 %v11053_v38, 16  ;;  %v5478_v15 = vshll.u32 %v11053_v38, 16  ;;  %v5892_v27 = vld [vmem:[#allocation3 + $0x2c] sm:$0x1] }
 0x2c1   : > { %v5500_v21 = vshrl.u32 %v11056_v10, 16  ;;  %v5503_v4 = vshll.u32 %v11056_v10, 16  ;;  %v6000_v29 = vsel %vm12805_vm2, %v5995_v1, %v5999_v24  ;;  %v5494_v57 = vrot.slane %v5492_v18, 7 }
 0x2c2   : > { %v5483_v63 = vshrl.u32 %v11054_v43, 16  ;;  %v5486_v25 = vshll.u32 %v11054_v43, 16  ;;  %v10756_v17 = vcombine.low %v5990_v58, %v6000_v29  ;;  %v5477_v47 = vrot.slane %v5475_v54, 7 }
 0x2c3   : > { %v5502_v55 = vrot.slane %v5500_v21, 7  ;;  %v6506_v16 = vsel %vm13026_vm13, %v10772_v0, %v6505_v48  ;;  %v5497_v3 = vor.u32 %v5495_v46, %v5494_v57  ;;  %v5498_v26 = vrot.slane %v5494_v57, 4 }
 0x2c4   : > { %v5485_v7 = vrot.slane %v5483_v63, 7  ;;  %v6507_v33 = vrot.slane %v6505_v48, 4  ;;  %9537 = vmatprep.mubr.bf16.mxu1 %v10756_v17  ;;  %v5480_v61 = vor.u32 %v5478_v15, %v5477_v47  ;;  %v5481_v24 = vrot.slane %v5477_v47, 4  ;;  %v12401_v15 = vld [vmem:[%s16194_s3 + $0x1d0] sm:$0xff]   ;;  %v6402_v63 = vld [vmem:[#allocation3 + $0x24] sm:$0xe] }
 0x2c5   : > { %v5505_v32 = vor.u32 %v5503_v4, %v5502_v55  ;;  %v5507_v14 = vrot.slane %v5502_v55, 4  ;;  %v5703_v44 = vsel %vm12869_vm10, %v5497_v3, %v5702_v50  ;;  %9538 = vmatmul.mubr.bf16.gmra.mrb[120].mxu1 %v12363_v20  ;;  %v6002_v1 = vshrl.u32 %v5890_v2, 16  ;;  %11878 = vmatprep.subr.bf16.mxu0 %v12401_v15 }
 0x2c6   : > { %v5488_v31 = vor.u32 %v5486_v25, %v5485_v7  ;;  %v5490_v34 = vrot.slane %v5485_v7, 4  ;;  %v6509_v0 = vsel %vm13026_vm13, %v6507_v33, %v6508_v39  ;;  %5704 = vst [vmem:[#allocation3 + $0x90] sm:$0xf] %v5703_v44  ;;  %v5696_v56 = vsel %vm12869_vm10, %v5480_v61, %v5695_v5  ;;  %v6403_v25 = vld [vmem:[#allocation3 + $0x28] sm:$0xf] }
 0x2c7   : > { %v5506_v48 = vsel %vm12847_vm7, %v5498_v26, %v5505_v32  ;;  %v5707_v58 = vsel %vm12859_vm9, %v5507_v14, %v5706_v23  ;;  %v10788_v38 = vcombine.low %v6506_v16, %v6509_v0  ;;  %5697 = vst [vmem:[#allocation3 + $0x84] sm:$0xf] %v5696_v56  ;;  %v6005_v18 = vshll.u32 %v5890_v2, 16  ;;  %v5716_v14 = vld [vmem:[#allocation3 + $0xa8] sm:$0xf] }
 0x2c8   : > { %5705 = vst [vmem:[#allocation3 + $0x94] sm:$0xf] %v5506_v48  ;;  %5708 = vst [vmem:[#allocation3 + $0x98] sm:$0x1] %v5707_v58  ;;  %v5489_v10 = vsel %vm12847_vm7, %v5481_v24, %v5488_v31  ;;  %v5700_v39 = vsel %vm12859_vm9, %v5490_v34, %v5699_v42  ;;  %v6011_v46 = vshll.u32 %v5891_v22, 16  ;;  %v6015_v43 = vshrl.u32 %v5891_v22, 16 }
 0x2c9   : > { %5698 = vst [vmem:[#allocation3 + $0x88] sm:$0xf] %v5489_v10  ;;  %5701 = vst [vmem:[#allocation3 + $0x8c] sm:$0x1] %v5700_v39  ;;  %9699 = vmatmul.mubr.bf16.gmra.mrb[184].mxu0 %v10788_v38  ;;  %v6021_v50 = vshll.u32 %v5892_v27, 16  ;;  %v5154_v54 = vadd.f32 %v14743_v51, %v14594_v53  ;;  %v6004_v21 = vrot.slane %v6002_v1, 4  ;;  %v5146_v29 = vadd.f32 %v14749_v36, %v14588_v40 }
 0x2ca   : > { %9706 = vmatprep.mubr.bf16.mxu0 %v12364_v41  ;;  %v6007_v4 = vrot.slane %v6005_v18, 5  ;;  %v5157_v57 = vadd.f32 %v14751_v52, %v14596_v62  ;;  %v6013_v17 = vrot.slane %v6011_v46, 5  ;;  %v6017_v47 = vrot.slane %v6015_v43, 4  ;;  %v5709_v31 = vld [vmem:[#allocation3 + $0x9c] sm:$0xf]  ;;  %v12367_v43 = vld [vmem:[#allocation3 + $0x24] sm:$0xff]  }
 0x2cb   : > { %v6023_v5 = vrot.slane %v6021_v50, 5  ;;  %v5202_v55 = vmax.f32 %v5154_v54, 0.0  ;;  %v5200_v51 = vmax.f32 %v5146_v29, 0.0  ;;  %v5149_v16 = vadd.f32 %v14757_v12, %v14590_v6  ;;  %v5720_v0 = vld [vmem:[#allocation3 + $0xb0] sm:$0x1] }
 0x2cc   : > { %v6008_v53 = vor.u32 %v6007_v4, %v6004_v21  ;;  %v5203_v23 = vmax.f32 %v5157_v57, 0.0  ;;  %v6018_v3 = vor.u32 %v6017_v47, %v6013_v17  ;;  %v10773_v7 = vrot.slane %v6402_v63, 9  ;;  %v6404_v56 = vld [vmem:[#allocation3 + $0x2c] sm:$0x1]  ;;  %v5893_v48 = vld [vmem:[#allocation3 + $0x30] sm:$0xf] }
 0x2cd   : > { %v11059_v26 = vpack.c.bf16 %v5202_v55, %v5202_v55  ;;  %v6512_v40 = vrot.slane %v6403_v25, 5  ;;  %v11057_v42 = vpack.c.bf16 %v5200_v51, %v5200_v51  ;;  %v5201_v52 = vmax.f32 %v5149_v16, 0.0  ;;  %v5894_v63 = vld [vmem:[#allocation3 + $0x34] sm:$0xf]  ;;  %v5895_v51 = vld [vmem:[#allocation3 + $0x38] sm:$0x1] }
 0x2ce   : > { %v6009_v36 = vrot.slane %v6008_v53, 4  ;;  %v11060_v62 = vpack.c.bf16 %v5203_v23, %v5203_v23  ;;  %v6019_v33 = vrot.slane %v6018_v3, 4  ;;  %v6515_v57 = vrot.slane %v6404_v56, 5  ;;  %v5713_v53 = vld [vmem:[#allocation3 + $0xa4] sm:$0x1] }
 0x2cf   : > { %v5526_v20 = vshrl.u32 %v11059_v26, 16  ;;  %v5529_v61 = vshll.u32 %v11059_v26, 16  ;;  %v14845_v24 = vsel %vm13026_vm13, %v10773_v7, %v6512_v40  ;;  %v5509_v6 = vshrl.u32 %v11057_v42, 16  ;;  %v12405_v16 = vld [vmem:[%s16194_s3 + $0x1d8] sm:$0xff]  }
 0x2d0   : > { %v6014_v32 = vsel %vm12805_vm2, %v6009_v36, %v6013_v17  ;;  %v5512_v12 = vshll.u32 %v11057_v42, 16  ;;  %v5534_v2 = vshrl.u32 %v11060_v62, 16  ;;  %v6024_v22 = vsel %vm12805_vm2, %v6019_v33, %v6023_v5  ;;  %v12404_v17 = vld [vmem:[%s16194_s3 + $0x190] sm:$0xff]   ;;  %v6405_v42 = vld [vmem:[#allocation3 + $0x30] sm:$0xe] }
 0x2d1   : > { %v5528_v44 = vrot.slane %v5526_v20, 7  ;;  %v5537_v34 = vshll.u32 %v11060_v62, 16  ;;  %v11058_v27 = vpack.c.bf16 %v5201_v52, %v5201_v52  ;;  %v10757_v58 = vcombine.low %v6014_v32, %v6024_v22  ;;  %11879 = vmatpush3.bf16.msra.mxu0 %v12404_v17  ;;  %v12406_v32 = vld [vmem:[%s16194_s3 + $0x198] sm:$0xff]  }
 0x2d2   : > { %v5511_v38 = vrot.slane %v5509_v6, 7  ;;  %v5536_v10 = vrot.slane %v5534_v2, 7  ;;  %v6514_v39 = vrot.slane %v6512_v40, 4  ;;  %v6026_v25 = vshrl.u32 %v5893_v48, 16  ;;  %v12368_v40 = vld [vmem:[#allocation3 + $0x3c] sm:$0xff]   ;;  %11880 = vmatprep.subr.bf16.mxu0 %v12405_v16 }
 0x2d3   : > { %v5531_v41 = vor.u32 %v5529_v61, %v5528_v44  ;;  %v5532_v1 = vrot.slane %v5528_v44, 4  ;;  %v5517_v18 = vshrl.u32 %v11058_v27, 16  ;;  %v5520_v46 = vshll.u32 %v11058_v27, 16  ;;  %9545 = vmatprep.mubr.bf16.mxu1 %v10757_v58  ;;  %v6406_v61 = vld [vmem:[#allocation3 + $0x34] sm:$0xf] }
 0x2d4   : > { %v5514_v50 = vor.u32 %v5512_v12, %v5511_v38  ;;  %v5515_v54 = vrot.slane %v5511_v38, 4  ;;  %v5539_v15 = vor.u32 %v5537_v34, %v5536_v10  ;;  %v5541_v21 = vrot.slane %v5536_v10, 4  ;;  %9546 = vmatmul.mubr.bf16.gmra.mrb[124].mxu1 %v12367_v43 }
 0x2d5   : > { %v5717_v4 = vsel %vm12869_vm10, %v5531_v41, %v5716_v14  ;;  %v5519_v29 = vrot.slane %v5517_v18, 7  ;;  %v6029_v23 = vshll.u32 %v5893_v48, 16  ;;  %v6516_v7 = vsel %vm13026_vm13, %v6514_v39, %v6515_v57  ;;  %11881 = vmatpush3.bf16.msra.mxu0 %v12406_v32 }
 0x2d6   : > { %5718 = vst [vmem:[#allocation3 + $0xa8] sm:$0xf] %v5717_v4  ;;  %v5710_v47 = vsel %vm12869_vm10, %v5514_v50, %v5709_v31  ;;  %v5540_v5 = vsel %vm12847_vm7, %v5532_v1, %v5539_v15  ;;  %v5721_v55 = vsel %vm12859_vm9, %v5541_v21, %v5720_v0  ;;  %v6028_v36 = vrot.slane %v6026_v25, 4  ;;  %v5730_v21 = vld [vmem:[#allocation3 + $0xc0] sm:$0xf] }
 0x2d7   : > { %5711 = vst [vmem:[#allocation3 + $0x9c] sm:$0xf] %v5710_v47  ;;  %5719 = vst [vmem:[#allocation3 + $0xac] sm:$0xf] %v5540_v5  ;;  %v5522_v3 = vor.u32 %v5520_v46, %v5519_v29  ;;  %v5524_v26 = vrot.slane %v5519_v29, 4  ;;  %v10789_v62 = vcombine.low %v14845_v24, %v6516_v7  ;;  %v6031_v52 = vrot.slane %v6029_v23, 5 }
 0x2d8   : > { %5722 = vst [vmem:[#allocation3 + $0xb0] sm:$0x1] %v5721_v55  ;;  %v6035_v33 = vshll.u32 %v5894_v63, 16  ;;  %v6039_v20 = vshrl.u32 %v5894_v63, 16  ;;  %v6045_v12 = vshll.u32 %v5895_v51, 16  ;;  %v5170_v2 = vadd.f32 %v14764_v35, %v14620_v59  ;;  %v12407_v24 = vld [vmem:[%s16194_s3 + $0x1e0] sm:$0xff]  }
 0x2d9   : > { %v5523_v14 = vsel %vm12847_vm7, %v5515_v54, %v5522_v3  ;;  %v5714_v6 = vsel %vm12859_vm9, %v5524_v26, %v5713_v53  ;;  %9707 = vmatmul.mubr.bf16.gmra.mrb[188].mxu0 %v10789_v62  ;;  %v6032_v22 = vor.u32 %v6031_v52, %v6028_v36  ;;  %v5162_v34 = vadd.f32 %v14770_v13, %v14606_v37  ;;  %v6407_v35 = vld [vmem:[#allocation3 + $0x38] sm:$0x1]  ;;  %v12410_v37 = vld [vmem:[%s16194_s3 + $0x178] sm:$0xff]   ;;  %v5896_v63 = vld [vmem:[#allocation3 + $0x3c] sm:$0xf] }
 0x2da   : > { %5712 = vst [vmem:[#allocation3 + $0xa0] sm:$0xf] %v5523_v14  ;;  %5715 = vst [vmem:[#allocation3 + $0xa4] sm:$0x1] %v5714_v6  ;;  %v6037_v44 = vrot.slane %v6035_v33, 5  ;;  %v6041_v31 = vrot.slane %v6039_v20, 4  ;;  %9714 = vmatprep.mubr.bf16.mxu0 %v12368_v40  ;;  %v5173_v56 = vadd.f32 %v14782_v11, %v14624_v60  ;;  %v5165_v59 = vadd.f32 %v14788_v49, %v14608_v28 }
 0x2db   : > { %v6047_v0 = vrot.slane %v6045_v12, 5  ;;  %v5206_v27 = vmax.f32 %v5170_v2, 0.0  ;;  %v6033_v48 = vrot.slane %v6032_v22, 4  ;;  %v5204_v38 = vmax.f32 %v5162_v34, 0.0  ;;  %11882 = vmatprep.subr.bf16.mxu0 %v12407_v24  ;;  %v12411_v60 = vld [vmem:[%s16194_s3 + $0x1a0] sm:$0xff]   ;;  %11776 = vmatprep.subr.bf16.mxu1 %v12410_v37  ;;  %v12369_v53 = vld [vmem:[#allocation3 + $0x30] sm:$0xff]  }
 0x2dc   : > { %v6042_v58 = vor.u32 %v6041_v31, %v6037_v44  ;;  %v10774_v10 = vrot.slane %v6405_v42, 9  ;;  %v5207_v39 = vmax.f32 %v5173_v56, 0.0  ;;  %v5205_v41 = vmax.f32 %v5165_v59, 0.0  ;;  %11883 = vmatpush3.bf16.msra.mxu0 %v12411_v60  ;;  %v5723_v47 = vld [vmem:[#allocation3 + $0xb4] sm:$0xf]  ;;  %v12370_v31 = vld [vmem:[#allocation3 + $0x48] sm:$0xff]  }
 0x2dd   : > { %v11063_v13 = vpack.c.bf16 %v5206_v27, %v5206_v27  ;;  %v6519_v1 = vrot.slane %v6406_v61, 5  ;;  %v6038_v28 = vsel %vm12805_vm2, %v6033_v48, %v6037_v44  ;;  %v11061_v49 = vpack.c.bf16 %v5204_v38, %v5204_v38  ;;  %v5734_v23 = vld [vmem:[#allocation3 + $0xc8] sm:$0x1]  ;;  %v5897_v7 = vld [vmem:[#allocation3 + $0x40] sm:$0xf] }
 0x2de   : > { %v6043_v11 = vrot.slane %v6042_v58, 4  ;;  %v6522_v18 = vrot.slane %v6407_v35, 5  ;;  %v11064_v50 = vpack.c.bf16 %v5207_v39, %v5207_v39  ;;  %v11062_v54 = vpack.c.bf16 %v5205_v41, %v5205_v41  ;;  %v5727_v62 = vld [vmem:[#allocation3 + $0xbc] sm:$0x1]  ;;  %v5898_v52 = vld [vmem:[#allocation3 + $0x44] sm:$0x1] }
 0x2df   : > { %v5560_v46 = vshrl.u32 %v11063_v13, 16  ;;  %v5563_v43 = vshll.u32 %v11063_v13, 16  ;;  %v5543_v4 = vshrl.u32 %v11061_v49, 16  ;;  %v5546_v29 = vshll.u32 %v11061_v49, 16  ;;  %v6408_v6 = vld [vmem:[#allocation3 + $0x3c] sm:$0xe] }
 0x2e0   : > { %v6048_v15 = vsel %vm12805_vm2, %v6043_v11, %v6047_v0  ;;  %v6520_v57 = vsel %vm13026_vm13, %v10774_v10, %v6519_v1  ;;  %v5568_v5 = vshrl.u32 %v11064_v50, 16  ;;  %v5571_v55 = vshll.u32 %v11064_v50, 16  ;;  %v6409_v12 = vld [vmem:[#allocation3 + $0x40] sm:$0xf]  ;;  %v6410_v34 = vld [vmem:[#allocation3 + $0x44] sm:$0x1] }
 0x2e1   : > { %v10758_v25 = vcombine.low %v6038_v28, %v6048_v15  ;;  %v5562_v17 = vrot.slane %v5560_v46, 7  ;;  %v5545_v51 = vrot.slane %v5543_v4, 7  ;;  %v5551_v16 = vshrl.u32 %v11062_v54, 16  ;;  %v5899_v10 = vld [vmem:[#allocation3 + $0x48] sm:$0xf] }
 0x2e2   : > { %v5554_v3 = vshll.u32 %v11062_v54, 16  ;;  %v6521_v26 = vrot.slane %v6519_v1, 4  ;;  %v5570_v42 = vrot.slane %v5568_v5, 7  ;;  %v6050_v33 = vshrl.u32 %v5896_v63, 16  ;;  %v5900_v41 = vld [vmem:[#allocation3 + $0x4c] sm:$0xf] }
 0x2e3   : > { %9553 = vmatprep.mubr.bf16.mxu1 %v10758_v25  ;;  %v5565_v40 = vor.u32 %v5563_v43, %v5562_v17  ;;  %v5566_v36 = vrot.slane %v5562_v17, 4  ;;  %v5548_v20 = vor.u32 %v5546_v29, %v5545_v51  ;;  %v5549_v61 = vrot.slane %v5545_v51, 4  ;;  %v5901_v49 = vld [vmem:[#allocation3 + $0x50] sm:$0x1]  ;;  %v6412_v4 = vld [vmem:[#allocation3 + $0x4c] sm:$0xf] }
 0x2e4   : > { %v5553_v32 = vrot.slane %v5551_v16, 7  ;;  %v6523_v14 = vsel %vm13026_vm13, %v6521_v26, %v6522_v18  ;;  %9554 = vmatmul.mubr.bf16.gmra.mrb[128].mxu1 %v12369_v53  ;;  %v5573_v24 = vor.u32 %v5571_v55, %v5570_v42  ;;  %v5575_v22 = vrot.slane %v5570_v42, 4  ;;  %v6413_v29 = vld [vmem:[#allocation3 + $0x50] sm:$0x1]  ;;  %v5902_v51 = vld [vmem:[#allocation3 + $0x54] sm:$0xf] }
 0x2e5   : > { %v5731_v2 = vsel %vm12869_vm10, %v5565_v40, %v5730_v21  ;;  %v10790_v44 = vcombine.low %v6520_v57, %v6523_v14  ;;  %v5724_v0 = vsel %vm12869_vm10, %v5548_v20, %v5723_v47  ;;  %v6052_v59 = vrot.slane %v6050_v33, 4  ;;  %v12413_v40 = vld [vmem:[%s16194_s3 + $0x1e8] sm:$0xff]   ;;  %v5903_v20 = vld [vmem:[#allocation3 + $0x58] sm:$0xf] }
 0x2e6   : > { %5732 = vst [vmem:[#allocation3 + $0xc0] sm:$0xf] %v5731_v2  ;;  %v5556_v27 = vor.u32 %v5554_v3, %v5553_v32  ;;  %v5558_v56 = vrot.slane %v5553_v32, 4  ;;  %5725 = vst [vmem:[#allocation3 + $0xb4] sm:$0xf] %v5724_v0  ;;  %v5574_v35 = vsel %vm12847_vm7, %v5566_v36, %v5573_v24  ;;  %v5735_v48 = vsel %vm12859_vm9, %v5575_v22, %v5734_v23  ;;  %v12412_v23 = vld [vmem:[%s16194_s3 + $0x138] sm:$0xff]  }
 0x2e7   : > { %9715 = vmatmul.mubr.bf16.gmra.mrb[192].mxu0 %v10790_v44  ;;  %v6053_v58 = vshll.u32 %v5896_v63, 16  ;;  %v6059_v38 = vshll.u32 %v5897_v7, 16  ;;  %5733 = vst [vmem:[#allocation3 + $0xc4] sm:$0xf] %v5574_v35  ;;  %5736 = vst [vmem:[#allocation3 + $0xc8] sm:$0x1] %v5735_v48  ;;  %11777 = vmatpush3.bf16.msra.mxu1 %v12412_v23 }
 0x2e8   : > { %v5557_v45 = vsel %vm12847_vm7, %v5549_v61, %v5556_v27  ;;  %v5728_v37 = vsel %vm12859_vm9, %v5558_v56, %v5727_v62  ;;  %9722 = vmatprep.mubr.bf16.mxu0 %v12370_v31  ;;  %v6063_v13 = vshrl.u32 %v5897_v7, 16  ;;  %v6069_v39 = vshll.u32 %v5898_v52, 16  ;;  %v12374_v42 = vld [vmem:[#allocation3 + $0x54] sm:$0xff]   ;;  %v12373_v32 = vld [vmem:[#allocation3 + $0x3c] sm:$0xff]   ;;  %11884 = vmatprep.subr.bf16.mxu0 %v12413_v40  ;;  %v6418_v23 = vld [vmem:[#allocation3 + $0x64] sm:$0xf] }
 0x2e9   : > { %5726 = vst [vmem:[#allocation3 + $0xb8] sm:$0xf] %v5557_v45  ;;  %5729 = vst [vmem:[#allocation3 + $0xbc] sm:$0x1] %v5728_v37  ;;  %v6055_v1 = vrot.slane %v6053_v58, 5  ;;  %v6061_v60 = vrot.slane %v6059_v38, 5 }
 0x2ea   : > { %v10775_v28 = vrot.slane %v6408_v6, 9  ;;  %v6526_v11 = vrot.slane %v6409_v12, 5  ;;  %v6065_v18 = vrot.slane %v6063_v13, 4  ;;  %v6071_v46 = vrot.slane %v6069_v39, 5  ;;  %v5904_v2 = vld [vmem:[#allocation3 + $0x5c] sm:$0x1] }
 0x2eb   : > { %v6529_v43 = vrot.slane %v6410_v34, 5  ;;  %v6074_v50 = vshrl.u32 %v5899_v10, 16  ;;  %v6056_v54 = vor.u32 %v6055_v1, %v6052_v59  ;;  %v6077_v21 = vshll.u32 %v5899_v10, 16  ;;  %v6414_v34 = vld [vmem:[#allocation3 + $0x54] sm:$0xe]  ;;  %v12415_v10 = vld [vmem:[%s16194_s3 + $0x1f0] sm:$0xff]  }
 0x2ec   : > { %v6527_v9 = vsel %vm13026_vm13, %v10775_v28, %v6526_v11  ;;  %v6528_v15 = vrot.slane %v6526_v11, 4  ;;  %v6066_v57 = vor.u32 %v6065_v18, %v6061_v60  ;;  %v6083_v25 = vshll.u32 %v5900_v41, 16  ;;  %v6415_v0 = vld [vmem:[#allocation3 + $0x58] sm:$0xf]  ;;  %v6416_v27 = vld [vmem:[#allocation3 + $0x5c] sm:$0x1] }
 0x2ed   : > { %v6076_v63 = vrot.slane %v6074_v50, 4  ;;  %v6087_v17 = vshrl.u32 %v5900_v41, 16  ;;  %v6057_v47 = vrot.slane %v6056_v54, 4  ;;  %v6079_v55 = vrot.slane %v6077_v21, 5  ;;  %v12414_v56 = vld [vmem:[%s16194_s3 + $0x1a8] sm:$0xff]  }
 0x2ee   : > { %v6530_v5 = vsel %vm13026_vm13, %v6528_v15, %v6529_v43  ;;  %v6093_v53 = vshll.u32 %v5901_v49, 16  ;;  %v6067_v16 = vrot.slane %v6066_v57, 4  ;;  %v6085_v26 = vrot.slane %v6083_v25, 5  ;;  %v5905_v38 = vld [vmem:[#allocation3 + $0x60] sm:$0xf]  ;;  %11885 = vmatpush3.bf16.msra.mxu0 %v12414_v56 }
 0x2ef   : > { %v10791_v3 = vcombine.low %v6527_v9, %v6530_v5  ;;  %v6089_v7 = vrot.slane %v6087_v17, 4  ;;  %v6062_v36 = vsel %vm12805_vm2, %v6057_v47, %v6061_v60  ;;  %v6080_v62 = vor.u32 %v6079_v55, %v6076_v63  ;;  %v5906_v41 = vld [vmem:[#allocation3 + $0x64] sm:$0xf]  ;;  %11886 = vmatprep.subr.bf16.mxu0 %v12415_v10  ;;  %v6417_v17 = vld [vmem:[#allocation3 + $0x60] sm:$0xe] }
 0x2f0   : > { %v6095_v52 = vrot.slane %v6093_v53, 5  ;;  %v10776_v33 = vrot.slane %v6411_v30, 9  ;;  %v6072_v61 = vsel %vm12805_vm2, %v6067_v16, %v6071_v46  ;;  %v6533_v6 = vrot.slane %v6412_v4, 5  ;;  %v12376_v46 = vld [vmem:[#allocation3 + $0x60] sm:$0xff]   ;;  %v12417_v30 = vld [vmem:[%s16194_s3 + $0x1b0] sm:$0xff]  }
 0x2f1   : > { %9723 = vmatmul.mubr.bf16.gmra.mrb[196].mxu0 %v10791_v3  ;;  %v6090_v14 = vor.u32 %v6089_v7, %v6085_v26  ;;  %v6536_v12 = vrot.slane %v6413_v29, 5  ;;  %v10759_v24 = vcombine.low %v6062_v36, %v6072_v61  ;;  %v6081_v22 = vrot.slane %v6080_v62, 4  ;;  %v5907_v4 = vld [vmem:[#allocation3 + $0x68] sm:$0x1]  ;;  %v12418_v47 = vld [vmem:[%s16194_s3 + $0x1f8] sm:$0xff]  }
 0x2f2   : > { %9730 = vmatprep.mubr.bf16.mxu0 %v12374_v42  ;;  %v6098_v44 = vshrl.u32 %v5902_v51, 16  ;;  %v6101_v31 = vshll.u32 %v5902_v51, 16  ;;  %v6534_v35 = vsel %vm13026_vm13, %v10776_v33, %v6533_v6  ;;  %v6535_v48 = vrot.slane %v6533_v6, 4  ;;  %11887 = vmatpush3.bf16.msra.mxu0 %v12417_v30  ;;  %v12419_v16 = vld [vmem:[%s16194_s3 + $0x1b8] sm:$0xff]   ;;  %v12375_v3 = vld [vmem:[#allocation3 + $0x48] sm:$0xff]   ;;  %v12379_v30 = vld [vmem:[#allocation3 + $0x54] sm:$0xff]  }
 0x2f3   : > { %v6091_v59 = vrot.slane %v6090_v14, 4  ;;  %v6107_v58 = vshll.u32 %v5903_v20, 16  ;;  %9561 = vmatprep.mubr.bf16.mxu1 %v10759_v24  ;;  %v6086_v45 = vsel %vm12805_vm2, %v6081_v22, %v6085_v26  ;;  %v6111_v39 = vshrl.u32 %v5903_v20, 16  ;;  %v6419_v42 = vld [vmem:[#allocation3 + $0x68] sm:$0x1]  ;;  %11888 = vmatprep.subr.bf16.mxu0 %v12418_v47 }
 0x2f4   : > { %v6100_v37 = vrot.slane %v6098_v44, 4  ;;  %v6103_v13 = vrot.slane %v6101_v31, 5  ;;  %9562 = vmatmul.mubr.bf16.gmra.mrb[132].mxu1 %v12373_v32  ;;  %v6537_v60 = vsel %vm13026_vm13, %v6535_v48, %v6536_v12  ;;  %v6117_v11 = vshll.u32 %v5904_v2, 16  ;;  %v5908_v61 = vld [vmem:[#allocation3 + $0x6c] sm:$0xf] }
 0x2f5   : > { %v6096_v1 = vsel %vm12805_vm2, %v6091_v59, %v6095_v52  ;;  %v6109_v28 = vrot.slane %v6107_v58, 5  ;;  %v10792_v18 = vcombine.low %v6534_v35, %v6537_v60  ;;  %v6113_v50 = vrot.slane %v6111_v39, 4  ;;  %v12421_v32 = vld [vmem:[%s16194_s3 + $0x240] sm:$0xff]   ;;  %v5909_v24 = vld [vmem:[#allocation3 + $0x70] sm:$0xf] }
 0x2f6   : > { %v10760_v49 = vcombine.low %v6086_v45, %v6096_v1  ;;  %v6104_v43 = vor.u32 %v6103_v13, %v6100_v37  ;;  %v6119_v54 = vrot.slane %v6117_v11, 5  ;;  %v10777_v9 = vrot.slane %v6414_v34, 9  ;;  %11889 = vmatpush3.bf16.msra.mxu0 %v12419_v16  ;;  %11986 = vmatprep.subr.bf16.mxu1 %v12421_v32  ;;  %v6420_v48 = vld [vmem:[#allocation3 + $0x6c] sm:$0xe]  ;;  %v6421_v37 = vld [vmem:[#allocation3 + $0x70] sm:$0xf] }
 0x2f7   : > { %v6540_v15 = vrot.slane %v6415_v0, 5  ;;  %v6543_v21 = vrot.slane %v6416_v27, 5  ;;  %v6114_v57 = vor.u32 %v6113_v50, %v6109_v28  ;;  %v6122_v63 = vshrl.u32 %v5905_v38, 16  ;;  %v5910_v0 = vld [vmem:[#allocation3 + $0x74] sm:$0x1]  ;;  %v12380_v13 = vld [vmem:[#allocation3 + $0x6c] sm:$0xff]  }
 0x2f8   : > { %9569 = vmatprep.mubr.bf16.mxu1 %v10760_v49  ;;  %v6105_v29 = vrot.slane %v6104_v43, 4  ;;  %v6125_v25 = vshll.u32 %v5905_v38, 16  ;;  %v6131_v53 = vshll.u32 %v5906_v41, 16  ;;  %v6135_v51 = vshrl.u32 %v5906_v41, 16  ;;  %v5911_v43 = vld [vmem:[#allocation3 + $0x78] sm:$0xf] }
 0x2f9   : > { %9731 = vmatmul.mubr.bf16.gmra.mrb[200].mxu0 %v10792_v18  ;;  %v6541_v5 = vsel %vm13026_vm13, %v10777_v9, %v6540_v15  ;;  %v6542_v55 = vrot.slane %v6540_v15, 4  ;;  %v6115_v7 = vrot.slane %v6114_v57, 4  ;;  %v6124_v40 = vrot.slane %v6122_v63, 4  ;;  %v5912_v50 = vld [vmem:[#allocation3 + $0x7c] sm:$0xf] }
 0x2fa   : > { %9738 = vmatprep.mubr.bf16.mxu0 %v12376_v46  ;;  %v6110_v26 = vsel %vm12805_vm2, %v6105_v29, %v6109_v28  ;;  %v6127_v36 = vrot.slane %v6125_v25, 5  ;;  %v6133_v52 = vrot.slane %v6131_v53, 5  ;;  %v6137_v33 = vrot.slane %v6135_v51, 4  ;;  %v6422_v28 = vld [vmem:[#allocation3 + $0x74] sm:$0x1] }
 0x2fb   : > { %v6544_v62 = vsel %vm13026_vm13, %v6542_v55, %v6543_v21  ;;  %v6141_v20 = vshll.u32 %v5907_v4, 16  ;;  %v6120_v14 = vsel %vm12805_vm2, %v6115_v7, %v6119_v54  ;;  %v10778_v2 = vrot.slane %v6417_v17, 9  ;;  %v5913_v25 = vld [vmem:[#allocation3 + $0x80] sm:$0x1]  ;;  %v6423_v53 = vld [vmem:[#allocation3 + $0x78] sm:$0xe] }
 0x2fc   : > { %v10793_v6 = vcombine.low %v6541_v5, %v6544_v62  ;;  %v6128_v12 = vor.u32 %v6127_v36, %v6124_v40  ;;  %9570 = vmatmul.mubr.bf16.gmra.mrb[136].mxu1 %v12375_v3  ;;  %v10761_v22 = vcombine.low %v6110_v26, %v6120_v14  ;;  %v6138_v44 = vor.u32 %v6137_v33, %v6133_v52  ;;  %v6424_v26 = vld [vmem:[#allocation3 + $0x7c] sm:$0xf]  ;;  %v6425_v62 = vld [vmem:[#allocation3 + $0x80] sm:$0x1]  ;;  %v5914_v32 = vld [vmem:[#allocation3 + $0x84] sm:$0xf] }
 0x2fd   : > { %v6143_v31 = vrot.slane %v6141_v20, 5  ;;  %v6547_v34 = vrot.slane %v6418_v23, 5  ;;  %v6550_v56 = vrot.slane %v6419_v42, 5  ;;  %v6146_v59 = vshrl.u32 %v5908_v61, 16  ;;  %v12382_v14 = vld [vmem:[#allocation3 + $0x78] sm:$0xff]  }
 0x2fe   : > { %v6129_v27 = vrot.slane %v6128_v12, 4  ;;  %v6149_v35 = vshll.u32 %v5908_v61, 16  ;;  %9577 = vmatprep.mubr.bf16.mxu1 %v10761_v22  ;;  %v6139_v58 = vrot.slane %v6138_v44, 4  ;;  %v6155_v45 = vshll.u32 %v5909_v24, 16  ;;  %v5915_v22 = vld [vmem:[#allocation3 + $0x88] sm:$0xf] }
 0x2ff   : > { %v6548_v38 = vsel %vm13026_vm13, %v10778_v2, %v6547_v34  ;;  %v6549_v10 = vrot.slane %v6547_v34, 4  ;;  %v6148_v41 = vrot.slane %v6146_v59, 4  ;;  %v6159_v60 = vshrl.u32 %v5909_v24, 16 }
 0x300   : > { %v6134_v39 = vsel %vm12805_vm2, %v6129_v27, %v6133_v52  ;;  %v6151_v1 = vrot.slane %v6149_v35, 5  ;;  %v6144_v11 = vsel %vm12805_vm2, %v6139_v58, %v6143_v31  ;;  %v6157_v18 = vrot.slane %v6155_v45, 5  ;;  %v5916_v27 = vld [vmem:[#allocation3 + $0x8c] sm:$0x1]  ;;  %v6426_v58 = vld [vmem:[#allocation3 + $0x84] sm:$0xe] }
 0x301   : > { %9739 = vmatmul.mubr.bf16.gmra.mrb[204].mxu0 %v10793_v6  ;;  %v6551_v49 = vsel %vm13026_vm13, %v6549_v10, %v6550_v56  ;;  %v6165_v46 = vshll.u32 %v5910_v0, 16  ;;  %v10762_v54 = vcombine.low %v6134_v39, %v6144_v11  ;;  %v6161_v21 = vrot.slane %v6159_v60, 4  ;;  %v12381_v10 = vld [vmem:[#allocation3 + $0x60] sm:$0xff]   ;;  %v6428_v11 = vld [vmem:[#allocation3 + $0x8c] sm:$0x1] }
 0x302   : > { %9746 = vmatprep.mubr.bf16.mxu0 %v12380_v13  ;;  %v10794_v9 = vcombine.low %v6548_v38, %v6551_v49  ;;  %v6152_v15 = vor.u32 %v6151_v1, %v6148_v41  ;;  %v10779_v29 = vrot.slane %v6420_v48, 9  ;;  %v6554_v57 = vrot.slane %v6421_v37, 5  ;;  %v6427_v38 = vld [vmem:[#allocation3 + $0x88] sm:$0xf] }
 0x303   : > { %v6167_v4 = vrot.slane %v6165_v46, 5  ;;  %v6557_v63 = vrot.slane %v6422_v28, 5  ;;  %v6162_v47 = vor.u32 %v6161_v21, %v6157_v18  ;;  %v6170_v5 = vshrl.u32 %v5911_v43, 16  ;;  %v5918_v21 = vld [vmem:[#allocation3 + $0x94] sm:$0xf] }
 0x304   : > { %v6153_v17 = vrot.slane %v6152_v15, 4  ;;  %v6173_v55 = vshll.u32 %v5911_v43, 16  ;;  %9578 = vmatmul.mubr.bf16.gmra.mrb[140].mxu1 %v12379_v30  ;;  %v14970_v51 = vsel %vm13026_vm13, %v10779_v29, %v6554_v57  ;;  %v6556_v23 = vrot.slane %v6554_v57, 4 }
 0x305   : > { %v6179_v16 = vshll.u32 %v5912_v50, 16  ;;  %v6183_v3 = vshrl.u32 %v5912_v50, 16  ;;  %9585 = vmatprep.mubr.bf16.mxu1 %v10762_v54  ;;  %v6163_v40 = vrot.slane %v6162_v47, 4  ;;  %v6172_v36 = vrot.slane %v6170_v5, 4  ;;  %v5917_v50 = vld [vmem:[#allocation3 + $0x90] sm:$0xf] }
 0x306   : > { %v6158_v7 = vsel %vm12805_vm2, %v6153_v17, %v6157_v18  ;;  %v6175_v42 = vrot.slane %v6173_v55, 5  ;;  %v6558_v52 = vsel %vm13026_vm13, %v6556_v23, %v6557_v63  ;;  %v6189_v61 = vshll.u32 %v5913_v25, 16  ;;  %v6429_v17 = vld [vmem:[#allocation3 + $0x90] sm:$0xe]  ;;  %v12386_v47 = vld [vmem:[#allocation3 + $0x84] sm:$0xff]  }
 0x307   : > { %v6181_v33 = vrot.slane %v6179_v16, 5  ;;  %v6185_v20 = vrot.slane %v6183_v3, 4  ;;  %v6168_v6 = vsel %vm12805_vm2, %v6163_v40, %v6167_v4  ;;  %v10795_v12 = vcombine.low %v14970_v51, %v6558_v52  ;;  %v5919_v4 = vld [vmem:[#allocation3 + $0x98] sm:$0x1]  ;;  %v6430_v23 = vld [vmem:[#allocation3 + $0x94] sm:$0xf] }
 0x308   : > { %v6176_v2 = vor.u32 %v6175_v42, %v6172_v36  ;;  %v10780_v24 = vrot.slane %v6423_v53, 9  ;;  %v10763_v44 = vcombine.low %v6158_v7, %v6168_v6  ;;  %v6191_v34 = vrot.slane %v6189_v61, 5  ;;  %v6431_v40 = vld [vmem:[#allocation3 + $0x98] sm:$0x1] }
 0x309   : > { %9747 = vmatmul.mubr.bf16.gmra.mrb[208].mxu0 %v10794_v9  ;;  %v6186_v31 = vor.u32 %v6185_v20, %v6181_v33  ;;  %v6561_v0 = vrot.slane %v6424_v26, 5  ;;  %v6564_v59 = vrot.slane %v6425_v62, 5  ;;  %v6194_v35 = vshrl.u32 %v5914_v32, 16  ;;  %v12385_v20 = vld [vmem:[#allocation3 + $0x6c] sm:$0xff]  }
 0x30a   : > { %9754 = vmatprep.mubr.bf16.mxu0 %v12382_v14  ;;  %v6177_v56 = vrot.slane %v6176_v2, 4  ;;  %v6197_v48 = vshll.u32 %v5914_v32, 16  ;;  %v6203_v39 = vshll.u32 %v5915_v22, 16  ;;  %v6207_v28 = vshrl.u32 %v5915_v22, 16 }
 0x30b   : > { %v6187_v45 = vrot.slane %v6186_v31, 4  ;;  %v14981_v37 = vsel %vm13026_vm13, %v10780_v24, %v6561_v0  ;;  %v6563_v13 = vrot.slane %v6561_v0, 4  ;;  %v6196_v1 = vrot.slane %v6194_v35, 4 }
 0x30c   : > { %v6182_v41 = vsel %vm12805_vm2, %v6177_v56, %v6181_v33  ;;  %v6199_v60 = vrot.slane %v6197_v48, 5  ;;  %9586 = vmatmul.mubr.bf16.gmra.mrb[144].mxu1 %v12381_v10  ;;  %v6205_v46 = vrot.slane %v6203_v39, 5  ;;  %v6213_v43 = vshll.u32 %v5916_v27, 16  ;;  %v5920_v33 = vld [vmem:[#allocation3 + $0x9c] sm:$0xf] }
 0x30d   : > { %v6192_v49 = vsel %vm12805_vm2, %v6187_v45, %v6191_v34  ;;  %v14989_v18 = vsel %vm13026_vm13, %v6563_v13, %v6564_v59  ;;  %9593 = vmatprep.mubr.bf16.mxu1 %v10763_v44  ;;  %v6209_v15 = vrot.slane %v6207_v28, 4  ;;  %v10781_v57 = vrot.slane %v6426_v58, 9  ;;  %v5921_v44 = vld [vmem:[#allocation3 + $0xa0] sm:$0xf]  ;;  %v5922_v56 = vld [vmem:[#allocation3 + $0xa4] sm:$0x1] }
 0x30e   : > { %v10764_v30 = vcombine.low %v6182_v41, %v6192_v49  ;;  %v10796_v54 = vcombine.low %v14981_v37, %v14989_v18  ;;  %v6200_v9 = vor.u32 %v6199_v60, %v6196_v1  ;;  %v6215_v29 = vrot.slane %v6213_v43, 5  ;;  %v6433_v39 = vld [vmem:[#allocation3 + $0xa0] sm:$0xf]  ;;  %v12388_v41 = vld [vmem:[#allocation3 + $0x90] sm:$0xff]   ;;  %v6434_v49 = vld [vmem:[#allocation3 + $0xa4] sm:$0x1] }
 0x30f   : > { %v6568_v63 = vrot.slane %v6427_v38, 5  ;;  %v6571_v25 = vrot.slane %v6428_v11, 5  ;;  %v6210_v55 = vor.u32 %v6209_v15, %v6205_v46  ;;  %v6218_v53 = vshrl.u32 %v5917_v50, 16  ;;  %v6432_v38 = vld [vmem:[#allocation3 + $0x9c] sm:$0xe] }
 0x310   : > { %v6201_v5 = vrot.slane %v6200_v9, 4  ;;  %v6221_v51 = vshll.u32 %v5917_v50, 16  ;;  %v6227_v26 = vshll.u32 %v5918_v21, 16  ;;  %v6231_v7 = vshrl.u32 %v5918_v21, 16  ;;  %v5924_v9 = vld [vmem:[#allocation3 + $0xac] sm:$0xf] }
 0x311   : > { %9755 = vmatmul.mubr.bf16.gmra.mrb[212].mxu0 %v10795_v12  ;;  %v14995_v16 = vsel %vm13026_vm13, %v10781_v57, %v6568_v63  ;;  %v6570_v3 = vrot.slane %v6568_v63, 4  ;;  %v6211_v42 = vrot.slane %v6210_v55, 4  ;;  %v6220_v62 = vrot.slane %v6218_v53, 4  ;;  %v12387_v15 = vld [vmem:[#allocation3 + $0x78] sm:$0xff]   ;;  %v5925_v57 = vld [vmem:[#allocation3 + $0xb0] sm:$0x1] }
 0x312   : > { %9762 = vmatprep.mubr.bf16.mxu0 %v12386_v47  ;;  %v6206_v36 = vsel %vm12805_vm2, %v6201_v5, %v6205_v46  ;;  %v6223_v52 = vrot.slane %v6221_v51, 5  ;;  %v6229_v32 = vrot.slane %v6227_v26, 5  ;;  %v6233_v14 = vrot.slane %v6231_v7, 4 }
 0x313   : > { %v15001_v61 = vsel %vm13026_vm13, %v6570_v3, %v6571_v25  ;;  %v6237_v6 = vshll.u32 %v5919_v4, 16  ;;  %v6216_v12 = vsel %vm12805_vm2, %v6211_v42, %v6215_v29  ;;  %v10782_v22 = vrot.slane %v6429_v17, 9 }
 0x314   : > { %v10797_v2 = vcombine.low %v14995_v16, %v15001_v61  ;;  %v6224_v24 = vor.u32 %v6223_v52, %v6220_v62  ;;  %9594 = vmatmul.mubr.bf16.gmra.mrb[148].mxu1 %v12385_v20  ;;  %v10765_v31 = vcombine.low %v6206_v36, %v6216_v12  ;;  %v6234_v34 = vor.u32 %v6233_v14, %v6229_v32  ;;  %v6436_v36 = vld [vmem:[#allocation3 + $0xac] sm:$0xf]  ;;  %v6437_v20 = vld [vmem:[#allocation3 + $0xb0] sm:$0x1] }
 0x315   : > { %v6239_v0 = vrot.slane %v6237_v6, 5  ;;  %v6575_v27 = vrot.slane %v6430_v23, 5  ;;  %9601 = vmatprep.mubr.bf16.mxu1 %v10764_v30  ;;  %v6578_v35 = vrot.slane %v6431_v40, 5  ;;  %v6242_v48 = vshrl.u32 %v5920_v33, 16  ;;  %v5923_v30 = vld [vmem:[#allocation3 + $0xa8] sm:$0xf] }
 0x316   : > { %v6225_v59 = vrot.slane %v6224_v24, 4  ;;  %v6245_v58 = vshll.u32 %v5920_v33, 16  ;;  %v6235_v10 = vrot.slane %v6234_v34, 4  ;;  %v6251_v13 = vshll.u32 %v5921_v44, 16  ;;  %v6435_v23 = vld [vmem:[#allocation3 + $0xa8] sm:$0xe] }
 0x317   : > { %v15009_v45 = vsel %vm13026_vm13, %v10782_v22, %v6575_v27  ;;  %v6577_v37 = vrot.slane %v6575_v27, 4  ;;  %v6244_v60 = vrot.slane %v6242_v48, 4  ;;  %v6255_v11 = vshrl.u32 %v5921_v44, 16  ;;  %v5926_v24 = vld [vmem:[#allocation3 + $0xb4] sm:$0xf]  ;;  %v12392_v22 = vld [vmem:[#allocation3 + $0x9c] sm:$0xff]  }
 0x318   : > { %v6230_v1 = vsel %vm12805_vm2, %v6225_v59, %v6229_v32  ;;  %v6247_v28 = vrot.slane %v6245_v58, 5  ;;  %v6240_v18 = vsel %vm12805_vm2, %v6235_v10, %v6239_v0  ;;  %v6253_v43 = vrot.slane %v6251_v13, 5  ;;  %v5927_v27 = vld [vmem:[#allocation3 + $0xb8] sm:$0xf]  ;;  %v5928_v58 = vld [vmem:[#allocation3 + $0xbc] sm:$0x1] }
 0x319   : > { %9763 = vmatmul.mubr.bf16.gmra.mrb[216].mxu0 %v10796_v54  ;;  %v15017_v46 = vsel %vm13026_vm13, %v6577_v37, %v6578_v35  ;;  %v6261_v50 = vshll.u32 %v5922_v56, 16  ;;  %v15019_v21 = vcombine.low %v6230_v1, %v6240_v18  ;;  %v6257_v54 = vrot.slane %v6255_v11, 4  ;;  %v6440_v1 = vld [vmem:[#allocation3 + $0xbc] sm:$0x1] }
 0x31a   : > { %9770 = vmatprep.mubr.bf16.mxu0 %v12388_v41  ;;  %v10798_v4 = vcombine.low %v15009_v45, %v15017_v46  ;;  %v6248_v29 = vor.u32 %v6247_v28, %v6244_v60  ;;  %v10783_v25 = vrot.slane %v6432_v38, 9  ;;  %v6582_v17 = vrot.slane %v6433_v39, 5  ;;  %v6438_v39 = vld [vmem:[#allocation3 + $0xb4] sm:$0xe]  ;;  %v6439_v41 = vld [vmem:[#allocation3 + $0xb8] sm:$0xf] }
 0x31b   : > { %v6263_v63 = vrot.slane %v6261_v50, 5  ;;  %v6585_v47 = vrot.slane %v6434_v49, 5  ;;  %v6258_v55 = vor.u32 %v6257_v54, %v6253_v43  ;;  %v6266_v53 = vshrl.u32 %v5923_v30, 16  ;;  %v12391_v60 = vld [vmem:[#allocation3 + $0x84] sm:$0xff]  }
 0x31c   : > { %v6249_v5 = vrot.slane %v6248_v29, 4  ;;  %v6269_v51 = vshll.u32 %v5923_v30, 16  ;;  %9602 = vmatmul.mubr.bf16.gmra.mrb[152].mxu1 %v12387_v15  ;;  %v15025_v3 = vsel %vm13026_vm13, %v10783_v25, %v6582_v17  ;;  %v6584_v26 = vrot.slane %v6582_v17, 4  ;;  %v7770_v29 = vld [vmem:[#allocation3 + $0x18] sm:$0xf]  ;;  %v12395_v54 = vld [vmem:[#allocation3 + $0xa8] sm:$0xff]  }
 0x31d   : > { %v6275_v7 = vshll.u32 %v5924_v9, 16  ;;  %v6279_v40 = vshrl.u32 %v5924_v9, 16  ;;  %9609 = vmatprep.mubr.bf16.mxu1 %v10765_v31  ;;  %v6259_v62 = vrot.slane %v6258_v55, 4  ;;  %v6268_v52 = vrot.slane %v6266_v53, 4 }
 0x31e   : > { %v6254_v42 = vsel %vm12805_vm2, %v6249_v5, %v6253_v43  ;;  %v6271_v33 = vrot.slane %v6269_v51, 5  ;;  %v15031_v32 = vsel %vm13026_vm13, %v6584_v26, %v6585_v47  ;;  %v6285_v12 = vshll.u32 %v5925_v57, 16  ;;  %v7771_v47 = vld [vmem:[#allocation3 + $0x1c] sm:$0xf]  ;;  %v7772_v5 = vld [vmem:[#allocation3 + $0x20] sm:$0x1] }
 0x31f   : > { %v6277_v14 = vrot.slane %v6275_v7, 5  ;;  %v6281_v6 = vrot.slane %v6279_v40, 4  ;;  %v6264_v44 = vsel %vm12805_vm2, %v6259_v62, %v6263_v63  ;;  %v10799_v31 = vcombine.low %v15025_v3, %v15031_v32  ;;  %v7337_v26 = vld [vmem:[#allocation3 + $0xc] sm:$0xe]  ;;  %v15059_v62 = vpop.f32.mrb[112].mxu1 }
 0x320   : > { %v6272_v34 = vor.u32 %v6271_v33, %v6268_v52  ;;  %v10784_v0 = vrot.slane %v6435_v23, 9  ;;  %v15040_v56 = vcombine.low %v6254_v42, %v6264_v44  ;;  %v6287_v35 = vrot.slane %v6285_v12, 5  ;;  %v12394_v52 = vld [vmem:[#allocation3 + $0x90] sm:$0xff]  }
 0x321   : > { %9771 = vmatmul.mubr.bf16.gmra.mrb[220].mxu0 %v10797_v2  ;;  %v6282_v59 = vor.u32 %v6281_v6, %v6277_v14  ;;  %v6589_v48 = vrot.slane %v6436_v36, 5  ;;  %v6592_v10 = vrot.slane %v6437_v20, 5  ;;  %v6290_v37 = vshrl.u32 %v5926_v24, 16  ;;  %v7339_v12 = vld [vmem:[#allocation3 + $0x14] sm:$0x1] }
 0x322   : > { %9778 = vmatprep.mubr.bf16.mxu0 %v12392_v22  ;;  %v6273_v38 = vrot.slane %v6272_v34, 4  ;;  %v6293_v13 = vshll.u32 %v5926_v24, 16  ;;  %v6299_v2 = vshll.u32 %v5927_v27, 16  ;;  %v6303_v43 = vshrl.u32 %v5927_v27, 16  ;;  %v15070_v27 = vpop.f32.mrb[113].mxu1 }
 0x323   : > { %v6283_v28 = vrot.slane %v6282_v59, 4  ;;  %v15044_v16 = vsel %vm13026_vm13, %v10784_v0, %v6589_v48  ;;  %v6591_v61 = vrot.slane %v6589_v48, 4  ;;  %v6292_v49 = vrot.slane %v6290_v37, 4  ;;  %v6825_v0 = vld [vmem:[#allocation3 + $0xc] sm:$0xf]  ;;  %v15076_v48 = vpop.f32.mrb[114].mxu1 }
 0x324   : > { %v6278_v11 = vsel %vm12805_vm2, %v6273_v38, %v6277_v14  ;;  %v6295_v18 = vrot.slane %v6293_v13, 5  ;;  %9610 = vmatmul.mubr.bf16.gmra.mrb[156].mxu1 %v12391_v60  ;;  %v6301_v9 = vrot.slane %v6299_v2, 5  ;;  %v6309_v15 = vshll.u32 %v5928_v58, 16  ;;  %v15082_v13 = vpop.f32.mrb[115].mxu1  ;;  %v6827_v2 = vld [vmem:[#allocation3 + $0x14] sm:$0x1] }
 0x325   : > { %v6288_v50 = vsel %vm12805_vm2, %v6283_v28, %v6287_v35  ;;  %v15052_v30 = vsel %vm13026_vm13, %v6591_v61, %v6592_v10  ;;  %9617 = vmatprep.mubr.bf16.mxu1 %v15019_v21  ;;  %v6305_v17 = vrot.slane %v6303_v43, 4  ;;  %v10785_v53 = vrot.slane %v6438_v39, 9  ;;  %v7338_v21 = vld [vmem:[#allocation3 + $0x10] sm:$0xf] }
 0x326   : > { %v15055_v57 = vcombine.low %v6278_v11, %v6288_v50  ;;  %v10800_v63 = vcombine.low %v15044_v16, %v15052_v30  ;;  %v6296_v25 = vor.u32 %v6295_v18, %v6292_v49  ;;  %v6311_v55 = vrot.slane %v6309_v15, 5  ;;  %v6826_v35 = vld [vmem:[#allocation3 + $0x10] sm:$0xf]  ;;  %v7773_v15 = vld [vmem:[#allocation3 + $0x24] sm:$0xf] }
 0x327   : > { %v6596_v51 = vrot.slane %v6439_v41, 5  ;;  %v6599_v23 = vrot.slane %v6440_v1, 5  ;;  %v6306_v40 = vor.u32 %v6305_v17, %v6301_v9  ;;  %v7819_v36 = vshrl.u32 %v7770_v29, 16 }
 0x328   : > { %v6297_v7 = vrot.slane %v6296_v25, 4  ;;  %v7822_v42 = vshll.u32 %v7770_v29, 16  ;;  %v7828_v14 = vshll.u32 %v7771_v47, 16  ;;  %v7832_v6 = vshrl.u32 %v7771_v47, 16  ;;  %v12403_v29 = vld [vmem:[#allocation3 + $0xb4] sm:$0xff]  }
 0x329   : > { %9779 = vmatmul.mubr.bf16.gmra.mrb[224].mxu0 %v10798_v4  ;;  %v15066_v33 = vsel %vm13026_vm13, %v10785_v53, %v6596_v51  ;;  %v6598_v20 = vrot.slane %v6596_v51, 4  ;;  %v6307_v22 = vrot.slane %v6306_v40, 4  ;;  %v7821_v44 = vrot.slane %v7819_v36, 4  ;;  %v7774_v47 = vld [vmem:[#allocation3 + $0x28] sm:$0xf] }
 0x32a   : > { %9786 = vmatprep.mubr.bf16.mxu0 %v12395_v54  ;;  %v6302_v24 = vsel %vm12805_vm2, %v6297_v7, %v6301_v9  ;;  %v7824_v34 = vrot.slane %v7822_v42, 5  ;;  %v7830_v46 = vrot.slane %v7828_v14, 5  ;;  %v7834_v4 = vrot.slane %v7832_v6, 4  ;;  %v12402_v7 = vld [vmem:[#allocation3 + $0x9c] sm:$0xff]  }
 0x32b   : > { %v15074_v45 = vsel %vm13026_vm13, %v6598_v20, %v6599_v23  ;;  %v7838_v59 = vshll.u32 %v7772_v5, 16  ;;  %v6312_v58 = vsel %vm12805_vm2, %v6307_v22, %v6311_v55  ;;  %v10834_v37 = vrot.slane %v7337_v26, 9  ;;  %v7775_v23 = vld [vmem:[#allocation3 + $0x2c] sm:$0x1]  ;;  %v7340_v26 = vld [vmem:[#allocation3 + $0x18] sm:$0xe] }
 0x32c   : > { %v10801_v38 = vcombine.low %v15066_v33, %v15074_v45  ;;  %v7825_v10 = vor.u32 %v7824_v34, %v7821_v44  ;;  %9618 = vmatmul.mubr.bf16.gmra.mrb[160].mxu1 %v12394_v52  ;;  %v15084_v39 = vcombine.low %v6302_v24, %v6312_v58  ;;  %v7835_v41 = vor.u32 %v7834_v4, %v7830_v46  ;;  %v7342_v42 = vld [vmem:[#allocation3 + $0x20] sm:$0x1] }
 0x32d   : > { %v7840_v1 = vrot.slane %v7838_v59, 5  ;;  %v7435_v60 = vrot.slane %v7338_v21, 5  ;;  %9625 = vmatprep.mubr.bf16.mxu1 %v15040_v56  ;;  %v7438_v61 = vrot.slane %v7339_v12, 5  ;;  %v6874_v11 = vshrl.u32 %v6825_v0, 16  ;;  %v6828_v21 = vld [vmem:[#allocation3 + $0x18] sm:$0xf] }
 0x32e   : > { %v7826_v28 = vrot.slane %v7825_v10, 4  ;;  %v6877_v49 = vshll.u32 %v6825_v0, 16  ;;  %v7836_v18 = vrot.slane %v7835_v41, 4  ;;  %v6883_v9 = vshll.u32 %v6826_v35, 16  ;;  %v6829_v59 = vld [vmem:[#allocation3 + $0x1c] sm:$0xf] }
 0x32f   : > { %v15089_v43 = vsel %vm13026_vm13, %v10834_v37, %v7435_v60  ;;  %v7437_v50 = vrot.slane %v7435_v60, 4  ;;  %v6876_v25 = vrot.slane %v6874_v11, 4  ;;  %v6887_v56 = vshrl.u32 %v6826_v35, 16 }
 0x330   : > { %v7831_v54 = vsel %vm12805_vm2, %v7826_v28, %v7830_v46  ;;  %v6879_v17 = vrot.slane %v6877_v49, 5  ;;  %v7841_v5 = vsel %vm12805_vm2, %v7836_v18, %v7840_v1  ;;  %v6885_v53 = vrot.slane %v6883_v9, 5  ;;  %v6830_v49 = vld [vmem:[#allocation3 + $0x20] sm:$0x1] }
 0x331   : > { %9787 = vmatmul.mubr.bf16.gmra.mrb[228].mxu0 %v10799_v31  ;;  %v15100_v55 = vsel %vm13026_vm13, %v7437_v50, %v7438_v61  ;;  %v6893_v51 = vshll.u32 %v6827_v2, 16  ;;  %v15102_v40 = vcombine.low %v7831_v54, %v7841_v5  ;;  %v6889_v32 = vrot.slane %v6887_v56, 4  ;;  %v7341_v31 = vld [vmem:[#allocation3 + $0x1c] sm:$0xf]  ;;  %v12409_v61 = vld [vmem:[#allocation3 + $0xc0] sm:$0xff]  }
 0x332   : > { %9794 = vmatprep.mubr.bf16.mxu0 %v12403_v29  ;;  %v10850_v36 = vcombine.low %v15089_v43, %v15100_v55  ;;  %v6880_v3 = vor.u32 %v6879_v17, %v6876_v25  ;;  %v7843_v20 = vshrl.u32 %v7773_v15, 16  ;;  %v7846_v14 = vshll.u32 %v7773_v15, 16  ;;  %v7776_v25 = vld [vmem:[#allocation3 + $0x30] sm:$0xf]  ;;  %v7348_v55 = vld [vmem:[#allocation3 + $0x38] sm:$0x1] }
 0x333   : > { %v6895_v52 = vrot.slane %v6893_v51, 5  ;;  %v7852_v6 = vshll.u32 %v7774_v47, 16  ;;  %v6890_v24 = vor.u32 %v6889_v32, %v6885_v53  ;;  %v7856_v22 = vshrl.u32 %v7774_v47, 16 }
 0x334   : > { %v6881_v12 = vrot.slane %v6880_v3, 4  ;;  %v7862_v44 = vshll.u32 %v7775_v23, 16  ;;  %9626 = vmatmul.mubr.bf16.gmra.mrb[164].mxu1 %v12402_v7  ;;  %v7845_v34 = vrot.slane %v7843_v20, 4  ;;  %v7848_v0 = vrot.slane %v7846_v14, 5  ;;  %v7778_v23 = vld [vmem:[#allocation3 + $0x38] sm:$0x1] }
 0x335   : > { %v7854_v46 = vrot.slane %v7852_v6, 5  ;;  %v10835_v4 = vrot.slane %v7340_v26, 9  ;;  %9633 = vmatprep.mubr.bf16.mxu1 %v15055_v57  ;;  %v6891_v58 = vrot.slane %v6890_v24, 4  ;;  %v7858_v10 = vrot.slane %v7856_v22, 4  ;;  %v12408_v57 = vld [vmem:[#allocation3 + $0xa8] sm:$0xff]  }
 0x336   : > { %v6886_v35 = vsel %vm12805_vm2, %v6881_v12, %v6885_v53  ;;  %v7864_v37 = vrot.slane %v7862_v44, 5  ;;  %v7849_v41 = vor.u32 %v7848_v0, %v7845_v34  ;;  %v7442_v1 = vrot.slane %v7341_v31, 5  ;;  %v7777_v53 = vld [vmem:[#allocation3 + $0x34] sm:$0xf]  ;;  %v7343_v31 = vld [vmem:[#allocation3 + $0x24] sm:$0xe] }
 0x337   : > { %v7445_v60 = vrot.slane %v7342_v42, 5  ;;  %v6898_v28 = vshrl.u32 %v6828_v21, 16  ;;  %v6896_v2 = vsel %vm12805_vm2, %v6891_v58, %v6895_v52  ;;  %v7859_v11 = vor.u32 %v7858_v10, %v7854_v46  ;;  %v7344_v14 = vld [vmem:[#allocation3 + $0x28] sm:$0xf]  ;;  %v7345_v44 = vld [vmem:[#allocation3 + $0x2c] sm:$0x1] }
 0x338   : > { %v6901_v18 = vshll.u32 %v6828_v21, 16  ;;  %v6907_v50 = vshll.u32 %v6829_v59, 16  ;;  %v15114_v9 = vcombine.low %v6886_v35, %v6896_v2  ;;  %v7850_v15 = vrot.slane %v7849_v41, 4  ;;  %v6832_v41 = vld [vmem:[#allocation3 + $0x28] sm:$0xf] }
 0x339   : > { %9795 = vmatmul.mubr.bf16.gmra.mrb[232].mxu0 %v10800_v63  ;;  %v15118_v29 = vsel %vm13026_vm13, %v10835_v4, %v7442_v1  ;;  %v7444_v54 = vrot.slane %v7442_v1, 4  ;;  %v7860_v17 = vrot.slane %v7859_v11, 4  ;;  %v6900_v56 = vrot.slane %v6898_v28, 4 }
 0x33a   : > { %9802 = vmatprep.mubr.bf16.mxu0 %v12409_v61  ;;  %v6903_v47 = vrot.slane %v6901_v18, 5  ;;  %v6909_v5 = vrot.slane %v6907_v50, 5  ;;  %v7855_v16 = vsel %vm12805_vm2, %v7850_v15, %v7854_v46  ;;  %v6911_v63 = vshrl.u32 %v6829_v59, 16  ;;  %v6831_v59 = vld [vmem:[#allocation3 + $0x24] sm:$0xf] }
 0x33b   : > { %v15124_v30 = vsel %vm13026_vm13, %v7444_v54, %v7445_v60  ;;  %v6917_v51 = vshll.u32 %v6830_v49, 16  ;;  %v7865_v26 = vsel %vm12805_vm2, %v7860_v17, %v7864_v37  ;;  %v7867_v32 = vshrl.u32 %v7776_v25, 16  ;;  %v6833_v49 = vld [vmem:[#allocation3 + $0x2c] sm:$0x1]  ;;  %v7779_v50 = vld [vmem:[#allocation3 + $0x3c] sm:$0xf] }
 0x33c   : > { %v10851_v7 = vcombine.low %v15118_v29, %v15124_v30  ;;  %v6904_v3 = vor.u32 %v6903_v47, %v6900_v56  ;;  %9634 = vmatmul.mubr.bf16.gmra.mrb[168].mxu1 %v12408_v57  ;;  %v15130_v42 = vcombine.low %v7855_v16, %v7865_v26  ;;  %v6913_v21 = vrot.slane %v6911_v63, 4  ;;  %v12416_v57 = vld [vmem:[#allocation3 + $0xb4] sm:$0xff]   ;;  %v7780_v54 = vld [vmem:[#allocation3 + $0x40] sm:$0xf] }
 0x33d   : > { %v6919_v52 = vrot.slane %v6917_v51, 5  ;;  %v7870_v20 = vshll.u32 %v7776_v25, 16  ;;  %9641 = vmatprep.mubr.bf16.mxu1 %v15084_v39  ;;  %v7869_v12 = vrot.slane %v7867_v32, 4  ;;  %v7876_v24 = vshll.u32 %v7777_v53, 16  ;;  %v12420_v63 = vld [vmem:[#allocation3 + $0x18] sm:$0xff]  }
 0x33e   : > { %v6905_v6 = vrot.slane %v6904_v3, 4  ;;  %v7880_v22 = vshrl.u32 %v7777_v53, 16  ;;  %v6914_v34 = vor.u32 %v6913_v21, %v6909_v5  ;;  %v7886_v46 = vshll.u32 %v7778_v23, 16  ;;  %v7781_v3 = vld [vmem:[#allocation3 + $0x44] sm:$0x1] }
 0x33f   : > { %v7872_v0 = vrot.slane %v7870_v20, 5  ;;  %v10836_v4 = vrot.slane %v7343_v31, 9  ;;  %v7878_v58 = vrot.slane %v7876_v24, 5  ;;  %v7449_v37 = vrot.slane %v7344_v14, 5  ;;  %v7346_v14 = vld [vmem:[#allocation3 + $0x30] sm:$0xe] }
 0x340   : > { %v6910_v35 = vsel %vm12805_vm2, %v6905_v6, %v6909_v5  ;;  %v7882_v10 = vrot.slane %v7880_v22, 4  ;;  %v6915_v39 = vrot.slane %v6914_v34, 4  ;;  %v7888_v60 = vrot.slane %v7886_v46, 5  ;;  %v7347_v6 = vld [vmem:[#allocation3 + $0x34] sm:$0xf] }
 0x341   : > { %9803 = vmatmul.mubr.bf16.gmra.mrb[236].mxu0 %v10801_v38  ;;  %v7873_v1 = vor.u32 %v7872_v0, %v7869_v12  ;;  %v7452_v28 = vrot.slane %v7345_v44, 5  ;;  %v15141_v2 = vsel %vm13026_vm13, %v10836_v4, %v7449_v37  ;;  %v7451_v11 = vrot.slane %v7449_v37, 4  ;;  %v6834_v46 = vld [vmem:[#allocation3 + $0x30] sm:$0xf]  ;;  %v12422_v4 = vld [vmem:[%s16194_s3 + $0x200] sm:$0xff]  }
 0x342   : > { %10004 = vmatprep.mubr.bf16.mxu0 %v15102_v40  ;;  %v7883_v61 = vor.u32 %v7882_v10, %v7878_v58  ;;  %v6922_v18 = vshrl.u32 %v6831_v59, 16  ;;  %v6920_v33 = vsel %vm12805_vm2, %v6915_v39, %v6919_v52  ;;  %v6925_v38 = vshll.u32 %v6831_v59, 16  ;;  %v6835_v37 = vld [vmem:[#allocation3 + $0x34] sm:$0xf] }
 0x343   : > { %v7874_v45 = vrot.slane %v7873_v1, 4  ;;  %v6931_v15 = vshll.u32 %v6832_v41, 16  ;;  %v15145_v25 = vcombine.low %v6910_v35, %v6920_v33  ;;  %v15149_v17 = vsel %vm13026_vm13, %v7451_v11, %v7452_v28 }
 0x344   : > { %v7884_v40 = vrot.slane %v7883_v61, 4  ;;  %v6924_v56 = vrot.slane %v6922_v18, 4  ;;  %9642 = vmatmul.mubr.bf16.gmra.mrb[172].mxu1 %v12416_v57  ;;  %v10852_v5 = vcombine.low %v15141_v2, %v15149_v17  ;;  %v6927_v53 = vrot.slane %v6925_v38, 5  ;;  %v12423_v18 = vld [vmem:[#allocation3 + $0x24] sm:$0xff]   ;;  %v12426_v57 = vld [vmem:[%s16194_s3 + $0x208] sm:$0xff]  }
 0x345   : > { %v7879_v47 = vsel %vm12805_vm2, %v7874_v45, %v7878_v58  ;;  %v6933_v16 = vrot.slane %v6931_v15, 5  ;;  %9843 = vmatprep.mubr.bf16.mxu1 %v10850_v36  ;;  %v6935_v23 = vshrl.u32 %v6832_v41, 16  ;;  %v6941_v26 = vshll.u32 %v6833_v49, 16 }
 0x346   : > { %v7889_v51 = vsel %vm12805_vm2, %v7884_v40, %v7888_v60  ;;  %v7891_v32 = vshrl.u32 %v7779_v50, 16  ;;  %v6928_v21 = vor.u32 %v6927_v53, %v6924_v56  ;;  %v7894_v52 = vshll.u32 %v7779_v50, 16  ;;  %v12425_v60 = vld [vmem:[%s16194_s3 + $0x248] sm:$0xff]   ;;  %v6836_v40 = vld [vmem:[#allocation3 + $0x38] sm:$0x1] }
 0x347   : > { %v15160_v31 = vcombine.low %v7879_v47, %v7889_v51  ;;  %v7900_v20 = vshll.u32 %v7780_v54, 16  ;;  %v6937_v12 = vrot.slane %v6935_v23, 4  ;;  %v6943_v24 = vrot.slane %v6941_v26, 5  ;;  %v7782_v47 = vld [vmem:[#allocation3 + $0x48] sm:$0xf]  ;;  %v12429_v51 = vld [vmem:[%s16194_s3 + $0x250] sm:$0xff]  }
 0x348   : > { %v7893_v22 = vrot.slane %v7891_v32, 4  ;;  %v7904_v43 = vshrl.u32 %v7780_v54, 16  ;;  %v6929_v36 = vrot.slane %v6928_v21, 4  ;;  %v7896_v44 = vrot.slane %v7894_v52, 5  ;;  %v7349_v21 = vld [vmem:[#allocation3 + $0x3c] sm:$0xe] }
 0x349   : > { %10005 = vmatmul.mubr.bf16.vlgmr.msra.gmra.mrb[240].mxu0 %v12420_v63  ;;  %v7902_v34 = vrot.slane %v7900_v20, 5  ;;  %v7910_v0 = vshll.u32 %v7781_v3, 16  ;;  %v6938_v59 = vor.u32 %v6937_v12, %v6933_v16  ;;  %v10837_v58 = vrot.slane %v7346_v14, 9  ;;  %v7784_v63 = vld [vmem:[#allocation3 + $0x50] sm:$0x1]  ;;  %v12430_v52 = vld [vmem:[%s16194_s3 + $0x210] sm:$0xff]  }
 0x34a   : > { %10012 = vmatprep.mubr.bf16.mxu0 %v15130_v42  ;;  %v7906_v35 = vrot.slane %v7904_v43, 4  ;;  %v7456_v10 = vrot.slane %v7347_v6, 5  ;;  %v6934_v41 = vsel %vm12805_vm2, %v6929_v36, %v6933_v16  ;;  %v7897_v39 = vor.u32 %v7896_v44, %v7893_v22  ;;  %v12433_v22 = vld [vmem:[%s16194_s3 + $0x258] sm:$0xff]  }
 0x34b   : > { %v7912_v1 = vrot.slane %v7910_v0, 5  ;;  %v7459_v28 = vrot.slane %v7348_v55, 5  ;;  %v6939_v42 = vrot.slane %v6938_v59, 4  ;;  %v6946_v33 = vshrl.u32 %v6834_v46, 16 }
 0x34c   : > { %v7907_v61 = vor.u32 %v7906_v35, %v7902_v34  ;;  %v15173_v11 = vsel %vm13026_vm13, %v10837_v58, %v7456_v10  ;;  %v7458_v49 = vrot.slane %v7456_v10, 4  ;;  %9844 = vmatmul.mubr.bf16.vlgmr.msra.gmra.mrb[176].mxu1 %v15114_v9  ;;  %v7898_v50 = vrot.slane %v7897_v39, 4 }
 0x34d   : > { %v6949_v45 = vshll.u32 %v6834_v46, 16  ;;  %v6955_v38 = vshll.u32 %v6835_v37, 16  ;;  %9851 = vmatprep.mubr.bf16.mxu1 %v10851_v7  ;;  %11987 = vmatpush3.bf16.msra.mxu1 %v12422_v4  ;;  %v6944_v15 = vsel %vm12805_vm2, %v6939_v42, %v6943_v24  ;;  %v6959_v56 = vshrl.u32 %v6835_v37, 16  ;;  %v7783_v7 = vld [vmem:[#allocation3 + $0x4c] sm:$0xf] }
 0x34e   : > { %v7908_v54 = vrot.slane %v7907_v61, 4  ;;  %v15186_v9 = vsel %vm13026_vm13, %v7458_v49, %v7459_v28  ;;  %v15188_v53 = vcombine.low %v6934_v41, %v6944_v15  ;;  %v7903_v16 = vsel %vm12805_vm2, %v7898_v50, %v7902_v34  ;;  %11988 = vmatprep.subr.bf16.mxu1 %v12425_v60  ;;  %v7350_v24 = vld [vmem:[#allocation3 + $0x40] sm:$0xf]  ;;  %v7351_v34 = vld [vmem:[#allocation3 + $0x44] sm:$0x1] }
 0x34f   : > { %v10853_v29 = vcombine.low %v15173_v11, %v15186_v9  ;;  %v6948_v30 = vrot.slane %v6946_v33, 4  ;;  %v6951_v26 = vrot.slane %v6949_v45, 5  ;;  %v6957_v3 = vrot.slane %v6955_v38, 5  ;;  %v6837_v41 = vld [vmem:[#allocation3 + $0x3c] sm:$0xf]  ;;  %v12437_v38 = vld [vmem:[%s16194_s3 + $0x260] sm:$0xff]  }
 0x350   : > { %v7913_v23 = vsel %vm12805_vm2, %v7908_v54, %v7912_v1  ;;  %v6961_v32 = vrot.slane %v6959_v56, 4  ;;  %v6965_v14 = vshll.u32 %v6836_v40, 16  ;;  %v7915_v6 = vshrl.u32 %v7782_v47, 16  ;;  %v6838_v28 = vld [vmem:[#allocation3 + $0x40] sm:$0xf]  ;;  %v12445_v11 = vld [vmem:[%s16194_s3 + $0x270] sm:$0xff]  }
 0x351   : > { %10013 = vmatmul.mubr.bf16.gmra.mrb[244].mxu0 %v12423_v18  ;;  %v10885_v20 = vcombine.low %v7903_v16, %v7913_v23  ;;  %v7918_v12 = vshll.u32 %v7782_v47, 16  ;;  %11989 = vmatpush3.bf16.msra.mxu1 %v12426_v57  ;;  %v6952_v43 = vor.u32 %v6951_v26, %v6948_v30  ;;  %v7924_v36 = vshll.u32 %v7783_v7, 16  ;;  %v6839_v50 = vld [vmem:[#allocation3 + $0x44] sm:$0x1]  ;;  %v12424_v57 = vld [vmem:[#allocation3 + $0x30] sm:$0xff]   ;;  %v12438_v16 = vld [vmem:[%s16194_s3 + $0x220] sm:$0xff]  }
 0x352   : > { %10020 = vmatprep.mubr.bf16.mxu0 %v15160_v31  ;;  %v6962_v55 = vor.u32 %v6961_v32, %v6957_v3  ;;  %v7928_v44 = vshrl.u32 %v7783_v7, 16  ;;  %v6967_v0 = vrot.slane %v6965_v14, 5  ;;  %v7917_v46 = vrot.slane %v7915_v6, 4  ;;  %11990 = vmatprep.subr.bf16.mxu1 %v12429_v51  ;;  %v7786_v47 = vld [vmem:[#allocation3 + $0x58] sm:$0xf] }
 0x353   : > { %v7920_v4 = vrot.slane %v7918_v12, 5  ;;  %v7934_v59 = vshll.u32 %v7784_v63, 16  ;;  %v6953_v35 = vrot.slane %v6952_v43, 4  ;;  %v7926_v10 = vrot.slane %v7924_v36, 5  ;;  %v7787_v23 = vld [vmem:[#allocation3 + $0x5c] sm:$0x1] }
 0x354   : > { %v6963_v58 = vrot.slane %v6962_v55, 4  ;;  %v7930_v37 = vrot.slane %v7928_v44, 4  ;;  %9852 = vmatmul.mubr.bf16.gmra.mrb[180].mxu1 %v15145_v25  ;;  %v10838_v1 = vrot.slane %v7349_v21, 9  ;;  %v7463_v60 = vrot.slane %v7350_v24, 5  ;;  %v12434_v25 = vld [vmem:[%s16194_s3 + $0x218] sm:$0xff]   ;;  %v12441_v43 = vld [vmem:[%s16194_s3 + $0x268] sm:$0xff]  }
 0x355   : > { %v7921_v39 = vor.u32 %v7920_v4, %v7917_v46  ;;  %v7936_v31 = vrot.slane %v7934_v59, 5  ;;  %9859 = vmatprep.mubr.bf16.mxu1 %v10852_v5  ;;  %v6958_v42 = vsel %vm12805_vm2, %v6953_v35, %v6957_v3  ;;  %v7466_v18 = vrot.slane %v7351_v34, 5  ;;  %11991 = vmatpush3.bf16.msra.mxu1 %v12430_v52  ;;  %v7785_v5 = vld [vmem:[#allocation3 + $0x54] sm:$0xf]  ;;  %v7352_v26 = vld [vmem:[#allocation3 + $0x48] sm:$0xe] }
 0x356   : > { %v6968_v61 = vsel %vm12805_vm2, %v6963_v58, %v6967_v0  ;;  %v7931_v49 = vor.u32 %v7930_v37, %v7926_v10  ;;  %v15221_v2 = vsel %vm13026_vm13, %v10838_v1, %v7463_v60  ;;  %v7465_v17 = vrot.slane %v7463_v60, 4  ;;  %11992 = vmatprep.subr.bf16.mxu1 %v12433_v22  ;;  %v7353_v14 = vld [vmem:[#allocation3 + $0x4c] sm:$0xf]  ;;  %v7354_v34 = vld [vmem:[#allocation3 + $0x50] sm:$0x1] }
 0x357   : > { %v15217_v33 = vcombine.low %v6958_v42, %v6968_v61  ;;  %v7922_v45 = vrot.slane %v7921_v39, 4  ;;  %v6970_v54 = vshrl.u32 %v6837_v41, 16  ;;  %v6973_v40 = vshll.u32 %v6837_v41, 16  ;;  %v6840_v35 = vld [vmem:[#allocation3 + $0x48] sm:$0xf]  ;;  %v12442_v39 = vld [vmem:[%s16194_s3 + $0x228] sm:$0xff]  }
 0x358   : > { %v7932_v15 = vrot.slane %v7931_v49, 4  ;;  %v6979_v56 = vshll.u32 %v6838_v28, 16  ;;  %v15233_v7 = vsel %vm13026_vm13, %v7465_v17, %v7466_v18  ;;  %v6983_v63 = vshrl.u32 %v6838_v28, 16  ;;  %v6841_v61 = vld [vmem:[#allocation3 + $0x4c] sm:$0xf] }
 0x359   : > { %10021 = vmatmul.mubr.bf16.gmra.mrb[248].mxu0 %v12424_v57  ;;  %v7927_v30 = vsel %vm12805_vm2, %v7922_v45, %v7926_v10  ;;  %v6989_v51 = vshll.u32 %v6839_v50, 16  ;;  %v10854_v32 = vcombine.low %v15221_v2, %v15233_v7  ;;  %v6972_v21 = vrot.slane %v6970_v54, 4  ;;  %11993 = vmatpush3.bf16.msra.mxu1 %v12434_v25  ;;  %v6842_v45 = vld [vmem:[#allocation3 + $0x50] sm:$0x1]  ;;  %v7788_v17 = vld [vmem:[#allocation3 + $0x60] sm:$0xf] }
 0x35a   : > { %10028 = vmatprep.mubr.bf16.mxu0 %v10885_v20  ;;  %v7937_v3 = vsel %vm12805_vm2, %v7932_v15, %v7936_v31  ;;  %v6975_v52 = vrot.slane %v6973_v40, 5  ;;  %v6981_v12 = vrot.slane %v6979_v56, 5  ;;  %v6985_v24 = vrot.slane %v6983_v63, 4  ;;  %11994 = vmatprep.subr.bf16.mxu1 %v12437_v38  ;;  %v12427_v31 = vld [vmem:[#allocation3 + $0x3c] sm:$0xff]   ;;  %v7789_v40 = vld [vmem:[#allocation3 + $0x64] sm:$0xf] }
 0x35b   : > { %v10886_v6 = vcombine.low %v7927_v30, %v7937_v3  ;;  %v6991_v22 = vrot.slane %v6989_v51, 5  ;;  %v7939_v55 = vshrl.u32 %v7785_v5, 16  ;;  %v7942_v36 = vshll.u32 %v7785_v5, 16  ;;  %v12446_v56 = vld [vmem:[%s16194_s3 + $0x230] sm:$0xff]   ;;  %v12449_v51 = vld [vmem:[%s16194_s3 + $0x278] sm:$0xff]  }
 0x35c   : > { %v6976_v20 = vor.u32 %v6975_v52, %v6972_v21  ;;  %v7948_v44 = vshll.u32 %v7786_v47, 16  ;;  %9860 = vmatmul.mubr.bf16.gmra.mrb[184].mxu1 %v15188_v53  ;;  %v6986_v0 = vor.u32 %v6985_v24, %v6981_v12  ;;  %v7952_v46 = vshrl.u32 %v7786_v47, 16  ;;  %v7790_v52 = vld [vmem:[#allocation3 + $0x68] sm:$0x1] }
 0x35d   : > { %v7958_v4 = vshll.u32 %v7787_v23, 16  ;;  %v10839_v59 = vrot.slane %v7352_v26, 9  ;;  %9867 = vmatprep.mubr.bf16.mxu1 %v10853_v29  ;;  %v7941_v10 = vrot.slane %v7939_v55, 4  ;;  %v7944_v37 = vrot.slane %v7942_v36, 5  ;;  %11995 = vmatpush3.bf16.msra.mxu1 %v12438_v16 }
 0x35e   : > { %v6977_v58 = vrot.slane %v6976_v20, 4  ;;  %v7950_v41 = vrot.slane %v7948_v44, 5  ;;  %v6987_v53 = vrot.slane %v6986_v0, 4  ;;  %v7954_v1 = vrot.slane %v7952_v46, 4  ;;  %11996 = vmatprep.subr.bf16.mxu1 %v12441_v43  ;;  %v7356_v44 = vld [vmem:[#allocation3 + $0x58] sm:$0xf] }
 0x35f   : > { %v7960_v60 = vrot.slane %v7958_v4, 5  ;;  %v7470_v28 = vrot.slane %v7353_v14, 5  ;;  %v7945_v29 = vor.u32 %v7944_v37, %v7941_v10  ;;  %v7473_v42 = vrot.slane %v7354_v34, 5  ;;  %v12428_v34 = vld [vmem:[#allocation3 + $0x48] sm:$0xff]  }
 0x360   : > { %v6982_v9 = vsel %vm12805_vm2, %v6977_v58, %v6981_v12  ;;  %v6994_v49 = vshrl.u32 %v6840_v35, 16  ;;  %v6992_v18 = vsel %vm12805_vm2, %v6987_v53, %v6991_v22  ;;  %v7955_v50 = vor.u32 %v7954_v1, %v7950_v41  ;;  %v7355_v22 = vld [vmem:[#allocation3 + $0x54] sm:$0xe] }
 0x361   : > { %10029 = vmatmul.mubr.bf16.gmra.mrb[252].mxu0 %v12427_v31  ;;  %v15258_v25 = vsel %vm13026_vm13, %v10839_v59, %v7470_v28  ;;  %v7472_v57 = vrot.slane %v7470_v28, 4  ;;  %v15260_v5 = vcombine.low %v6982_v9, %v6992_v18  ;;  %v7946_v38 = vrot.slane %v7945_v29, 4  ;;  %11997 = vmatpush3.bf16.msra.mxu1 %v12442_v39  ;;  %v6843_v31 = vld [vmem:[#allocation3 + $0x54] sm:$0xf]  ;;  %v6845_v9 = vld [vmem:[#allocation3 + $0x5c] sm:$0x1] }
 0x362   : > { %10036 = vmatprep.mubr.bf16.mxu0 %v10886_v6  ;;  %v6996_v15 = vrot.slane %v6994_v49, 4  ;;  %v6997_v54 = vshll.u32 %v6840_v35, 16  ;;  %v7956_v47 = vrot.slane %v7955_v50, 4  ;;  %v7003_v30 = vshll.u32 %v6841_v61, 16  ;;  %11998 = vmatprep.subr.bf16.mxu1 %v12445_v11  ;;  %v7357_v35 = vld [vmem:[#allocation3 + $0x5c] sm:$0x1] }
 0x363   : > { %v15267_v16 = vsel %vm13026_vm13, %v7472_v57, %v7473_v42  ;;  %v7007_v63 = vshrl.u32 %v6841_v61, 16  ;;  %v7951_v23 = vsel %vm12805_vm2, %v7946_v38, %v7950_v41  ;;  %v7013_v21 = vshll.u32 %v6842_v45, 16  ;;  %v6844_v11 = vld [vmem:[#allocation3 + $0x58] sm:$0xf]  ;;  %v7791_v45 = vld [vmem:[#allocation3 + $0x6c] sm:$0xf] }
 0x364   : > { %v10855_v26 = vcombine.low %v15258_v25, %v15267_v16  ;;  %v6999_v3 = vrot.slane %v6997_v54, 5  ;;  %9868 = vmatmul.mubr.bf16.gmra.mrb[188].mxu1 %v15217_v33  ;;  %v7961_v14 = vsel %vm12805_vm2, %v7956_v47, %v7960_v60  ;;  %v7005_v6 = vrot.slane %v7003_v30, 5  ;;  %v12450_v33 = vld [vmem:[%s16194_s3 + $0x238] sm:$0xff]   ;;  %v12431_v47 = vld [vmem:[#allocation3 + $0x54] sm:$0xff]  }
 0x365   : > { %v7009_v12 = vrot.slane %v7007_v63, 4  ;;  %v7963_v24 = vshrl.u32 %v7788_v17, 16  ;;  %9875 = vmatprep.mubr.bf16.mxu1 %v10854_v32  ;;  %v10887_v43 = vcombine.low %v7951_v23, %v7961_v14  ;;  %v7015_v55 = vrot.slane %v7013_v21, 5  ;;  %11999 = vmatpush3.bf16.msra.mxu1 %v12446_v56  ;;  %v7793_v23 = vld [vmem:[#allocation3 + $0x74] sm:$0x1] }
 0x366   : > { %v7000_v20 = vor.u32 %v6999_v3, %v6996_v15  ;;  %v7966_v36 = vshll.u32 %v7788_v17, 16  ;;  %v7972_v4 = vshll.u32 %v7789_v40, 16  ;;  %v7976_v59 = vshrl.u32 %v7789_v40, 16  ;;  %12000 = vmatprep.subr.bf16.mxu1 %v12449_v51  ;;  %v7792_v40 = vld [vmem:[#allocation3 + $0x70] sm:$0xf] }
 0x367   : > { %v7010_v0 = vor.u32 %v7009_v12, %v7005_v6  ;;  %v7965_v46 = vrot.slane %v7963_v24, 4  ;;  %v7982_v7 = vshll.u32 %v7790_v52, 16  ;;  %v10840_v32 = vrot.slane %v7355_v22, 9 }
 0x368   : > { %v7001_v58 = vrot.slane %v7000_v20, 4  ;;  %v7968_v2 = vrot.slane %v7966_v36, 5  ;;  %v7974_v37 = vrot.slane %v7972_v4, 5  ;;  %v7978_v41 = vrot.slane %v7976_v59, 4  ;;  %v15294_v56 = vpop.f32.mrb[176].mxu0 }
 0x369   : > { %10037 = vmatmul.mubr.bf16.gmra.mrb[0].mxu0 %v12428_v34  ;;  %v7011_v10 = vrot.slane %v7010_v0, 4  ;;  %v7477_v39 = vrot.slane %v7356_v44, 5  ;;  %v7984_v60 = vrot.slane %v7982_v7, 5  ;;  %v7480_v28 = vrot.slane %v7357_v35, 5  ;;  %12001 = vmatpush3.bf16.msra.mxu1 %v12450_v33  ;;  %v15298_v3 = vpop.f32.mrb[177].mxu0 }
 0x36a   : > { %10044 = vmatprep.mubr.bf16.mxu0 %v10887_v43  ;;  %v7006_v53 = vsel %vm12805_vm2, %v7001_v58, %v7005_v6  ;;  %v7969_v1 = vor.u32 %v7968_v2, %v7965_v46  ;;  %v7979_v42 = vor.u32 %v7978_v41, %v7974_v37  ;;  %v7018_v25 = vshrl.u32 %v6843_v31, 16  ;;  %v7358_v6 = vld [vmem:[#allocation3 + $0x60] sm:$0xe]  ;;  %v15302_v12 = vpop.f32.mrb[178].mxu0  ;;  %v7359_v20 = vld [vmem:[#allocation3 + $0x64] sm:$0xf] }
 0x36b   : > { %v7016_v29 = vsel %vm12805_vm2, %v7011_v10, %v7015_v55  ;;  %v7478_v61 = vsel %vm13026_vm13, %v10840_v32, %v7477_v39  ;;  %v7479_v49 = vrot.slane %v7477_v39, 4  ;;  %v7021_v57 = vshll.u32 %v6843_v31, 16  ;;  %v15304_v55 = vpop.f32.mrb[179].mxu0  ;;  %v7360_v0 = vld [vmem:[#allocation3 + $0x68] sm:$0x1] }
 0x36c   : > { %v10823_v18 = vcombine.low %v7006_v53, %v7016_v29  ;;  %v7970_v50 = vrot.slane %v7969_v1, 4  ;;  %9876 = vmatmul.mubr.bf16.gmra.mrb[192].mxu1 %v15260_v5  ;;  %v7980_v17 = vrot.slane %v7979_v42, 4  ;;  %v7027_v15 = vshll.u32 %v6844_v11, 16  ;;  %v6846_v58 = vld [vmem:[#allocation3 + $0x60] sm:$0xf] }
 0x36d   : > { %v7481_v38 = vsel %vm13026_vm13, %v7479_v49, %v7480_v28  ;;  %v7031_v54 = vshrl.u32 %v6844_v11, 16  ;;  %9883 = vmatprep.mubr.bf16.mxu1 %v10855_v26  ;;  %v7020_v63 = vrot.slane %v7018_v25, 4  ;;  %v7023_v51 = vrot.slane %v7021_v57, 5  ;;  %v6847_v53 = vld [vmem:[#allocation3 + $0x64] sm:$0xf] }
 0x36e   : > { %v7975_v16 = vsel %vm12805_vm2, %v7970_v50, %v7974_v37  ;;  %v10856_v30 = vcombine.low %v7478_v61, %v7481_v38  ;;  %v7985_v5 = vsel %vm12805_vm2, %v7980_v17, %v7984_v60  ;;  %v7029_v21 = vrot.slane %v7027_v15, 5  ;;  %v6848_v11 = vld [vmem:[#allocation3 + $0x68] sm:$0x1]  ;;  %v12432_v29 = vld [vmem:[#allocation3 + $0x60] sm:$0xff]  }
 0x36f   : > { %v7033_v52 = vrot.slane %v7031_v54, 4  ;;  %v7037_v14 = vshll.u32 %v6845_v9, 16  ;;  %v10888_v26 = vcombine.low %v7975_v16, %v7985_v5  ;;  %v7024_v24 = vor.u32 %v7023_v51, %v7020_v63  ;;  %v7361_v5 = vld [vmem:[#allocation3 + $0x6c] sm:$0xe] }
 0x370   : > { %v7987_v22 = vshrl.u32 %v7791_v45, 16  ;;  %v7990_v43 = vshll.u32 %v7791_v45, 16  ;;  %v7996_v33 = vshll.u32 %v7792_v40, 16  ;;  %v8000_v34 = vshrl.u32 %v7792_v40, 16 }
 0x371   : > { %10045 = vmatmul.mubr.bf16.gmra.mrb[4].mxu0 %v12431_v47  ;;  %v7034_v36 = vor.u32 %v7033_v52, %v7029_v21  ;;  %v7039_v44 = vrot.slane %v7037_v14, 5  ;;  %v7025_v46 = vrot.slane %v7024_v24, 4  ;;  %v8006_v35 = vshll.u32 %v7793_v23, 16  ;;  %v7795_v47 = vld [vmem:[#allocation3 + $0x7c] sm:$0xf] }
 0x372   : > { %10052 = vmatprep.mubr.bf16.mxu0 %v10888_v26  ;;  %v7989_v4 = vrot.slane %v7987_v22, 4  ;;  %v7992_v59 = vrot.slane %v7990_v43, 5  ;;  %v7998_v7 = vrot.slane %v7996_v33, 5  ;;  %v8002_v32 = vrot.slane %v8000_v34, 4  ;;  %v7796_v23 = vld [vmem:[#allocation3 + $0x80] sm:$0x1] }
 0x373   : > { %v7035_v2 = vrot.slane %v7034_v36, 4  ;;  %v10841_v10 = vrot.slane %v7358_v6, 9  ;;  %v7030_v37 = vsel %vm12805_vm2, %v7025_v46, %v7029_v21  ;;  %v8008_v39 = vrot.slane %v8006_v35, 5  ;;  %v7362_v26 = vld [vmem:[#allocation3 + $0x70] sm:$0xf] }
 0x374   : > { %v7993_v41 = vor.u32 %v7992_v59, %v7989_v4  ;;  %v7484_v31 = vrot.slane %v7359_v20, 5  ;;  %9884 = vmatmul.mubr.bf16.gmra.mrb[196].mxu1 %v10823_v18  ;;  %v8003_v60 = vor.u32 %v8002_v32, %v7998_v7  ;;  %v7487_v28 = vrot.slane %v7360_v0, 5  ;;  %v7794_v18 = vld [vmem:[#allocation3 + $0x78] sm:$0xf]  ;;  %v7363_v36 = vld [vmem:[#allocation3 + $0x74] sm:$0x1] }
 0x375   : > { %v7040_v1 = vsel %vm12805_vm2, %v7035_v2, %v7039_v44  ;;  %v7042_v9 = vshrl.u32 %v6846_v58, 16  ;;  %9891 = vmatprep.mubr.bf16.mxu1 %v10856_v30  ;;  %v7045_v45 = vshll.u32 %v6846_v58, 16  ;;  %v7051_v17 = vshll.u32 %v6847_v53, 16  ;;  %v6849_v46 = vld [vmem:[#allocation3 + $0x6c] sm:$0xf] }
 0x376   : > { %v10824_v42 = vcombine.low %v7030_v37, %v7040_v1  ;;  %v7994_v61 = vrot.slane %v7993_v41, 4  ;;  %v7485_v49 = vsel %vm13026_vm13, %v10841_v10, %v7484_v31  ;;  %v7486_v50 = vrot.slane %v7484_v31, 4  ;;  %v12435_v37 = vld [vmem:[#allocation3 + $0x6c] sm:$0xff]  }
 0x377   : > { %v8004_v25 = vrot.slane %v8003_v60, 4  ;;  %v7044_v57 = vrot.slane %v7042_v9, 4  ;;  %v7055_v54 = vshrl.u32 %v6847_v53, 16  ;;  %v7061_v40 = vshll.u32 %v6848_v11, 16  ;;  %v6850_v53 = vld [vmem:[#allocation3 + $0x70] sm:$0xf] }
 0x378   : > { %v7999_v38 = vsel %vm12805_vm2, %v7994_v61, %v7998_v7  ;;  %v7488_v15 = vsel %vm13026_vm13, %v7486_v50, %v7487_v28  ;;  %v7047_v63 = vrot.slane %v7045_v45, 5  ;;  %v7053_v51 = vrot.slane %v7051_v17, 5  ;;  %v6851_v9 = vld [vmem:[#allocation3 + $0x74] sm:$0x1] }
 0x379   : > { %10053 = vmatmul.mubr.bf16.gmra.mrb[8].mxu0 %v12432_v29  ;;  %v8009_v16 = vsel %vm12805_vm2, %v8004_v25, %v8008_v39  ;;  %v10857_v30 = vcombine.low %v7485_v49, %v7488_v15  ;;  %v7057_v52 = vrot.slane %v7055_v54, 4  ;;  %v7063_v14 = vrot.slane %v7061_v40, 5  ;;  %v7797_v25 = vld [vmem:[#allocation3 + $0x84] sm:$0xf] }
 0x37a   : > { %v10889_v21 = vcombine.low %v7999_v38, %v8009_v16  ;;  %v8011_v6 = vshrl.u32 %v7794_v18, 16  ;;  %v7048_v24 = vor.u32 %v7047_v63, %v7044_v57  ;;  %v8014_v22 = vshll.u32 %v7794_v18, 16  ;;  %v7798_v38 = vld [vmem:[#allocation3 + $0x88] sm:$0xf]  ;;  %v7799_v16 = vld [vmem:[#allocation3 + $0x8c] sm:$0x1] }
 0x37b   : > { %v8020_v43 = vshll.u32 %v7795_v47, 16  ;;  %v8024_v20 = vshrl.u32 %v7795_v47, 16  ;;  %v7058_v44 = vor.u32 %v7057_v52, %v7053_v51  ;;  %v8030_v34 = vshll.u32 %v7796_v23, 16 }
 0x37c   : > { %10060 = vmatprep.mubr.bf16.mxu0 %v10889_v21  ;;  %v8013_v33 = vrot.slane %v8011_v6, 4  ;;  %v10842_v0 = vrot.slane %v7361_v5, 9  ;;  %9892 = vmatmul.mubr.bf16.gmra.mrb[200].mxu1 %v10824_v42  ;;  %v7049_v4 = vrot.slane %v7048_v24, 4  ;;  %v8016_v59 = vrot.slane %v8014_v22, 5  ;;  %v7364_v5 = vld [vmem:[#allocation3 + $0x78] sm:$0xe] }
 0x37d   : > { %v8022_v35 = vrot.slane %v8020_v43, 5  ;;  %v8026_v58 = vrot.slane %v8024_v20, 4  ;;  %9899 = vmatprep.mubr.bf16.mxu1 %v10857_v30  ;;  %v7059_v2 = vrot.slane %v7058_v44, 4  ;;  %v8032_v7 = vrot.slane %v8030_v34, 5  ;;  %v7365_v21 = vld [vmem:[#allocation3 + $0x7c] sm:$0xf] }
 0x37e   : > { %v7491_v32 = vrot.slane %v7362_v26, 5  ;;  %v7494_v10 = vrot.slane %v7363_v36, 5  ;;  %v7054_v41 = vsel %vm12805_vm2, %v7049_v4, %v7053_v51  ;;  %v8017_v39 = vor.u32 %v8016_v59, %v8013_v33  ;;  %v7366_v24 = vld [vmem:[#allocation3 + $0x80] sm:$0x1]  ;;  %v12436_v22 = vld [vmem:[#allocation3 + $0x78] sm:$0xff]  }
 0x37f   : > { %v8027_v31 = vor.u32 %v8026_v58, %v8022_v35  ;;  %v7066_v1 = vshrl.u32 %v6849_v46, 16  ;;  %v7064_v60 = vsel %vm12805_vm2, %v7059_v2, %v7063_v14  ;;  %v7069_v29 = vshll.u32 %v6849_v46, 16  ;;  %v6852_v33 = vld [vmem:[#allocation3 + $0x78] sm:$0xf]  ;;  %v6853_v59 = vld [vmem:[#allocation3 + $0x7c] sm:$0xf] }
 0x380   : > { %v7492_v28 = vsel %vm13026_vm13, %v10842_v0, %v7491_v32  ;;  %v7493_v11 = vrot.slane %v7491_v32, 4  ;;  %v10825_v42 = vcombine.low %v7054_v41, %v7064_v60  ;;  %v8018_v61 = vrot.slane %v8017_v39, 4 }
 0x381   : > { %10061 = vmatmul.mubr.bf16.gmra.mrb[12].mxu0 %v12435_v37  ;;  %v8028_v49 = vrot.slane %v8027_v31, 4  ;;  %v7068_v50 = vrot.slane %v7066_v1, 4  ;;  %v7071_v45 = vrot.slane %v7069_v29, 5  ;;  %v7075_v17 = vshll.u32 %v6850_v53, 16 }
 0x382   : > { %v7495_v57 = vsel %vm13026_vm13, %v7493_v11, %v7494_v10  ;;  %v7079_v18 = vshrl.u32 %v6850_v53, 16  ;;  %v8023_v15 = vsel %vm12805_vm2, %v8018_v61, %v8022_v35  ;;  %v7085_v47 = vshll.u32 %v6851_v9, 16  ;;  %v6854_v53 = vld [vmem:[#allocation3 + $0x80] sm:$0x1] }
 0x383   : > { %v8033_v54 = vsel %vm12805_vm2, %v8028_v49, %v8032_v7  ;;  %v10858_v40 = vcombine.low %v7492_v28, %v7495_v57  ;;  %v7072_v63 = vor.u32 %v7071_v45, %v7068_v50  ;;  %v7077_v51 = vrot.slane %v7075_v17, 5  ;;  %v7801_v57 = vld [vmem:[#allocation3 + $0x94] sm:$0xf] }
 0x384   : > { %v10890_v30 = vcombine.low %v8023_v15, %v8033_v54  ;;  %v7081_v23 = vrot.slane %v7079_v18, 4  ;;  %9900 = vmatmul.mubr.bf16.gmra.mrb[204].mxu1 %v10825_v42  ;;  %v7087_v52 = vrot.slane %v7085_v47, 5  ;;  %v8035_v14 = vshrl.u32 %v7797_v25, 16  ;;  %v7800_v42 = vld [vmem:[#allocation3 + $0x90] sm:$0xf] }
 0x385   : > { %v8038_v6 = vshll.u32 %v7797_v25, 16  ;;  %v8044_v26 = vshll.u32 %v7798_v38, 16  ;;  %9907 = vmatprep.mubr.bf16.mxu1 %v10858_v40  ;;  %v7073_v43 = vrot.slane %v7072_v63, 4  ;;  %v8048_v36 = vshrl.u32 %v7798_v38, 16  ;;  %v7802_v15 = vld [vmem:[#allocation3 + $0x98] sm:$0x1] }
 0x386   : > { %10068 = vmatprep.mubr.bf16.mxu0 %v10890_v30  ;;  %v7082_v20 = vor.u32 %v7081_v23, %v7077_v51  ;;  %v8054_v44 = vshll.u32 %v7799_v16, 16  ;;  %v8037_v34 = vrot.slane %v8035_v14, 4  ;;  %v10843_v4 = vrot.slane %v7364_v5, 9  ;;  %v7367_v54 = vld [vmem:[#allocation3 + $0x84] sm:$0xe] }
 0x387   : > { %v8040_v0 = vrot.slane %v8038_v6, 5  ;;  %v8046_v46 = vrot.slane %v8044_v26, 5  ;;  %v7078_v35 = vsel %vm12805_vm2, %v7073_v43, %v7077_v51  ;;  %v8050_v2 = vrot.slane %v8048_v36, 4  ;;  %v7368_v63 = vld [vmem:[#allocation3 + $0x88] sm:$0xf] }
 0x388   : > { %v7083_v58 = vrot.slane %v7082_v20, 4  ;;  %v8056_v7 = vrot.slane %v8054_v44, 5  ;;  %v7498_v10 = vrot.slane %v7365_v21, 5  ;;  %v7501_v37 = vrot.slane %v7366_v24, 5  ;;  %v7369_v51 = vld [vmem:[#allocation3 + $0x8c] sm:$0x1] }
 0x389   : > { %10069 = vmatmul.mubr.bf16.gmra.mrb[16].mxu0 %v12436_v22  ;;  %v8041_v32 = vor.u32 %v8040_v0, %v8037_v34  ;;  %v7090_v41 = vshrl.u32 %v6852_v33, 16  ;;  %v8051_v31 = vor.u32 %v8050_v2, %v8046_v46  ;;  %v7093_v1 = vshll.u32 %v6852_v33, 16  ;;  %v12439_v5 = vld [vmem:[#allocation3 + $0x84] sm:$0xff]  }
 0x38a   : > { %v7088_v39 = vsel %vm12805_vm2, %v7083_v58, %v7087_v52  ;;  %v7099_v60 = vshll.u32 %v6853_v59, 16  ;;  %v7499_v9 = vsel %vm13026_vm13, %v10843_v4, %v7498_v10  ;;  %v7500_v29 = vrot.slane %v7498_v10, 4  ;;  %v6855_v6 = vld [vmem:[#allocation3 + $0x84] sm:$0xf]  ;;  %v6856_v20 = vld [vmem:[#allocation3 + $0x88] sm:$0xf] }
 0x38b   : > { %v10826_v28 = vcombine.low %v7078_v35, %v7088_v39  ;;  %v8042_v11 = vrot.slane %v8041_v32, 4  ;;  %v8052_v61 = vrot.slane %v8051_v31, 4  ;;  %v7092_v49 = vrot.slane %v7090_v41, 4 }
 0x38c   : > { %v7095_v50 = vrot.slane %v7093_v1, 5  ;;  %v7101_v25 = vrot.slane %v7099_v60, 5  ;;  %v7502_v17 = vsel %vm13026_vm13, %v7500_v29, %v7501_v37  ;;  %v7103_v18 = vshrl.u32 %v6853_v59, 16 }
 0x38d   : > { %9908 = vmatmul.mubr.bf16.gmra.mrb[208].mxu1 %v10826_v28  ;;  %v8047_v45 = vsel %vm12805_vm2, %v8042_v11, %v8046_v46  ;;  %v7109_v38 = vshll.u32 %v6854_v53, 16  ;;  %v8057_v40 = vsel %vm12805_vm2, %v8052_v61, %v8056_v7  ;;  %v10859_v47 = vcombine.low %v7499_v9, %v7502_v17  ;;  %v6857_v9 = vld [vmem:[#allocation3 + $0x8c] sm:$0x1] }
 0x38e   : > { %v7096_v16 = vor.u32 %v7095_v50, %v7092_v49  ;;  %v8059_v30 = vshrl.u32 %v7800_v42, 16  ;;  %v10891_v23 = vcombine.low %v8047_v45, %v8057_v40  ;;  %v7105_v21 = vrot.slane %v7103_v18, 4  ;;  %v15344_v44 = vpop.f32.mrb[116].mxu1 }
 0x38f   : > { %v7111_v52 = vrot.slane %v7109_v38, 5  ;;  %v8062_v14 = vshll.u32 %v7800_v42, 16  ;;  %9915 = vmatprep.mubr.bf16.mxu1 %v10859_v47  ;;  %v8068_v22 = vshll.u32 %v7801_v57, 16  ;;  %v8072_v43 = vshrl.u32 %v7801_v57, 16  ;;  %v15342_v36 = vpop.f32.mrb[180].mxu0  ;;  %v15348_v59 = vpop.f32.mrb[117].mxu1 }
 0x390   : > { %v7097_v26 = vrot.slane %v7096_v16, 4  ;;  %v8061_v24 = vrot.slane %v8059_v30, 4  ;;  %10076 = vmatprep.mubr.bf16.mxu0 %v10891_v23  ;;  %v7106_v33 = vor.u32 %v7105_v21, %v7101_v25  ;;  %v8078_v0 = vshll.u32 %v7802_v15, 16  ;;  %v15346_v4 = vpop.f32.mrb[181].mxu0  ;;  %v15354_v10 = vpop.f32.mrb[118].mxu1 }
 0x391   : > { %v8064_v34 = vrot.slane %v8062_v14, 5  ;;  %v10844_v46 = vrot.slane %v7367_v54, 9  ;;  %10077 = vmatmul.mubr.bf16.gmra.mrb[20].mxu0 %v12439_v5  ;;  %v8070_v58 = vrot.slane %v8068_v22, 5  ;;  %v8074_v2 = vrot.slane %v8072_v43, 4  ;;  %v15352_v32 = vpop.f32.mrb[182].mxu0  ;;  %v15358_v1 = vpop.f32.mrb[119].mxu1 }
 0x392   : > { %v7102_v35 = vsel %vm12805_vm2, %v7097_v26, %v7101_v25  ;;  %v7505_v7 = vrot.slane %v7368_v63, 5  ;;  %v7107_v37 = vrot.slane %v7106_v33, 4  ;;  %v8080_v39 = vrot.slane %v8078_v0, 5  ;;  %v15356_v53 = vpop.f32.mrb[183].mxu0  ;;  %v7803_v25 = vld [vmem:[#allocation3 + $0x9c] sm:$0xf] }
 0x393   : > { %v8065_v41 = vor.u32 %v8064_v34, %v8061_v24  ;;  %v7508_v31 = vrot.slane %v7369_v51, 5  ;;  %v8075_v60 = vor.u32 %v8074_v2, %v8070_v58  ;;  %v7114_v29 = vshrl.u32 %v6855_v6, 16  ;;  %v7804_v38 = vld [vmem:[#allocation3 + $0xa0] sm:$0xf]  ;;  %v7805_v16 = vld [vmem:[#allocation3 + $0xa4] sm:$0x1] }
 0x394   : > { %v7506_v28 = vsel %vm13026_vm13, %v10844_v46, %v7505_v7  ;;  %v7507_v11 = vrot.slane %v7505_v7, 4  ;;  %v7112_v42 = vsel %vm12805_vm2, %v7107_v37, %v7111_v52  ;;  %v7117_v49 = vshll.u32 %v6855_v6, 16  ;;  %v7370_v5 = vld [vmem:[#allocation3 + $0x90] sm:$0xe]  ;;  %v7371_v26 = vld [vmem:[#allocation3 + $0x94] sm:$0xf] }
 0x395   : > { %v8066_v61 = vrot.slane %v8065_v41, 4  ;;  %v7123_v50 = vshll.u32 %v6856_v20, 16  ;;  %v10827_v57 = vcombine.low %v7102_v35, %v7112_v42  ;;  %v8076_v45 = vrot.slane %v8075_v60, 4  ;;  %v7372_v24 = vld [vmem:[#allocation3 + $0x98] sm:$0x1]  ;;  %v12440_v22 = vld [vmem:[#allocation3 + $0x90] sm:$0xff]  }
 0x396   : > { %v7509_v17 = vsel %vm13026_vm13, %v7507_v11, %v7508_v31  ;;  %v7116_v18 = vrot.slane %v7114_v29, 4  ;;  %v7119_v40 = vrot.slane %v7117_v49, 5  ;;  %v7127_v63 = vshrl.u32 %v6856_v20, 16 }
 0x397   : > { %v8071_v15 = vsel %vm12805_vm2, %v8066_v61, %v8070_v58  ;;  %v10860_v54 = vcombine.low %v7506_v28, %v7509_v17  ;;  %v7125_v47 = vrot.slane %v7123_v50, 5  ;;  %9916 = vmatmul.mubr.bf16.gmra.mrb[212].mxu1 %v10827_v57  ;;  %v8081_v30 = vsel %vm12805_vm2, %v8076_v45, %v8080_v39  ;;  %v15387_v45 = vld [vmem:[%s16195_s4] ss:$0 sm:$0xff] }
 0x398   : > { %v7133_v51 = vshll.u32 %v6857_v9, 16  ;;  %v8083_v23 = vshrl.u32 %v7803_v25, 16  ;;  %v10892_v21 = vcombine.low %v8071_v15, %v8081_v30  ;;  %v7120_v52 = vor.u32 %v7119_v40, %v7116_v18  ;;  %v15370_v46 = vpop.f32.mrb[120].mxu1  ;;  %v6858_v40 = vld [vmem:[#allocation3 + $0x90] sm:$0xf] }
 0x399   : > { %9923 = vmatprep.mubr.bf16.mxu1 %v10860_v54  ;;  %v8086_v14 = vshll.u32 %v7803_v25, 16  ;;  %v8092_v6 = vshll.u32 %v7804_v38, 16  ;;  %v7129_v43 = vrot.slane %v7127_v63, 4  ;;  %v8096_v0 = vshrl.u32 %v7804_v38, 16  ;;  %v15372_v7 = vpop.f32.mrb[121].mxu1 }
 0x39a   : > { %v7135_v33 = vrot.slane %v7133_v51, 5  ;;  %v8085_v34 = vrot.slane %v8083_v23, 4  ;;  %10084 = vmatprep.mubr.bf16.mxu0 %v10892_v21  ;;  %v7121_v35 = vrot.slane %v7120_v52, 4  ;;  %v8102_v2 = vshll.u32 %v7805_v16, 16  ;;  %v15374_v60 = vpop.f32.mrb[122].mxu1 }
 0x39b   : > { %v8088_v20 = vrot.slane %v8086_v14, 5  ;;  %v8094_v58 = vrot.slane %v8092_v6, 5  ;;  %10085 = vmatmul.mubr.bf16.gmra.mrb[24].mxu0 %v12440_v22  ;;  %v7130_v37 = vor.u32 %v7129_v43, %v7125_v47  ;;  %v8098_v41 = vrot.slane %v8096_v0, 4  ;;  %v15380_v61 = vpop.f32.mrb[123].mxu1  ;;  %v6860_v23 = vld [vmem:[#allocation3 + $0x98] sm:$0x1] }
 0x39c   : > { %v10845_v39 = vrot.slane %v7370_v5, 9  ;;  %v7512_v31 = vrot.slane %v7371_v26, 5  ;;  %v7126_v28 = vsel %vm12805_vm2, %v7121_v35, %v7125_v47  ;;  %v8104_v9 = vrot.slane %v8102_v2, 5  ;;  %v15378_v42 = vpop.f32.mrb[184].mxu0  ;;  %v7806_v6 = vld [vmem:[#allocation3 + $0xa8] sm:$0xf] }
 0x39d   : > { %v8089_v11 = vor.u32 %v8088_v20, %v8085_v34  ;;  %v7515_v29 = vrot.slane %v7372_v24, 5  ;;  %v7131_v49 = vrot.slane %v7130_v37, 4  ;;  %v8099_v50 = vor.u32 %v8098_v41, %v8094_v58  ;;  %v15389_v17 = vpop.f32.mrb[185].mxu0  ;;  %v7807_v22 = vld [vmem:[#allocation3 + $0xac] sm:$0xf] }
 0x39e   : > { %v7513_v25 = vsel %vm13026_vm13, %v10845_v39, %v7512_v31  ;;  %v7514_v57 = vrot.slane %v7512_v31, 4  ;;  %v11556_v38 = vadd.f32 %v15070_v27, %v15059_v62  ;;  %v11559_v15 = vadd.f32 %v15082_v13, %v15076_v48  ;;  %v15397_v47 = vpop.f32.mrb[186].mxu0  ;;  %v6859_v62 = vld [vmem:[#allocation3 + $0x94] sm:$0xf]  ;;  %v7808_v20 = vld [vmem:[#allocation3 + $0xb0] sm:$0x1] }
 0x39f   : > { %v8090_v18 = vrot.slane %v8089_v11, 4  ;;  %v11668_v54 = vadd.f32 %v15298_v3, %v15294_v56  ;;  %v7136_v16 = vsel %vm12805_vm2, %v7131_v49, %v7135_v33  ;;  %v8100_v30 = vrot.slane %v8099_v50, 4  ;;  %v15405_v27 = vpop.f32.mrb[187].mxu0  ;;  %v12443_v33 = vld [vmem:[#allocation3 + $0x9c] sm:$0xff]  }
 0x3a0   : > { %v7516_v63 = vsel %vm13026_vm13, %v7514_v57, %v7515_v29  ;;  %v11671_v51 = vadd.f32 %v15304_v55, %v15302_v12  ;;  %v10828_v48 = vcombine.low %v7126_v28, %v7136_v16  ;;  %v9524_v3 = vadd.f32 %v11556_v38, %v15387_v45  ;;  %v7373_v11 = vld [vmem:[#allocation3 + $0x9c] sm:$0xe] }
 0x3a1   : > { %v8095_v13 = vsel %vm12805_vm2, %v8090_v18, %v8094_v58  ;;  %v10861_v56 = vcombine.low %v7513_v25, %v7516_v63  ;;  %v8105_v5 = vsel %vm12805_vm2, %v8100_v30, %v8104_v9  ;;  %v9527_v21 = vadd.f32 %v11559_v15, %v15387_v45  ;;  %v7374_v9 = vld [vmem:[#allocation3 + $0xa0] sm:$0xf] }
 0x3a2   : > { %v7138_v52 = vshrl.u32 %v6858_v40, 16  ;;  %v7141_v14 = vshll.u32 %v6858_v40, 16  ;;  %9924 = vmatmul.mubr.bf16.gmra.mrb[216].mxu1 %v10828_v48  ;;  %v10893_v12 = vcombine.low %v8095_v13, %v8105_v5  ;;  %v15413_v55 = vadd.f32 %v11668_v54, %v9524_v3  ;;  %v7375_v54 = vld [vmem:[#allocation3 + $0xa4] sm:$0x1]  ;;  %v6861_v3 = vld [vmem:[#allocation3 + $0x9c] sm:$0xf] }
 0x3a3   : > { %v7147_v26 = vshll.u32 %v6859_v62, 16  ;;  %v7151_v24 = vshrl.u32 %v6859_v62, 16  ;;  %9931 = vmatprep.mubr.bf16.mxu1 %v10861_v56  ;;  %v15415_v43 = vadd.f32 %v11671_v51, %v9527_v21  ;;  %v7157_v35 = vshll.u32 %v6860_v23, 16 }
 0x3a4   : > { %v7140_v34 = vrot.slane %v7138_v52, 4  ;;  %v7143_v0 = vrot.slane %v7141_v14, 5  ;;  %10092 = vmatprep.mubr.bf16.mxu0 %v10893_v12  ;;  %v8107_v37 = vshrl.u32 %v7806_v6, 16  ;;  %v8110_v41 = vshll.u32 %v7806_v6, 16 }
 0x3a5   : > { %v7149_v58 = vrot.slane %v7147_v26, 5  ;;  %v7153_v2 = vrot.slane %v7151_v24, 4  ;;  %10093 = vmatmul.mubr.bf16.gmra.mrb[28].mxu0 %v12443_v33  ;;  %v8116_v31 = vshll.u32 %v7807_v22, 16  ;;  %v8120_v28 = vshrl.u32 %v7807_v22, 16 }
 0x3a6   : > { %v7144_v39 = vor.u32 %v7143_v0, %v7140_v34  ;;  %v8109_v49 = vrot.slane %v8107_v37, 4  ;;  %v8112_v50 = vrot.slane %v8110_v41, 5  ;;  %v8126_v25 = vshll.u32 %v7808_v20, 16  ;;  %v7811_v37 = vld [vmem:[#allocation3 + $0xbc] sm:$0x1] }
 0x3a7   : > { %v7154_v29 = vor.u32 %v7153_v2, %v7149_v58  ;;  %v7159_v18 = vrot.slane %v7157_v35, 5  ;;  %v8118_v38 = vrot.slane %v8116_v31, 5  ;;  %v8122_v15 = vrot.slane %v8120_v28, 4  ;;  %v15417_v51 = vpop.f32.mrb[124].mxu1  ;;  %v6863_v35 = vld [vmem:[#allocation3 + $0xa4] sm:$0x1] }
 0x3a8   : > { %v7145_v57 = vrot.slane %v7144_v39, 4  ;;  %v8113_v16 = vor.u32 %v8112_v50, %v8109_v49  ;;  %v10846_v30 = vrot.slane %v7373_v11, 9  ;;  %v7519_v63 = vrot.slane %v7374_v9, 5  ;;  %v15425_v23 = vpop.f32.mrb[125].mxu1  ;;  %v7810_v2 = vld [vmem:[#allocation3 + $0xb8] sm:$0xf] }
 0x3a9   : > { %v7155_v40 = vrot.slane %v7154_v29, 4  ;;  %v8123_v48 = vor.u32 %v8122_v15, %v8118_v38  ;;  %v8128_v13 = vrot.slane %v8126_v25, 5  ;;  %v15423_v56 = vadd.f32 %v15346_v4, %v15342_v36  ;;  %v15429_v6 = vpop.f32.mrb[126].mxu1  ;;  %v6862_v4 = vld [vmem:[#allocation3 + $0xa0] sm:$0xf]  ;;  %v12444_v11 = vld [vmem:[#allocation3 + $0xa8] sm:$0xff]  }
 0x3aa   : > { %v7150_v62 = vsel %vm12805_vm2, %v7145_v57, %v7149_v58  ;;  %v8114_v21 = vrot.slane %v8113_v16, 4  ;;  %v7521_v52 = vrot.slane %v7519_v63, 4  ;;  %v7522_v14 = vrot.slane %v7375_v54, 5  ;;  %v15439_v22 = vpop.f32.mrb[127].mxu1 }
 0x3ab   : > { %v7160_v5 = vsel %vm12805_vm2, %v7155_v40, %v7159_v18  ;;  %v8124_v26 = vrot.slane %v8123_v48, 4  ;;  %v15433_v24 = vadd.f32 %v15348_v59, %v15344_v44  ;;  %v15437_v36 = vadd.f32 %v15356_v53, %v15352_v32  ;;  %v7809_v59 = vld [vmem:[#allocation3 + $0xb4] sm:$0xf] }
 0x3ac   : > { %v10829_v12 = vcombine.low %v7150_v62, %v7160_v5  ;;  %v7520_v33 = vsel %vm13026_vm13, %v10846_v30, %v7519_v63  ;;  %v7523_v34 = vsel %vm13026_vm13, %v7521_v52, %v7522_v14  ;;  %v15447_v0 = vadd.f32 %v15358_v1, %v15354_v10  ;;  %v15453_v41 = vpop.f32.mrb[188].mxu0  ;;  %v7377_v1 = vld [vmem:[#allocation3 + $0xac] sm:$0xf]  ;;  %v7376_v63 = vld [vmem:[#allocation3 + $0xa8] sm:$0xe] }
 0x3ad   : > { %v7162_v44 = vshrl.u32 %v6861_v3, 16  ;;  %v8119_v32 = vsel %vm12805_vm2, %v8114_v21, %v8118_v38  ;;  %v8129_v53 = vsel %vm12805_vm2, %v8124_v26, %v8128_v13  ;;  %v10862_v20 = vcombine.low %v7520_v33, %v7523_v34  ;;  %v15455_v28 = vpop.f32.mrb[189].mxu0  ;;  %v7378_v5 = vld [vmem:[#allocation3 + $0xb0] sm:$0x1] }
 0x3ae   : > { %9932 = vmatmul.mubr.bf16.gmra.mrb[220].mxu1 %v10829_v12  ;;  %v7165_v58 = vshll.u32 %v6861_v3, 16  ;;  %v10894_v39 = vcombine.low %v8119_v32, %v8129_v53  ;;  %v7171_v10 = vshll.u32 %v6862_v4, 16  ;;  %v7175_v29 = vshrl.u32 %v6862_v4, 16  ;;  %v15457_v25 = vpop.f32.mrb[190].mxu0 }
 0x3af   : > { %v7164_v31 = vrot.slane %v7162_v44, 4  ;;  %9939 = vmatprep.mubr.bf16.mxu1 %v10862_v20  ;;  %v7181_v49 = vshll.u32 %v6863_v35, 16  ;;  %v8131_v50 = vshrl.u32 %v7809_v59, 16  ;;  %v8134_v18 = vshll.u32 %v7809_v59, 16  ;;  %v15459_v54 = vpop.f32.mrb[191].mxu0 }
 0x3b0   : > { %v7167_v9 = vrot.slane %v7165_v58, 5  ;;  %10100 = vmatprep.mubr.bf16.mxu0 %v10894_v39  ;;  %v7173_v57 = vrot.slane %v7171_v10, 5  ;;  %v8140_v38 = vshll.u32 %v7810_v2, 16  ;;  %v8144_v15 = vshrl.u32 %v7810_v2, 16 }
 0x3b1   : > { %10101 = vmatmul.mubr.bf16.gmra.mrb[32].mxu0 %v12444_v11  ;;  %v7177_v16 = vrot.slane %v7175_v29, 4  ;;  %v8133_v30 = vrot.slane %v8131_v50, 4  ;;  %v8136_v62 = vrot.slane %v8134_v18, 5  ;;  %v8150_v3 = vshll.u32 %v7811_v37, 16  ;;  %v6864_v37 = vld [vmem:[#allocation3 + $0xa8] sm:$0xf] }
 0x3b2   : > { %v7168_v40 = vor.u32 %v7167_v9, %v7164_v31  ;;  %v8142_v48 = vrot.slane %v8140_v38, 5  ;;  %v8146_v13 = vrot.slane %v8144_v15, 4  ;;  %v7183_v14 = vrot.slane %v7181_v49, 5  ;;  %v12447_v50 = vld [vmem:[#allocation3 + $0xb4] sm:$0xff]   ;;  %v7814_v18 = vld [vmem:[#allocation3 + $0xc8] sm:$0x1] }
 0x3b3   : > { %v7178_v52 = vor.u32 %v7177_v16, %v7173_v57  ;;  %v7526_v12 = vrot.slane %v7377_v1, 5  ;;  %v8137_v26 = vor.u32 %v8136_v62, %v8133_v30  ;;  %v8152_v33 = vrot.slane %v8150_v3, 5  ;;  %v7380_v62 = vld [vmem:[#allocation3 + $0xb8] sm:$0xf] }
 0x3b4   : > { %v7169_v21 = vrot.slane %v7168_v40, 4  ;;  %v8147_v4 = vor.u32 %v8146_v13, %v8142_v48  ;;  %v10847_v34 = vrot.slane %v7376_v63, 9  ;;  %v7529_v32 = vrot.slane %v7378_v5, 5  ;;  %v7379_v63 = vld [vmem:[#allocation3 + $0xb4] sm:$0xe] }
 0x3b5   : > { %v7179_v44 = vrot.slane %v7178_v52, 4  ;;  %v7528_v59 = vrot.slane %v7526_v12, 4  ;;  %v8138_v53 = vrot.slane %v8137_v26, 4  ;;  %v15465_v58 = vadd.f32 %v15389_v17, %v15378_v42  ;;  %v6865_v42 = vld [vmem:[#allocation3 + $0xac] sm:$0xf] }
 0x3b6   : > { %v7174_v35 = vsel %vm12805_vm2, %v7169_v21, %v7173_v57  ;;  %v8148_v20 = vrot.slane %v8147_v4, 4  ;;  %v15469_v2 = vadd.f32 %v15372_v7, %v15370_v46  ;;  %v15477_v10 = vadd.f32 %v15405_v27, %v15397_v47  ;;  %v6866_v17 = vld [vmem:[#allocation3 + $0xb0] sm:$0x1]  ;;  %v7812_v47 = vld [vmem:[#allocation3 + $0xc0] sm:$0xf] }
 0x3b7   : > { %v7184_v39 = vsel %vm12805_vm2, %v7179_v44, %v7183_v14  ;;  %v7530_v31 = vsel %vm13026_vm13, %v7528_v59, %v7529_v32  ;;  %v15481_v1 = vadd.f32 %v15380_v61, %v15374_v60  ;;  %v15483_v11 = vpop.f32.mrb[128].mxu1  ;;  %v8143_v7 = vsel %vm12805_vm2, %v8138_v53, %v8142_v48  ;;  %v7813_v27 = vld [vmem:[#allocation3 + $0xc4] sm:$0xf] }
 0x3b8   : > { %v10830_v46 = vcombine.low %v7174_v35, %v7184_v39  ;;  %v8153_v9 = vsel %vm12805_vm2, %v8148_v20, %v8152_v33  ;;  %v7527_v29 = vsel %vm13026_vm13, %v10847_v34, %v7526_v12  ;;  %v15491_v49 = vpop.f32.mrb[129].mxu1  ;;  %v7186_v57 = vshrl.u32 %v6864_v37, 16  ;;  %v7381_v33 = vld [vmem:[#allocation3 + $0xbc] sm:$0x1] }
 0x3b9   : > { %v10895_v60 = vcombine.low %v8143_v7, %v8153_v9  ;;  %v10863_v61 = vcombine.low %v7527_v29, %v7530_v31  ;;  %v15493_v38 = vpop.f32.mrb[130].mxu1  ;;  %v7189_v15 = vshll.u32 %v6864_v37, 16  ;;  %v7195_v40 = vshll.u32 %v6865_v42, 16 }
 0x3ba   : > { %9940 = vmatmul.mubr.bf16.gmra.mrb[224].mxu1 %v10830_v46  ;;  %v7199_v16 = vshrl.u32 %v6865_v42, 16  ;;  %v7205_v30 = vshll.u32 %v6866_v17, 16  ;;  %v15495_v48 = vpop.f32.mrb[192].mxu0  ;;  %v15497_v13 = vpop.f32.mrb[131].mxu1  ;;  %v7188_v3 = vrot.slane %v7186_v57, 4  ;;  %v8155_v5 = vshrl.u32 %v7812_v47, 16 }
 0x3bb   : > { %10108 = vmatprep.mubr.bf16.mxu0 %v10895_v60  ;;  %9947 = vmatprep.mubr.bf16.mxu1 %v10863_v61  ;;  %v8158_v21 = vshll.u32 %v7812_v47, 16  ;;  %v8164_v52 = vshll.u32 %v7813_v27, 16  ;;  %v15499_v14 = vpop.f32.mrb[193].mxu0  ;;  %v7191_v12 = vrot.slane %v7189_v15, 5  ;;  %v7197_v26 = vrot.slane %v7195_v40, 5 }
 0x3bc   : > { %10109 = vmatmul.mubr.bf16.gmra.mrb[36].mxu0 %v12447_v50  ;;  %v7201_v4 = vrot.slane %v7199_v16, 4  ;;  %v15501_v34 = vpop.f32.mrb[194].mxu0  ;;  %v8157_v35 = vrot.slane %v8155_v5, 4  ;;  %v8168_v32 = vshrl.u32 %v7813_v27, 16  ;;  %v7207_v39 = vrot.slane %v7205_v30, 5 }
 0x3bd   : > { %v8160_v44 = vrot.slane %v8158_v21, 5  ;;  %v8166_v59 = vrot.slane %v8164_v52, 5  ;;  %v15503_v53 = vpop.f32.mrb[195].mxu0  ;;  %v7192_v20 = vor.u32 %v7191_v12, %v7188_v3  ;;  %v8174_v31 = vshll.u32 %v7814_v18, 16  ;;  %v6867_v15 = vld [vmem:[#allocation3 + $0xb4] sm:$0xf] }
 0x3be   : > { %v7202_v37 = vor.u32 %v7201_v4, %v7197_v26  ;;  %v8170_v17 = vrot.slane %v8168_v32, 4  ;;  %v10848_v46 = vrot.slane %v7379_v63, 9  ;;  %v7533_v7 = vrot.slane %v7380_v62, 5  ;;  %v7382_v52 = vld [vmem:[#allocation3 + $0xc0] sm:$0xe] }
 0x3bf   : > { %v8161_v42 = vor.u32 %v8160_v44, %v8157_v35  ;;  %v7193_v9 = vrot.slane %v7192_v20, 4  ;;  %v7536_v47 = vrot.slane %v7381_v33, 5  ;;  %v15507_v60 = vadd.f32 %v15455_v28, %v15453_v41  ;;  %v6868_v41 = vld [vmem:[#allocation3 + $0xb8] sm:$0xf]  ;;  %v7383_v44 = vld [vmem:[#allocation3 + $0xc4] sm:$0xf] }
 0x3c0   : > { %v7203_v29 = vrot.slane %v7202_v37, 4  ;;  %v8171_v50 = vor.u32 %v8170_v17, %v8166_v59  ;;  %v8176_v27 = vrot.slane %v8174_v31, 5  ;;  %v7535_v57 = vrot.slane %v7533_v7, 4 }
 0x3c1   : > { %v8162_v61 = vrot.slane %v8161_v42, 4  ;;  %v7198_v40 = vsel %vm12805_vm2, %v7193_v9, %v7197_v26  ;;  %v15515_v16 = vadd.f32 %v15425_v23, %v15417_v51  ;;  %v15519_v30 = vadd.f32 %v15459_v54, %v15457_v25  ;;  %v6869_v25 = vld [vmem:[#allocation3 + $0xbc] sm:$0x1] }
 0x3c2   : > { %v7208_v18 = vsel %vm12805_vm2, %v7203_v29, %v7207_v39  ;;  %v8172_v63 = vrot.slane %v8171_v50, 4  ;;  %v7534_v62 = vsel %vm13026_vm13, %v10848_v46, %v7533_v7  ;;  %v7537_v3 = vsel %vm13026_vm13, %v7535_v57, %v7536_v47  ;;  %v12448_v39 = vld [vmem:[#allocation3 + $0xc0] sm:$0xff]  }
 0x3c3   : > { %v10831_v28 = vcombine.low %v7198_v40, %v7208_v18  ;;  %v8167_v21 = vsel %vm12805_vm2, %v8162_v61, %v8166_v59  ;;  %v10864_v51 = vcombine.low %v7534_v62, %v7537_v3  ;;  %v15531_v23 = vadd.f32 %v15439_v22, %v15429_v6  ;;  %v7384_v6 = vld [vmem:[#allocation3 + $0xc8] sm:$0x1]  ;;  %v6870_v22 = vld [vmem:[#allocation3 + $0xc0] sm:$0xf]  ;;  %v6871_v40 = vld [vmem:[#allocation3 + $0xc4] sm:$0xf] }
 0x3c4   : > { %v15525_v5 = vpop.f32.mrb[196].mxu0  ;;  %v7210_v54 = vshrl.u32 %v6867_v15, 16  ;;  %v8177_v26 = vsel %vm12805_vm2, %v8172_v63, %v8176_v27  ;;  %v7213_v4 = vshll.u32 %v6867_v15, 16  ;;  %v7219_v33 = vshll.u32 %v6868_v41, 16  ;;  %v6872_v18 = vld [vmem:[#allocation3 + $0xc8] sm:$0x1] }
 0x3c5   : > { %v15533_v12 = vpop.f32.mrb[197].mxu0  ;;  %9948 = vmatmul.mubr.bf16.gmra.mrb[228].mxu1 %v10831_v28  ;;  %v7223_v35 = vshrl.u32 %v6868_v41, 16  ;;  %v10896_v59 = vcombine.low %v8167_v21, %v8177_v26  ;;  %v7229_v46 = vshll.u32 %v6869_v25, 16  ;;  %v10849_v9 = vrot.slane %v7382_v52, 9  ;;  %v7815_v62 = vld [vmem:[#allocation3 + $0xcc] sm:$0xf] }
 0x3c6   : > { %v15537_v32 = vpop.f32.mrb[198].mxu0  ;;  %9955 = vmatprep.mubr.bf16.mxu1 %v10864_v51  ;;  %v7212_v20 = vrot.slane %v7210_v54, 4  ;;  %v7215_v31 = vrot.slane %v7213_v4, 5  ;;  %v7221_v42 = vrot.slane %v7219_v33, 5  ;;  %v7540_v29 = vrot.slane %v7383_v44, 5 }
 0x3c7   : > { %v15539_v37 = vpop.f32.mrb[199].mxu0  ;;  %v7225_v17 = vrot.slane %v7223_v35, 4  ;;  %v15541_v7 = vpop.f32.mrb[132].mxu1  ;;  %10116 = vmatprep.mubr.bf16.mxu0 %v10896_v59  ;;  %v15545_v47 = vadd.f32 %v15499_v14, %v15495_v48  ;;  %v15549_v57 = vadd.f32 %v15491_v49, %v15483_v11  ;;  %v15553_v15 = vadd.f32 %v15503_v53, %v15501_v34  ;;  %v7816_v26 = vld [vmem:[#allocation3 + $0xd0] sm:$0xf] }
 0x3c8   : > { %v11585_v61 = vpop.f32.mrb[133].mxu1  ;;  %10117 = vmatmul.mubr.bf16.gmra.mrb[40].mxu0 %v12448_v39  ;;  %v7216_v50 = vor.u32 %v7215_v31, %v7212_v20  ;;  %v7542_v28 = vrot.slane %v7540_v29, 4  ;;  %v7543_v63 = vrot.slane %v7384_v6, 5  ;;  %v15557_v48 = vadd.f32 %v15497_v13, %v15493_v38  ;;  %v7817_v44 = vld [vmem:[#allocation3 + $0xd4] sm:$0x1] }
 0x3c9   : > { %v7226_v27 = vor.u32 %v7225_v17, %v7221_v42  ;;  %v11587_v41 = vpop.f32.mrb[134].mxu1  ;;  %v7234_v14 = vshrl.u32 %v6870_v22, 16  ;;  %v7231_v11 = vrot.slane %v7229_v46, 5  ;;  %v7237_v49 = vshll.u32 %v6870_v22, 16 }
 0x3ca   : > { %v11588_v3 = vpop.f32.mrb[135].mxu1  ;;  %v7217_v21 = vrot.slane %v7216_v50, 4  ;;  %v7541_v34 = vsel %vm13026_vm13, %v10849_v9, %v7540_v29  ;;  %v7544_v53 = vsel %vm13026_vm13, %v7542_v28, %v7543_v63  ;;  %v7243_v52 = vshll.u32 %v6871_v40, 16 }
 0x3cb   : > { %v7227_v51 = vrot.slane %v7226_v27, 4  ;;  %v7236_v54 = vrot.slane %v7234_v14, 4  ;;  %v10865_v33 = vcombine.low %v7541_v34, %v7544_v53  ;;  %v7239_v35 = vrot.slane %v7237_v49, 5 }
 0x3cc   : > { %v15559_v25 = vpop.f32.mrb[200].mxu0  ;;  %v7222_v13 = vsel %vm12805_vm2, %v7217_v21, %v7221_v42  ;;  %v7245_v6 = vrot.slane %v7243_v52, 5  ;;  %v7247_v22 = vshrl.u32 %v6871_v40, 16  ;;  %v7253_v39 = vshll.u32 %v6872_v18, 16 }
 0x3cd   : > { %v11703_v38 = vpop.f32.mrb[201].mxu0  ;;  %v7232_v4 = vsel %vm12805_vm2, %v7227_v51, %v7231_v11  ;;  %v7240_v17 = vor.u32 %v7239_v35, %v7236_v54  ;;  %v8179_v46 = vshrl.u32 %v7815_v62, 16  ;;  %v8182_v9 = vshll.u32 %v7815_v62, 16  ;;  %v8283_v62 = vld [vmem:[#allocation3 + $0x1c] sm:$0xf] }
 0x3ce   : > { %v11705_v59 = vpop.f32.mrb[202].mxu0  ;;  %v10832_v20 = vcombine.low %v7222_v13, %v7232_v4  ;;  %v8188_v29 = vshll.u32 %v7816_v26, 16  ;;  %v7249_v27 = vrot.slane %v7247_v22, 4  ;;  %v8192_v42 = vshrl.u32 %v7816_v26, 16 }
 0x3cf   : > { %v11706_v31 = vpop.f32.mrb[203].mxu0  ;;  %v11590_v50 = vpop.f32.mrb[136].mxu1  ;;  %v8198_v28 = vshll.u32 %v7817_v44, 16  ;;  %v8181_v14 = vrot.slane %v8179_v46, 4  ;;  %v8184_v21 = vrot.slane %v8182_v9, 5  ;;  %v7241_v49 = vrot.slane %v7240_v17, 4 }
 0x3d0   : > { %9956 = vmatmul.mubr.bf16.gmra.mrb[232].mxu1 %v10832_v20  ;;  %v11591_v63 = vpop.f32.mrb[137].mxu1  ;;  %v8190_v51 = vrot.slane %v8188_v29, 5  ;;  %v7250_v34 = vor.u32 %v7249_v27, %v7245_v6  ;;  %v8194_v40 = vrot.slane %v8192_v42, 4  ;;  %v15571_v18 = vadd.f32 %v15533_v12, %v15525_v5  ;;  %v12468_v46 = vld [vmem:[%s12815_s30] sm:$0xf] }
 0x3d1   : > { %9963 = vmatprep.mubr.bf16.mxu1 %v10865_v33  ;;  %v11593_v11 = vpop.f32.mrb[138].mxu1  ;;  %v7255_v54 = vrot.slane %v7253_v39, 5  ;;  %v8185_v52 = vor.u32 %v8184_v21, %v8181_v14  ;;  %v15574_v26 = vadd.f32 %v11585_v61, %v15541_v7  ;;  %v15578_v13 = vadd.f32 %v15539_v37, %v15537_v32  ;;  %v12469_v32 = vld [vmem:[%s12815_s30 + $0x4] sm:$0xf] }
 0x3d2   : > { %v11594_v53 = vpop.f32.mrb[139].mxu1  ;;  %v7251_v33 = vrot.slane %v7250_v34, 4  ;;  %v8195_v35 = vor.u32 %v8194_v40, %v8190_v51  ;;  %v8200_v44 = vrot.slane %v8198_v28, 5  ;;  %v15580_v20 = vadd.f32 %v11588_v3, %v11587_v41  ;;  %v8284_v3 = vld [vmem:[#allocation3 + $0x20] sm:$0x1]  ;;  %v12451_v14 = vld [vmem:[#allocation3 + $0xcc] sm:$0xff]  }
 0x3d3   : > { %v8186_v12 = vrot.slane %v8185_v52, 4  ;;  %v8380_v22 = vrot.slane %v8283_v62, 5  ;;  %v7246_v17 = vsel %vm12805_vm2, %v7241_v49, %v7245_v6  ;;  %v10930_v37 = vcombine.low %v12468_v46, %v12469_v32  ;;  %v8282_v6 = vld [vmem:[#allocation3 + $0x18] sm:$0xe]  ;;  %v8287_v32 = vld [vmem:[#allocation3 + $0x2c] sm:$0x1] }
 0x3d4   : > { %v11708_v4 = vpop.f32.mrb[204].mxu0  ;;  %v7256_v7 = vsel %vm12805_vm2, %v7251_v33, %v7255_v54  ;;  %v8196_v61 = vrot.slane %v8195_v35, 4  ;;  %v15593_v21 = vadd.f32 %v11703_v38, %v15559_v25  ;;  %v15595_v49 = vadd.f32 %v11591_v63, %v11590_v50 }
 0x3d5   : > { %v11709_v5 = vpop.f32.mrb[205].mxu0  ;;  %v10833_v29 = vcombine.low %v7246_v17, %v7256_v7  ;;  %v8191_v41 = vsel %vm12805_vm2, %v8186_v12, %v8190_v51  ;;  %v8382_v27 = vrot.slane %v8380_v22, 4  ;;  %v15597_v34 = vadd.f32 %v11706_v31, %v11705_v59  ;;  %v8286_v51 = vld [vmem:[#allocation3 + $0x28] sm:$0xf]  ;;  %v12470_v17 = vld [vmem:[%s12815_s30 + $0x8] sm:$0xf] }
 0x3d6   : > { %v11711_v39 = vpop.f32.mrb[206].mxu0  ;;  %v8201_v28 = vsel %vm12805_vm2, %v8196_v61, %v8200_v44  ;;  %v15599_v54 = vadd.f32 %v11594_v53, %v11593_v11  ;;  %v8383_v19 = vrot.slane %v8284_v3, 5  ;;  %v10898_v35 = vrot.slane %v8282_v6, 9  ;;  %v8289_v3 = vld [vmem:[#allocation3 + $0x34] sm:$0xf] }
 0x3d7   : > { %v11712_v9 = vpop.f32.mrb[207].mxu0  ;;  %v11596_v42 = vpop.f32.mrb[140].mxu1  ;;  %v10897_v62 = vcombine.low %v8191_v41, %v8201_v28  ;;  %v15601_v25 = vadd.f32 %v11709_v5, %v11708_v4  ;;  %v8387_v50 = vrot.slane %v8286_v51, 5  ;;  %v12471_v4 = vld [vmem:[%s12815_s30 + $0xc] sm:$0xf]  ;;  %v8394_v51 = vrot.slane %v8289_v3, 5 }
 0x3d8   : > { %v11597_v40 = vpop.f32.mrb[141].mxu1  ;;  %9964 = vmatmul.mubr.bf16.gmra.mrb[236].mxu1 %v10833_v29  ;;  %v8384_v31 = vsel %vm13026_vm13, %v8382_v27, %v8383_v19  ;;  %v15607_v63 = vadd.f32 %v11712_v9, %v11711_v39  ;;  %v8381_v12 = vsel %vm13026_vm13, %v10898_v35, %v8380_v22  ;;  %v10931_v5 = vcombine.low %v12470_v17, %v12471_v4  ;;  %v8285_v41 = vld [vmem:[#allocation3 + $0x24] sm:$0xe]  ;;  %v8290_v17 = vld [vmem:[#allocation3 + $0x38] sm:$0x1] }
 0x3d9   : > { %v11599_v52 = vpop.f32.mrb[142].mxu1  ;;  %10165 = vmatprep.mubr.bf16.mxu1 %v10930_v37  ;;  %10124 = vmatprep.mubr.bf16.mxu0 %v10897_v62  ;;  %v15603_v38 = vadd.f32 %v11597_v40, %v11596_v42  ;;  %v10914_v46 = vcombine.low %v8381_v12, %v8384_v31  ;;  %v8389_v39 = vrot.slane %v8387_v50, 4  ;;  %v8390_v42 = vrot.slane %v8287_v32, 5  ;;  %v12473_v31 = vld [vmem:[%s12815_s30 + $0x14] sm:$0xf] }
 0x3da   : > { %v11600_v33 = vpop.f32.mrb[143].mxu1  ;;  %10125 = vmatmul.mubr.bf16.gmra.mrb[44].mxu0 %v12451_v14  ;;  %v10899_v40 = vrot.slane %v8285_v41, 9  ;;  %v8288_v32 = vld [vmem:[#allocation3 + $0x30] sm:$0xe] }
 0x3db   : > { %v15609_v11 = vadd.f32 %v11600_v33, %v11599_v52  ;;  %v8391_v62 = vsel %vm13026_vm13, %v8389_v39, %v8390_v42  ;;  %v10900_v42 = vrot.slane %v8288_v32, 9 }
 0x3dc   : > { %v11714_v59 = vpop.f32.mrb[208].mxu0  ;;  %v8388_v35 = vsel %vm13026_vm13, %v10899_v40, %v8387_v50  ;;  %v8397_v50 = vrot.slane %v8290_v17, 5 }
 0x3dd   : > { %v11715_v53 = vpop.f32.mrb[209].mxu0  ;;  %v10915_v12 = vcombine.low %v8388_v35, %v8391_v62  ;;  %v12474_v35 = vld [vmem:[%s12815_s30 + $0x18] sm:$0xf] }
 0x3de   : > { %v11717_v44 = vpop.f32.mrb[210].mxu0  ;;  %v15615_v7 = vadd.f32 %v11715_v53, %v11714_v59  ;;  %v12472_v59 = vld [vmem:[%s12815_s30 + $0x10] sm:$0xf] }
 0x3df   : > { %v11718_v61 = vpop.f32.mrb[211].mxu0  ;;  %v11602_v37 = vpop.f32.mrb[144].mxu1  ;;  %v10932_v53 = vcombine.low %v12472_v59, %v12473_v31  ;;  %v12475_v59 = vld [vmem:[%s12815_s30 + $0x1c] sm:$0xf] }
 0x3e0   : > { %v15617_v29 = vadd.f32 %v11718_v61, %v11717_v44  ;;  %v11603_v9 = vpop.f32.mrb[145].mxu1  ;;  %10166 = vmatmul.mubr.bf16.vlgmr.msra.gmra.mrb[240].mxu1 %v10914_v46  ;;  %v8396_v61 = vrot.slane %v8394_v51, 4  ;;  %v10933_v31 = vcombine.low %v12474_v35, %v12475_v59 }
 0x3e1   : > { %v15619_v27 = vadd.f32 %v11603_v9, %v11602_v37  ;;  %v11605_v22 = vpop.f32.mrb[146].mxu1  ;;  %10173 = vmatprep.mubr.bf16.mxu1 %v10931_v5  ;;  %v8292_v37 = vld [vmem:[#allocation3 + $0x40] sm:$0xf] }
 0x3e2   : > { %v11606_v28 = vpop.f32.mrb[147].mxu1 }
 0x3e3   : > { %v15621_v14 = vadd.f32 %v11606_v28, %v11605_v22  ;;  %v8398_v28 = vsel %vm13026_vm13, %v8396_v61, %v8397_v50  ;;  %v9532_v61 = vadd.f32 %v15433_v24, %v15387_v45 }
 0x3e4   : > { %v11720_v6 = vpop.f32.mrb[212].mxu0 }
 0x3e5   : > { %v11721_v52 = vpop.f32.mrb[213].mxu0 }
 0x3e6   : > { %v15625_v19 = vadd.f32 %v11721_v52, %v11720_v6  ;;  %v11723_v33 = vpop.f32.mrb[214].mxu0  ;;  %v8401_v6 = vrot.slane %v8292_v37, 5  ;;  %v8291_v37 = vld [vmem:[#allocation3 + $0x3c] sm:$0xe] }
 0x3e7   : > { %v11724_v44 = vpop.f32.mrb[215].mxu0  ;;  %v11608_v4 = vpop.f32.mrb[148].mxu1 }
 0x3e8   : > { %v15631_v5 = vadd.f32 %v11724_v44, %v11723_v33  ;;  %v11609_v46 = vpop.f32.mrb[149].mxu1  ;;  %10174 = vmatmul.mubr.bf16.gmra.mrb[244].mxu1 %v10915_v12  ;;  %v8395_v33 = vsel %vm13026_vm13, %v10900_v42, %v8394_v51  ;;  %v8293_v12 = vld [vmem:[#allocation3 + $0x44] sm:$0x1] }
 0x3e9   : > { %v15633_v39 = vadd.f32 %v11609_v46, %v11608_v4  ;;  %v11611_v9 = vpop.f32.mrb[150].mxu1  ;;  %10181 = vmatprep.mubr.bf16.mxu1 %v10932_v53  ;;  %v10916_v44 = vcombine.low %v8395_v33, %v8398_v28  ;;  %v8403_v46 = vrot.slane %v8401_v6, 4  ;;  %v9540_v28 = vadd.f32 %v15469_v2, %v15387_v45 }
 0x3ea   : > { %v11612_v41 = vpop.f32.mrb[151].mxu1  ;;  %v10901_v33 = vrot.slane %v8291_v37, 9  ;;  %v9548_v2 = vadd.f32 %v15515_v16, %v15387_v45 }
 0x3eb   : > { %v15635_v3 = vadd.f32 %v11612_v41, %v11611_v9  ;;  %v15649_v9 = vld [vmem:[#allocation3 + $0x4c] sm:$0xf]  ;;  %v9535_v41 = vadd.f32 %v15447_v0, %v15387_v45 }
 0x3ec   : > { %v11726_v22 = vpop.f32.mrb[216].mxu0  ;;  %v8408_v0 = vrot.slane %v15649_v9, 5  ;;  %v9551_v9 = vadd.f32 %v15531_v23, %v15387_v45 }
 0x3ed   : > { %v11727_v40 = vpop.f32.mrb[217].mxu0 }
 0x3ee   : > { %v15639_v62 = vadd.f32 %v11727_v40, %v11726_v22  ;;  %v11729_v52 = vpop.f32.mrb[218].mxu0  ;;  %v8404_v22 = vrot.slane %v8293_v12, 5  ;;  %v8402_v12 = vsel %vm13026_vm13, %v10901_v33, %v8401_v6  ;;  %v15690_v33 = vld [vmem:[#allocation3 + $0x58] sm:$0xf] }
 0x3ef   : > { %v11730_v53 = vpop.f32.mrb[219].mxu0  ;;  %v11614_v17 = vpop.f32.mrb[152].mxu1 }
 0x3f0   : > { %v15645_v4 = vadd.f32 %v11730_v53, %v11729_v52  ;;  %v11615_v32 = vpop.f32.mrb[153].mxu1  ;;  %10182 = vmatmul.mubr.bf16.gmra.mrb[248].mxu1 %v10916_v44  ;;  %v9543_v52 = vadd.f32 %v15481_v1, %v15387_v45  ;;  %v8405_v35 = vsel %vm13026_vm13, %v8403_v46, %v8404_v22  ;;  %v15667_v44 = vadd.f32 %v15423_v56, %v9532_v61  ;;  %v12476_v1 = vld [vmem:[%s12815_s30 + $0x20] sm:$0xf]  ;;  %v8296_v22 = vld [vmem:[#allocation3 + $0x50] sm:$0x1] }
 0x3f1   : > { %v15651_v50 = vadd.f32 %v11615_v32, %v11614_v17  ;;  %v11617_v51 = vpop.f32.mrb[154].mxu1  ;;  %10189 = vmatprep.mubr.bf16.mxu1 %v10933_v31  ;;  %v12477_v17 = vld [vmem:[%s12815_s30 + $0x24] sm:$0xf]  ;;  %v15676_v46 = vadd.f32 %v15437_v36, %v9535_v41  ;;  %v9556_v36 = vadd.f32 %v15549_v57, %v15387_v45  ;;  %v8294_v41 = vld [vmem:[#allocation3 + $0x48] sm:$0xe]  ;;  %v9567_v57 = vadd.f32 %v15580_v20, %v15387_v45 }
 0x3f2   : > { %v11618_v42 = vpop.f32.mrb[155].mxu1  ;;  %v10934_v32 = vcombine.low %v12476_v1, %v12477_v17  ;;  %v15686_v6 = vadd.f32 %v15477_v10, %v9543_v52  ;;  %v15697_v10 = vadd.f32 %v15507_v60, %v9548_v2  ;;  %v9572_v52 = vadd.f32 %v15595_v49, %v15387_v45  ;;  %v8297_v2 = vld [vmem:[#allocation3 + $0x54] sm:$0xe] }
 0x3f3   : > { %v15657_v40 = vadd.f32 %v11618_v42, %v11617_v51  ;;  %v10917_v51 = vcombine.low %v8402_v12, %v8405_v35  ;;  %v8410_v42 = vrot.slane %v8408_v0, 4  ;;  %v10902_v17 = vrot.slane %v8294_v41, 9 }
 0x3f4   : > { %v11732_v24 = vpop.f32.mrb[220].mxu0  ;;  %v8415_v20 = vrot.slane %v15690_v33, 5  ;;  %v9580_v49 = vadd.f32 %v15603_v38, %v15387_v45  ;;  %v15726_v38 = vadd.f32 %v15545_v47, %v9556_v36 }
 0x3f5   : > { %v11733_v59 = vpop.f32.mrb[221].mxu0 }
 0x3f6   : > { %v15664_v31 = vadd.f32 %v11733_v59, %v11732_v24  ;;  %v11735_v53 = vpop.f32.mrb[222].mxu0  ;;  %v15683_v24 = vadd.f32 %v15465_v58, %v9540_v28  ;;  %v9559_v59 = vadd.f32 %v15557_v48, %v15387_v45  ;;  %v8411_v58 = vrot.slane %v8296_v22, 5 }
 0x3f7   : > { %v11736_v37 = vpop.f32.mrb[223].mxu0  ;;  %v11620_v56 = vpop.f32.mrb[156].mxu1  ;;  %v15704_v48 = vadd.f32 %v15519_v30, %v9551_v9  ;;  %v9588_v30 = vadd.f32 %v15619_v27, %v15387_v45  ;;  %v8299_v9 = vld [vmem:[#allocation3 + $0x5c] sm:$0x1]  ;;  %v9591_v27 = vadd.f32 %v15621_v14, %v15387_v45 }
 0x3f8   : > { %v15680_v61 = vadd.f32 %v11736_v37, %v11735_v53  ;;  %v11621_v16 = vpop.f32.mrb[157].mxu1  ;;  %10190 = vmatmul.mubr.bf16.gmra.mrb[252].mxu1 %v10917_v51  ;;  %v9564_v53 = vadd.f32 %v15574_v26, %v15387_v45  ;;  %v9575_v26 = vadd.f32 %v15599_v54, %v15387_v45  ;;  %v8412_v60 = vsel %vm13026_vm13, %v8410_v42, %v8411_v58  ;;  %v15717_v51 = vld [vmem:[#allocation3 + $0x64] sm:$0xf]  ;;  %v12478_v42 = vld [vmem:[%s12815_s30 + $0x28] sm:$0xf] }
 0x3f9   : > { %v11622_v23 = vadd.f32 %v11621_v16, %v11620_v56  ;;  %v11623_v35 = vpop.f32.mrb[158].mxu1  ;;  %10197 = vmatprep.mubr.bf16.mxu1 %v10934_v32  ;;  %v9583_v37 = vadd.f32 %v15609_v11, %v15387_v45  ;;  %v8409_v56 = vsel %vm13026_vm13, %v10902_v17, %v8408_v0  ;;  %v12479_v16 = vld [vmem:[%s12815_s30 + $0x2c] sm:$0xf]  ;;  %v15729_v11 = vadd.f32 %v15553_v15, %v9559_v59 }
 0x3fa   : > { %v11624_v28 = vpop.f32.mrb[159].mxu1  ;;  %v10935_v41 = vcombine.low %v12478_v42, %v12479_v16  ;;  %v10903_v58 = vrot.slane %v8297_v2, 9  ;;  %v9596_v0 = vadd.f32 %v15633_v39, %v15387_v45  ;;  %v8417_v17 = vrot.slane %v8415_v20, 4 }
 0x3fb   : > { %v11625_v12 = vadd.f32 %v11624_v28, %v11623_v35  ;;  %v10918_v35 = vcombine.low %v8409_v56, %v8412_v60  ;;  %v8422_v42 = vrot.slane %v15717_v51, 5  ;;  %v9599_v15 = vadd.f32 %v15635_v3, %v15387_v45 }
 0x3fc   : > { %v11738_v1 = vpop.f32.mrb[224].mxu0  ;;  %v15741_v14 = vadd.f32 %v15571_v18, %v9564_v53  ;;  %v15744_v60 = vadd.f32 %v15578_v13, %v9567_v57  ;;  %v9604_v39 = vadd.f32 %v15651_v50, %v15387_v45  ;;  %v9607_v2 = vadd.f32 %v15657_v40, %v15387_v45 }
 0x3fd   : > { %v11739_v32 = vpop.f32.mrb[225].mxu0  ;;  %v9612_v3 = vadd.f32 %v11622_v23, %v15387_v45  ;;  %v9615_v18 = vadd.f32 %v11625_v12, %v15387_v45  ;;  %v15756_v57 = vadd.f32 %v15597_v34, %v9575_v26  ;;  %v15759_v50 = vadd.f32 %v15601_v25, %v9580_v49  ;;  %v12481_v12 = vld [vmem:[%s12815_s30 + $0x34] sm:$0xf] }
 0x3fe   : > { %v15719_v54 = vadd.f32 %v11739_v32, %v11738_v1  ;;  %v11741_v22 = vpop.f32.mrb[226].mxu0  ;;  %v8418_v32 = vrot.slane %v8299_v9, 5  ;;  %v15764_v23 = vadd.f32 %v15607_v63, %v9583_v37  ;;  %v15770_v45 = vadd.f32 %v15617_v29, %v9591_v27 }
 0x3ff   : > { %v11742_v33 = vpop.f32.mrb[227].mxu0  ;;  %v11626_v28 = vpop.f32.mrb[160].mxu1  ;;  %v8416_v34 = vsel %vm13026_vm13, %v10903_v58, %v8415_v20  ;;  %v15779_v16 = vadd.f32 %v15625_v19, %v9596_v0  ;;  %v15782_v37 = vadd.f32 %v15631_v5, %v9599_v15  ;;  %v15788_v29 = vadd.f32 %v15645_v4, %v9607_v2  ;;  %v15803_v4 = vld [vmem:[%s16195_s4] ss:$0 sm:$0xff]  ;;  %v8304_v58 = vld [vmem:[#allocation3 + $0x70] sm:$0xf] }
 0x400   : > { %v15733_v1 = vadd.f32 %v11742_v33, %v11741_v22  ;;  %v11627_v47 = vpop.f32.mrb[161].mxu1  ;;  %10198 = vmatmul.mubr.bf16.gmra.mrb[0].mxu1 %v10918_v35  ;;  %v15752_v22 = vadd.f32 %v15593_v21, %v9572_v52  ;;  %v8419_v40 = vsel %vm13026_vm13, %v8417_v17, %v8418_v32  ;;  %v15767_v21 = vadd.f32 %v15615_v7, %v9588_v30  ;;  %v12480_v52 = vld [vmem:[%s12815_s30 + $0x30] sm:$0xf] }
 0x401   : > { %v11628_v36 = vadd.f32 %v11627_v47, %v11626_v28  ;;  %v11629_v59 = vpop.f32.mrb[162].mxu1  ;;  %10205 = vmatprep.mubr.bf16.mxu1 %v10935_v41  ;;  %v10936_v25 = vcombine.low %v12480_v52, %v12481_v12  ;;  %v15785_v7 = vadd.f32 %v15639_v62, %v9604_v39  ;;  %v15791_v20 = vadd.f32 %v15664_v31, %v9612_v3  ;;  %v8302_v41 = vld [vmem:[#allocation3 + $0x68] sm:$0x1]  ;;  %v8300_v62 = vld [vmem:[#allocation3 + $0x60] sm:$0xe] }
 0x402   : > { %v11630_v9 = vpop.f32.mrb[163].mxu1  ;;  %v10919_v30 = vcombine.low %v8416_v34, %v8419_v40  ;;  %v15796_v19 = vadd.f32 %v15680_v61, %v9615_v18  ;;  %v8424_v5 = vrot.slane %v8422_v42, 4  ;;  %v8425_v61 = vrot.slane %v8302_v41, 5  ;;  %v12483_v40 = vld [vmem:[%s12815_s30 + $0x38] sm:$0xf] }
 0x403   : > { %v11631_v53 = vadd.f32 %v11630_v9, %v11629_v59  ;;  %v9620_v31 = vadd.f32 %v15803_v4, %v11628_v36  ;;  %v10904_v15 = vrot.slane %v8300_v62, 9  ;;  %v8429_v39 = vrot.slane %v8304_v58, 5  ;;  %v8303_v41 = vld [vmem:[#allocation3 + $0x6c] sm:$0xe] }
 0x404   : > { %v11744_v13 = vpop.f32.mrb[228].mxu0  ;;  %v8426_v59 = vsel %vm13026_vm13, %v8424_v5, %v8425_v61  ;;  %v10905_v58 = vrot.slane %v8303_v41, 9 }
 0x405   : > { %v11745_v56 = vpop.f32.mrb[229].mxu0  ;;  %v9623_v3 = vadd.f32 %v15803_v4, %v11631_v53  ;;  %v15812_v18 = vadd.f32 %v15719_v54, %v9620_v31  ;;  %v8431_v53 = vrot.slane %v8429_v39, 4  ;;  %v8307_v54 = vld [vmem:[#allocation3 + $0x7c] sm:$0xf] }
 0x406   : > { %v15776_v26 = vadd.f32 %v11745_v56, %v11744_v13  ;;  %v11747_v49 = vpop.f32.mrb[230].mxu0  ;;  %v8423_v13 = vsel %vm13026_vm13, %v10904_v15, %v8422_v42  ;;  %v12484_v56 = vld [vmem:[%s12815_s30 + $0x3c] sm:$0xf] }
 0x407   : > { %v11748_v63 = vpop.f32.mrb[231].mxu0  ;;  %v11632_v33 = vpop.f32.mrb[164].mxu1  ;;  %v10937_v34 = vcombine.low %v12483_v40, %v12484_v56  ;;  %v10920_v12 = vcombine.low %v8423_v13, %v8426_v59  ;;  %v15823_v42 = vadd.f32 %v15733_v1, %v9623_v3  ;;  %v8430_v1 = vsel %vm13026_vm13, %v10905_v58, %v8429_v39  ;;  %v12486_v3 = vld [vmem:[%s12815_s30 + $0x44] sm:$0xf]  ;;  %v8308_v56 = vld [vmem:[#allocation3 + $0x80] sm:$0x1] }
 0x408   : > { %v15793_v27 = vadd.f32 %v11748_v63, %v11747_v49  ;;  %v11633_v35 = vpop.f32.mrb[165].mxu1  ;;  %10206 = vmatmul.mubr.bf16.gmra.mrb[4].mxu1 %v10919_v30 }
 0x409   : > { %v11634_v28 = vadd.f32 %v11633_v35, %v11632_v33  ;;  %v11635_v0 = vpop.f32.mrb[166].mxu1  ;;  %10213 = vmatprep.mubr.bf16.mxu1 %v10936_v25  ;;  %v8305_v25 = vld [vmem:[#allocation3 + $0x74] sm:$0x1] }
 0x40a   : > { %v11636_v17 = vpop.f32.mrb[167].mxu1  ;;  %v8432_v5 = vrot.slane %v8305_v25, 5 }
 0x40b   : > { %v11637_v32 = vadd.f32 %v11636_v17, %v11635_v0  ;;  %v9628_v61 = vadd.f32 %v15803_v4, %v11634_v28  ;;  %v8436_v17 = vrot.slane %v8307_v54, 5  ;;  %v8439_v54 = vrot.slane %v8308_v56, 5  ;;  %v8311_v56 = vld [vmem:[#allocation3 + $0x8c] sm:$0x1] }
 0x40c   : > { %v11750_v47 = vpop.f32.mrb[232].mxu0  ;;  %v8433_v0 = vsel %vm13026_vm13, %v8431_v53, %v8432_v5  ;;  %v8306_v53 = vld [vmem:[#allocation3 + $0x78] sm:$0xe] }
 0x40d   : > { %v11751_v2 = vpop.f32.mrb[233].mxu0  ;;  %v10921_v40 = vcombine.low %v8430_v1, %v8433_v0  ;;  %v8438_v28 = vrot.slane %v8436_v17, 4  ;;  %v12487_v1 = vld [vmem:[%s12815_s30 + $0x48] sm:$0xf] }
 0x40e   : > { %v15809_v9 = vadd.f32 %v11751_v2, %v11750_v47  ;;  %v11753_v36 = vpop.f32.mrb[234].mxu0  ;;  %v12485_v2 = vld [vmem:[%s12815_s30 + $0x40] sm:$0xf] }
 0x40f   : > { %v11754_v52 = vpop.f32.mrb[235].mxu0  ;;  %v11638_v49 = vpop.f32.mrb[168].mxu1 }
 0x410   : > { %v15820_v63 = vadd.f32 %v11754_v52, %v11753_v36  ;;  %v11639_v30 = vpop.f32.mrb[169].mxu1  ;;  %10214 = vmatmul.mubr.bf16.gmra.mrb[8].mxu1 %v10920_v12  ;;  %v10938_v36 = vcombine.low %v12485_v2, %v12486_v3  ;;  %v9631_v12 = vadd.f32 %v15803_v4, %v11637_v32  ;;  %v8440_v32 = vsel %vm13026_vm13, %v8438_v28, %v8439_v54  ;;  %v12488_v2 = vld [vmem:[%s12815_s30 + $0x4c] sm:$0xf] }
 0x411   : > { %v11640_v33 = vadd.f32 %v11639_v30, %v11638_v49  ;;  %v11641_v51 = vpop.f32.mrb[170].mxu1  ;;  %10221 = vmatprep.mubr.bf16.mxu1 %v10937_v34  ;;  %v15838_v49 = vadd.f32 %v15776_v26, %v9628_v61  ;;  %v8310_v30 = vld [vmem:[#allocation3 + $0x88] sm:$0xf]  ;;  %v10939_v3 = vcombine.low %v12487_v1, %v12488_v2 }
 0x412   : > { %v11642_v35 = vpop.f32.mrb[171].mxu1  ;;  %v8443_v58 = vrot.slane %v8310_v30, 5  ;;  %v15845_v0 = vadd.f32 %v15793_v27, %v9631_v12  ;;  %v8309_v12 = vld [vmem:[#allocation3 + $0x84] sm:$0xe] }
 0x413   : > { %v11643_v62 = vadd.f32 %v11642_v35, %v11641_v51 }
 0x414   : > { %v11756_v31 = vpop.f32.mrb[236].mxu0 }
 0x415   : > { %v11757_v47 = vpop.f32.mrb[237].mxu0 }
 0x416   : > { %v15828_v15 = vadd.f32 %v11757_v47, %v11756_v31  ;;  %v11759_v59 = vpop.f32.mrb[238].mxu0  ;;  %v10906_v31 = vrot.slane %v8306_v53, 9  ;;  %v8313_v53 = vld [vmem:[#allocation3 + $0x94] sm:$0xf] }
 0x417   : > { %v11760_v13 = vpop.f32.mrb[239].mxu0  ;;  %v11644_v34 = vpop.f32.mrb[172].mxu1 }
 0x418   : > { %v15834_v52 = vadd.f32 %v11760_v13, %v11759_v59  ;;  %v11645_v25 = vpop.f32.mrb[173].mxu1  ;;  %10222 = vmatmul.mubr.bf16.gmra.mrb[12].mxu1 %v10921_v40  ;;  %v8437_v59 = vsel %vm13026_vm13, %v10906_v31, %v8436_v17  ;;  %v9636_v40 = vadd.f32 %v15803_v4, %v11640_v33  ;;  %v8446_v17 = vrot.slane %v8311_v56, 5 }
 0x419   : > { %v11646_v39 = vadd.f32 %v11645_v25, %v11644_v34  ;;  %v11647_v41 = vpop.f32.mrb[174].mxu1  ;;  %10229 = vmatprep.mubr.bf16.mxu1 %v10938_v36  ;;  %v10922_v13 = vcombine.low %v8437_v59, %v8440_v32  ;;  %v8445_v25 = vrot.slane %v8443_v58, 4  ;;  %v8450_v59 = vrot.slane %v8313_v53, 5  ;;  %v8312_v53 = vld [vmem:[#allocation3 + $0x90] sm:$0xe] }
 0x41a   : > { %v11648_v51 = vpop.f32.mrb[175].mxu1  ;;  %v15861_v32 = vadd.f32 %v15809_v9, %v9636_v40 }
 0x41b   : > { %v15840_v5 = vadd.f32 %v11648_v51, %v11647_v41  ;;  %v9639_v51 = vadd.f32 %v15803_v4, %v11643_v62 }
 0x41c   : > { %v11890_v35 = vpop.f32.mrb[240].mxu0 }
 0x41d   : > { %v11891_v26 = vpop.f32.mrb[241].mxu0 }
 0x41e   : > { %v15847_v61 = vadd.f32 %v11891_v26, %v11890_v35  ;;  %v11893_v47 = vpop.f32.mrb[242].mxu0  ;;  %v10907_v26 = vrot.slane %v8309_v12, 9 }
 0x41f   : > { %v11894_v36 = vpop.f32.mrb[243].mxu0  ;;  %v11778_v34 = vpop.f32.mrb[176].mxu1 }
 0x420   : > { %v15854_v28 = vadd.f32 %v11894_v36, %v11893_v47  ;;  %v11779_v27 = vpop.f32.mrb[177].mxu1  ;;  %10230 = vmatmul.mubr.bf16.gmra.mrb[16].mxu1 %v10922_v13  ;;  %v8447_v47 = vsel %vm13026_vm13, %v8445_v25, %v8446_v17  ;;  %v12489_v36 = vld [vmem:[%s12815_s30 + $0x50] sm:$0xf]  ;;  %v12490_v13 = vld [vmem:[%s12815_s30 + $0x54] sm:$0xf]  ;;  %v15877_v25 = vadd.f32 %v15820_v63, %v9639_v51 }
 0x421   : > { %v11780_v30 = vadd.f32 %v11779_v27, %v11778_v34  ;;  %v11781_v41 = vpop.f32.mrb[178].mxu1  ;;  %10237 = vmatprep.mubr.bf16.mxu1 %v10939_v3  ;;  %v10940_v56 = vcombine.low %v12489_v36, %v12490_v13  ;;  %v8314_v34 = vld [vmem:[#allocation3 + $0x98] sm:$0x1]  ;;  %v8316_v17 = vld [vmem:[#allocation3 + $0xa0] sm:$0xf] }
 0x422   : > { %v11782_v54 = vpop.f32.mrb[179].mxu1 }
 0x423   : > { %v15858_v33 = vadd.f32 %v11780_v30, %v15413_v55  ;;  %v11783_v35 = vadd.f32 %v11782_v54, %v11781_v41  ;;  %v8444_v55 = vsel %vm13026_vm13, %v10907_v26, %v8443_v58  ;;  %v8452_v30 = vrot.slane %v8450_v59, 4 }
 0x424   : > { %v11896_v31 = vpop.f32.mrb[244].mxu0  ;;  %v10923_v40 = vcombine.low %v8444_v55, %v8447_v47  ;;  %v10908_v26 = vrot.slane %v8312_v53, 9  ;;  %v8317_v53 = vld [vmem:[#allocation3 + $0xa4] sm:$0x1] }
 0x425   : > { %v11897_v1 = vpop.f32.mrb[245].mxu0  ;;  %v15866_v2 = vadd.f32 %v11783_v35, %v15415_v43  ;;  %v9644_v43 = vadd.f32 %v15803_v4, %v11646_v39  ;;  %v8453_v35 = vrot.slane %v8314_v34, 5  ;;  %v9647_v39 = vadd.f32 %v15803_v4, %v15840_v5  ;;  %v12492_v34 = vld [vmem:[%s12815_s30 + $0x5c] sm:$0xf] }
 0x426   : > { %v15868_v3 = vadd.f32 %v11897_v1, %v11896_v31  ;;  %v11899_v62 = vpop.f32.mrb[246].mxu0 }
 0x427   : > { %v11900_v9 = vpop.f32.mrb[247].mxu0  ;;  %v11784_v27 = vpop.f32.mrb[180].mxu1  ;;  %v8454_v1 = vsel %vm13026_vm13, %v8452_v30, %v8453_v35  ;;  %v15888_v36 = vadd.f32 %v15828_v15, %v9644_v43 }
 0x428   : > { %v15874_v12 = vadd.f32 %v11900_v9, %v11899_v62  ;;  %v11785_v41 = vpop.f32.mrb[181].mxu1  ;;  %10238 = vmatmul.mubr.bf16.gmra.mrb[20].mxu1 %v10923_v40  ;;  %v8457_v62 = vrot.slane %v8316_v17, 5  ;;  %v8451_v9 = vsel %vm13026_vm13, %v10908_v26, %v8450_v59  ;;  %v12491_v40 = vld [vmem:[%s12815_s30 + $0x58] sm:$0xf]  ;;  %v8315_v17 = vld [vmem:[#allocation3 + $0x9c] sm:$0xe] }
 0x429   : > { %v11786_v58 = vadd.f32 %v11785_v41, %v11784_v27  ;;  %v11787_v54 = vpop.f32.mrb[182].mxu1  ;;  %10245 = vmatprep.mubr.bf16.mxu1 %v10940_v56  ;;  %v10941_v4 = vcombine.low %v12491_v40, %v12492_v34  ;;  %v10924_v27 = vcombine.low %v8451_v9, %v8454_v1  ;;  %v8460_v59 = vrot.slane %v8317_v53, 5 }
 0x42a   : > { %v11788_v31 = vpop.f32.mrb[183].mxu1  ;;  %v8459_v15 = vrot.slane %v8457_v62, 4  ;;  %v10909_v1 = vrot.slane %v8315_v17, 9  ;;  %v15916_v34 = vadd.f32 %v15847_v61, %v15858_v33 }
 0x42b   : > { %v15881_v47 = vadd.f32 %v11786_v58, %v15667_v44  ;;  %v11789_v63 = vadd.f32 %v11788_v31, %v11787_v54  ;;  %v8319_v58 = vld [vmem:[#allocation3 + $0xac] sm:$0xf] }
 0x42c   : > { %v11902_v51 = vpop.f32.mrb[248].mxu0 }
 0x42d   : > { %v11903_v55 = vpop.f32.mrb[249].mxu0  ;;  %v15891_v13 = vadd.f32 %v11789_v63, %v15676_v46  ;;  %v15902_v46 = vadd.f32 %v15834_v52, %v9647_v39  ;;  %v8461_v52 = vsel %vm13026_vm13, %v8459_v15, %v8460_v59  ;;  %v8464_v39 = vrot.slane %v8319_v58, 5  ;;  %v8320_v15 = vld [vmem:[#allocation3 + $0xb0] sm:$0x1] }
 0x42e   : > { %v15893_v56 = vadd.f32 %v11903_v55, %v11902_v51  ;;  %v11905_v44 = vpop.f32.mrb[250].mxu0  ;;  %v8467_v33 = vrot.slane %v8320_v15, 5 }
 0x42f   : > { %v11906_v5 = vpop.f32.mrb[251].mxu0  ;;  %v11790_v30 = vpop.f32.mrb[184].mxu1 }
 0x430   : > { %v15899_v41 = vadd.f32 %v11906_v5, %v11905_v44  ;;  %v11791_v43 = vpop.f32.mrb[185].mxu1  ;;  %10246 = vmatmul.mubr.bf16.gmra.mrb[24].mxu1 %v10924_v27  ;;  %v12494_v5 = vld [vmem:[%s12815_s30 + $0x64] sm:$0xf] }
 0x431   : > { %v11792_v54 = vadd.f32 %v11791_v43, %v11790_v30  ;;  %v11793_v35 = vpop.f32.mrb[186].mxu1  ;;  %10253 = vmatprep.mubr.bf16.mxu1 %v10941_v4  ;;  %v12493_v4 = vld [vmem:[%s12815_s30 + $0x60] sm:$0xf] }
 0x432   : > { %v11794_v31 = vpop.f32.mrb[187].mxu1  ;;  %v10942_v27 = vcombine.low %v12493_v4, %v12494_v5 }
 0x433   : > { %v15905_v26 = vadd.f32 %v11792_v54, %v15683_v24  ;;  %v11795_v63 = vadd.f32 %v11794_v31, %v11793_v35  ;;  %v8458_v24 = vsel %vm13026_vm13, %v10909_v1, %v8457_v62  ;;  %v8318_v54 = vld [vmem:[#allocation3 + $0xa8] sm:$0xe]  ;;  %v8322_v35 = vld [vmem:[#allocation3 + $0xb8] sm:$0xf] }
 0x434   : > { %v11908_v51 = vpop.f32.mrb[252].mxu0  ;;  %v10925_v30 = vcombine.low %v8458_v24, %v8461_v52  ;;  %v10910_v1 = vrot.slane %v8318_v54, 9  ;;  %v15931_v24 = vadd.f32 %v15854_v28, %v15866_v2  ;;  %v8323_v28 = vld [vmem:[#allocation3 + $0xbc] sm:$0x1] }
 0x435   : > { %v11909_v55 = vpop.f32.mrb[253].mxu0  ;;  %v15910_v44 = vadd.f32 %v11795_v63, %v15686_v6  ;;  %v8466_v6 = vrot.slane %v8464_v39, 4 }
 0x436   : > { %v15912_v9 = vadd.f32 %v11909_v55, %v11908_v51  ;;  %v11911_v40 = vpop.f32.mrb[254].mxu0  ;;  %v8471_v55 = vrot.slane %v8322_v35, 5 }
 0x437   : > { %v11912_v53 = vpop.f32.mrb[255].mxu0  ;;  %v11796_v43 = vpop.f32.mrb[188].mxu1  ;;  %v8468_v52 = vsel %vm13026_vm13, %v8466_v6, %v8467_v33  ;;  %v15944_v6 = vadd.f32 %v15868_v3, %v15881_v47 }
 0x438   : > { %v15922_v17 = vadd.f32 %v11912_v53, %v11911_v40  ;;  %v11797_v58 = vpop.f32.mrb[189].mxu1  ;;  %10254 = vmatmul.mubr.bf16.gmra.mrb[28].mxu1 %v10925_v30  ;;  %v12495_v53 = vld [vmem:[%s12815_s30 + $0x68] sm:$0xf]  ;;  %v12496_v30 = vld [vmem:[%s12815_s30 + $0x6c] sm:$0xf] }
 0x439   : > { %v11798_v59 = vadd.f32 %v11797_v58, %v11796_v43  ;;  %v11799_v61 = vpop.f32.mrb[190].mxu1  ;;  %10261 = vmatprep.mubr.bf16.mxu1 %v10942_v27  ;;  %v10943_v15 = vcombine.low %v12495_v53, %v12496_v30 }
 0x43a   : > { %v11800_v62 = vpop.f32.mrb[191].mxu1 }
 0x43b   : > { %v15925_v31 = vadd.f32 %v11798_v59, %v15697_v10  ;;  %v11801_v63 = vadd.f32 %v11800_v62, %v11799_v61  ;;  %v8465_v10 = vsel %vm13026_vm13, %v10910_v1, %v8464_v39  ;;  %v8321_v59 = vld [vmem:[#allocation3 + $0xb4] sm:$0xe]  ;;  %v8325_v61 = vld [vmem:[#allocation3 + $0xc4] sm:$0xf]  ;;  %v8474_v62 = vrot.slane %v8323_v28, 5 }
 0x43c   : > { %v11914_v51 = vpop.f32.mrb[0].mxu0  ;;  %v10926_v58 = vcombine.low %v8465_v10, %v8468_v52  ;;  %v10911_v1 = vrot.slane %v8321_v59, 9  ;;  %v15955_v10 = vadd.f32 %v15874_v12, %v15891_v13  ;;  %v8326_v12 = vld [vmem:[#allocation3 + $0xc8] sm:$0x1]  ;;  %v8328_v13 = vld [vmem:[#allocation3 + $0xd0] sm:$0xf] }
 0x43d   : > { %v11915_v40 = vpop.f32.mrb[1].mxu0  ;;  %v15934_v4 = vadd.f32 %v11801_v63, %v15704_v48  ;;  %v8473_v48 = vrot.slane %v8471_v55, 4 }
 0x43e   : > { %v15936_v5 = vadd.f32 %v11915_v40, %v11914_v51  ;;  %v11917_v27 = vpop.f32.mrb[2].mxu0  ;;  %v8478_v40 = vrot.slane %v8325_v61, 5  ;;  %v8324_v61 = vld [vmem:[#allocation3 + $0xc0] sm:$0xe] }
 0x43f   : > { %v11918_v43 = vpop.f32.mrb[3].mxu0  ;;  %v11802_v2 = vpop.f32.mrb[192].mxu1  ;;  %v8475_v52 = vsel %vm13026_vm13, %v8473_v48, %v8474_v62  ;;  %v15968_v48 = vadd.f32 %v15893_v56, %v15905_v26  ;;  %v10912_v56 = vrot.slane %v8324_v61, 9  ;;  %v8327_v26 = vld [vmem:[#allocation3 + $0xcc] sm:$0xe] }
 0x440   : > { %v15946_v54 = vadd.f32 %v11918_v43, %v11917_v27  ;;  %v11803_v35 = vpop.f32.mrb[193].mxu1  ;;  %10262 = vmatmul.mubr.bf16.gmra.mrb[32].mxu1 %v10926_v58  ;;  %v12497_v43 = vld [vmem:[%s12815_s30 + $0x70] sm:$0xf]  ;;  %v12498_v58 = vld [vmem:[%s12815_s30 + $0x74] sm:$0xf]  ;;  %v10913_v61 = vrot.slane %v8327_v26, 9 }
 0x441   : > { %v11804_v33 = vadd.f32 %v11803_v35, %v11802_v2  ;;  %v11805_v39 = vpop.f32.mrb[194].mxu1  ;;  %10269 = vmatprep.mubr.bf16.mxu1 %v10943_v15  ;;  %v10944_v28 = vcombine.low %v12497_v43, %v12498_v58  ;;  %v15977_v58 = vadd.f32 %v15899_v41, %v15910_v44 }
 0x442   : > { %v11806_v63 = vpop.f32.mrb[195].mxu1 }
 0x443   : > { %v15949_v3 = vadd.f32 %v11804_v33, %v15726_v38  ;;  %v11807_v47 = vadd.f32 %v11806_v63, %v11805_v39  ;;  %v8472_v38 = vsel %vm13026_vm13, %v10911_v1, %v8471_v55  ;;  %v8480_v33 = vrot.slane %v8478_v40, 4  ;;  %v8329_v1 = vld [vmem:[#allocation3 + $0xd4] sm:$0x1] }
 0x444   : > { %v11920_v51 = vpop.f32.mrb[4].mxu0  ;;  %v10927_v35 = vcombine.low %v8472_v38, %v8475_v52  ;;  %v8481_v63 = vrot.slane %v8326_v12, 5 }
 0x445   : > { %v11921_v27 = vpop.f32.mrb[5].mxu0  ;;  %v15958_v53 = vadd.f32 %v11807_v47, %v15729_v11  ;;  %v8485_v47 = vrot.slane %v8328_v13, 5  ;;  %v16000_v8 = vadd.f32 %v15936_v5, %v15949_v3 }
 0x446   : > { %v15960_v30 = vadd.f32 %v11921_v27, %v11920_v51  ;;  %v11923_v15 = vpop.f32.mrb[6].mxu0  ;;  %v8482_v38 = vsel %vm13026_vm13, %v8480_v33, %v8481_v63  ;;  %v15986_v33 = vadd.f32 %v15912_v9, %v15925_v31 }
 0x447   : > { %v11924_v2 = vpop.f32.mrb[7].mxu0  ;;  %v11808_v59 = vpop.f32.mrb[196].mxu1 }
 0x448   : > { %v15970_v11 = vadd.f32 %v11924_v2, %v11923_v15  ;;  %v11809_v39 = vpop.f32.mrb[197].mxu1  ;;  %10270 = vmatmul.mubr.bf16.gmra.mrb[36].mxu1 %v10927_v35  ;;  %v12499_v2 = vld [vmem:[%s12815_s30 + $0x78] sm:$0xf]  ;;  %v12500_v35 = vld [vmem:[%s12815_s30 + $0x7c] sm:$0xf]  ;;  %s215_s30 = sand.u32 1, %s12555_s19  }
 0x449   : > { %v11810_v62 = vadd.f32 %v11809_v39, %v11808_v59  ;;  %v11811_v55 = vpop.f32.mrb[198].mxu1  ;;  %10277 = vmatprep.mubr.bf16.mxu1 %v10944_v28  ;;  %v8479_v28 = vsel %vm13026_vm13, %v10912_v56, %v8478_v40  ;;  %v10945_v12 = vcombine.low %v12499_v2, %v12500_v35  ;;  %v8487_v39 = vrot.slane %v8485_v47, 4  ;;  %s10438_s23 = sshll.u32 %s215_s30, 8  ;;  %s16150_s10 = scalar_lea.sflag [#allocation6], %s215_s30 }
 0x44a   : > { %v11812_v51 = vpop.f32.mrb[199].mxu1  ;;  %v10928_v41 = vcombine.low %v8479_v28, %v8482_v38  ;;  %v15995_v38 = vadd.f32 %v15922_v17, %v15934_v4  ;;  %s16075_s25 = scalar_lea.vmem [#allocation5], %s10438_s23 }
 0x44b   : > { %v9886_v52 = vadd.f32 %v11810_v62, %v15741_v14  ;;  %v11813_v27 = vadd.f32 %v11812_v51, %v11811_v55  ;;  %v8488_v62 = vrot.slane %v8329_v1, 5  ;;  %s10372_s6 = sshll.u32 %s16075_s25, 4  ;;  %s16144_s6 = int_to_ptr.vmem [resolvable:$true] %s10372_s6 }
 0x44c   : > { %v11926_v15 = vpop.f32.mrb[8].mxu0  ;;  %s12501_s22 = scalar_lea.vmem %s16144_s6, 4096  ;;  %p12508_p0 = scmp.lt.s32.totalorder %s16144_s6, %s12506_s12 }
 0x44d   : > { %v11927_v43 = vpop.f32.mrb[9].mxu0  ;;  %v9889_v13 = vadd.f32 %v11813_v27, %v15744_v60  ;;  %v8486_v60 = vsel %vm13026_vm13, %v10913_v61, %v8485_v47  ;;  %v8489_v26 = vsel %vm13026_vm13, %v8487_v39, %v8488_v62  ;;  %p12502_p11 = scmp.ne.s32.totalorder %s16144_s6, %s12501_s22  ;;  %p12509_p1 = scmp.lt.s32.totalorder %s12507_s13, %s12501_s22 }
 0x44e   : > { %v11928_v59 = vadd.f32 %v11927_v43, %v11926_v15  ;;  %v11929_v14 = vpop.f32.mrb[10].mxu0  ;;  %v10929_v43 = vcombine.low %v8486_v60, %v8489_v26 }
 0x44f   : > { %v11930_v55 = vpop.f32.mrb[11].mxu0  ;;  %v11814_v44 = vpop.f32.mrb[200].mxu1  ;;  %p12503_p12 = pnand %p12502_p11, %p12637_p5  ;;  %p12510_p2 = por %p12509_p1, %p12508_p0 }
 0x450   : > { %v11931_v63 = vadd.f32 %v11930_v55, %v11929_v14  ;;  %v11815_v51 = vpop.f32.mrb[201].mxu1  ;;  %10278 = vmatmul.mubr.bf16.gmra.mrb[40].mxu1 %v10928_v41 }
 0x451   : > { %v11816_v40 = vadd.f32 %v11815_v51, %v11814_v44  ;;  %v11817_v56 = vpop.f32.mrb[202].mxu1  ;;  %10285 = vmatprep.mubr.bf16.mxu1 %v10945_v12  ;;  %p12504_p13 = pneg %p12503_p12 }
 0x452   : > { %v11818_v1 = vpop.f32.mrb[203].mxu1 }
 0x453   : > { %v9894_v27 = vadd.f32 %v11816_v40, %v15752_v22  ;;  %v11819_v15 = vadd.f32 %v11818_v1, %v11817_v56  ;;  %v16009_v40 = vadd.f32 %v15960_v30, %v9886_v52  ;;  %p12511_p3 = pnand %p12510_p2, %p12504_p13 }
 0x454   : > { %v11932_v9 = vpop.f32.mrb[12].mxu0 }
 0x455   : > { %v11933_v31 = vpop.f32.mrb[13].mxu0  ;;  %v9897_v28 = vadd.f32 %v11819_v15, %v15756_v57  ;;  %v16005_v57 = vadd.f32 %v15946_v54, %v15958_v53  ;;  %v16013_v54 = vadd.f32 %v15970_v11, %v9889_v13  ;;  %v16016_v30 = vadd.f32 %v11928_v59, %v9894_v27 }
 0x456   : > { %v11934_v2 = vadd.f32 %v11933_v31, %v11932_v9  ;;  %v11935_v35 = vpop.f32.mrb[14].mxu0 }
 0x457   : > { %v11936_v12 = vpop.f32.mrb[15].mxu0  ;;  %v11820_v47 = vpop.f32.mrb[204].mxu1 }
 0x458   : > { %v11937_v14 = vadd.f32 %v11936_v12, %v11935_v35  ;;  %v11821_v22 = vpop.f32.mrb[205].mxu1  ;;  %10286 = vmatmul.mubr.bf16.gmra.mrb[44].mxu1 %v10929_v43 }
 0x459   : > { %v11822_v61 = vadd.f32 %v11821_v22, %v11820_v47  ;;  %v11823_v39 = vpop.f32.mrb[206].mxu1 }
 0x45a   : > { %v11824_v62 = vpop.f32.mrb[207].mxu1 }
 0x45b   : > { %v9902_v17 = vadd.f32 %v11822_v61, %v15759_v50  ;;  %v11825_v4 = vadd.f32 %v11824_v62, %v11823_v39 }
 0x45c   : > { %v11938_v55 = vpop.f32.mrb[16].mxu0 }
 0x45d   : > { %v11939_v41 = vpop.f32.mrb[17].mxu0  ;;  %v9905_v44 = vadd.f32 %v11825_v4, %v15764_v23  ;;  %v16018_v4 = vadd.f32 %v11931_v63, %v9897_v28 }
 0x45e   : > { %v11940_v5 = vadd.f32 %v11939_v41, %v11938_v55  ;;  %v11941_v3 = vpop.f32.mrb[18].mxu0  ;;  %v16021_v41 = vadd.f32 %v11934_v2, %v9902_v17 }
 0x45f   : > { %v11942_v51 = vpop.f32.mrb[19].mxu0 }
 0x460   : > { %v11826_v56 = vpop.f32.mrb[208].mxu1  ;;  %v11943_v60 = vadd.f32 %v11942_v51, %v11941_v3 }
 0x461   : > { %v11827_v26 = vpop.f32.mrb[209].mxu1 }
 0x462   : > { %v11828_v1 = vadd.f32 %v11827_v26, %v11826_v56  ;;  %v11829_v50 = vpop.f32.mrb[210].mxu1  ;;  %v16024_v26 = vadd.f32 %v11937_v14, %v9905_v44 }
 0x463   : > { %v11830_v15 = vpop.f32.mrb[211].mxu1 }
 0x464   : > { %v9910_v9 = vadd.f32 %v11828_v1, %v15767_v21  ;;  %v11831_v31 = vadd.f32 %v11830_v15, %v11829_v50  ;;  %v11944_v43 = vpop.f32.mrb[20].mxu0 }
 0x465   : > { %v11945_v53 = vpop.f32.mrb[21].mxu0 }
 0x466   : > { %v9913_v23 = vadd.f32 %v11831_v31, %v15770_v45  ;;  %v11946_v35 = vadd.f32 %v11945_v53, %v11944_v43  ;;  %v11947_v12 = vpop.f32.mrb[22].mxu0  ;;  %v16026_v63 = vadd.f32 %v11940_v5, %v9910_v9 }
 0x467   : > { %v11948_v52 = vpop.f32.mrb[23].mxu0 }
 0x468   : > { %v11949_v47 = vadd.f32 %v11948_v52, %v11947_v12  ;;  %v16030_v14 = vadd.f32 %v11943_v60, %v9913_v23 }
 0x46a   : > { %v11832_v22 = vpop.f32.mrb[212].mxu1 }
 0x46b   : > { %v11833_v61 = vpop.f32.mrb[213].mxu1 }
 0x46c   : > { %v11834_v39 = vadd.f32 %v11833_v61, %v11832_v22  ;;  %v11835_v62 = vpop.f32.mrb[214].mxu1 }
 0x46d   : > { %v11836_v21 = vpop.f32.mrb[215].mxu1 }
 0x46e   : > { %v9918_v55 = vadd.f32 %v11834_v39, %v15779_v16  ;;  %v11837_v11 = vadd.f32 %v11836_v21, %v11835_v62  ;;  %v11950_v13 = vpop.f32.mrb[24].mxu0 }
 0x46f   : > { %v11951_v45 = vpop.f32.mrb[25].mxu0 }
 0x470   : > { %v9921_v3 = vadd.f32 %v11837_v11, %v15782_v37  ;;  %v11952_v59 = vadd.f32 %v11951_v45, %v11950_v13  ;;  %v11953_v27 = vpop.f32.mrb[26].mxu0  ;;  %v16032_v44 = vadd.f32 %v11946_v35, %v9918_v55 }
 0x471   : > { %v11954_v51 = vpop.f32.mrb[27].mxu0 }
 0x472   : > { %v11955_v56 = vadd.f32 %v11954_v51, %v11953_v27  ;;  %v16035_v13 = vadd.f32 %v11949_v47, %v9921_v3 }
 0x475   : > { %v11838_v1 = vpop.f32.mrb[216].mxu1 }
 0x476   : > { %v11839_v50 = vpop.f32.mrb[217].mxu1 }
 0x477   : > { %v11840_v28 = vadd.f32 %v11839_v50, %v11838_v1  ;;  %v11841_v15 = vpop.f32.mrb[218].mxu1 }
 0x478   : > { %v11842_v16 = vpop.f32.mrb[219].mxu1  ;;  %v11956_v31 = vpop.f32.mrb[28].mxu0 }
 0x479   : > { %v9926_v2 = vadd.f32 %v11840_v28, %v15785_v7  ;;  %v11843_v17 = vadd.f32 %v11842_v16, %v11841_v15  ;;  %v11957_v43 = vpop.f32.mrb[29].mxu0 }
 0x47a   : > { %v11958_v53 = vadd.f32 %v11957_v43, %v11956_v31  ;;  %v11959_v37 = vpop.f32.mrb[30].mxu0 }
 0x47b   : > { %v9929_v12 = vadd.f32 %v11843_v17, %v15788_v29  ;;  %v11960_v52 = vpop.f32.mrb[31].mxu0  ;;  %v16038_v60 = vadd.f32 %v11952_v59, %v9926_v2 }
 0x47c   : > { %v11961_v22 = vadd.f32 %v11960_v52, %v11959_v37 }
 0x47d   : > { %v16040_v55 = vadd.f32 %v11955_v56, %v9929_v12 }
 0x481   : > { %v11844_v5 = vpop.f32.mrb[220].mxu1 }
 0x482   : > { %v11845_v9 = vpop.f32.mrb[221].mxu1 }
 0x483   : > { %v11846_v61 = vadd.f32 %v11845_v9, %v11844_v5  ;;  %v11847_v39 = vpop.f32.mrb[222].mxu1 }
 0x484   : > { %v11848_v62 = vpop.f32.mrb[223].mxu1  ;;  %v11962_v11 = vpop.f32.mrb[32].mxu0 }
 0x485   : > { %v9934_v21 = vadd.f32 %v11846_v61, %v15791_v20  ;;  %v11849_v7 = vadd.f32 %v11848_v62, %v11847_v39  ;;  %v11963_v45 = vpop.f32.mrb[33].mxu0 }
 0x486   : > { %v11964_v27 = vadd.f32 %v11963_v45, %v11962_v11  ;;  %v11965_v51 = vpop.f32.mrb[34].mxu0 }
 0x487   : > { %v9937_v29 = vadd.f32 %v11849_v7, %v15796_v19  ;;  %v11966_v23 = vpop.f32.mrb[35].mxu0  ;;  %v16042_v28 = vadd.f32 %v11958_v53, %v9934_v21 }
 0x488   : > { %v11967_v35 = vadd.f32 %v11966_v23, %v11965_v51 }
 0x489   : > { %v16046_v56 = vadd.f32 %v11961_v22, %v9937_v29 }
 0x48d   : > { %v11850_v1 = vpop.f32.mrb[224].mxu1 }
 0x48e   : > { %v11851_v50 = vpop.f32.mrb[225].mxu1 }
 0x48f   : > { %v11852_v20 = vadd.f32 %v11851_v50, %v11850_v1  ;;  %v11853_v15 = vpop.f32.mrb[226].mxu1  ;;  %v11968_v16 = vpop.f32.mrb[36].mxu0 }
 0x490   : > { %v11854_v47 = vpop.f32.mrb[227].mxu1  ;;  %v11969_v3 = vpop.f32.mrb[37].mxu0 }
 0x491   : > { %v9942_v31 = vadd.f32 %v11852_v20, %v15812_v18  ;;  %v11855_v19 = vadd.f32 %v11854_v47, %v11853_v15  ;;  %v11970_v17 = vadd.f32 %v11969_v3, %v11968_v16  ;;  %v11971_v43 = vpop.f32.mrb[38].mxu0 }
 0x492   : > { %v11972_v59 = vpop.f32.mrb[39].mxu0 }
 0x493   : > { %v9945_v2 = vadd.f32 %v11855_v19, %v15823_v42  ;;  %v11973_v37 = vadd.f32 %v11972_v59, %v11971_v43  ;;  %v16048_v12 = vadd.f32 %v11964_v27, %v9942_v31 }
 0x495   : > { %v16051_v21 = vadd.f32 %v11967_v35, %v9945_v2 }
 0x498   : > { %v11856_v53 = vpop.f32.mrb[228].mxu1 }
 0x499   : > { %v11857_v52 = vpop.f32.mrb[229].mxu1 }
 0x49a   : > { %v11858_v5 = vadd.f32 %v11857_v52, %v11856_v53  ;;  %v11859_v9 = vpop.f32.mrb[230].mxu1 }
 0x49b   : > { %v11860_v61 = vpop.f32.mrb[231].mxu1  ;;  %v11974_v18 = vpop.f32.mrb[40].mxu0 }
 0x49c   : > { %v9950_v39 = vadd.f32 %v11858_v5, %v15838_v49  ;;  %v11861_v62 = vadd.f32 %v11860_v61, %v11859_v9  ;;  %v11975_v7 = vpop.f32.mrb[41].mxu0 }
 0x49d   : > { %v11976_v42 = vadd.f32 %v11975_v7, %v11974_v18  ;;  %v11977_v45 = vpop.f32.mrb[42].mxu0 }
 0x49e   : > { %v9953_v11 = vadd.f32 %v11861_v62, %v15845_v0  ;;  %v16054_v22 = vadd.f32 %v11970_v17, %v9950_v39  ;;  %v11978_v29 = vpop.f32.mrb[43].mxu0 }
 0x49f   : > { %v11979_v27 = vadd.f32 %v11978_v29, %v11977_v45 }
 0x4a0   : > { %v16056_v1 = vadd.f32 %v11973_v37, %v9953_v11 }
 0x4a3   : > { %v11862_v51 = vpop.f32.mrb[232].mxu1 }
 0x4a4   : > { %v11863_v23 = vpop.f32.mrb[233].mxu1 }
 0x4a5   : > { %v11864_v50 = vadd.f32 %v11863_v23, %v11862_v51  ;;  %v11865_v20 = vpop.f32.mrb[234].mxu1 }
 0x4a6   : > { %v11866_v49 = vpop.f32.mrb[235].mxu1 }
 0x4a7   : > { %v9958_v15 = vadd.f32 %v11864_v50, %v15861_v32  ;;  %v11867_v35 = vadd.f32 %v11866_v49, %v11865_v20 }
 0x4a9   : > { %v9961_v16 = vadd.f32 %v11867_v35, %v15877_v25  ;;  %v16060_v47 = vadd.f32 %v11976_v42, %v9958_v15 }
 0x4ab   : > { %v11868_v0 = vpop.f32.mrb[236].mxu1  ;;  %v16062_v3 = vadd.f32 %v11979_v27, %v9961_v16 }
 0x4ac   : > { %v11869_v31 = vpop.f32.mrb[237].mxu1 }
 0x4ad   : > { %v11870_v19 = vadd.f32 %v11869_v31, %v11868_v0  ;;  %v11871_v17 = vpop.f32.mrb[238].mxu1  ;;  %v11980_v43 = vpop.f32.mrb[44].mxu0 }
 0x4ae   : > { %v11872_v59 = vpop.f32.mrb[239].mxu1  ;;  %v11981_v53 = vpop.f32.mrb[45].mxu0 }
 0x4af   : > { %v9966_v2 = vadd.f32 %v11870_v19, %v15888_v36  ;;  %v11873_v37 = vadd.f32 %v11872_v59, %v11871_v17  ;;  %v11982_v32 = vadd.f32 %v11981_v53, %v11980_v43  ;;  %v11983_v52 = vpop.f32.mrb[46].mxu0 }
 0x4b0   : > { %v11984_v5 = vpop.f32.mrb[47].mxu0 }
 0x4b1   : > { %v9969_v25 = vadd.f32 %v11873_v37, %v15902_v46  ;;  %v16066_v9 = vadd.f32 %v11982_v32, %v9966_v2  ;;  %v11985_v61 = vadd.f32 %v11984_v5, %v11983_v52 }
 0x4b3   : > { %v12002_v39 = vpop.f32.mrb[240].mxu1  ;;  %v16069_v62 = vadd.f32 %v11985_v61, %v9969_v25 }
 0x4b4   : > { %v12003_v18 = vpop.f32.mrb[241].mxu1 }
 0x4b5   : > { %v12004_v7 = vadd.f32 %v12003_v18, %v12002_v39  ;;  %v12005_v11 = vpop.f32.mrb[242].mxu1 }
 0x4b6   : > { %v12006_v36 = vpop.f32.mrb[243].mxu1 }
 0x4b7   : > { %v10168_v42 = vadd.f32 %v12004_v7, %v15916_v34  ;;  %v12007_v45 = vadd.f32 %v12006_v36, %v12005_v11 }
 0x4b9   : > { %v10294_v29 = vmax.f32 %v10168_v42, 0.0  ;;  %v10171_v46 = vadd.f32 %v12007_v45, %v15931_v24 }
 0x4bb   : > { %10326 = vst [vmem:[%s16075_s25] sm:$0xff] %v10294_v29  ;;  %v10295_v27 = vmax.f32 %v10171_v46, 0.0  ;;  %v12008_v51 = vpop.f32.mrb[244].mxu1 }
 0x4bc   : > { %v12009_v23 = vpop.f32.mrb[245].mxu1 }
 0x4bd   : > { %10327 = vst [vmem:[%s16075_s25 + $0x8] sm:$0xff] %v10295_v27  ;;  %v12010_v50 = vadd.f32 %v12009_v23, %v12008_v51  ;;  %v12011_v20 = vpop.f32.mrb[246].mxu1 }
 0x4be   : > { %v12012_v49 = vpop.f32.mrb[247].mxu1 }
 0x4bf   : > { %v10176_v34 = vadd.f32 %v12010_v50, %v15944_v6  ;;  %v12013_v15 = vadd.f32 %v12012_v49, %v12011_v20 }
 0x4c1   : > { %v10296_v35 = vmax.f32 %v10176_v34, 0.0  ;;  %v10179_v24 = vadd.f32 %v12013_v15, %v15955_v10 }
 0x4c3   : > { %10328 = vst [vmem:[%s16075_s25 + $0x10] sm:$0xff] %v10296_v35  ;;  %v10297_v16 = vmax.f32 %v10179_v24, 0.0  ;;  %v12014_v0 = vpop.f32.mrb[248].mxu1 }
 0x4c4   : > { %v12015_v31 = vpop.f32.mrb[249].mxu1 }
 0x4c5   : > { %10329 = vst [vmem:[%s16075_s25 + $0x18] sm:$0xff] %v10297_v16  ;;  %v12016_v19 = vadd.f32 %v12015_v31, %v12014_v0  ;;  %v12017_v17 = vpop.f32.mrb[250].mxu1 }
 0x4c6   : > { %v12018_v43 = vpop.f32.mrb[251].mxu1 }
 0x4c7   : > { %v10184_v59 = vadd.f32 %v12016_v19, %v15968_v48  ;;  %v12019_v2 = vadd.f32 %v12018_v43, %v12017_v17 }
 0x4c9   : > { %v10298_v37 = vmax.f32 %v10184_v59, 0.0  ;;  %v10187_v6 = vadd.f32 %v12019_v2, %v15977_v58 }
 0x4cb   : > { %10330 = vst [vmem:[%s16075_s25 + $0x20] sm:$0xff] %v10298_v37  ;;  %v10299_v53 = vmax.f32 %v10187_v6, 0.0  ;;  %v12020_v10 = vpop.f32.mrb[252].mxu1 }
 0x4cc   : > { %v12021_v32 = vpop.f32.mrb[253].mxu1 }
 0x4cd   : > { %10331 = vst [vmem:[%s16075_s25 + $0x28] sm:$0xff] %v10299_v53  ;;  %v12022_v52 = vadd.f32 %v12021_v32, %v12020_v10  ;;  %v12023_v25 = vpop.f32.mrb[254].mxu1 }
 0x4ce   : > { %v12024_v5 = vpop.f32.mrb[255].mxu1 }
 0x4cf   : > { %v10192_v61 = vadd.f32 %v12022_v52, %v15986_v33  ;;  %v12025_v39 = vadd.f32 %v12024_v5, %v12023_v25 }
 0x4d1   : > { %v10300_v18 = vmax.f32 %v10192_v61, 0.0  ;;  %v10195_v48 = vadd.f32 %v12025_v39, %v15995_v38 }
 0x4d3   : > { %10332 = vst [vmem:[%s16075_s25 + $0x30] sm:$0xff] %v10300_v18  ;;  %v10301_v7 = vmax.f32 %v10195_v48, 0.0  ;;  %v12026_v58 = vpop.f32.mrb[0].mxu1 }
 0x4d4   : > { %v12027_v11 = vpop.f32.mrb[1].mxu1 }
 0x4d5   : > { %10333 = vst [vmem:[%s16075_s25 + $0x38] sm:$0xff] %v10301_v7  ;;  %v12028_v36 = vadd.f32 %v12027_v11, %v12026_v58  ;;  %v12029_v42 = vpop.f32.mrb[2].mxu1 }
 0x4d6   : > { %v12030_v45 = vpop.f32.mrb[3].mxu1 }
 0x4d7   : > { %v10200_v29 = vadd.f32 %v12028_v36, %v16000_v8  ;;  %v12031_v46 = vadd.f32 %v12030_v45, %v12029_v42 }
 0x4d9   : > { %v10302_v27 = vmax.f32 %v10200_v29, 0.0  ;;  %v10203_v33 = vadd.f32 %v12031_v46, %v16005_v57 }
 0x4db   : > { %10334 = vst [vmem:[%s16075_s25 + $0x40] sm:$0xff] %v10302_v27  ;;  %v10303_v51 = vmax.f32 %v10203_v33, 0.0  ;;  %v12032_v38 = vpop.f32.mrb[4].mxu1 }
 0x4dc   : > { %v12033_v23 = vpop.f32.mrb[5].mxu1 }
 0x4dd   : > { %10335 = vst [vmem:[%s16075_s25 + $0x48] sm:$0xff] %v10303_v51  ;;  %v12034_v50 = vadd.f32 %v12033_v23, %v12032_v38  ;;  %v12035_v20 = vpop.f32.mrb[6].mxu1 }
 0x4de   : > { %v12036_v49 = vpop.f32.mrb[7].mxu1 }
 0x4df   : > { %v10208_v34 = vadd.f32 %v12034_v50, %v16009_v40  ;;  %v12037_v15 = vadd.f32 %v12036_v49, %v12035_v20 }
 0x4e1   : > { %v10304_v35 = vmax.f32 %v10208_v34, 0.0  ;;  %v10211_v8 = vadd.f32 %v12037_v15, %v16013_v54 }
 0x4e3   : > { %10336 = vst [vmem:[%s16075_s25 + $0x50] sm:$0xff] %v10304_v35  ;;  %v10305_v24 = vmax.f32 %v10211_v8, 0.0  ;;  %v12038_v57 = vpop.f32.mrb[8].mxu1 }
 0x4e4   : > { %v12039_v16 = vpop.f32.mrb[9].mxu1 }
 0x4e5   : > { %10337 = vst [vmem:[%s16075_s25 + $0x58] sm:$0xff] %v10305_v24  ;;  %v12040_v0 = vadd.f32 %v12039_v16, %v12038_v57  ;;  %v12041_v31 = vpop.f32.mrb[10].mxu1 }
 0x4e6   : > { %v12042_v19 = vpop.f32.mrb[11].mxu1 }
 0x4e7   : > { %v10216_v17 = vadd.f32 %v12040_v0, %v16016_v30  ;;  %v12043_v43 = vadd.f32 %v12042_v19, %v12041_v31 }
 0x4e9   : > { %v10306_v59 = vmax.f32 %v10216_v17, 0.0  ;;  %v10219_v40 = vadd.f32 %v12043_v43, %v16018_v4 }
 0x4eb   : > { %10338 = vst [vmem:[%s16075_s25 + $0x60] sm:$0xff] %v10306_v59  ;;  %v10307_v2 = vmax.f32 %v10219_v40, 0.0  ;;  %v12044_v54 = vpop.f32.mrb[12].mxu1 }
 0x4ec   : > { %v12045_v37 = vpop.f32.mrb[13].mxu1 }
 0x4ed   : > { %10339 = vst [vmem:[%s16075_s25 + $0x68] sm:$0xff] %v10307_v2  ;;  %v12046_v6 = vadd.f32 %v12045_v37, %v12044_v54  ;;  %v12047_v53 = vpop.f32.mrb[14].mxu1 }
 0x4ee   : > { %v12048_v10 = vpop.f32.mrb[15].mxu1 }
 0x4ef   : > { %v10224_v32 = vadd.f32 %v12046_v6, %v16021_v41  ;;  %v12049_v52 = vadd.f32 %v12048_v10, %v12047_v53 }
 0x4f1   : > { %v10308_v25 = vmax.f32 %v10224_v32, 0.0  ;;  %v10227_v30 = vadd.f32 %v12049_v52, %v16024_v26 }
 0x4f3   : > { %10340 = vst [vmem:[%s16075_s25 + $0x70] sm:$0xff] %v10308_v25  ;;  %v10309_v5 = vmax.f32 %v10227_v30, 0.0  ;;  %v12050_v4 = vpop.f32.mrb[16].mxu1 }
 0x4f4   : > { %v12051_v61 = vpop.f32.mrb[17].mxu1 }
 0x4f5   : > { %10341 = vst [vmem:[%s16075_s25 + $0x78] sm:$0xff] %v10309_v5  ;;  %v12052_v39 = vadd.f32 %v12051_v61, %v12050_v4  ;;  %v12053_v18 = vpop.f32.mrb[18].mxu1 }
 0x4f6   : > { %v12054_v48 = vpop.f32.mrb[19].mxu1 }
 0x4f7   : > { %v10232_v7 = vadd.f32 %v12052_v39, %v16026_v63  ;;  %v12055_v58 = vadd.f32 %v12054_v48, %v12053_v18 }
 0x4f9   : > { %v10310_v11 = vmax.f32 %v10232_v7, 0.0  ;;  %v10235_v41 = vadd.f32 %v12055_v58, %v16030_v14 }
 0x4fb   : > { %10342 = vst [vmem:[%s16075_s25 + $0x80] sm:$0xff] %v10310_v11  ;;  %v10311_v36 = vmax.f32 %v10235_v41, 0.0  ;;  %v12056_v26 = vpop.f32.mrb[20].mxu1 }
 0x4fc   : > { %v12057_v42 = vpop.f32.mrb[21].mxu1 }
 0x4fd   : > { %10343 = vst [vmem:[%s16075_s25 + $0x88] sm:$0xff] %v10311_v36  ;;  %v12058_v45 = vadd.f32 %v12057_v42, %v12056_v26  ;;  %v12059_v29 = vpop.f32.mrb[22].mxu1 }
 0x4fe   : > { %v12060_v46 = vpop.f32.mrb[23].mxu1 }
 0x4ff   : > { %v10240_v27 = vadd.f32 %v12058_v45, %v16032_v44  ;;  %v12061_v33 = vadd.f32 %v12060_v46, %v12059_v29 }
 0x501   : > { %v10312_v51 = vmax.f32 %v10240_v27, 0.0  ;;  %v10243_v63 = vadd.f32 %v12061_v33, %v16035_v13 }
 0x503   : > { %10344 = vst [vmem:[%s16075_s25 + $0x90] sm:$0xff] %v10312_v51  ;;  %v10313_v38 = vmax.f32 %v10243_v63, 0.0  ;;  %v12062_v14 = vpop.f32.mrb[24].mxu1 }
 0x504   : > { %v12063_v23 = vpop.f32.mrb[25].mxu1 }
 0x505   : > { %10345 = vst [vmem:[%s16075_s25 + $0x98] sm:$0xff] %v10313_v38  ;;  %v12064_v50 = vadd.f32 %v12063_v23, %v12062_v14  ;;  %v12065_v20 = vpop.f32.mrb[26].mxu1 }
 0x506   : > { %v12066_v49 = vpop.f32.mrb[27].mxu1 }
 0x507   : > { %v10248_v34 = vadd.f32 %v12064_v50, %v16038_v60  ;;  %v12067_v15 = vadd.f32 %v12066_v49, %v12065_v20 }
 0x509   : > { %v10314_v35 = vmax.f32 %v10248_v34, 0.0  ;;  %v10251_v44 = vadd.f32 %v12067_v15, %v16040_v55 }
 0x50b   : > { %10346 = vst [vmem:[%s16075_s25 + $0xa0] sm:$0xff] %v10314_v35  ;;  %v10315_v8 = vmax.f32 %v10251_v44, 0.0  ;;  %v12068_v13 = vpop.f32.mrb[28].mxu1 }
 0x50c   : > { %v12069_v24 = vpop.f32.mrb[29].mxu1 }
 0x50d   : > { %10347 = vst [vmem:[%s16075_s25 + $0xa8] sm:$0xff] %v10315_v8  ;;  %v12070_v57 = vadd.f32 %v12069_v24, %v12068_v13  ;;  %v12071_v16 = vpop.f32.mrb[30].mxu1 }
 0x50e   : > { %v12072_v0 = vpop.f32.mrb[31].mxu1 }
 0x50f   : > { %v10256_v31 = vadd.f32 %v12070_v57, %v16042_v28  ;;  %v12073_v19 = vadd.f32 %v12072_v0, %v12071_v16 }
 0x511   : > { %v10316_v17 = vmax.f32 %v10256_v31, 0.0  ;;  %v10259_v60 = vadd.f32 %v12073_v19, %v16046_v56 }
 0x513   : > { %10348 = vst [vmem:[%s16075_s25 + $0xb0] sm:$0xff] %v10316_v17  ;;  %v10317_v43 = vmax.f32 %v10259_v60, 0.0  ;;  %v12074_v55 = vpop.f32.mrb[32].mxu1 }
 0x514   : > { %v12075_v59 = vpop.f32.mrb[33].mxu1 }
 0x515   : > { %10349 = vst [vmem:[%s16075_s25 + $0xb8] sm:$0xff] %v10317_v43  ;;  %v12076_v40 = vadd.f32 %v12075_v59, %v12074_v55  ;;  %v12077_v2 = vpop.f32.mrb[34].mxu1 }
 0x516   : > { %v12078_v54 = vpop.f32.mrb[35].mxu1 }
 0x517   : > { %v10264_v37 = vadd.f32 %v12076_v40, %v16048_v12  ;;  %v12079_v6 = vadd.f32 %v12078_v54, %v12077_v2 }
 0x519   : > { %v10318_v53 = vmax.f32 %v10264_v37, 0.0  ;;  %v10267_v28 = vadd.f32 %v12079_v6, %v16051_v21 }
 0x51b   : > { %10350 = vst [vmem:[%s16075_s25 + $0xc0] sm:$0xff] %v10318_v53  ;;  %v10319_v10 = vmax.f32 %v10267_v28, 0.0  ;;  %v12080_v56 = vpop.f32.mrb[36].mxu1 }
 0x51c   : > { %v12081_v32 = vpop.f32.mrb[37].mxu1 }
 0x51d   : > { %10351 = vst [vmem:[%s16075_s25 + $0xc8] sm:$0xff] %v10319_v10  ;;  %v12082_v52 = vadd.f32 %v12081_v32, %v12080_v56  ;;  %v12083_v25 = vpop.f32.mrb[38].mxu1 }
 0x51e   : > { %v12084_v30 = vpop.f32.mrb[39].mxu1 }
 0x51f   : > { %v10272_v5 = vadd.f32 %v12082_v52, %v16054_v22  ;;  %v12085_v4 = vadd.f32 %v12084_v30, %v12083_v25 }
 0x521   : > { %v10320_v61 = vmax.f32 %v10272_v5, 0.0  ;;  %v10275_v12 = vadd.f32 %v12085_v4, %v16056_v1 }
 0x523   : > { %10352 = vst [vmem:[%s16075_s25 + $0xd0] sm:$0xff] %v10320_v61  ;;  %v10321_v39 = vmax.f32 %v10275_v12, 0.0  ;;  %v12086_v21 = vpop.f32.mrb[40].mxu1 }
 0x524   : > { %v12087_v18 = vpop.f32.mrb[41].mxu1 }
 0x525   : > { %10353 = vst [vmem:[%s16075_s25 + $0xd8] sm:$0xff] %v10321_v39  ;;  %v12088_v48 = vadd.f32 %v12087_v18, %v12086_v21  ;;  %v12089_v7 = vpop.f32.mrb[42].mxu1 }
 0x526   : > { %v12090_v58 = vpop.f32.mrb[43].mxu1 }
 0x527   : > { %v10280_v11 = vadd.f32 %v12088_v48, %v16060_v47  ;;  %v12091_v41 = vadd.f32 %v12090_v58, %v12089_v7 }
 0x529   : > { %v10322_v22 = vmax.f32 %v10280_v11, 0.0  ;;  %v10283_v36 = vadd.f32 %v12091_v41, %v16062_v3 }
 0x52b   : > { %10354 = vst [vmem:[%s16075_s25 + $0xe0] sm:$0xff] %v10322_v22  ;;  %v10323_v1 = vmax.f32 %v10283_v36, 0.0  ;;  %v12092_v26 = vpop.f32.mrb[44].mxu1 }
 0x52c   : > { %v12093_v42 = vpop.f32.mrb[45].mxu1 }
 0x52d   : > { %10355 = vst [vmem:[%s16075_s25 + $0xe8] sm:$0xff] %v10323_v1  ;;  %v12094_v45 = vadd.f32 %v12093_v42, %v12092_v26  ;;  %v12095_v29 = vpop.f32.mrb[46].mxu1 }
 0x52e   : > { %v12096_v46 = vpop.f32.mrb[47].mxu1 }
 0x52f   : > { %v10288_v27 = vadd.f32 %v12094_v45, %v16066_v9  ;;  %v12097_v33 = vadd.f32 %v12096_v46, %v12095_v29 }
 0x531   : > { %v10324_v47 = vmax.f32 %v10288_v27, 0.0  ;;  %v10291_v3 = vadd.f32 %v12097_v33, %v16069_v62 }
 0x533   : > { %10356 = vst [vmem:[%s16075_s25 + $0xf0] sm:$0xff] %v10324_v47  ;;  %v10325_v51 = vmax.f32 %v10291_v3, 0.0 }
 0x535   : > { %10357 = vst [vmem:[%s16075_s25 + $0xf8] sm:$0xff] %v10325_v51 }
 0x536   : > { %12514 = shalt.err (!%p12511_p3)
}
 0x537   : > { %s12515_s14 = scalar_lea.hbm %s16142_s9, 4096  ;;  %s12519_s17 = scalar_lea.hbm %s16196_s5, 8192 }
 0x538   : > { %p12516_p4 = scmp.ne.s32.totalorder %s16142_s9, %s12515_s14  ;;  %p12520_p9 = scmp.lt.u32.totalorder %s16142_s9, %s16196_s5 }
 0x539   : > { %p12521_p10 = scmp.lt.u32.totalorder %s12519_s17, %s12515_s14  ;;  %p12523_p12 = scmp.lt.u32.totalorder %s12515_s14, %s16142_s9 }
 0x53a   : > { %p12517_p7 = pnand %p12516_p4, %p12637_p5 }
 0x53b   : > { %p12522_p11 = por %p12521_p10, %p12520_p9 }
 0x53c   : > { %p12518_p8 = pneg %p12517_p7 }
 0x53d   : > { %p12524_p13 = por %p12523_p12, %p12522_p11 }
 0x53f   : > { %p12525_p0 = pnand %p12524_p13, %p12518_p8 }
 0x541   : > { %12528 = shalt.err (!%p12525_p0)
}
 0x542   : > { %s12567_s25 = smov 128   ;;  %s12568_s26 = smov 8  }
 0x543   : > { %12162 = dma.vmem_to_hbm [thread:$0]  (%p12637_p5), %s16144_s6, 4096, %s16142_s9, %s16150_s10, %s12567_s25, %s12567_s25, %s12568_s26  }
 0x544 PF: > { %p12168_p1 = scmp.ge.s32.totalorder %s12563_s21, 2  ;;  %s10387_s7 = sand.u32 1, %s12551_s18  }
 0x545   : > { %s10388_s8 = scalar_lea.sflag [#allocation6], %s10387_s7 }
 0x546   : > { %p12165_p2 = pnand %p12168_p1, %p12641_p6 }
 0x548   : > { %12546 = dma.done.wait (!%p12165_p2), %s10388_s8, 4096  }
 0x549   : > { %12548 = vsyncadd (!%p12165_p2), %s10388_s8, 4294963200  ;;  %p15_p3 = scmp.ge.s32.totalorder %s12624_s24, 4   ;;  %s16300_s18 = smov %s12555_s19 }
 0x54a   : > { %s16301_s19 = smov %s12559_s20  ;;  %s16302_s20 = smov %s12635_s27 }
 0x54b   : > { %s16303_s21 = smov %s12624_s24  ;;  %17 = sbr.rel (!%p15_p3) target bundleno = 3 (0x3), region = 79 }
 0x552   :  { %10393 = vsyncpa [#allocation6], 1 }
 0x553   :  { %10395 = vsyncpa [#allocation6 + $0x1], 1 }

</bundles_post_ra>
